<compile_context>
chip_gen: v5e
topology: v5e:2x2
jax: 0.10.0
libtpu: 0.0.40
codegen_flags: <defaults>
</compile_context>

<pallas_src>
import functools

import jax
import jax.numpy as jnp
from jax.experimental import pallas as pl
from jax.experimental.pallas import tpu as pltpu

LANES = 128


# ----------------------------- Pallas kernels ------------------------------

def _conv_pool_relu_kernel(x_ref, w_ref, b_ref, o_ref, *, W, K, C, OW, PH, PW):
    """Fused valid KxK conv + bias + 2x2 max-pool + ReLU for one image.

    x_ref : (H*W, C)      flattened NHWC image (padded channels are zero).
    w_ref : (K*K*C, OCP)  weight, rows ordered (dy, dx, c); OC padded to 128.
    b_ref : (1, OCP)      bias, zero in padded lanes.
    o_ref : (PH, PW, OCP) pooled + ReLU'd output, lane-dense.
    """
    OCP = o_ref.shape[-1]
    Pc = W + OW  # contiguous flat-conv rows covering one output-row pair

    bias = b_ref[...]                                            # (1, OCP)

    # Selection matrices that compact even / odd columns of a row pair
    # (pooled[pw] = max(vert[2pw], vert[2pw+1])) via two tiny MXU matmuls,
    # avoiding strided/reshape ops in the epilogue.
    r = jax.lax.broadcasted_iota(jnp.int32, (PW, OW), 0)
    c_ = jax.lax.broadcasted_iota(jnp.int32, (PW, OW), 1)
    sel_e = jnp.where(c_ == 2 * r, 1.0, 0.0).astype(jnp.float32)
    sel_o = jnp.where(c_ == 2 * r + 1, 1.0, 0.0).astype(jnp.float32)

    def row_pair(ph, carry):
        # Flat row index of conv-output row 2*ph; 2*W is a multiple of 8.
        base = pl.multiple_of(2 * ph * W, 8)
        acc = jnp.zeros((Pc, OCP), jnp.float32)
        for dy in range(K):
            for dx in range(K):
                s = dy * W + dx
                xs = x_ref[pl.ds(base + s, Pc), :]               # (Pc, C)
                ws = w_ref[pl.ds((dy * K + dx) * C, C), :]       # (C, OCP)
                if C == 1:
                    acc = acc + xs * ws                          # VPU broadcast
                else:
                    acc = acc + jnp.dot(xs, ws,
                                        preferred_element_type=jnp.float32)
        acc = acc + bias
        # acc rows [0, OW)   -> conv output row 2*ph
        # acc rows [W, W+OW) -> conv output row 2*ph + 1 (rows [OW, W) unused)
        vert = jnp.maximum(acc[:OW, :], acc[W:W + OW, :])        # (OW, OCP)
        pooled = jnp.maximum(
            jnp.dot(sel_e, vert, preferred_element_type=jnp.float32),
            jnp.dot(sel_o, vert, preferred_element_type=jnp.float32))
        o_ref[ph] = jnp.maximum(pooled, 0.0)                     # fused ReLU
        return carry

    jax.lax.fori_loop(0, PH, row_pair, 0)


def _mlp_kernel(x_ref, w1_ref, b1_ref, w2_ref, b2_ref, o_ref, h_ref):
    """Fused fc1 + ReLU + fc2; hidden activation stays in a VMEM scratch."""
    # TODO(synk): conv2_drop / F.dropout are stochastic; implemented here as
    # eval-mode identity.
    h_ref[...] = jnp.maximum(
        jnp.dot(x_ref[...], w1_ref[...], preferred_element_type=jnp.float32)
        + b1_ref[...], 0.0)
    o_ref[...] = (jnp.dot(h_ref[...], w2_ref[...],
                          preferred_element_type=jnp.float32)
                  + b2_ref[...]).astype(o_ref.dtype)


# ------------------------------ wrappers ------------------------------------

def conv_pool_relu(x_flat, w_mat, b_mat, *, H, W, K):
    """x_flat: (B, H*W, C) -> (B, PH, PW, OCP) = relu(maxpool2x2(conv_valid))."""
    B, HW, C = x_flat.shape
    assert HW == H * W and w_mat.shape[0] == K * K * C
    OH, OW = H - K + 1, W - K + 1
    PH, PW = OH // 2, OW // 2
    OCP = w_mat.shape[1]
    kern = functools.partial(_conv_pool_relu_kernel,
                             W=W, K=K, C=C, OW=OW, PH=PH, PW=PW)
    return pl.pallas_call(
        kern,
        out_shape=jax.ShapeDtypeStruct((B, PH, PW, OCP), jnp.float32),
        grid=(B,),
        in_specs=[
            pl.BlockSpec((None, HW, C), lambda b: (b, 0, 0)),
            pl.BlockSpec((K * K * C, OCP), lambda b: (0, 0)),
            pl.BlockSpec((1, OCP), lambda b: (0, 0)),
        ],
        out_specs=pl.BlockSpec((None, PH, PW, OCP), lambda b: (b, 0, 0, 0)),
        compiler_params=pltpu.CompilerParams(
            dimension_semantics=("parallel",)),
    )(x_flat, w_mat, b_mat)


def _row_tile(m, cap=256):
    if m <= cap:
        return m
    for t in (cap, 128, 64, 32, 16, 8, 4, 2):
        if m % t == 0:
            return t
    return m


def mlp(x, w1, b1, w2, b2):
    """Fused relu(x @ w1 + b1) @ w2 + b2 ; output channels lane-padded."""
    B, KIN = x.shape
    HID = w1.shape[1]
    OCP = w2.shape[1]
    tb = _row_tile(B)
    return pl.pallas_call(
        _mlp_kernel,
        out_shape=jax.ShapeDtypeStruct((B, OCP), jnp.float32),
        grid=(B // tb,),
        in_specs=[
            pl.BlockSpec((tb, KIN), lambda i: (i, 0)),
            pl.BlockSpec((KIN, HID), lambda i: (0, 0)),
            pl.BlockSpec((1, HID), lambda i: (0, 0)),
            pl.BlockSpec((HID, OCP), lambda i: (0, 0)),
            pl.BlockSpec((1, OCP), lambda i: (0, 0)),
        ],
        out_specs=pl.BlockSpec((tb, OCP), lambda i: (i, 0)),
        scratch_shapes=[pltpu.VMEM((tb, HID), jnp.float32)],
        compiler_params=pltpu.CompilerParams(
            dimension_semantics=("parallel",)),
    )(x, w1, b1, w2, b2)


# --------------------------- parameter preparation ---------------------------

def _pad_to(a, axis, size):
    pad = [(0, 0)] * a.ndim
    pad[axis] = (0, size - a.shape[axis])
    return jnp.pad(a, pad)


def init_raw_params(key):
    ks = jax.random.split(key, 8)
    s = 0.1
    return {
        # conv1: Conv2d(1, 10, kernel_size=5)   (OC, IC, KH, KW)
        "conv1_w": s * jax.random.normal(ks[0], (10, 1, 5, 5), jnp.float32),
        "conv1_b": s * jax.random.normal(ks[1], (10,), jnp.float32),
        # conv2: Conv2d(10, 20, kernel_size=5)
        "conv2_w": s * jax.random.normal(ks[2], (20, 10, 5, 5), jnp.float32),
        "conv2_b": s * jax.random.normal(ks[3], (20,), jnp.float32),
        # fc1: Linear(320, 256), stored as (in, out) so y = x @ W
        "fc1_w": s * jax.random.normal(ks[4], (320, 256), jnp.float32),
        "fc1_b": s * jax.random.normal(ks[5], (256,), jnp.float32),
        # fc2: Linear(256, 10), stored as (in, out)
        "fc2_w": s * jax.random.normal(ks[6], (256, 10), jnp.float32),
        "fc2_b": s * jax.random.normal(ks[7], (10,), jnp.float32),
    }


def prepare_params(raw):
    """PyTorch-layout params -> lane-padded matmul operands for the kernels."""
    p = {}

    # conv1: (10,1,5,5) -> (25, 128), rows ordered (dy, dx, c).
    w1 = jnp.transpose(raw["conv1_w"], (2, 3, 1, 0))           # (5,5,1,10)
    p["conv1_wm"] = _pad_to(w1, 3, LANES).reshape(5 * 5 * 1, LANES)
    p["conv1_bm"] = _pad_to(raw["conv1_b"], 0, LANES).reshape(1, LANES)

    # conv2: (20,10,5,5) -> (25*128, 128): input channels padded to 128 so
    # conv1's lane-padded output feeds it directly (padded rows/cols are zero).
    w2 = jnp.transpose(raw["conv2_w"], (2, 3, 1, 0))           # (5,5,10,20)
    w2 = _pad_to(_pad_to(w2, 2, LANES), 3, LANES)              # (5,5,128,128)
    p["conv2_wm"] = w2.reshape(5 * 5 * LANES, LANES)
    p["conv2_bm"] = _pad_to(raw["conv2_b"], 0, LANES).reshape(1, LANES)

    # fc1: rows of (320,256) are indexed c*16 + h*4 + w (PyTorch NCHW flatten).
    # Fold the NHWC(padded)->NCHW permutation into the weight so the kernel can
    # consume conv2's (B, 4*4*128) output directly with no transpose glue.
    f1 = raw["fc1_w"].reshape(20, 4, 4, 256)                   # (c,h,w,n)
    f1 = jnp.transpose(f1, (1, 2, 0, 3))                       # (h,w,c,n)
    f1 = _pad_to(f1, 2, LANES)                                 # (h,w,128,n)
    p["fc1_we"] = f1.reshape(4 * 4 * LANES, 256)
    p["fc1_bm"] = raw["fc1_b"].reshape(1, 256)

    # fc2: pad output channels to 128 lanes; logits sliced to 10 afterwards.
    p["fc2_wm"] = _pad_to(raw["fc2_w"], 1, LANES)              # (256, 128)
    p["fc2_bm"] = _pad_to(raw["fc2_b"], 0, LANES).reshape(1, LANES)
    return p


# ------------------------------- forward pass --------------------------------

def net_forward(x_nchw, params):
    B = x_nchw.shape[0]
    # Single input channel, so NCHW -> flattened NHWC is a pure (free) reshape.
    x = x_nchw.reshape(B, 28 * 28, 1).astype(jnp.float32)

    # conv1(5x5) + maxpool2x2 + relu -> (B, 12, 12, 128), channels 10..127 == 0
    h1 = conv_pool_relu(x, params["conv1_wm"], params["conv1_bm"],
                        H=28, W=28, K=5)
    h1 = h1.reshape(B, 12 * 12, LANES)                         # free reshape

    # conv2(5x5) [+ eval-mode dropout] + maxpool2x2 + relu -> (B, 4, 4, 128)
    h2 = conv_pool_relu(h1, params["conv2_wm"], params["conv2_bm"],
                        H=12, W=12, K=5)

    # Flatten (NCHW layout folded into fc1_we) and run the fused fc1+fc2 kernel.
    flat = h2.reshape(B, 4 * 4 * LANES)                        # free reshape
    logits_p = mlp(flat, params["fc1_we"], params["fc1_bm"],
                   params["fc2_wm"], params["fc2_bm"])         # (B, 128)
    return logits_p[:, :10]


if __name__ == "__main__":
    key = jax.random.PRNGKey(0)
    k_x, k_p = jax.random.split(key)
    # MNIST-shaped input implied by fc1 expecting 20*4*4 = 320 features.
    x = jax.random.normal(k_x, (2, 1, 28, 28), jnp.float32)
    params = prepare_params(init_raw_params(k_p))

    out = jax.jit(net_forward)(x, params)
    out = jax.block_until_ready(out)
    assert out.shape == (2, 10) and out.dtype == jnp.float32
    assert bool(jnp.all(jnp.isfinite(out)))
    print("KERNEL_OK")
</pallas_src>

<mosaic_0001>
module attributes {stable_mosaic.version = 11 : i64} {
  func.func @_conv_pool_relu_kernel(%arg0: i32, %arg1: memref<1x784x1xf32, #tpu.memory_space<vmem>>, %arg2: memref<25x128xf32, #tpu.memory_space<vmem>>, %arg3: memref<1x128xf32, #tpu.memory_space<vmem>>, %arg4: memref<1x12x12x128xf32, #tpu.memory_space<vmem>>) attributes {dimension_semantics = [#tpu.dimension_semantics<parallel>], iteration_bounds = array<i64: 2>, scalar_prefetch = 0 : i64, scratch_operands = 0 : i64, tpu.core_type = #tpu.core_type<tc>, window_params = [{transform_indices = @transform_0, window_bounds = array<i64: 1, 784, 1>}, {pipeline_mode = #tpu.pipeline_mode<synchronous>, transform_indices = @transform_1, window_bounds = array<i64: 25, 128>}, {pipeline_mode = #tpu.pipeline_mode<synchronous>, transform_indices = @transform_2, window_bounds = array<i64: 1, 128>}, {transform_indices = @transform_3, window_bounds = array<i64: 1, 12, 12, 128>}]} {
    %c0 = arith.constant 0 : index
    %c0_0 = arith.constant 0 : index
    %0 = vector.load %arg3[%c0, %c0_0] : memref<1x128xf32, #tpu.memory_space<vmem>>, vector<1x128xf32>
    %1 = tpu.iota {dimensions = array<i32: 0>} : vector<12x24xi32>
    %2 = tpu.iota {dimensions = array<i32: 1>} : vector<12x24xi32>
    %c2_i32 = arith.constant 2 : i32
    %3 = vector.broadcast %c2_i32 : i32 to vector<12x24xi32>
    %4 = arith.muli %3, %1 : vector<12x24xi32>
    %5 = arith.cmpi eq, %2, %4 : vector<12x24xi32>
    %cst = arith.constant 1.000000e+00 : f32
    %cst_1 = arith.constant 0.000000e+00 : f32
    %6 = vector.broadcast %cst : f32 to vector<12x24xf32>
    %7 = vector.broadcast %cst_1 : f32 to vector<12x24xf32>
    %8 = arith.select %5, %6, %7 : vector<12x24xi1>, vector<12x24xf32>
    %c2_i32_2 = arith.constant 2 : i32
    %9 = vector.broadcast %c2_i32_2 : i32 to vector<12x24xi32>
    %10 = arith.muli %9, %1 : vector<12x24xi32>
    %c1_i32 = arith.constant 1 : i32
    %11 = vector.broadcast %c1_i32 : i32 to vector<12x24xi32>
    %12 = arith.addi %10, %11 : vector<12x24xi32>
    %13 = arith.cmpi eq, %2, %12 : vector<12x24xi32>
    %cst_3 = arith.constant 1.000000e+00 : f32
    %cst_4 = arith.constant 0.000000e+00 : f32
    %14 = vector.broadcast %cst_3 : f32 to vector<12x24xf32>
    %15 = vector.broadcast %cst_4 : f32 to vector<12x24xf32>
    %16 = arith.select %13, %14, %15 : vector<12x24xi1>, vector<12x24xf32>
    %c0_i32 = arith.constant 0 : i32
    %c12_i32 = arith.constant 12 : i32
    %17 = arith.addi %c0_i32, %c12_i32 : i32
    %c1_i32_5 = arith.constant 1 : i32
    scf.for %arg5 = %c0_i32 to %17 step %c1_i32_5  : i32 {
      %c2_i32_7 = arith.constant 2 : i32
      %18 = arith.muli %c2_i32_7, %arg5 : i32
      %c28_i32 = arith.constant 28 : i32
      %19 = arith.muli %18, %c28_i32 : i32
      %20 = tpu.assume_multiple %19, 8 : i32
      %cst_8 = arith.constant 0.000000e+00 : f32
      %21 = vector.broadcast %cst_8 : f32 to vector<52x128xf32>
      %c0_i32_9 = arith.constant 0 : i32
      %22 = arith.addi %20, %c0_i32_9 : i32
      %c0_10 = arith.constant 0 : index
      %23 = arith.index_cast %22 : i32 to index
      %c0_11 = arith.constant 0 : index
      %24 = vector.load %arg1[%c0_10, %23, %c0_11] : memref<1x784x1xf32, #tpu.memory_space<vmem>>, vector<1x52x1xf32>
      %25 = vector.shape_cast %24 : vector<1x52x1xf32> to vector<52x1xf32>
      %c0_12 = arith.constant 0 : index
      %c0_13 = arith.constant 0 : index
      %26 = vector.load %arg2[%c0_12, %c0_13] : memref<25x128xf32, #tpu.memory_space<vmem>>, vector<1x128xf32>
      %27 = vector.broadcast %25 : vector<52x1xf32> to vector<52x128xf32>
      %28 = vector.broadcast %26 : vector<1x128xf32> to vector<52x128xf32>
      %29 = arith.mulf %27, %28 : vector<52x128xf32>
      %30 = arith.addf %21, %29 : vector<52x128xf32>
      %c1_i32_14 = arith.constant 1 : i32
      %31 = arith.addi %20, %c1_i32_14 : i32
      %c0_15 = arith.constant 0 : index
      %32 = arith.index_cast %31 : i32 to index
      %c0_16 = arith.constant 0 : index
      %33 = vector.load %arg1[%c0_15, %32, %c0_16] : memref<1x784x1xf32, #tpu.memory_space<vmem>>, vector<1x52x1xf32>
      %34 = vector.shape_cast %33 : vector<1x52x1xf32> to vector<52x1xf32>
      %c1 = arith.constant 1 : index
      %c0_17 = arith.constant 0 : index
      %35 = vector.load %arg2[%c1, %c0_17] : memref<25x128xf32, #tpu.memory_space<vmem>>, vector<1x128xf32>
      %36 = vector.broadcast %34 : vector<52x1xf32> to vector<52x128xf32>
      %37 = vector.broadcast %35 : vector<1x128xf32> to vector<52x128xf32>
      %38 = arith.mulf %36, %37 : vector<52x128xf32>
      %39 = arith.addf %30, %38 : vector<52x128xf32>
      %c2_i32_18 = arith.constant 2 : i32
      %40 = arith.addi %20, %c2_i32_18 : i32
      %c0_19 = arith.constant 0 : index
      %41 = arith.index_cast %40 : i32 to index
      %c0_20 = arith.constant 0 : index
      %42 = vector.load %arg1[%c0_19, %41, %c0_20] : memref<1x784x1xf32, #tpu.memory_space<vmem>>, vector<1x52x1xf32>
      %43 = vector.shape_cast %42 : vector<1x52x1xf32> to vector<52x1xf32>
      %c2 = arith.constant 2 : index
      %c0_21 = arith.constant 0 : index
      %44 = vector.load %arg2[%c2, %c0_21] : memref<25x128xf32, #tpu.memory_space<vmem>>, vector<1x128xf32>
      %45 = vector.broadcast %43 : vector<52x1xf32> to vector<52x128xf32>
      %46 = vector.broadcast %44 : vector<1x128xf32> to vector<52x128xf32>
      %47 = arith.mulf %45, %46 : vector<52x128xf32>
      %48 = arith.addf %39, %47 : vector<52x128xf32>
      %c3_i32 = arith.constant 3 : i32
      %49 = arith.addi %20, %c3_i32 : i32
      %c0_22 = arith.constant 0 : index
      %50 = arith.index_cast %49 : i32 to index
      %c0_23 = arith.constant 0 : index
      %51 = vector.load %arg1[%c0_22, %50, %c0_23] : memref<1x784x1xf32, #tpu.memory_space<vmem>>, vector<1x52x1xf32>
      %52 = vector.shape_cast %51 : vector<1x52x1xf32> to vector<52x1xf32>
      %c3 = arith.constant 3 : index
      %c0_24 = arith.constant 0 : index
      %53 = vector.load %arg2[%c3, %c0_24] : memref<25x128xf32, #tpu.memory_space<vmem>>, vector<1x128xf32>
      %54 = vector.broadcast %52 : vector<52x1xf32> to vector<52x128xf32>
      %55 = vector.broadcast %53 : vector<1x128xf32> to vector<52x128xf32>
      %56 = arith.mulf %54, %55 : vector<52x128xf32>
      %57 = arith.addf %48, %56 : vector<52x128xf32>
      %c4_i32 = arith.constant 4 : i32
      %58 = arith.addi %20, %c4_i32 : i32
      %c0_25 = arith.constant 0 : index
      %59 = arith.index_cast %58 : i32 to index
      %c0_26 = arith.constant 0 : index
      %60 = vector.load %arg1[%c0_25, %59, %c0_26] : memref<1x784x1xf32, #tpu.memory_space<vmem>>, vector<1x52x1xf32>
      %61 = vector.shape_cast %60 : vector<1x52x1xf32> to vector<52x1xf32>
      %c4 = arith.constant 4 : index
      %c0_27 = arith.constant 0 : index
      %62 = vector.load %arg2[%c4, %c0_27] : memref<25x128xf32, #tpu.memory_space<vmem>>, vector<1x128xf32>
      %63 = vector.broadcast %61 : vector<52x1xf32> to vector<52x128xf32>
      %64 = vector.broadcast %62 : vector<1x128xf32> to vector<52x128xf32>
      %65 = arith.mulf %63, %64 : vector<52x128xf32>
      %66 = arith.addf %57, %65 : vector<52x128xf32>
      %c28_i32_28 = arith.constant 28 : i32
      %67 = arith.addi %20, %c28_i32_28 : i32
      %c0_29 = arith.constant 0 : index
      %68 = arith.index_cast %67 : i32 to index
      %c0_30 = arith.constant 0 : index
      %69 = vector.load %arg1[%c0_29, %68, %c0_30] : memref<1x784x1xf32, #tpu.memory_space<vmem>>, vector<1x52x1xf32>
      %70 = vector.shape_cast %69 : vector<1x52x1xf32> to vector<52x1xf32>
      %c5 = arith.constant 5 : index
      %c0_31 = arith.constant 0 : index
      %71 = vector.load %arg2[%c5, %c0_31] : memref<25x128xf32, #tpu.memory_space<vmem>>, vector<1x128xf32>
      %72 = vector.broadcast %70 : vector<52x1xf32> to vector<52x128xf32>
      %73 = vector.broadcast %71 : vector<1x128xf32> to vector<52x128xf32>
      %74 = arith.mulf %72, %73 : vector<52x128xf32>
      %75 = arith.addf %66, %74 : vector<52x128xf32>
      %c29_i32 = arith.constant 29 : i32
      %76 = arith.addi %20, %c29_i32 : i32
      %c0_32 = arith.constant 0 : index
      %77 = arith.index_cast %76 : i32 to index
      %c0_33 = arith.constant 0 : index
      %78 = vector.load %arg1[%c0_32, %77, %c0_33] : memref<1x784x1xf32, #tpu.memory_space<vmem>>, vector<1x52x1xf32>
      %79 = vector.shape_cast %78 : vector<1x52x1xf32> to vector<52x1xf32>
      %c6 = arith.constant 6 : index
      %c0_34 = arith.constant 0 : index
      %80 = vector.load %arg2[%c6, %c0_34] : memref<25x128xf32, #tpu.memory_space<vmem>>, vector<1x128xf32>
      %81 = vector.broadcast %79 : vector<52x1xf32> to vector<52x128xf32>
      %82 = vector.broadcast %80 : vector<1x128xf32> to vector<52x128xf32>
      %83 = arith.mulf %81, %82 : vector<52x128xf32>
      %84 = arith.addf %75, %83 : vector<52x128xf32>
      %c30_i32 = arith.constant 30 : i32
      %85 = arith.addi %20, %c30_i32 : i32
      %c0_35 = arith.constant 0 : index
      %86 = arith.index_cast %85 : i32 to index
      %c0_36 = arith.constant 0 : index
      %87 = vector.load %arg1[%c0_35, %86, %c0_36] : memref<1x784x1xf32, #tpu.memory_space<vmem>>, vector<1x52x1xf32>
      %88 = vector.shape_cast %87 : vector<1x52x1xf32> to vector<52x1xf32>
      %c7 = arith.constant 7 : index
      %c0_37 = arith.constant 0 : index
      %89 = vector.load %arg2[%c7, %c0_37] : memref<25x128xf32, #tpu.memory_space<vmem>>, vector<1x128xf32>
      %90 = vector.broadcast %88 : vector<52x1xf32> to vector<52x128xf32>
      %91 = vector.broadcast %89 : vector<1x128xf32> to vector<52x128xf32>
      %92 = arith.mulf %90, %91 : vector<52x128xf32>
      %93 = arith.addf %84, %92 : vector<52x128xf32>
      %c31_i32 = arith.constant 31 : i32
      %94 = arith.addi %20, %c31_i32 : i32
      %c0_38 = arith.constant 0 : index
      %95 = arith.index_cast %94 : i32 to index
      %c0_39 = arith.constant 0 : index
      %96 = vector.load %arg1[%c0_38, %95, %c0_39] : memref<1x784x1xf32, #tpu.memory_space<vmem>>, vector<1x52x1xf32>
      %97 = vector.shape_cast %96 : vector<1x52x1xf32> to vector<52x1xf32>
      %c8 = arith.constant 8 : index
      %c0_40 = arith.constant 0 : index
      %98 = vector.load %arg2[%c8, %c0_40] : memref<25x128xf32, #tpu.memory_space<vmem>>, vector<1x128xf32>
      %99 = vector.broadcast %97 : vector<52x1xf32> to vector<52x128xf32>
      %100 = vector.broadcast %98 : vector<1x128xf32> to vector<52x128xf32>
      %101 = arith.mulf %99, %100 : vector<52x128xf32>
      %102 = arith.addf %93, %101 : vector<52x128xf32>
      %c32_i32 = arith.constant 32 : i32
      %103 = arith.addi %20, %c32_i32 : i32
      %c0_41 = arith.constant 0 : index
      %104 = arith.index_cast %103 : i32 to index
      %c0_42 = arith.constant 0 : index
      %105 = vector.load %arg1[%c0_41, %104, %c0_42] : memref<1x784x1xf32, #tpu.memory_space<vmem>>, vector<1x52x1xf32>
      %106 = vector.shape_cast %105 : vector<1x52x1xf32> to vector<52x1xf32>
      %c9 = arith.constant 9 : index
      %c0_43 = arith.constant 0 : index
      %107 = vector.load %arg2[%c9, %c0_43] : memref<25x128xf32, #tpu.memory_space<vmem>>, vector<1x128xf32>
      %108 = vector.broadcast %106 : vector<52x1xf32> to vector<52x128xf32>
      %109 = vector.broadcast %107 : vector<1x128xf32> to vector<52x128xf32>
      %110 = arith.mulf %108, %109 : vector<52x128xf32>
      %111 = arith.addf %102, %110 : vector<52x128xf32>
      %c56_i32 = arith.constant 56 : i32
      %112 = arith.addi %20, %c56_i32 : i32
      %c0_44 = arith.constant 0 : index
      %113 = arith.index_cast %112 : i32 to index
      %c0_45 = arith.constant 0 : index
      %114 = vector.load %arg1[%c0_44, %113, %c0_45] : memref<1x784x1xf32, #tpu.memory_space<vmem>>, vector<1x52x1xf32>
      %115 = vector.shape_cast %114 : vector<1x52x1xf32> to vector<52x1xf32>
      %c10 = arith.constant 10 : index
      %c0_46 = arith.constant 0 : index
      %116 = vector.load %arg2[%c10, %c0_46] : memref<25x128xf32, #tpu.memory_space<vmem>>, vector<1x128xf32>
      %117 = vector.broadcast %115 : vector<52x1xf32> to vector<52x128xf32>
      %118 = vector.broadcast %116 : vector<1x128xf32> to vector<52x128xf32>
      %119 = arith.mulf %117, %118 : vector<52x128xf32>
      %120 = arith.addf %111, %119 : vector<52x128xf32>
      %c57_i32 = arith.constant 57 : i32
      %121 = arith.addi %20, %c57_i32 : i32
      %c0_47 = arith.constant 0 : index
      %122 = arith.index_cast %121 : i32 to index
      %c0_48 = arith.constant 0 : index
      %123 = vector.load %arg1[%c0_47, %122, %c0_48] : memref<1x784x1xf32, #tpu.memory_space<vmem>>, vector<1x52x1xf32>
      %124 = vector.shape_cast %123 : vector<1x52x1xf32> to vector<52x1xf32>
      %c11 = arith.constant 11 : index
      %c0_49 = arith.constant 0 : index
      %125 = vector.load %arg2[%c11, %c0_49] : memref<25x128xf32, #tpu.memory_space<vmem>>, vector<1x128xf32>
      %126 = vector.broadcast %124 : vector<52x1xf32> to vector<52x128xf32>
      %127 = vector.broadcast %125 : vector<1x128xf32> to vector<52x128xf32>
      %128 = arith.mulf %126, %127 : vector<52x128xf32>
      %129 = arith.addf %120, %128 : vector<52x128xf32>
      %c58_i32 = arith.constant 58 : i32
      %130 = arith.addi %20, %c58_i32 : i32
      %c0_50 = arith.constant 0 : index
      %131 = arith.index_cast %130 : i32 to index
      %c0_51 = arith.constant 0 : index
      %132 = vector.load %arg1[%c0_50, %131, %c0_51] : memref<1x784x1xf32, #tpu.memory_space<vmem>>, vector<1x52x1xf32>
      %133 = vector.shape_cast %132 : vector<1x52x1xf32> to vector<52x1xf32>
      %c12 = arith.constant 12 : index
      %c0_52 = arith.constant 0 : index
      %134 = vector.load %arg2[%c12, %c0_52] : memref<25x128xf32, #tpu.memory_space<vmem>>, vector<1x128xf32>
      %135 = vector.broadcast %133 : vector<52x1xf32> to vector<52x128xf32>
      %136 = vector.broadcast %134 : vector<1x128xf32> to vector<52x128xf32>
      %137 = arith.mulf %135, %136 : vector<52x128xf32>
      %138 = arith.addf %129, %137 : vector<52x128xf32>
      %c59_i32 = arith.constant 59 : i32
      %139 = arith.addi %20, %c59_i32 : i32
      %c0_53 = arith.constant 0 : index
      %140 = arith.index_cast %139 : i32 to index
      %c0_54 = arith.constant 0 : index
      %141 = vector.load %arg1[%c0_53, %140, %c0_54] : memref<1x784x1xf32, #tpu.memory_space<vmem>>, vector<1x52x1xf32>
      %142 = vector.shape_cast %141 : vector<1x52x1xf32> to vector<52x1xf32>
      %c13 = arith.constant 13 : index
      %c0_55 = arith.constant 0 : index
      %143 = vector.load %arg2[%c13, %c0_55] : memref<25x128xf32, #tpu.memory_space<vmem>>, vector<1x128xf32>
      %144 = vector.broadcast %142 : vector<52x1xf32> to vector<52x128xf32>
      %145 = vector.broadcast %143 : vector<1x128xf32> to vector<52x128xf32>
      %146 = arith.mulf %144, %145 : vector<52x128xf32>
      %147 = arith.addf %138, %146 : vector<52x128xf32>
      %c60_i32 = arith.constant 60 : i32
      %148 = arith.addi %20, %c60_i32 : i32
      %c0_56 = arith.constant 0 : index
      %149 = arith.index_cast %148 : i32 to index
      %c0_57 = arith.constant 0 : index
      %150 = vector.load %arg1[%c0_56, %149, %c0_57] : memref<1x784x1xf32, #tpu.memory_space<vmem>>, vector<1x52x1xf32>
      %151 = vector.shape_cast %150 : vector<1x52x1xf32> to vector<52x1xf32>
      %c14 = arith.constant 14 : index
      %c0_58 = arith.constant 0 : index
      %152 = vector.load %arg2[%c14, %c0_58] : memref<25x128xf32, #tpu.memory_space<vmem>>, vector<1x128xf32>
      %153 = vector.broadcast %151 : vector<52x1xf32> to vector<52x128xf32>
      %154 = vector.broadcast %152 : vector<1x128xf32> to vector<52x128xf32>
      %155 = arith.mulf %153, %154 : vector<52x128xf32>
      %156 = arith.addf %147, %155 : vector<52x128xf32>
      %c84_i32 = arith.constant 84 : i32
      %157 = arith.addi %20, %c84_i32 : i32
      %c0_59 = arith.constant 0 : index
      %158 = arith.index_cast %157 : i32 to index
      %c0_60 = arith.constant 0 : index
      %159 = vector.load %arg1[%c0_59, %158, %c0_60] : memref<1x784x1xf32, #tpu.memory_space<vmem>>, vector<1x52x1xf32>
      %160 = vector.shape_cast %159 : vector<1x52x1xf32> to vector<52x1xf32>
      %c15 = arith.constant 15 : index
      %c0_61 = arith.constant 0 : index
      %161 = vector.load %arg2[%c15, %c0_61] : memref<25x128xf32, #tpu.memory_space<vmem>>, vector<1x128xf32>
      %162 = vector.broadcast %160 : vector<52x1xf32> to vector<52x128xf32>
      %163 = vector.broadcast %161 : vector<1x128xf32> to vector<52x128xf32>
      %164 = arith.mulf %162, %163 : vector<52x128xf32>
      %165 = arith.addf %156, %164 : vector<52x128xf32>
      %c85_i32 = arith.constant 85 : i32
      %166 = arith.addi %20, %c85_i32 : i32
      %c0_62 = arith.constant 0 : index
      %167 = arith.index_cast %166 : i32 to index
      %c0_63 = arith.constant 0 : index
      %168 = vector.load %arg1[%c0_62, %167, %c0_63] : memref<1x784x1xf32, #tpu.memory_space<vmem>>, vector<1x52x1xf32>
      %169 = vector.shape_cast %168 : vector<1x52x1xf32> to vector<52x1xf32>
      %c16 = arith.constant 16 : index
      %c0_64 = arith.constant 0 : index
      %170 = vector.load %arg2[%c16, %c0_64] : memref<25x128xf32, #tpu.memory_space<vmem>>, vector<1x128xf32>
      %171 = vector.broadcast %169 : vector<52x1xf32> to vector<52x128xf32>
      %172 = vector.broadcast %170 : vector<1x128xf32> to vector<52x128xf32>
      %173 = arith.mulf %171, %172 : vector<52x128xf32>
      %174 = arith.addf %165, %173 : vector<52x128xf32>
      %c86_i32 = arith.constant 86 : i32
      %175 = arith.addi %20, %c86_i32 : i32
      %c0_65 = arith.constant 0 : index
      %176 = arith.index_cast %175 : i32 to index
      %c0_66 = arith.constant 0 : index
      %177 = vector.load %arg1[%c0_65, %176, %c0_66] : memref<1x784x1xf32, #tpu.memory_space<vmem>>, vector<1x52x1xf32>
      %178 = vector.shape_cast %177 : vector<1x52x1xf32> to vector<52x1xf32>
      %c17 = arith.constant 17 : index
      %c0_67 = arith.constant 0 : index
      %179 = vector.load %arg2[%c17, %c0_67] : memref<25x128xf32, #tpu.memory_space<vmem>>, vector<1x128xf32>
      %180 = vector.broadcast %178 : vector<52x1xf32> to vector<52x128xf32>
      %181 = vector.broadcast %179 : vector<1x128xf32> to vector<52x128xf32>
      %182 = arith.mulf %180, %181 : vector<52x128xf32>
      %183 = arith.addf %174, %182 : vector<52x128xf32>
      %c87_i32 = arith.constant 87 : i32
      %184 = arith.addi %20, %c87_i32 : i32
      %c0_68 = arith.constant 0 : index
      %185 = arith.index_cast %184 : i32 to index
      %c0_69 = arith.constant 0 : index
      %186 = vector.load %arg1[%c0_68, %185, %c0_69] : memref<1x784x1xf32, #tpu.memory_space<vmem>>, vector<1x52x1xf32>
      %187 = vector.shape_cast %186 : vector<1x52x1xf32> to vector<52x1xf32>
      %c18 = arith.constant 18 : index
      %c0_70 = arith.constant 0 : index
      %188 = vector.load %arg2[%c18, %c0_70] : memref<25x128xf32, #tpu.memory_space<vmem>>, vector<1x128xf32>
      %189 = vector.broadcast %187 : vector<52x1xf32> to vector<52x128xf32>
      %190 = vector.broadcast %188 : vector<1x128xf32> to vector<52x128xf32>
      %191 = arith.mulf %189, %190 : vector<52x128xf32>
      %192 = arith.addf %183, %191 : vector<52x128xf32>
      %c88_i32 = arith.constant 88 : i32
      %193 = arith.addi %20, %c88_i32 : i32
      %c0_71 = arith.constant 0 : index
      %194 = arith.index_cast %193 : i32 to index
      %c0_72 = arith.constant 0 : index
      %195 = vector.load %arg1[%c0_71, %194, %c0_72] : memref<1x784x1xf32, #tpu.memory_space<vmem>>, vector<1x52x1xf32>
      %196 = vector.shape_cast %195 : vector<1x52x1xf32> to vector<52x1xf32>
      %c19 = arith.constant 19 : index
      %c0_73 = arith.constant 0 : index
      %197 = vector.load %arg2[%c19, %c0_73] : memref<25x128xf32, #tpu.memory_space<vmem>>, vector<1x128xf32>
      %198 = vector.broadcast %196 : vector<52x1xf32> to vector<52x128xf32>
      %199 = vector.broadcast %197 : vector<1x128xf32> to vector<52x128xf32>
      %200 = arith.mulf %198, %199 : vector<52x128xf32>
      %201 = arith.addf %192, %200 : vector<52x128xf32>
      %c112_i32 = arith.constant 112 : i32
      %202 = arith.addi %20, %c112_i32 : i32
      %c0_74 = arith.constant 0 : index
      %203 = arith.index_cast %202 : i32 to index
      %c0_75 = arith.constant 0 : index
      %204 = vector.load %arg1[%c0_74, %203, %c0_75] : memref<1x784x1xf32, #tpu.memory_space<vmem>>, vector<1x52x1xf32>
      %205 = vector.shape_cast %204 : vector<1x52x1xf32> to vector<52x1xf32>
      %c20 = arith.constant 20 : index
      %c0_76 = arith.constant 0 : index
      %206 = vector.load %arg2[%c20, %c0_76] : memref<25x128xf32, #tpu.memory_space<vmem>>, vector<1x128xf32>
      %207 = vector.broadcast %205 : vector<52x1xf32> to vector<52x128xf32>
      %208 = vector.broadcast %206 : vector<1x128xf32> to vector<52x128xf32>
      %209 = arith.mulf %207, %208 : vector<52x128xf32>
      %210 = arith.addf %201, %209 : vector<52x128xf32>
      %c113_i32 = arith.constant 113 : i32
      %211 = arith.addi %20, %c113_i32 : i32
      %c0_77 = arith.constant 0 : index
      %212 = arith.index_cast %211 : i32 to index
      %c0_78 = arith.constant 0 : index
      %213 = vector.load %arg1[%c0_77, %212, %c0_78] : memref<1x784x1xf32, #tpu.memory_space<vmem>>, vector<1x52x1xf32>
      %214 = vector.shape_cast %213 : vector<1x52x1xf32> to vector<52x1xf32>
      %c21 = arith.constant 21 : index
      %c0_79 = arith.constant 0 : index
      %215 = vector.load %arg2[%c21, %c0_79] : memref<25x128xf32, #tpu.memory_space<vmem>>, vector<1x128xf32>
      %216 = vector.broadcast %214 : vector<52x1xf32> to vector<52x128xf32>
      %217 = vector.broadcast %215 : vector<1x128xf32> to vector<52x128xf32>
      %218 = arith.mulf %216, %217 : vector<52x128xf32>
      %219 = arith.addf %210, %218 : vector<52x128xf32>
      %c114_i32 = arith.constant 114 : i32
      %220 = arith.addi %20, %c114_i32 : i32
      %c0_80 = arith.constant 0 : index
      %221 = arith.index_cast %220 : i32 to index
      %c0_81 = arith.constant 0 : index
      %222 = vector.load %arg1[%c0_80, %221, %c0_81] : memref<1x784x1xf32, #tpu.memory_space<vmem>>, vector<1x52x1xf32>
      %223 = vector.shape_cast %222 : vector<1x52x1xf32> to vector<52x1xf32>
      %c22 = arith.constant 22 : index
      %c0_82 = arith.constant 0 : index
      %224 = vector.load %arg2[%c22, %c0_82] : memref<25x128xf32, #tpu.memory_space<vmem>>, vector<1x128xf32>
      %225 = vector.broadcast %223 : vector<52x1xf32> to vector<52x128xf32>
      %226 = vector.broadcast %224 : vector<1x128xf32> to vector<52x128xf32>
      %227 = arith.mulf %225, %226 : vector<52x128xf32>
      %228 = arith.addf %219, %227 : vector<52x128xf32>
      %c115_i32 = arith.constant 115 : i32
      %229 = arith.addi %20, %c115_i32 : i32
      %c0_83 = arith.constant 0 : index
      %230 = arith.index_cast %229 : i32 to index
      %c0_84 = arith.constant 0 : index
      %231 = vector.load %arg1[%c0_83, %230, %c0_84] : memref<1x784x1xf32, #tpu.memory_space<vmem>>, vector<1x52x1xf32>
      %232 = vector.shape_cast %231 : vector<1x52x1xf32> to vector<52x1xf32>
      %c23 = arith.constant 23 : index
      %c0_85 = arith.constant 0 : index
      %233 = vector.load %arg2[%c23, %c0_85] : memref<25x128xf32, #tpu.memory_space<vmem>>, vector<1x128xf32>
      %234 = vector.broadcast %232 : vector<52x1xf32> to vector<52x128xf32>
      %235 = vector.broadcast %233 : vector<1x128xf32> to vector<52x128xf32>
      %236 = arith.mulf %234, %235 : vector<52x128xf32>
      %237 = arith.addf %228, %236 : vector<52x128xf32>
      %c116_i32 = arith.constant 116 : i32
      %238 = arith.addi %20, %c116_i32 : i32
      %c0_86 = arith.constant 0 : index
      %239 = arith.index_cast %238 : i32 to index
      %c0_87 = arith.constant 0 : index
      %240 = vector.load %arg1[%c0_86, %239, %c0_87] : memref<1x784x1xf32, #tpu.memory_space<vmem>>, vector<1x52x1xf32>
      %241 = vector.shape_cast %240 : vector<1x52x1xf32> to vector<52x1xf32>
      %c24 = arith.constant 24 : index
      %c0_88 = arith.constant 0 : index
      %242 = vector.load %arg2[%c24, %c0_88] : memref<25x128xf32, #tpu.memory_space<vmem>>, vector<1x128xf32>
      %243 = vector.broadcast %241 : vector<52x1xf32> to vector<52x128xf32>
      %244 = vector.broadcast %242 : vector<1x128xf32> to vector<52x128xf32>
      %245 = arith.mulf %243, %244 : vector<52x128xf32>
      %246 = arith.addf %237, %245 : vector<52x128xf32>
      %247 = vector.broadcast %0 : vector<1x128xf32> to vector<52x128xf32>
      %248 = arith.addf %246, %247 : vector<52x128xf32>
      %249 = vector.extract_strided_slice %248 {offsets = [0, 0], sizes = [24, 128], strides = [1, 1]} : vector<52x128xf32> to vector<24x128xf32>
      %250 = vector.extract_strided_slice %248 {offsets = [28, 0], sizes = [24, 128], strides = [1, 1]} : vector<52x128xf32> to vector<24x128xf32>
      %251 = arith.maximumf %249, %250 : vector<24x128xf32>
      %cst_89 = arith.constant dense<0.000000e+00> : vector<12x128xf32>
      %252 = tpu.matmul %8, %251, %cst_89 {dimension_numbers = #tpu.dot_dimension_numbers<[1], [0], [0], [1], [0, 0, 1, 1], [], []>} : vector<12x24xf32>, vector<24x128xf32>, vector<12x128xf32> -> vector<12x128xf32>
      %cst_90 = arith.constant dense<0.000000e+00> : vector<12x128xf32>
      %253 = tpu.matmul %16, %251, %cst_90 {dimension_numbers = #tpu.dot_dimension_numbers<[1], [0], [0], [1], [0, 0, 1, 1], [], []>} : vector<12x24xf32>, vector<24x128xf32>, vector<12x128xf32> -> vector<12x128xf32>
      %254 = arith.maximumf %252, %253 : vector<12x128xf32>
      %cst_91 = arith.constant 0.000000e+00 : f32
      %255 = vector.broadcast %cst_91 : f32 to vector<12x128xf32>
      %256 = arith.maximumf %254, %255 : vector<12x128xf32>
      %c0_92 = arith.constant 0 : index
      %257 = arith.index_cast %arg5 : i32 to index
      %c0_93 = arith.constant 0 : index
      %c0_94 = arith.constant 0 : index
      %258 = vector.load %arg4[%c0_92, %257, %c0_93, %c0_94] : memref<1x12x12x128xf32, #tpu.memory_space<vmem>>, vector<1x1x12x128xf32>
      %259 = vector.shape_cast %258 : vector<1x1x12x128xf32> to vector<12x128xf32>
      %260 = vector.shape_cast %256 : vector<12x128xf32> to vector<1x1x12x128xf32>
      tpu.vector_store %arg4[%c0_92, %257, %c0_93, %c0_94], %260 {strides = array<i32>} : memref<1x12x12x128xf32, #tpu.memory_space<vmem>>, vector<1x1x12x128xf32>,
    }
    %c12_i32_6 = arith.constant 12 : i32
    return
  }
  func.func @transform_0(%arg0: i32) -> (i32, i32, i32) {
    %c0_i32 = arith.constant 0 : i32
    %c0_i32_0 = arith.constant 0 : i32
    %c0_i32_1 = arith.constant 0 : i32
    return %arg0, %c0_i32, %c0_i32_0 : i32, i32, i32
  }
  func.func @transform_1(%arg0: i32) -> (i32, i32) {
    %c0_i32 = arith.constant 0 : i32
    %c0_i32_0 = arith.constant 0 : i32
    %c0_i32_1 = arith.constant 0 : i32
    return %c0_i32, %c0_i32_0 : i32, i32
  }
  func.func @transform_2(%arg0: i32) -> (i32, i32) {
    %c0_i32 = arith.constant 0 : i32
    %c0_i32_0 = arith.constant 0 : i32
    %c0_i32_1 = arith.constant 0 : i32
    return %c0_i32, %c0_i32_0 : i32, i32
  }
  func.func @transform_3(%arg0: i32) -> (i32, i32, i32, i32) {
    %c0_i32 = arith.constant 0 : i32
    %c0_i32_0 = arith.constant 0 : i32
    %c0_i32_1 = arith.constant 0 : i32
    %c0_i32_2 = arith.constant 0 : i32
    return %arg0, %c0_i32, %c0_i32_0, %c0_i32_1 : i32, i32, i32, i32
  }
}

module attributes {stable_mosaic.version = 11 : i64} {
  func.func @_conv_pool_relu_kernel(%arg0: i32, %arg1: memref<1x144x128xf32, #tpu.memory_space<vmem>>, %arg2: memref<3200x128xf32, #tpu.memory_space<vmem>>, %arg3: memref<1x128xf32, #tpu.memory_space<vmem>>, %arg4: memref<1x4x4x128xf32, #tpu.memory_space<vmem>>) attributes {dimension_semantics = [#tpu.dimension_semantics<parallel>], iteration_bounds = array<i64: 2>, scalar_prefetch = 0 : i64, scratch_operands = 0 : i64, tpu.core_type = #tpu.core_type<tc>, window_params = [{transform_indices = @transform_0, window_bounds = array<i64: 1, 144, 128>}, {pipeline_mode = #tpu.pipeline_mode<synchronous>, transform_indices = @transform_1, window_bounds = array<i64: 3200, 128>}, {pipeline_mode = #tpu.pipeline_mode<synchronous>, transform_indices = @transform_2, window_bounds = array<i64: 1, 128>}, {transform_indices = @transform_3, window_bounds = array<i64: 1, 4, 4, 128>}]} {
    %c0 = arith.constant 0 : index
    %c0_0 = arith.constant 0 : index
    %0 = vector.load %arg3[%c0, %c0_0] : memref<1x128xf32, #tpu.memory_space<vmem>>, vector<1x128xf32>
    %1 = tpu.iota {dimensions = array<i32: 0>} : vector<4x8xi32>
    %2 = tpu.iota {dimensions = array<i32: 1>} : vector<4x8xi32>
    %c2_i32 = arith.constant 2 : i32
    %3 = vector.broadcast %c2_i32 : i32 to vector<4x8xi32>
    %4 = arith.muli %3, %1 : vector<4x8xi32>
    %5 = arith.cmpi eq, %2, %4 : vector<4x8xi32>
    %cst = arith.constant 1.000000e+00 : f32
    %cst_1 = arith.constant 0.000000e+00 : f32
    %6 = vector.broadcast %cst : f32 to vector<4x8xf32>
    %7 = vector.broadcast %cst_1 : f32 to vector<4x8xf32>
    %8 = arith.select %5, %6, %7 : vector<4x8xi1>, vector<4x8xf32>
    %c2_i32_2 = arith.constant 2 : i32
    %9 = vector.broadcast %c2_i32_2 : i32 to vector<4x8xi32>
    %10 = arith.muli %9, %1 : vector<4x8xi32>
    %c1_i32 = arith.constant 1 : i32
    %11 = vector.broadcast %c1_i32 : i32 to vector<4x8xi32>
    %12 = arith.addi %10, %11 : vector<4x8xi32>
    %13 = arith.cmpi eq, %2, %12 : vector<4x8xi32>
    %cst_3 = arith.constant 1.000000e+00 : f32
    %cst_4 = arith.constant 0.000000e+00 : f32
    %14 = vector.broadcast %cst_3 : f32 to vector<4x8xf32>
    %15 = vector.broadcast %cst_4 : f32 to vector<4x8xf32>
    %16 = arith.select %13, %14, %15 : vector<4x8xi1>, vector<4x8xf32>
    %c0_i32 = arith.constant 0 : i32
    %c4_i32 = arith.constant 4 : i32
    %17 = arith.addi %c0_i32, %c4_i32 : i32
    %c1_i32_5 = arith.constant 1 : i32
    scf.for %arg5 = %c0_i32 to %17 step %c1_i32_5  : i32 {
      %c2_i32_7 = arith.constant 2 : i32
      %18 = arith.muli %c2_i32_7, %arg5 : i32
      %c12_i32 = arith.constant 12 : i32
      %19 = arith.muli %18, %c12_i32 : i32
      %20 = tpu.assume_multiple %19, 8 : i32
      %cst_8 = arith.constant 0.000000e+00 : f32
      %21 = vector.broadcast %cst_8 : f32 to vector<20x128xf32>
      %c0_i32_9 = arith.constant 0 : i32
      %22 = arith.addi %20, %c0_i32_9 : i32
      %c0_10 = arith.constant 0 : index
      %23 = arith.index_cast %22 : i32 to index
      %c0_11 = arith.constant 0 : index
      %24 = vector.load %arg1[%c0_10, %23, %c0_11] : memref<1x144x128xf32, #tpu.memory_space<vmem>>, vector<1x20x128xf32>
      %25 = vector.shape_cast %24 : vector<1x20x128xf32> to vector<20x128xf32>
      %c0_12 = arith.constant 0 : index
      %c0_13 = arith.constant 0 : index
      %26 = vector.load %arg2[%c0_12, %c0_13] : memref<3200x128xf32, #tpu.memory_space<vmem>>, vector<128x128xf32>
      %cst_14 = arith.constant dense<0.000000e+00> : vector<20x128xf32>
      %27 = tpu.matmul %25, %26, %cst_14 {dimension_numbers = #tpu.dot_dimension_numbers<[1], [0], [0], [1], [0, 0, 1, 1], [], []>} : vector<20x128xf32>, vector<128x128xf32>, vector<20x128xf32> -> vector<20x128xf32>
      %28 = arith.addf %21, %27 : vector<20x128xf32>
      %c1_i32_15 = arith.constant 1 : i32
      %29 = arith.addi %20, %c1_i32_15 : i32
      %c0_16 = arith.constant 0 : index
      %30 = arith.index_cast %29 : i32 to index
      %c0_17 = arith.constant 0 : index
      %31 = vector.load %arg1[%c0_16, %30, %c0_17] : memref<1x144x128xf32, #tpu.memory_space<vmem>>, vector<1x20x128xf32>
      %32 = vector.shape_cast %31 : vector<1x20x128xf32> to vector<20x128xf32>
      %c128 = arith.constant 128 : index
      %c0_18 = arith.constant 0 : index
      %33 = vector.load %arg2[%c128, %c0_18] : memref<3200x128xf32, #tpu.memory_space<vmem>>, vector<128x128xf32>
      %cst_19 = arith.constant dense<0.000000e+00> : vector<20x128xf32>
      %34 = tpu.matmul %32, %33, %cst_19 {dimension_numbers = #tpu.dot_dimension_numbers<[1], [0], [0], [1], [0, 0, 1, 1], [], []>} : vector<20x128xf32>, vector<128x128xf32>, vector<20x128xf32> -> vector<20x128xf32>
      %35 = arith.addf %28, %34 : vector<20x128xf32>
      %c2_i32_20 = arith.constant 2 : i32
      %36 = arith.addi %20, %c2_i32_20 : i32
      %c0_21 = arith.constant 0 : index
      %37 = arith.index_cast %36 : i32 to index
      %c0_22 = arith.constant 0 : index
      %38 = vector.load %arg1[%c0_21, %37, %c0_22] : memref<1x144x128xf32, #tpu.memory_space<vmem>>, vector<1x20x128xf32>
      %39 = vector.shape_cast %38 : vector<1x20x128xf32> to vector<20x128xf32>
      %c256 = arith.constant 256 : index
      %c0_23 = arith.constant 0 : index
      %40 = vector.load %arg2[%c256, %c0_23] : memref<3200x128xf32, #tpu.memory_space<vmem>>, vector<128x128xf32>
      %cst_24 = arith.constant dense<0.000000e+00> : vector<20x128xf32>
      %41 = tpu.matmul %39, %40, %cst_24 {dimension_numbers = #tpu.dot_dimension_numbers<[1], [0], [0], [1], [0, 0, 1, 1], [], []>} : vector<20x128xf32>, vector<128x128xf32>, vector<20x128xf32> -> vector<20x128xf32>
      %42 = arith.addf %35, %41 : vector<20x128xf32>
      %c3_i32 = arith.constant 3 : i32
      %43 = arith.addi %20, %c3_i32 : i32
      %c0_25 = arith.constant 0 : index
      %44 = arith.index_cast %43 : i32 to index
      %c0_26 = arith.constant 0 : index
      %45 = vector.load %arg1[%c0_25, %44, %c0_26] : memref<1x144x128xf32, #tpu.memory_space<vmem>>, vector<1x20x128xf32>
      %46 = vector.shape_cast %45 : vector<1x20x128xf32> to vector<20x128xf32>
      %c384 = arith.constant 384 : index
      %c0_27 = arith.constant 0 : index
      %47 = vector.load %arg2[%c384, %c0_27] : memref<3200x128xf32, #tpu.memory_space<vmem>>, vector<128x128xf32>
      %cst_28 = arith.constant dense<0.000000e+00> : vector<20x128xf32>
      %48 = tpu.matmul %46, %47, %cst_28 {dimension_numbers = #tpu.dot_dimension_numbers<[1], [0], [0], [1], [0, 0, 1, 1], [], []>} : vector<20x128xf32>, vector<128x128xf32>, vector<20x128xf32> -> vector<20x128xf32>
      %49 = arith.addf %42, %48 : vector<20x128xf32>
      %c4_i32_29 = arith.constant 4 : i32
      %50 = arith.addi %20, %c4_i32_29 : i32
      %c0_30 = arith.constant 0 : index
      %51 = arith.index_cast %50 : i32 to index
      %c0_31 = arith.constant 0 : index
      %52 = vector.load %arg1[%c0_30, %51, %c0_31] : memref<1x144x128xf32, #tpu.memory_space<vmem>>, vector<1x20x128xf32>
      %53 = vector.shape_cast %52 : vector<1x20x128xf32> to vector<20x128xf32>
      %c512 = arith.constant 512 : index
      %c0_32 = arith.constant 0 : index
      %54 = vector.load %arg2[%c512, %c0_32] : memref<3200x128xf32, #tpu.memory_space<vmem>>, vector<128x128xf32>
      %cst_33 = arith.constant dense<0.000000e+00> : vector<20x128xf32>
      %55 = tpu.matmul %53, %54, %cst_33 {dimension_numbers = #tpu.dot_dimension_numbers<[1], [0], [0], [1], [0, 0, 1, 1], [], []>} : vector<20x128xf32>, vector<128x128xf32>, vector<20x128xf32> -> vector<20x128xf32>
      %56 = arith.addf %49, %55 : vector<20x128xf32>
      %c12_i32_34 = arith.constant 12 : i32
      %57 = arith.addi %20, %c12_i32_34 : i32
      %c0_35 = arith.constant 0 : index
      %58 = arith.index_cast %57 : i32 to index
      %c0_36 = arith.constant 0 : index
      %59 = vector.load %arg1[%c0_35, %58, %c0_36] : memref<1x144x128xf32, #tpu.memory_space<vmem>>, vector<1x20x128xf32>
      %60 = vector.shape_cast %59 : vector<1x20x128xf32> to vector<20x128xf32>
      %c640 = arith.constant 640 : index
      %c0_37 = arith.constant 0 : index
      %61 = vector.load %arg2[%c640, %c0_37] : memref<3200x128xf32, #tpu.memory_space<vmem>>, vector<128x128xf32>
      %cst_38 = arith.constant dense<0.000000e+00> : vector<20x128xf32>
      %62 = tpu.matmul %60, %61, %cst_38 {dimension_numbers = #tpu.dot_dimension_numbers<[1], [0], [0], [1], [0, 0, 1, 1], [], []>} : vector<20x128xf32>, vector<128x128xf32>, vector<20x128xf32> -> vector<20x128xf32>
      %63 = arith.addf %56, %62 : vector<20x128xf32>
      %c13_i32 = arith.constant 13 : i32
      %64 = arith.addi %20, %c13_i32 : i32
      %c0_39 = arith.constant 0 : index
      %65 = arith.index_cast %64 : i32 to index
      %c0_40 = arith.constant 0 : index
      %66 = vector.load %arg1[%c0_39, %65, %c0_40] : memref<1x144x128xf32, #tpu.memory_space<vmem>>, vector<1x20x128xf32>
      %67 = vector.shape_cast %66 : vector<1x20x128xf32> to vector<20x128xf32>
      %c768 = arith.constant 768 : index
      %c0_41 = arith.constant 0 : index
      %68 = vector.load %arg2[%c768, %c0_41] : memref<3200x128xf32, #tpu.memory_space<vmem>>, vector<128x128xf32>
      %cst_42 = arith.constant dense<0.000000e+00> : vector<20x128xf32>
      %69 = tpu.matmul %67, %68, %cst_42 {dimension_numbers = #tpu.dot_dimension_numbers<[1], [0], [0], [1], [0, 0, 1, 1], [], []>} : vector<20x128xf32>, vector<128x128xf32>, vector<20x128xf32> -> vector<20x128xf32>
      %70 = arith.addf %63, %69 : vector<20x128xf32>
      %c14_i32 = arith.constant 14 : i32
      %71 = arith.addi %20, %c14_i32 : i32
      %c0_43 = arith.constant 0 : index
      %72 = arith.index_cast %71 : i32 to index
      %c0_44 = arith.constant 0 : index
      %73 = vector.load %arg1[%c0_43, %72, %c0_44] : memref<1x144x128xf32, #tpu.memory_space<vmem>>, vector<1x20x128xf32>
      %74 = vector.shape_cast %73 : vector<1x20x128xf32> to vector<20x128xf32>
      %c896 = arith.constant 896 : index
      %c0_45 = arith.constant 0 : index
      %75 = vector.load %arg2[%c896, %c0_45] : memref<3200x128xf32, #tpu.memory_space<vmem>>, vector<128x128xf32>
      %cst_46 = arith.constant dense<0.000000e+00> : vector<20x128xf32>
      %76 = tpu.matmul %74, %75, %cst_46 {dimension_numbers = #tpu.dot_dimension_numbers<[1], [0], [0], [1], [0, 0, 1, 1], [], []>} : vector<20x128xf32>, vector<128x128xf32>, vector<20x128xf32> -> vector<20x128xf32>
      %77 = arith.addf %70, %76 : vector<20x128xf32>
      %c15_i32 = arith.constant 15 : i32
      %78 = arith.addi %20, %c15_i32 : i32
      %c0_47 = arith.constant 0 : index
      %79 = arith.index_cast %78 : i32 to index
      %c0_48 = arith.constant 0 : index
      %80 = vector.load %arg1[%c0_47, %79, %c0_48] : memref<1x144x128xf32, #tpu.memory_space<vmem>>, vector<1x20x128xf32>
      %81 = vector.shape_cast %80 : vector<1x20x128xf32> to vector<20x128xf32>
      %c1024 = arith.constant 1024 : index
      %c0_49 = arith.constant 0 : index
      %82 = vector.load %arg2[%c1024, %c0_49] : memref<3200x128xf32, #tpu.memory_space<vmem>>, vector<128x128xf32>
      %cst_50 = arith.constant dense<0.000000e+00> : vector<20x128xf32>
      %83 = tpu.matmul %81, %82, %cst_50 {dimension_numbers = #tpu.dot_dimension_numbers<[1], [0], [0], [1], [0, 0, 1, 1], [], []>} : vector<20x128xf32>, vector<128x128xf32>, vector<20x128xf32> -> vector<20x128xf32>
      %84 = arith.addf %77, %83 : vector<20x128xf32>
      %c16_i32 = arith.constant 16 : i32
      %85 = arith.addi %20, %c16_i32 : i32
      %c0_51 = arith.constant 0 : index
      %86 = arith.index_cast %85 : i32 to index
      %c0_52 = arith.constant 0 : index
      %87 = vector.load %arg1[%c0_51, %86, %c0_52] : memref<1x144x128xf32, #tpu.memory_space<vmem>>, vector<1x20x128xf32>
      %88 = vector.shape_cast %87 : vector<1x20x128xf32> to vector<20x128xf32>
      %c1152 = arith.constant 1152 : index
      %c0_53 = arith.constant 0 : index
      %89 = vector.load %arg2[%c1152, %c0_53] : memref<3200x128xf32, #tpu.memory_space<vmem>>, vector<128x128xf32>
      %cst_54 = arith.constant dense<0.000000e+00> : vector<20x128xf32>
      %90 = tpu.matmul %88, %89, %cst_54 {dimension_numbers = #tpu.dot_dimension_numbers<[1], [0], [0], [1], [0, 0, 1, 1], [], []>} : vector<20x128xf32>, vector<128x128xf32>, vector<20x128xf32> -> vector<20x128xf32>
      %91 = arith.addf %84, %90 : vector<20x128xf32>
      %c24_i32 = arith.constant 24 : i32
      %92 = arith.addi %20, %c24_i32 : i32
      %c0_55 = arith.constant 0 : index
      %93 = arith.index_cast %92 : i32 to index
      %c0_56 = arith.constant 0 : index
      %94 = vector.load %arg1[%c0_55, %93, %c0_56] : memref<1x144x128xf32, #tpu.memory_space<vmem>>, vector<1x20x128xf32>
      %95 = vector.shape_cast %94 : vector<1x20x128xf32> to vector<20x128xf32>
      %c1280 = arith.constant 1280 : index
      %c0_57 = arith.constant 0 : index
      %96 = vector.load %arg2[%c1280, %c0_57] : memref<3200x128xf32, #tpu.memory_space<vmem>>, vector<128x128xf32>
      %cst_58 = arith.constant dense<0.000000e+00> : vector<20x128xf32>
      %97 = tpu.matmul %95, %96, %cst_58 {dimension_numbers = #tpu.dot_dimension_numbers<[1], [0], [0], [1], [0, 0, 1, 1], [], []>} : vector<20x128xf32>, vector<128x128xf32>, vector<20x128xf32> -> vector<20x128xf32>
      %98 = arith.addf %91, %97 : vector<20x128xf32>
      %c25_i32 = arith.constant 25 : i32
      %99 = arith.addi %20, %c25_i32 : i32
      %c0_59 = arith.constant 0 : index
      %100 = arith.index_cast %99 : i32 to index
      %c0_60 = arith.constant 0 : index
      %101 = vector.load %arg1[%c0_59, %100, %c0_60] : memref<1x144x128xf32, #tpu.memory_space<vmem>>, vector<1x20x128xf32>
      %102 = vector.shape_cast %101 : vector<1x20x128xf32> to vector<20x128xf32>
      %c1408 = arith.constant 1408 : index
      %c0_61 = arith.constant 0 : index
      %103 = vector.load %arg2[%c1408, %c0_61] : memref<3200x128xf32, #tpu.memory_space<vmem>>, vector<128x128xf32>
      %cst_62 = arith.constant dense<0.000000e+00> : vector<20x128xf32>
      %104 = tpu.matmul %102, %103, %cst_62 {dimension_numbers = #tpu.dot_dimension_numbers<[1], [0], [0], [1], [0, 0, 1, 1], [], []>} : vector<20x128xf32>, vector<128x128xf32>, vector<20x128xf32> -> vector<20x128xf32>
      %105 = arith.addf %98, %104 : vector<20x128xf32>
      %c26_i32 = arith.constant 26 : i32
      %106 = arith.addi %20, %c26_i32 : i32
      %c0_63 = arith.constant 0 : index
      %107 = arith.index_cast %106 : i32 to index
      %c0_64 = arith.constant 0 : index
      %108 = vector.load %arg1[%c0_63, %107, %c0_64] : memref<1x144x128xf32, #tpu.memory_space<vmem>>, vector<1x20x128xf32>
      %109 = vector.shape_cast %108 : vector<1x20x128xf32> to vector<20x128xf32>
      %c1536 = arith.constant 1536 : index
      %c0_65 = arith.constant 0 : index
      %110 = vector.load %arg2[%c1536, %c0_65] : memref<3200x128xf32, #tpu.memory_space<vmem>>, vector<128x128xf32>
      %cst_66 = arith.constant dense<0.000000e+00> : vector<20x128xf32>
      %111 = tpu.matmul %109, %110, %cst_66 {dimension_numbers = #tpu.dot_dimension_numbers<[1], [0], [0], [1], [0, 0, 1, 1], [], []>} : vector<20x128xf32>, vector<128x128xf32>, vector<20x128xf32> -> vector<20x128xf32>
      %112 = arith.addf %105, %111 : vector<20x128xf32>
      %c27_i32 = arith.constant 27 : i32
      %113 = arith.addi %20, %c27_i32 : i32
      %c0_67 = arith.constant 0 : index
      %114 = arith.index_cast %113 : i32 to index
      %c0_68 = arith.constant 0 : index
      %115 = vector.load %arg1[%c0_67, %114, %c0_68] : memref<1x144x128xf32, #tpu.memory_space<vmem>>, vector<1x20x128xf32>
      %116 = vector.shape_cast %115 : vector<1x20x128xf32> to vector<20x128xf32>
      %c1664 = arith.constant 1664 : index
      %c0_69 = arith.constant 0 : index
      %117 = vector.load %arg2[%c1664, %c0_69] : memref<3200x128xf32, #tpu.memory_space<vmem>>, vector<128x128xf32>
      %cst_70 = arith.constant dense<0.000000e+00> : vector<20x128xf32>
      %118 = tpu.matmul %116, %117, %cst_70 {dimension_numbers = #tpu.dot_dimension_numbers<[1], [0], [0], [1], [0, 0, 1, 1], [], []>} : vector<20x128xf32>, vector<128x128xf32>, vector<20x128xf32> -> vector<20x128xf32>
      %119 = arith.addf %112, %118 : vector<20x128xf32>
      %c28_i32 = arith.constant 28 : i32
      %120 = arith.addi %20, %c28_i32 : i32
      %c0_71 = arith.constant 0 : index
      %121 = arith.index_cast %120 : i32 to index
      %c0_72 = arith.constant 0 : index
      %122 = vector.load %arg1[%c0_71, %121, %c0_72] : memref<1x144x128xf32, #tpu.memory_space<vmem>>, vector<1x20x128xf32>
      %123 = vector.shape_cast %122 : vector<1x20x128xf32> to vector<20x128xf32>
      %c1792 = arith.constant 1792 : index
      %c0_73 = arith.constant 0 : index
      %124 = vector.load %arg2[%c1792, %c0_73] : memref<3200x128xf32, #tpu.memory_space<vmem>>, vector<128x128xf32>
      %cst_74 = arith.constant dense<0.000000e+00> : vector<20x128xf32>
      %125 = tpu.matmul %123, %124, %cst_74 {dimension_numbers = #tpu.dot_dimension_numbers<[1], [0], [0], [1], [0, 0, 1, 1], [], []>} : vector<20x128xf32>, vector<128x128xf32>, vector<20x128xf32> -> vector<20x128xf32>
      %126 = arith.addf %119, %125 : vector<20x128xf32>
      %c36_i32 = arith.constant 36 : i32
      %127 = arith.addi %20, %c36_i32 : i32
      %c0_75 = arith.constant 0 : index
      %128 = arith.index_cast %127 : i32 to index
      %c0_76 = arith.constant 0 : index
      %129 = vector.load %arg1[%c0_75, %128, %c0_76] : memref<1x144x128xf32, #tpu.memory_space<vmem>>, vector<1x20x128xf32>
      %130 = vector.shape_cast %129 : vector<1x20x128xf32> to vector<20x128xf32>
      %c1920 = arith.constant 1920 : index
      %c0_77 = arith.constant 0 : index
      %131 = vector.load %arg2[%c1920, %c0_77] : memref<3200x128xf32, #tpu.memory_space<vmem>>, vector<128x128xf32>
      %cst_78 = arith.constant dense<0.000000e+00> : vector<20x128xf32>
      %132 = tpu.matmul %130, %131, %cst_78 {dimension_numbers = #tpu.dot_dimension_numbers<[1], [0], [0], [1], [0, 0, 1, 1], [], []>} : vector<20x128xf32>, vector<128x128xf32>, vector<20x128xf32> -> vector<20x128xf32>
      %133 = arith.addf %126, %132 : vector<20x128xf32>
      %c37_i32 = arith.constant 37 : i32
      %134 = arith.addi %20, %c37_i32 : i32
      %c0_79 = arith.constant 0 : index
      %135 = arith.index_cast %134 : i32 to index
      %c0_80 = arith.constant 0 : index
      %136 = vector.load %arg1[%c0_79, %135, %c0_80] : memref<1x144x128xf32, #tpu.memory_space<vmem>>, vector<1x20x128xf32>
      %137 = vector.shape_cast %136 : vector<1x20x128xf32> to vector<20x128xf32>
      %c2048 = arith.constant 2048 : index
      %c0_81 = arith.constant 0 : index
      %138 = vector.load %arg2[%c2048, %c0_81] : memref<3200x128xf32, #tpu.memory_space<vmem>>, vector<128x128xf32>
      %cst_82 = arith.constant dense<0.000000e+00> : vector<20x128xf32>
      %139 = tpu.matmul %137, %138, %cst_82 {dimension_numbers = #tpu.dot_dimension_numbers<[1], [0], [0], [1], [0, 0, 1, 1], [], []>} : vector<20x128xf32>, vector<128x128xf32>, vector<20x128xf32> -> vector<20x128xf32>
      %140 = arith.addf %133, %139 : vector<20x128xf32>
      %c38_i32 = arith.constant 38 : i32
      %141 = arith.addi %20, %c38_i32 : i32
      %c0_83 = arith.constant 0 : index
      %142 = arith.index_cast %141 : i32 to index
      %c0_84 = arith.constant 0 : index
      %143 = vector.load %arg1[%c0_83, %142, %c0_84] : memref<1x144x128xf32, #tpu.memory_space<vmem>>, vector<1x20x128xf32>
      %144 = vector.shape_cast %143 : vector<1x20x128xf32> to vector<20x128xf32>
      %c2176 = arith.constant 2176 : index
      %c0_85 = arith.constant 0 : index
      %145 = vector.load %arg2[%c2176, %c0_85] : memref<3200x128xf32, #tpu.memory_space<vmem>>, vector<128x128xf32>
      %cst_86 = arith.constant dense<0.000000e+00> : vector<20x128xf32>
      %146 = tpu.matmul %144, %145, %cst_86 {dimension_numbers = #tpu.dot_dimension_numbers<[1], [0], [0], [1], [0, 0, 1, 1], [], []>} : vector<20x128xf32>, vector<128x128xf32>, vector<20x128xf32> -> vector<20x128xf32>
      %147 = arith.addf %140, %146 : vector<20x128xf32>
      %c39_i32 = arith.constant 39 : i32
      %148 = arith.addi %20, %c39_i32 : i32
      %c0_87 = arith.constant 0 : index
      %149 = arith.index_cast %148 : i32 to index
      %c0_88 = arith.constant 0 : index
      %150 = vector.load %arg1[%c0_87, %149, %c0_88] : memref<1x144x128xf32, #tpu.memory_space<vmem>>, vector<1x20x128xf32>
      %151 = vector.shape_cast %150 : vector<1x20x128xf32> to vector<20x128xf32>
      %c2304 = arith.constant 2304 : index
      %c0_89 = arith.constant 0 : index
      %152 = vector.load %arg2[%c2304, %c0_89] : memref<3200x128xf32, #tpu.memory_space<vmem>>, vector<128x128xf32>
      %cst_90 = arith.constant dense<0.000000e+00> : vector<20x128xf32>
      %153 = tpu.matmul %151, %152, %cst_90 {dimension_numbers = #tpu.dot_dimension_numbers<[1], [0], [0], [1], [0, 0, 1, 1], [], []>} : vector<20x128xf32>, vector<128x128xf32>, vector<20x128xf32> -> vector<20x128xf32>
      %154 = arith.addf %147, %153 : vector<20x128xf32>
      %c40_i32 = arith.constant 40 : i32
      %155 = arith.addi %20, %c40_i32 : i32
      %c0_91 = arith.constant 0 : index
      %156 = arith.index_cast %155 : i32 to index
      %c0_92 = arith.constant 0 : index
      %157 = vector.load %arg1[%c0_91, %156, %c0_92] : memref<1x144x128xf32, #tpu.memory_space<vmem>>, vector<1x20x128xf32>
      %158 = vector.shape_cast %157 : vector<1x20x128xf32> to vector<20x128xf32>
      %c2432 = arith.constant 2432 : index
      %c0_93 = arith.constant 0 : index
      %159 = vector.load %arg2[%c2432, %c0_93] : memref<3200x128xf32, #tpu.memory_space<vmem>>, vector<128x128xf32>
      %cst_94 = arith.constant dense<0.000000e+00> : vector<20x128xf32>
      %160 = tpu.matmul %158, %159, %cst_94 {dimension_numbers = #tpu.dot_dimension_numbers<[1], [0], [0], [1], [0, 0, 1, 1], [], []>} : vector<20x128xf32>, vector<128x128xf32>, vector<20x128xf32> -> vector<20x128xf32>
      %161 = arith.addf %154, %160 : vector<20x128xf32>
      %c48_i32 = arith.constant 48 : i32
      %162 = arith.addi %20, %c48_i32 : i32
      %c0_95 = arith.constant 0 : index
      %163 = arith.index_cast %162 : i32 to index
      %c0_96 = arith.constant 0 : index
      %164 = vector.load %arg1[%c0_95, %163, %c0_96] : memref<1x144x128xf32, #tpu.memory_space<vmem>>, vector<1x20x128xf32>
      %165 = vector.shape_cast %164 : vector<1x20x128xf32> to vector<20x128xf32>
      %c2560 = arith.constant 2560 : index
      %c0_97 = arith.constant 0 : index
      %166 = vector.load %arg2[%c2560, %c0_97] : memref<3200x128xf32, #tpu.memory_space<vmem>>, vector<128x128xf32>
      %cst_98 = arith.constant dense<0.000000e+00> : vector<20x128xf32>
      %167 = tpu.matmul %165, %166, %cst_98 {dimension_numbers = #tpu.dot_dimension_numbers<[1], [0], [0], [1], [0, 0, 1, 1], [], []>} : vector<20x128xf32>, vector<128x128xf32>, vector<20x128xf32> -> vector<20x128xf32>
      %168 = arith.addf %161, %167 : vector<20x128xf32>
      %c49_i32 = arith.constant 49 : i32
      %169 = arith.addi %20, %c49_i32 : i32
      %c0_99 = arith.constant 0 : index
      %170 = arith.index_cast %169 : i32 to index
      %c0_100 = arith.constant 0 : index
      %171 = vector.load %arg1[%c0_99, %170, %c0_100] : memref<1x144x128xf32, #tpu.memory_space<vmem>>, vector<1x20x128xf32>
      %172 = vector.shape_cast %171 : vector<1x20x128xf32> to vector<20x128xf32>
      %c2688 = arith.constant 2688 : index
      %c0_101 = arith.constant 0 : index
      %173 = vector.load %arg2[%c2688, %c0_101] : memref<3200x128xf32, #tpu.memory_space<vmem>>, vector<128x128xf32>
      %cst_102 = arith.constant dense<0.000000e+00> : vector<20x128xf32>
      %174 = tpu.matmul %172, %173, %cst_102 {dimension_numbers = #tpu.dot_dimension_numbers<[1], [0], [0], [1], [0, 0, 1, 1], [], []>} : vector<20x128xf32>, vector<128x128xf32>, vector<20x128xf32> -> vector<20x128xf32>
      %175 = arith.addf %168, %174 : vector<20x128xf32>
      %c50_i32 = arith.constant 50 : i32
      %176 = arith.addi %20, %c50_i32 : i32
      %c0_103 = arith.constant 0 : index
      %177 = arith.index_cast %176 : i32 to index
      %c0_104 = arith.constant 0 : index
      %178 = vector.load %arg1[%c0_103, %177, %c0_104] : memref<1x144x128xf32, #tpu.memory_space<vmem>>, vector<1x20x128xf32>
      %179 = vector.shape_cast %178 : vector<1x20x128xf32> to vector<20x128xf32>
      %c2816 = arith.constant 2816 : index
      %c0_105 = arith.constant 0 : index
      %180 = vector.load %arg2[%c2816, %c0_105] : memref<3200x128xf32, #tpu.memory_space<vmem>>, vector<128x128xf32>
      %cst_106 = arith.constant dense<0.000000e+00> : vector<20x128xf32>
      %181 = tpu.matmul %179, %180, %cst_106 {dimension_numbers = #tpu.dot_dimension_numbers<[1], [0], [0], [1], [0, 0, 1, 1], [], []>} : vector<20x128xf32>, vector<128x128xf32>, vector<20x128xf32> -> vector<20x128xf32>
      %182 = arith.addf %175, %181 : vector<20x128xf32>
      %c51_i32 = arith.constant 51 : i32
      %183 = arith.addi %20, %c51_i32 : i32
      %c0_107 = arith.constant 0 : index
      %184 = arith.index_cast %183 : i32 to index
      %c0_108 = arith.constant 0 : index
      %185 = vector.load %arg1[%c0_107, %184, %c0_108] : memref<1x144x128xf32, #tpu.memory_space<vmem>>, vector<1x20x128xf32>
      %186 = vector.shape_cast %185 : vector<1x20x128xf32> to vector<20x128xf32>
      %c2944 = arith.constant 2944 : index
      %c0_109 = arith.constant 0 : index
      %187 = vector.load %arg2[%c2944, %c0_109] : memref<3200x128xf32, #tpu.memory_space<vmem>>, vector<128x128xf32>
      %cst_110 = arith.constant dense<0.000000e+00> : vector<20x128xf32>
      %188 = tpu.matmul %186, %187, %cst_110 {dimension_numbers = #tpu.dot_dimension_numbers<[1], [0], [0], [1], [0, 0, 1, 1], [], []>} : vector<20x128xf32>, vector<128x128xf32>, vector<20x128xf32> -> vector<20x128xf32>
      %189 = arith.addf %182, %188 : vector<20x128xf32>
      %c52_i32 = arith.constant 52 : i32
      %190 = arith.addi %20, %c52_i32 : i32
      %c0_111 = arith.constant 0 : index
      %191 = arith.index_cast %190 : i32 to index
      %c0_112 = arith.constant 0 : index
      %192 = vector.load %arg1[%c0_111, %191, %c0_112] : memref<1x144x128xf32, #tpu.memory_space<vmem>>, vector<1x20x128xf32>
      %193 = vector.shape_cast %192 : vector<1x20x128xf32> to vector<20x128xf32>
      %c3072 = arith.constant 3072 : index
      %c0_113 = arith.constant 0 : index
      %194 = vector.load %arg2[%c3072, %c0_113] : memref<3200x128xf32, #tpu.memory_space<vmem>>, vector<128x128xf32>
      %cst_114 = arith.constant dense<0.000000e+00> : vector<20x128xf32>
      %195 = tpu.matmul %193, %194, %cst_114 {dimension_numbers = #tpu.dot_dimension_numbers<[1], [0], [0], [1], [0, 0, 1, 1], [], []>} : vector<20x128xf32>, vector<128x128xf32>, vector<20x128xf32> -> vector<20x128xf32>
      %196 = arith.addf %189, %195 : vector<20x128xf32>
      %197 = vector.broadcast %0 : vector<1x128xf32> to vector<20x128xf32>
      %198 = arith.addf %196, %197 : vector<20x128xf32>
      %199 = vector.extract_strided_slice %198 {offsets = [0, 0], sizes = [8, 128], strides = [1, 1]} : vector<20x128xf32> to vector<8x128xf32>
      %200 = vector.extract_strided_slice %198 {offsets = [12, 0], sizes = [8, 128], strides = [1, 1]} : vector<20x128xf32> to vector<8x128xf32>
      %201 = arith.maximumf %199, %200 : vector<8x128xf32>
      %cst_115 = arith.constant dense<0.000000e+00> : vector<4x128xf32>
      %202 = tpu.matmul %8, %201, %cst_115 {dimension_numbers = #tpu.dot_dimension_numbers<[1], [0], [0], [1], [0, 0, 1, 1], [], []>} : vector<4x8xf32>, vector<8x128xf32>, vector<4x128xf32> -> vector<4x128xf32>
      %cst_116 = arith.constant dense<0.000000e+00> : vector<4x128xf32>
      %203 = tpu.matmul %16, %201, %cst_116 {dimension_numbers = #tpu.dot_dimension_numbers<[1], [0], [0], [1], [0, 0, 1, 1], [], []>} : vector<4x8xf32>, vector<8x128xf32>, vector<4x128xf32> -> vector<4x128xf32>
      %204 = arith.maximumf %202, %203 : vector<4x128xf32>
      %cst_117 = arith.constant 0.000000e+00 : f32
      %205 = vector.broadcast %cst_117 : f32 to vector<4x128xf32>
      %206 = arith.maximumf %204, %205 : vector<4x128xf32>
      %c0_118 = arith.constant 0 : index
      %207 = arith.index_cast %arg5 : i32 to index
      %c0_119 = arith.constant 0 : index
      %c0_120 = arith.constant 0 : index
      %208 = vector.load %arg4[%c0_118, %207, %c0_119, %c0_120] : memref<1x4x4x128xf32, #tpu.memory_space<vmem>>, vector<1x1x4x128xf32>
      %209 = vector.shape_cast %208 : vector<1x1x4x128xf32> to vector<4x128xf32>
      %210 = vector.shape_cast %206 : vector<4x128xf32> to vector<1x1x4x128xf32>
      tpu.vector_store %arg4[%c0_118, %207, %c0_119, %c0_120], %210 {strides = array<i32>} : memref<1x4x4x128xf32, #tpu.memory_space<vmem>>, vector<1x1x4x128xf32>,
    }
    %c4_i32_6 = arith.constant 4 : i32
    return
  }
  func.func @transform_0(%arg0: i32) -> (i32, i32, i32) {
    %c0_i32 = arith.constant 0 : i32
    %c0_i32_0 = arith.constant 0 : i32
    %c0_i32_1 = arith.constant 0 : i32
    return %arg0, %c0_i32, %c0_i32_0 : i32, i32, i32
  }
  func.func @transform_1(%arg0: i32) -> (i32, i32) {
    %c0_i32 = arith.constant 0 : i32
    %c0_i32_0 = arith.constant 0 : i32
    %c0_i32_1 = arith.constant 0 : i32
    return %c0_i32, %c0_i32_0 : i32, i32
  }
  func.func @transform_2(%arg0: i32) -> (i32, i32) {
    %c0_i32 = arith.constant 0 : i32
    %c0_i32_0 = arith.constant 0 : i32
    %c0_i32_1 = arith.constant 0 : i32
    return %c0_i32, %c0_i32_0 : i32, i32
  }
  func.func @transform_3(%arg0: i32) -> (i32, i32, i32, i32) {
    %c0_i32 = arith.constant 0 : i32
    %c0_i32_0 = arith.constant 0 : i32
    %c0_i32_1 = arith.constant 0 : i32
    %c0_i32_2 = arith.constant 0 : i32
    return %arg0, %c0_i32, %c0_i32_0, %c0_i32_1 : i32, i32, i32, i32
  }
}

module attributes {stable_mosaic.version = 11 : i64} {
  func.func @_mlp_kernel(%arg0: i32, %arg1: memref<2x2048xf32, #tpu.memory_space<vmem>>, %arg2: memref<2048x256xf32, #tpu.memory_space<vmem>>, %arg3: memref<1x256xf32, #tpu.memory_space<vmem>>, %arg4: memref<256x128xf32, #tpu.memory_space<vmem>>, %arg5: memref<1x128xf32, #tpu.memory_space<vmem>>, %arg6: memref<2x128xf32, #tpu.memory_space<vmem>>, %arg7: memref<2x256xf32, #tpu.memory_space<vmem>>) attributes {dimension_semantics = [#tpu.dimension_semantics<parallel>], iteration_bounds = array<i64: 1>, scalar_prefetch = 0 : i64, scratch_operands = 1 : i64, tpu.core_type = #tpu.core_type<tc>, window_params = [{transform_indices = @transform_0, window_bounds = array<i64: 2, 2048>}, {pipeline_mode = #tpu.pipeline_mode<synchronous>, transform_indices = @transform_1, window_bounds = array<i64: 2048, 256>}, {pipeline_mode = #tpu.pipeline_mode<synchronous>, transform_indices = @transform_2, window_bounds = array<i64: 1, 256>}, {pipeline_mode = #tpu.pipeline_mode<synchronous>, transform_indices = @transform_3, window_bounds = array<i64: 256, 128>}, {pipeline_mode = #tpu.pipeline_mode<synchronous>, transform_indices = @transform_4, window_bounds = array<i64: 1, 128>}, {transform_indices = @transform_5, window_bounds = array<i64: 2, 128>}]} {
    %c0 = arith.constant 0 : index
    %c0_0 = arith.constant 0 : index
    %0 = vector.load %arg1[%c0, %c0_0] : memref<2x2048xf32, #tpu.memory_space<vmem>>, vector<2x2048xf32>
    %c0_1 = arith.constant 0 : index
    %c0_2 = arith.constant 0 : index
    %1 = vector.load %arg2[%c0_1, %c0_2] : memref<2048x256xf32, #tpu.memory_space<vmem>>, vector<2048x256xf32>
    %cst = arith.constant dense<0.000000e+00> : vector<2x256xf32>
    %2 = tpu.matmul %0, %1, %cst {dimension_numbers = #tpu.dot_dimension_numbers<[1], [0], [0], [1], [0, 0, 1, 1], [], []>} : vector<2x2048xf32>, vector<2048x256xf32>, vector<2x256xf32> -> vector<2x256xf32>
    %c0_3 = arith.constant 0 : index
    %c0_4 = arith.constant 0 : index
    %3 = vector.load %arg3[%c0_3, %c0_4] : memref<1x256xf32, #tpu.memory_space<vmem>>, vector<1x256xf32>
    %4 = vector.broadcast %3 : vector<1x256xf32> to vector<2x256xf32>
    %5 = arith.addf %2, %4 : vector<2x256xf32>
    %cst_5 = arith.constant 0.000000e+00 : f32
    %6 = vector.broadcast %cst_5 : f32 to vector<2x256xf32>
    %7 = arith.maximumf %5, %6 : vector<2x256xf32>
    %c0_6 = arith.constant 0 : index
    %c0_7 = arith.constant 0 : index
    %8 = vector.load %arg7[%c0_6, %c0_7] : memref<2x256xf32, #tpu.memory_space<vmem>>, vector<2x256xf32>
    tpu.vector_store %arg7[%c0_6, %c0_7], %7 {strides = array<i32>} : memref<2x256xf32, #tpu.memory_space<vmem>>, vector<2x256xf32>,
    %c0_8 = arith.constant 0 : index
    %c0_9 = arith.constant 0 : index
    %9 = vector.load %arg7[%c0_8, %c0_9] : memref<2x256xf32, #tpu.memory_space<vmem>>, vector<2x256xf32>
    %c0_10 = arith.constant 0 : index
    %c0_11 = arith.constant 0 : index
    %10 = vector.load %arg4[%c0_10, %c0_11] : memref<256x128xf32, #tpu.memory_space<vmem>>, vector<256x128xf32>
    %cst_12 = arith.constant dense<0.000000e+00> : vector<2x128xf32>
    %11 = tpu.matmul %9, %10, %cst_12 {dimension_numbers = #tpu.dot_dimension_numbers<[1], [0], [0], [1], [0, 0, 1, 1], [], []>} : vector<2x256xf32>, vector<256x128xf32>, vector<2x128xf32> -> vector<2x128xf32>
    %c0_13 = arith.constant 0 : index
    %c0_14 = arith.constant 0 : index
    %12 = vector.load %arg5[%c0_13, %c0_14] : memref<1x128xf32, #tpu.memory_space<vmem>>, vector<1x128xf32>
    %13 = vector.broadcast %12 : vector<1x128xf32> to vector<2x128xf32>
    %14 = arith.addf %11, %13 : vector<2x128xf32>
    %c0_15 = arith.constant 0 : index
    %c0_16 = arith.constant 0 : index
    %15 = vector.load %arg6[%c0_15, %c0_16] : memref<2x128xf32, #tpu.memory_space<vmem>>, vector<2x128xf32>
    tpu.vector_store %arg6[%c0_15, %c0_16], %14 {strides = array<i32>} : memref<2x128xf32, #tpu.memory_space<vmem>>, vector<2x128xf32>,
    return
  }
  func.func @transform_0(%arg0: i32) -> (i32, i32) {
    %c0_i32 = arith.constant 0 : i32
    %c0_i32_0 = arith.constant 0 : i32
    return %arg0, %c0_i32 : i32, i32
  }
  func.func @transform_1(%arg0: i32) -> (i32, i32) {
    %c0_i32 = arith.constant 0 : i32
    %c0_i32_0 = arith.constant 0 : i32
    %c0_i32_1 = arith.constant 0 : i32
    return %c0_i32, %c0_i32_0 : i32, i32
  }
  func.func @transform_2(%arg0: i32) -> (i32, i32) {
    %c0_i32 = arith.constant 0 : i32
    %c0_i32_0 = arith.constant 0 : i32
    %c0_i32_1 = arith.constant 0 : i32
    return %c0_i32, %c0_i32_0 : i32, i32
  }
  func.func @transform_3(%arg0: i32) -> (i32, i32) {
    %c0_i32 = arith.constant 0 : i32
    %c0_i32_0 = arith.constant 0 : i32
    %c0_i32_1 = arith.constant 0 : i32
    return %c0_i32, %c0_i32_0 : i32, i32
  }
  func.func @transform_4(%arg0: i32) -> (i32, i32) {
    %c0_i32 = arith.constant 0 : i32
    %c0_i32_0 = arith.constant 0 : i32
    %c0_i32_1 = arith.constant 0 : i32
    return %c0_i32, %c0_i32_0 : i32, i32
  }
  func.func @transform_5(%arg0: i32) -> (i32, i32) {
    %c0_i32 = arith.constant 0 : i32
    %c0_i32_0 = arith.constant 0 : i32
    return %arg0, %c0_i32 : i32, i32
  }
}

</mosaic_0001>

<bundles_post_ra>
// kernel: net_forward.3
= control target key start
LH: loop header
LB: loop body
LE: loop exit
PB: predicated region body
PF: predicated region fallthrough
CT: control target
= control target key end

     0   :  { %8 = vsyncpa [#allocation3], 0  ;;  %s3042_s0 = inlined_call_operand.vmem [shape: f32[2,784,1], index: 0, kind: input, shape index: {}]   ;;  %s3043_s1 = inlined_call_operand.hbm [shape: f32[25,128], index: 1, kind: input, shape index: {}]   ;;  %s3044_s2 = inlined_call_operand.hbm [shape: f32[1,128], index: 2, kind: input, shape index: {}]   ;;  %s3045_s3 = inlined_call_operand.vmem [shape: f32[2,12,12,128], index: 3, kind: output, shape index: {}]  }
   0x1   :  { %9 = vsyncpa [#allocation5], 0  ;;  %s2353_s12 = smov 0  }
   0x2 LB: > { %s125_s15 = sshll.u32 %s3043_s1, 4  ;;  %s1980_s16 = sadd.s32 4294967295, %s2321_s12   ;;  %s2321_s12 = sphi %s2353_s12, %s15_s12   ;;  %s126_s15 = int_to_ptr.hbm [resolvable:$true] %s125_s15 }
   0x3   : > { %p1982_p0 = scmp.ge.s32.totalorder %s2321_s12, 1  ;;  %p114_p1 = scmp.lt.s32.totalorder %s2321_s12, 3 }
   0x4   : > { %p2189_p2 = scmp.eq.s32.totalorder %s1980_s16, 0  ;;  %s2327_s18 = smov [#allocation2]  }
   0x5   : > { %p2364_p3 = pnand %p1982_p0, %p114_p1  ;;  %s127_s19 = sshll.u32 %s2327_s18, 4  ;;  %s128_s19 = int_to_ptr.vmem [resolvable:$true] %s127_s19 }
   0x6   : > { %s140_s22 = sshll.u32 %s3044_s2, 4  ;;  %s2328_s23 = smov [#allocation4]   ;;  %s141_s22 = int_to_ptr.hbm [resolvable:$true] %s140_s22 }
   0x7   : > { %p2182_p4 = pneg %p2364_p3  ;;  %s142_s24 = sshll.u32 %s2328_s23, 4  ;;  %s143_s24 = int_to_ptr.vmem [resolvable:$true] %s142_s24 }
   0x8   : > { %s2329_s25 = smov 128   ;;  %s2330_s26 = smov 8  }
   0x9   : > { %p2183_p5 = pnand %p2189_p2, %p2182_p4  ;;  %163 = sbr.rel (%p2364_p3) target bundleno = 760 (0x2f8), region = 32 }
   0xb   : > { %2185 = dma.hbm_to_vmem [thread:$0]  (!%p2183_p5), %s126_s15, 512, %s128_s19, [#allocation3], %s2329_s25, %s2329_s25, %s2330_s26  }
   0xc   : > { %2188 = dma.hbm_to_vmem [thread:$0]  (!%p2183_p5), %s141_s22, 16, %s143_s24, [#allocation5]  }
   0xe   : > { %2312 = dma.done.wait (%p2189_p2), [#allocation3], 512  }
   0xf   : > { %2314 = vsyncadd (%p2189_p2), [#allocation3], 4294966784 }
  0x10   : > { %2316 = dma.done.wait (%p2189_p2), [#allocation5], 16  }
  0x11   : > { %2318 = vsyncadd (%p2189_p2), [#allocation5], 4294967280  ;;  %p193_p6 = scmp.lt.s32.totalorder %s1980_s16, 1  ;;  %v204_v0 = vlaneseq  ;;  %v2385_v7 = vld [vmem:[#allocation4] sm:$0x1]  ;;  %v2331_v8 = vmov 0.0  }
  0x12   : > { %s2400_s8 = smov 0  }
  0x13   : > { %s3048_s16 = smov (!%p193_p6, %s1980_s16), 1  ;;  %v205_v1 = vshrl.u32 %v204_v0, 7  ;;  %v208_v2 = vand.u32 127, %v204_v0 }
  0x14   : > { %s2172_s27 = smul.u32 784, %s3048_s16 }
  0x15   : > { %v206_v3 = vadd.s32 8, %v205_v1  ;;  %v209_v4 = vmul.u32 2, %v205_v1  ;;  %s2173_s28 = smul.u32 192, %s3048_s16 }
  0x16   : > { %s2383_s4 = scalar_lea.vmem %s3042_s0, %s2172_s27 }
  0x17   : > { %v210_v5 = vmul.u32 2, %v206_v3  ;;  %vm211_vm0 = vcmp.eq.s32.totalorder %v208_v2, %v209_v4  ;;  %v215_v6 = vadd.s32 1, %v209_v4  ;;  %s2390_s7 = scalar_lea.vmem %s3045_s3, %s2173_s28 }
  0x18   : > { %v2392_v9 = vsel %vm211_vm0, 1.0, %v2331_v8 }
  0x19   : > { %vm212_vm1 = vcmp.eq.s32.totalorder %v208_v2, %v210_v5  ;;  %v216_v10 = vadd.s32 1, %v210_v5  ;;  %vm217_vm2 = vcmp.eq.s32.totalorder %v208_v2, %v215_v6 }
  0x1a   : > { %v2394_v11 = vsel %vm212_vm1, 1.0, %v2331_v8  ;;  %v2396_v12 = vsel %vm217_vm2, 1.0, %v2331_v8 }
  0x1b   : > { %vm218_vm3 = vcmp.eq.s32.totalorder %v208_v2, %v216_v10 }
  0x1c   : > { %v2398_v13 = vsel %vm218_vm3, 1.0, %v2331_v8 }
  0x1d LB: >> { %v2332_v14 = vmov 0   ;;  %s227_s9 = smul.u32 56, %s2325_s8  ;;  %vm1741_vm4 = vcmask 1043456   ;;  %vm1755_vm5 = vcmask 195584   ;;  %s2163_s11 = sshll.u32 %s2325_s8, 4  ;;  %s2325_s8 = sphi %s2400_s8, %s226_s8  }
  0x1e   : >> { %2217 = vset.pattern.permute.xlu2 %v2332_v14  ;;  %2216 = vset.pattern.permute.xlu1 %v2332_v14  ;;  %s1819_s13 = scalar_lea.vmem %s2390_s7, %s2163_s11  ;;  %s226_s8 = sadd.s32 1, %s2325_s8  }
  0x1f   : >> { %2215 = vset.pattern.permute.xlu0 %v2332_v14  ;;  %s2407_s10 = scalar_lea.vmem %s2383_s4, %s227_s9  ;;  %p223_p7 = scmp.ge.s32.totalorder %s226_s8, 12  }
  0x20   : >> { %v2410_v15 = vld [vmem:[%s2407_s10 + $0x20] sm:$0xff]  ;;  %v231_v16 = vld [vmem:[%s2407_s10 + $0x10] sm:$0xff]  ;;  %v2416_v18 = vld [vmem:[%s2407_s10 + $0x28] sm:$0xff] }
  0x21   : >> { %v229_v17 = vld [vmem:[%s2407_s10] sm:$0xff]  ;;  %259 = vperm.xlu2 %2217, %v2410_v15   ;;  %249 = vperm.xlu1 %2216, %v231_v16   ;;  %v232_v19 = vld [vmem:[%s2407_s10 + $0x18] sm:$0xff]  ;;  %v230_v20 = vld [vmem:[%s2407_s10 + $0x8] sm:$0xff] }
  0x22   : >> { %239 = vperm.xlu0 %2215, %v229_v17   ;;  %v1992_v21 = vld [vmem:[%s2407_s10 + $0x9] sm:$0xff]  ;;  %v1991_v22 = vld [vmem:[%s2407_s10 + $0x1] sm:$0xff]  ;;  %v1994_v25 = vld [vmem:[%s2407_s10 + $0x19] sm:$0xff] }
  0x23   : >> { %v235_v23 = vld [vmem:[%s2407_s10 + $0x30] sm:$0xf]  ;;  %v1995_v24 = vld [vmem:[%s2407_s10 + $0x21] sm:$0xff]  ;;  %v2014_v47 = vld [vmem:[%s2407_s10 + $0x14] sm:$0xff] }
  0x24   : >> { %v1993_v26 = vld [vmem:[%s2407_s10 + $0x11] sm:$0xff]  ;;  %v1998_v27 = vld [vmem:[%s2407_s10 + $0x2] sm:$0xff]  ;;  %v2001_v30 = vld [vmem:[%s2407_s10 + $0x1a] sm:$0xff] }
  0x25   : >> { %v1997_v28 = vld [vmem:[%s2407_s10 + $0x31] sm:$0xf]  ;;  %v1996_v29 = vld [vmem:[%s2407_s10 + $0x29] sm:$0xff]  ;;  %v2008_v41 = vld [vmem:[%s2407_s10 + $0x1b] sm:$0xff] }
  0x26   : >> { %v2000_v31 = vld [vmem:[%s2407_s10 + $0x12] sm:$0xff]  ;;  %v1999_v32 = vld [vmem:[%s2407_s10 + $0xa] sm:$0xff]  ;;  %v2002_v35 = vld [vmem:[%s2407_s10 + $0x22] sm:$0xff] }
  0x27   : >> { %v2004_v33 = vld [vmem:[%s2407_s10 + $0x32] sm:$0xf]  ;;  %v2003_v34 = vld [vmem:[%s2407_s10 + $0x2a] sm:$0xff]  ;;  %v2015_v46 = vld [vmem:[%s2407_s10 + $0x1c] sm:$0xff] }
  0x28   : >> { %v2007_v36 = vld [vmem:[%s2407_s10 + $0x13] sm:$0xff]  ;;  %v2006_v37 = vld [vmem:[%s2407_s10 + $0xb] sm:$0xff]  ;;  %v2005_v38 = vld [vmem:[%s2407_s10 + $0x3] sm:$0xff] }
  0x29   : >> { %264 = vperm.xlu2 %2217, %v2416_v18   ;;  %254 = vperm.xlu1 %2216, %v232_v19   ;;  %v2010_v39 = vld [vmem:[%s2407_s10 + $0x2b] sm:$0xff]  ;;  %v2009_v40 = vld [vmem:[%s2407_s10 + $0x23] sm:$0xff]  ;;  %v2011_v44 = vld [vmem:[%s2407_s10 + $0x33] sm:$0xf] }
  0x2a   : >> { %244 = vperm.xlu0 %2215, %v230_v20   ;;  %v2013_v42 = vld [vmem:[%s2407_s10 + $0xc] sm:$0xff]  ;;  %v2012_v43 = vld [vmem:[%s2407_s10 + $0x4] sm:$0xff]  ;;  %v2018_v48 = vld [vmem:[%s2407_s10 + $0x34] sm:$0xf] }
  0x2b   : >> { %v2016_v45 = vld [vmem:[%s2407_s10 + $0x24] sm:$0xff]  ;;  %v2017_v49 = vld [vmem:[%s2407_s10 + $0x2c] sm:$0xff]  ;;  %v2022_v51 = vld [vmem:[%s2407_s10 + $0x34] sm:$0xff] }
  0x2c   : >> { %v2025_v53 = vld [vmem:[%s2407_s10 + $0x4c] sm:$0xf]  ;;  %v2457_v54 = vld [vmem:[%s2407_s10 + $0x44] sm:$0xff]  ;;  %v2460_v55 = vld [vmem:[%s2407_s10 + $0x3c] sm:$0xff] }
  0x2d   : >> { %v2028_v57 = vld [vmem:[%s2407_s10 + $0x2d] sm:$0xff]  ;;  %v2027_v58 = vld [vmem:[%s2407_s10 + $0x25] sm:$0xff]  ;;  %v2026_v59 = vld [vmem:[%s2407_s10 + $0x1d] sm:$0xff] }
  0x2e   : >> { %v2031_v63 = vld [vmem:[%s2407_s10 + $0x45] sm:$0xff]  ;;  %v2030_v0 = vld [vmem:[%s2407_s10 + $0x3d] sm:$0xff]  ;;  %v2029_v1 = vld [vmem:[%s2407_s10 + $0x35] sm:$0xff] }
  0x2f   : >> { %v2034_v5 = vld [vmem:[%s2407_s10 + $0x26] sm:$0xff]  ;;  %v2033_v6 = vld [vmem:[%s2407_s10 + $0x1e] sm:$0xff]  ;;  %v2036_v19 = vld [vmem:[%s2407_s10 + $0x36] sm:$0xff] }
  0x30   : >> { %v2032_v8 = vld [vmem:[%s2407_s10 + $0x4d] sm:$0xf]  ;;  %v2037_v17 = vld [vmem:[%s2407_s10 + $0x3e] sm:$0xff] }
  0x31   : >> { %304 = vperm.xlu2 %2217, %v1992_v21   ;;  %299 = vperm.xlu1 %2216, %v1991_v22   ;;  %v2035_v20 = vld [vmem:[%s2407_s10 + $0x2e] sm:$0xff] }
  0x32   : >> { %269 = vperm.xlu0 %2215, %v235_v23  }
  0x39   : >> { %319 = vperm.xlu2 %2217, %v1995_v24   ;;  %314 = vperm.xlu1 %2216, %v1994_v25   ;;  %v2040_v24 = vld [vmem:[%s2407_s10 + $0x1f] sm:$0xff]  ;;  %v2039_v25 = vld [vmem:[%s2407_s10 + $0x4e] sm:$0xf] }
  0x3a   : >> { %309 = vperm.xlu0 %2215, %v1993_v26   ;;  %v2038_v26 = vld [vmem:[%s2407_s10 + $0x46] sm:$0xff] }
  0x41   : >> { %359 = vperm.xlu2 %2217, %v1998_v27   ;;  %329 = vperm.xlu1 %2216, %v1997_v28  }
  0x42   : >> { %324 = vperm.xlu0 %2215, %v1996_v29  }
  0x49   : >> { %374 = vperm.xlu2 %2217, %v2001_v30   ;;  %369 = vperm.xlu1 %2216, %v2000_v31   ;;  %v2043_v30 = vld [vmem:[%s2407_s10 + $0x37] sm:$0xff]  ;;  %v2042_v31 = vld [vmem:[%s2407_s10 + $0x2f] sm:$0xff] }
  0x4a   : >> { %364 = vperm.xlu0 %2215, %v1999_v32   ;;  %v2041_v32 = vld [vmem:[%s2407_s10 + $0x27] sm:$0xff] }
  0x51   : >> { %389 = vperm.xlu2 %2217, %v2004_v33   ;;  %384 = vperm.xlu1 %2216, %v2003_v34  }
  0x52   : >> { %379 = vperm.xlu0 %2215, %v2002_v35  }
  0x59   : >> { %429 = vperm.xlu2 %2217, %v2007_v36   ;;  %424 = vperm.xlu1 %2216, %v2006_v37   ;;  %v2046_v36 = vld [vmem:[%s2407_s10 + $0x4f] sm:$0xf]  ;;  %v2045_v37 = vld [vmem:[%s2407_s10 + $0x47] sm:$0xff] }
  0x5a   : >> { %419 = vperm.xlu0 %2215, %v2005_v38   ;;  %v2044_v38 = vld [vmem:[%s2407_s10 + $0x3f] sm:$0xff] }
  0x61   : >> { %444 = vperm.xlu2 %2217, %v2010_v39   ;;  %439 = vperm.xlu1 %2216, %v2009_v40  }
  0x62   : >> { %434 = vperm.xlu0 %2215, %v2008_v41  }
  0x69   : >> { %484 = vperm.xlu2 %2217, %v2013_v42   ;;  %479 = vperm.xlu1 %2216, %v2012_v43   ;;  %v2049_v42 = vld [vmem:[%s2407_s10 + $0x30] sm:$0xff] }
  0x6a   : >> { %449 = vperm.xlu0 %2215, %v2011_v44  }
  0x71   : >> { %499 = vperm.xlu2 %2217, %v2016_v45   ;;  %494 = vperm.xlu1 %2216, %v2015_v46  }
  0x72   : >> { %489 = vperm.xlu0 %2215, %v2014_v47   ;;  %v2051_v47 = vld [vmem:[%s2407_s10 + $0x40] sm:$0xff] }
  0x79   : >> { %539 = vperm.xlu2 %2217, %v2015_v46   ;;  %509 = vperm.xlu1 %2216, %v2018_v48   ;;  %v2052_v46 = vld [vmem:[%s2407_s10 + $0x48] sm:$0xff]  ;;  %v2050_v48 = vld [vmem:[%s2407_s10 + $0x38] sm:$0xff] }
  0x7a   : >> { %504 = vperm.xlu0 %2215, %v2017_v49  }
  0x7b   : >> { %v2450_v50 = vpop.permute.xlu2 %259 }
  0x81   : >> { %554 = vperm.xlu2 %2217, %v2022_v51   ;;  %549 = vperm.xlu1 %2216, %v2017_v49   ;;  %v2535_v49 = vld [vmem:[#allocation2] ss:$0 sm:$0xff]  ;;  %v2537_v51 = vld [vmem:[#allocation2 + $0x1] ss:$0 sm:$0xff] }
  0x82   : >> { %544 = vperm.xlu0 %2215, %v2016_v45  }
  0x83   : >> { %v2453_v52 = vpop.permute.xlu2 %264 }
  0x89   : >> { %569 = vperm.xlu2 %2217, %v2025_v53   ;;  %564 = vperm.xlu1 %2216, %v2457_v54  }
  0x8a   : >> { %559 = vperm.xlu0 %2215, %v2460_v55  }
  0x8b   : >> { %v2464_v56 = vpop.permute.xlu2 %304 }
  0x91   : >> { %609 = vperm.xlu2 %2217, %v2028_v57   ;;  %604 = vperm.xlu1 %2216, %v2027_v58   ;;  %v2544_v58 = vld [vmem:[#allocation2 + $0x2] ss:$0 sm:$0xff] }
  0x92   : >> { %599 = vperm.xlu0 %2215, %v2026_v59  }
  0x93   : >> { %v2469_v60 = vpop.permute.xlu2 %319  ;;  %v2471_v61 = vpop.permute.xlu1 %249 }
  0x94   : >> { %v2473_v62 = vpop.permute.xlu0 %239 }
  0x95   : >> { %v273_v57 = vmul.f32 %v2535_v49, %v2473_v62 }
  0x99   : >> { %624 = vperm.xlu2 %2217, %v2031_v63   ;;  %619 = vperm.xlu1 %2216, %v2030_v0   ;;  %v2546_v0 = vld [vmem:[#allocation2 + $0x3] ss:$0 sm:$0xff] }
  0x9a   : >> { %614 = vperm.xlu0 %2215, %v2029_v1   ;;  %v2053_v1 = vld [vmem:[%s2407_s10 + $0x50] sm:$0xf] }
  0x9b   : >> { %v2478_v2 = vpop.permute.xlu2 %359  ;;  %v2480_v3 = vpop.permute.xlu1 %254 }
  0x9c   : >> { %v2482_v4 = vpop.permute.xlu0 %244 }
  0xa1   : >> { %664 = vperm.xlu2 %2217, %v2034_v5   ;;  %659 = vperm.xlu1 %2216, %v2033_v6   ;;  %v393_v5 = vmul.f32 %v2544_v58, %v2478_v2 }
  0xa2   : >> { %629 = vperm.xlu0 %2215, %v2032_v8  }
  0xa3   : >> { %v2487_v10 = vpop.permute.xlu2 %374  ;;  %v300_v14 = vpop.permute.xlu1 %299 }
  0xa4   : >> { %v2489_v16 = vpop.permute.xlu0 %269  ;;  %v333_v53 = vmul.f32 %v2537_v51, %v300_v14  ;;  %v2553_v14 = vld [vmem:[#allocation2 + $0x4] ss:$0 sm:$0xff] }
  0xa6   : >> { %v340_v63 = vadd.f32 %v333_v53, %v273_v57 }
  0xa8   : >> { %v400_v62 = vadd.f32 %v393_v5, %v340_v63  ;;  %v2061_v5 = vld [vmem:[%s2407_s10 + $0x39] sm:$0xff] }
  0xa9   : >> { %679 = vperm.xlu2 %2217, %v2037_v17   ;;  %674 = vperm.xlu1 %2216, %v2036_v19   ;;  %v2555_v17 = vld [vmem:[#allocation2 + $0x5] ss:$0 sm:$0xff] }
  0xaa   : >> { %669 = vperm.xlu0 %2215, %v2035_v20  }
  0xab   : >> { %v2494_v21 = vpop.permute.xlu2 %389  ;;  %v315_v22 = vpop.permute.xlu1 %314 }
  0xac   : >> { %v2496_v23 = vpop.permute.xlu0 %309  ;;  %v336_v8 = vmul.f32 %v2537_v51, %v315_v22  ;;  %v2562_v22 = vld [vmem:[%s2407_s10 + $0x58] sm:$0xff] }
  0xb1   : >> { %719 = vperm.xlu2 %2217, %v2040_v24   ;;  %689 = vperm.xlu1 %2216, %v2039_v25   ;;  %v276_v24 = vmul.f32 %v2535_v49, %v2480_v3 }
  0xb2   : >> { %684 = vperm.xlu0 %2215, %v2038_v26  }
  0xb3   : >> { %v2501_v27 = vpop.permute.xlu2 %429  ;;  %v2503_v28 = vpop.permute.xlu1 %329 }
  0xb4   : >> { %v2505_v29 = vpop.permute.xlu0 %324  ;;  %v339_v3 = vmul.f32 %v2537_v51, %v2503_v28  ;;  %v399_v28 = vmul.f32 %v2544_v58, %v2494_v21 }
  0xb9   : >> { %734 = vperm.xlu2 %2217, %v2043_v30   ;;  %729 = vperm.xlu1 %2216, %v2042_v31   ;;  %v343_v30 = vadd.f32 %v336_v8, %v276_v24  ;;  %v2580_v8 = vld [vmem:[%s2407_s10 + $0x60] sm:$0xff] }
  0xba   : >> { %724 = vperm.xlu0 %2215, %v2041_v32  }
  0xbb   : >> { %v2510_v33 = vpop.permute.xlu2 %444  ;;  %v2512_v34 = vpop.permute.xlu1 %369 }
  0xbc   : >> { %v2514_v35 = vpop.permute.xlu0 %364  ;;  %v395_v24 = vmul.f32 %v2544_v58, %v2512_v34 }
  0xc1   : >> { %749 = vperm.xlu2 %2217, %v2046_v36   ;;  %744 = vperm.xlu1 %2216, %v2045_v37   ;;  %v2057_v36 = vld [vmem:[%s2407_s10 + $0x50] sm:$0xff]  ;;  %v396_v37 = vmul.f32 %v2544_v58, %v2487_v10  ;;  %v279_v10 = vmul.f32 %v2535_v49, %v2489_v16 }
  0xc2   : >> { %739 = vperm.xlu0 %2215, %v2044_v38  }
  0xc3   : >> { %v2519_v39 = vpop.permute.xlu2 %484  ;;  %v2521_v40 = vpop.permute.xlu1 %384 }
  0xc4   : >> { %v2523_v41 = vpop.permute.xlu0 %379 }
  0xc9   : >> { %789 = vperm.xlu2 %2217, %v2049_v42   ;;  %784 = vperm.xlu1 %2216, %v2416_v18  }
  0xca   : >> { %779 = vperm.xlu0 %2215, %v2410_v15  }
  0xcb   : >> { %v2528_v43 = vpop.permute.xlu2 %499  ;;  %v2530_v44 = vpop.permute.xlu1 %424 }
  0xcc   : >> { %v420_v45 = vpop.permute.xlu0 %419 }
  0xcd   : >> { %v453_v6 = vmul.f32 %v2546_v0, %v420_v45  ;;  %v403_v45 = vadd.f32 %v396_v37, %v343_v30 }
  0xcf   : >> { %v460_v2 = vadd.f32 %v453_v6, %v400_v62  ;;  %v2060_v6 = vld [vmem:[%s2407_s10 + $0x68] sm:$0xf] }
  0xd1   : >> { %804 = vperm.xlu2 %2217, %v2052_v46   ;;  %799 = vperm.xlu1 %2216, %v2051_v47  }
  0xd2   : >> { %794 = vperm.xlu0 %2215, %v2050_v48  }
  0xd3   : >> { %v540_v18 = vpop.permute.xlu2 %539  ;;  %v2540_v15 = vpop.permute.xlu1 %439 }
  0xd4   : >> { %v435_v59 = vpop.permute.xlu0 %434  ;;  %v573_v31 = vmul.f32 %v2555_v17, %v540_v18 }
  0xd5   : >> { %v456_v38 = vmul.f32 %v2546_v0, %v435_v59  ;;  %v346_v59 = vadd.f32 %v339_v3, %v279_v10  ;;  %v2063_v3 = vld [vmem:[%s2407_s10 + $0x49] sm:$0xff]  ;;  %v338_v10 = vmul.f32 %v2537_v51, %v2505_v29 }
  0xd7   : >> { %v463_v53 = vadd.f32 %v456_v38, %v403_v45  ;;  %v406_v21 = vadd.f32 %v399_v28, %v346_v59  ;;  %v457_v28 = vmul.f32 %v2546_v0, %v2540_v15 }
  0xd9   : >> { %844 = vperm.xlu2 %2217, %v2051_v47   ;;  %839 = vperm.xlu1 %2216, %v2050_v48  }
  0xda   : >> { %809 = vperm.xlu0 %2215, %v2053_v1  }
  0xdb   : >> { %v555_v19 = vpop.permute.xlu2 %554  ;;  %v480_v20 = vpop.permute.xlu1 %479 }
  0xdc   : >> { %v513_v25 = vmul.f32 %v2553_v14, %v480_v20  ;;  %v450_v26 = vpop.permute.xlu0 %449  ;;  %v576_v63 = vmul.f32 %v2555_v17, %v555_v19  ;;  %v274_v20 = vmul.f32 %v2535_v49, %v2482_v4  ;;  %v275_v19 = vmul.f32 %v2535_v49, %v2471_v61 }
  0xdd   : >> { %v459_v16 = vmul.f32 %v2546_v0, %v450_v26  ;;  %v394_v4 = vmul.f32 %v2544_v58, %v2514_v35  ;;  %v455_v35 = vmul.f32 %v2546_v0, %v2501_v27  ;;  %v398_v27 = vmul.f32 %v2544_v58, %v2521_v40 }
  0xde   : >> { %v520_v32 = vadd.f32 %v513_v25, %v460_v2 }
  0xdf   : >> { %v466_v30 = vadd.f32 %v459_v16, %v406_v21 }
  0xe0   : >> { %v2568_v42 = vadd.f32 %v573_v31, %v520_v32  ;;  %v454_v32 = vmul.f32 %v2546_v0, %v2530_v44  ;;  %v277_v44 = vmul.f32 %v2535_v49, %v2450_v50  ;;  %v514_v50 = vmul.f32 %v2553_v14, %v2519_v39 }
  0xe1   : >> { %859 = vperm.xlu2 %2217, %v2562_v22   ;;  %854 = vperm.xlu1 %2216, %v2057_v36  }
  0xe2   : >> { %849 = vperm.xlu0 %2215, %v2052_v46   ;;  %v335_v46 = vmul.f32 %v2537_v51, %v2496_v23  ;;  %v334_v23 = vmul.f32 %v2537_v51, %v2464_v56  ;;  %v2064_v56 = vld [vmem:[%s2407_s10 + $0x51] sm:$0xff] }
  0xe3   : >> { %v570_v47 = vpop.permute.xlu2 %569  ;;  %v495_v48 = vpop.permute.xlu1 %494 }
  0xe4   : >> { %v516_v18 = vmul.f32 %v2553_v14, %v495_v48  ;;  %v490_v57 = vpop.permute.xlu0 %489  ;;  %v342_v26 = vadd.f32 %v335_v46, %v275_v19  ;;  %v341_v34 = vadd.f32 %v334_v23, %v274_v20  ;;  %v579_v37 = vmul.f32 %v2555_v17, %v570_v47  ;;  %v2062_v48 = vld [vmem:[%s2407_s10 + $0x41] sm:$0xff]  ;;  %v2065_v23 = vld [vmem:[%s2407_s10 + $0x59] sm:$0xff] }
  0xe5   : >> { %v337_v47 = vmul.f32 %v2537_v51, %v2469_v60  ;;  %v397_v60 = vmul.f32 %v2544_v58, %v2523_v41  ;;  %v2067_v41 = vld [vmem:[%s2407_s10 + $0x69] sm:$0xf]  ;;  %v2066_v58 = vld [vmem:[%s2407_s10 + $0x61] sm:$0xff] }
  0xe6   : >> { %v523_v1 = vadd.f32 %v516_v18, %v463_v53  ;;  %v402_v36 = vadd.f32 %v395_v24, %v342_v26  ;;  %v401_v45 = vadd.f32 %v394_v4, %v341_v34  ;;  %v515_v53 = vmul.f32 %v2553_v14, %v490_v57 }
  0xe7   : >> { %v458_v4 = vmul.f32 %v2546_v0, %v2510_v33 }
  0xe8   : >> { %v2587_v62 = vadd.f32 %v576_v63, %v523_v1  ;;  %v461_v59 = vadd.f32 %v454_v32, %v401_v45  ;;  %v278_v63 = vmul.f32 %v2535_v49, %v2453_v52  ;;  %v462_v29 = vadd.f32 %v455_v35, %v402_v36  ;;  %v2622_v1 = vld [vmem:[#allocation2 + $0x6] ss:$0 sm:$0xff] }
  0xe9   : >> { %899 = vperm.xlu2 %2217, %v2061_v5   ;;  %869 = vperm.xlu1 %2216, %v2060_v6   ;;  %v344_v6 = vadd.f32 %v337_v47, %v277_v44 }
  0xea   : >> { %864 = vperm.xlu0 %2215, %v2580_v8   ;;  %v345_v5 = vadd.f32 %v338_v10, %v278_v63  ;;  %v522_v52 = vadd.f32 %v515_v53, %v462_v29  ;;  %v521_v46 = vadd.f32 %v514_v50, %v461_v59  ;;  %v2073_v63 = vld [vmem:[%s2407_s10 + $0x62] sm:$0xff]  ;;  %v2071_v50 = vld [vmem:[%s2407_s10 + $0x52] sm:$0xff] }
  0xeb   : >> { %v610_v2 = vpop.permute.xlu2 %609  ;;  %v510_v25 = vpop.permute.xlu1 %509  ;;  %v404_v24 = vadd.f32 %v397_v60, %v344_v6 }
  0xec   : >> { %v519_v61 = vmul.f32 %v2553_v14, %v510_v25  ;;  %v505_v31 = vpop.permute.xlu0 %504  ;;  %v405_v39 = vadd.f32 %v398_v27, %v345_v5  ;;  %v635_v20 = vmul.f32 %v2622_v1, %v610_v2  ;;  %v2072_v27 = vld [vmem:[%s2407_s10 + $0x5a] sm:$0xff] }
  0xed   : >> { %v518_v25 = vmul.f32 %v2553_v14, %v505_v31  ;;  %v464_v15 = vadd.f32 %v457_v28, %v404_v24  ;;  %v2076_v28 = vld [vmem:[%s2407_s10 + $0x43] sm:$0xff] }
  0xee   : >> { %v526_v38 = vadd.f32 %v519_v61, %v466_v30  ;;  %v465_v2 = vadd.f32 %v458_v4, %v405_v39  ;;  %v517_v30 = vmul.f32 %v2553_v14, %v2528_v43  ;;  %v2651_v14 = vld [vmem:[#allocation2 + $0x7] ss:$0 sm:$0xff] }
  0xf0   : >> { %v2612_v18 = vadd.f32 %v579_v37, %v526_v38  ;;  %v525_v32 = vadd.f32 %v518_v25, %v465_v2  ;;  %v524_v31 = vadd.f32 %v517_v30, %v464_v15  ;;  %v2078_v25 = vld [vmem:[%s2407_s10 + $0x53] sm:$0xff]  ;;  %v2077_v2 = vld [vmem:[%s2407_s10 + $0x4b] sm:$0xff] }
  0xf1   : >> { %914 = vperm.xlu2 %2217, %v2064_v56   ;;  %909 = vperm.xlu1 %2216, %v2063_v3   ;;  %v2070_v56 = vld [vmem:[%s2407_s10 + $0x4a] sm:$0xff]  ;;  %v2069_v3 = vld [vmem:[%s2407_s10 + $0x42] sm:$0xff] }
  0xf2   : >> { %904 = vperm.xlu0 %2215, %v2062_v48   ;;  %v2068_v48 = vld [vmem:[%s2407_s10 + $0x3a] sm:$0xff] }
  0xf3   : >> { %v625_v51 = vpop.permute.xlu2 %624  ;;  %v550_v57 = vpop.permute.xlu1 %549 }
  0xf4   : >> { %v575_v49 = vmul.f32 %v2555_v17, %v550_v57  ;;  %v545_v40 = vpop.permute.xlu0 %544  ;;  %v638_v37 = vmul.f32 %v2622_v1, %v625_v51 }
  0xf5   : >> { %v574_v16 = vmul.f32 %v2555_v17, %v545_v40 }
  0xf6   : >> { %v582_v19 = vadd.f32 %v575_v49, %v522_v52 }
  0xf7   : >> { %v581_v21 = vadd.f32 %v574_v16, %v521_v46  ;;  %v2074_v16 = vld [vmem:[%s2407_s10 + $0x6a] sm:$0xf] }
  0xf8   : >> { %v2639_v26 = vadd.f32 %v635_v20, %v582_v19  ;;  %v2671_v20 = vld [vmem:[#allocation2 + $0x8] ss:$0 sm:$0xff] }
  0xf9   : >> { %929 = vperm.xlu2 %2217, %v2067_v41   ;;  %924 = vperm.xlu1 %2216, %v2066_v58  }
  0xfa   : >> { %919 = vperm.xlu0 %2215, %v2065_v23  }
  0xfb   : >> { %v665_v61 = vpop.permute.xlu2 %664  ;;  %v565_v34 = vpop.permute.xlu1 %564 }
  0xfc   : >> { %v578_v33 = vmul.f32 %v2555_v17, %v565_v34  ;;  %v560_v0 = vpop.permute.xlu0 %559  ;;  %v694_v47 = vmul.f32 %v2651_v14, %v665_v61 }
  0xfd   : >> { %v577_v36 = vmul.f32 %v2555_v17, %v560_v0 }
  0xfe   : >> { %v585_v38 = vadd.f32 %v578_v33, %v525_v32 }
  0xff   : >> { %v584_v45 = vadd.f32 %v577_v36, %v524_v31  ;;  %v2081_v36 = vld [vmem:[%s2407_s10 + $0x6b] sm:$0xf] }
 0x100   : >> { %v2649_v43 = vadd.f32 %v638_v37, %v585_v38  ;;  %v2080_v37 = vld [vmem:[%s2407_s10 + $0x63] sm:$0xff] }
 0x101   : >> { %969 = vperm.xlu2 %2217, %v2070_v56   ;;  %964 = vperm.xlu1 %2216, %v2069_v3  }
 0x102   : >> { %959 = vperm.xlu0 %2215, %v2068_v48  }
 0x103   : >> { %v680_v35 = vpop.permute.xlu2 %679  ;;  %v605_v10 = vpop.permute.xlu1 %604 }
 0x104   : >> { %v634_v17 = vmul.f32 %v2622_v1, %v605_v10  ;;  %v600_v53 = vpop.permute.xlu0 %599  ;;  %v697_v40 = vmul.f32 %v2651_v14, %v680_v35 }
 0x105   : >> { %v633_v44 = vmul.f32 %v2622_v1, %v600_v53  ;;  %v2085_v53 = vld [vmem:[%s2407_s10 + $0x54] sm:$0xff] }
 0x106   : >> { %v641_v59 = vadd.f32 %v634_v17, %v581_v21 }
 0x107   : >> { %v640_v29 = vadd.f32 %v633_v44, %v2568_v42  ;;  %v2075_v42 = vld [vmem:[%s2407_s10 + $0x3b] sm:$0xff] }
 0x108   : >> { %v2660_v60 = vadd.f32 %v694_v47, %v641_v59  ;;  %v2699_v47 = vld [vmem:[#allocation2 + $0x9] ss:$0 sm:$0xff] }
 0x109   : >> { %984 = vperm.xlu2 %2217, %v2073_v63   ;;  %979 = vperm.xlu1 %2216, %v2072_v27  }
 0x10a   : >> { %974 = vperm.xlu0 %2215, %v2071_v50  }
 0x10b   : >> { %v720_v51 = vpop.permute.xlu2 %719  ;;  %v620_v57 = vpop.permute.xlu1 %619 }
 0x10c   : >> { %v637_v5 = vmul.f32 %v2622_v1, %v620_v57  ;;  %v615_v52 = vpop.permute.xlu0 %614  ;;  %v753_v23 = vmul.f32 %v2671_v20, %v720_v51  ;;  %v2087_v57 = vld [vmem:[%s2407_s10 + $0x64] sm:$0xff] }
 0x10d   : >> { %v636_v49 = vmul.f32 %v2622_v1, %v615_v52  ;;  %v2086_v52 = vld [vmem:[%s2407_s10 + $0x5c] sm:$0xff] }
 0x10e   : >> { %v644_v6 = vadd.f32 %v637_v5, %v584_v45 }
 0x10f   : >> { %v643_v46 = vadd.f32 %v636_v49, %v2587_v62  ;;  %v2079_v62 = vld [vmem:[%s2407_s10 + $0x5b] sm:$0xff] }
 0x110   : >> { %v2669_v39 = vadd.f32 %v697_v40, %v644_v6 }
 0x111   : >> { %1024 = vperm.xlu2 %2217, %v2076_v28   ;;  %1019 = vperm.xlu1 %2216, %v2075_v42  }
 0x112   : >> { %989 = vperm.xlu0 %2215, %v2074_v16  }
 0x113   : >> { %v735_v19 = vpop.permute.xlu2 %734  ;;  %v660_v41 = vpop.permute.xlu1 %659 }
 0x114   : >> { %v693_v58 = vmul.f32 %v2651_v14, %v660_v41  ;;  %v630_v24 = vpop.permute.xlu0 %629  ;;  %v756_v0 = vmul.f32 %v2671_v20, %v735_v19  ;;  %v2717_v41 = vld [vmem:[#allocation2 + $0xa] ss:$0 sm:$0xff] }
 0x115   : >> { %v639_v21 = vmul.f32 %v2622_v1, %v630_v24 }
 0x116   : >> { %v700_v4 = vadd.f32 %v693_v58, %v640_v29 }
 0x117   : >> { %v646_v15 = vadd.f32 %v639_v21, %v2612_v18 }
 0x118   : >> { %v2680_v30 = vadd.f32 %v753_v23, %v700_v4 }
 0x119   : >> { %1039 = vperm.xlu2 %2217, %v2079_v62   ;;  %1034 = vperm.xlu1 %2216, %v2078_v25   ;;  %v2726_v25 = vld [vmem:[%s2407_s10 + $0x74] sm:$0xff] }
 0x11a   : >> { %1029 = vperm.xlu0 %2215, %v2077_v2   ;;  %v2092_v2 = vld [vmem:[%s2407_s10 + $0x6c] sm:$0xff] }
 0x11b   : >> { %v750_v61 = vpop.permute.xlu2 %749  ;;  %v675_v34 = vpop.permute.xlu1 %674 }
 0x11c   : >> { %v696_v32 = vmul.f32 %v2651_v14, %v675_v34  ;;  %v670_v1 = vpop.permute.xlu0 %669  ;;  %v759_v10 = vmul.f32 %v2671_v20, %v750_v61 }
 0x11d   : >> { %v695_v33 = vmul.f32 %v2651_v14, %v670_v1 }
 0x11e   : >> { %v703_v31 = vadd.f32 %v696_v32, %v643_v46 }
 0x11f   : >> { %v702_v18 = vadd.f32 %v695_v33, %v2639_v26  ;;  %v2084_v26 = vld [vmem:[%s2407_s10 + $0x4c] sm:$0xff] }
 0x120   : >> { %v2688_v38 = vadd.f32 %v756_v0, %v703_v31 }
 0x121   : >> { %1079 = vperm.xlu2 %2217, %v2460_v55   ;;  %1049 = vperm.xlu1 %2216, %v2081_v36  }
 0x122   : >> { %1044 = vperm.xlu0 %2215, %v2080_v37  }
 0x123   : >> { %v790_v56 = vpop.permute.xlu2 %789  ;;  %v690_v3 = vpop.permute.xlu1 %689 }
 0x124   : >> { %v699_v45 = vmul.f32 %v2651_v14, %v690_v3  ;;  %v685_v48 = vpop.permute.xlu0 %684  ;;  %v815_v50 = vmul.f32 %v2699_v47, %v790_v56  ;;  %v2095_v56 = vld [vmem:[%s2407_s10 + $0x84] sm:$0xf] }
 0x125   : >> { %v698_v35 = vmul.f32 %v2651_v14, %v685_v48 }
 0x126   : >> { %v706_v17 = vadd.f32 %v699_v45, %v646_v15  ;;  %v2743_v45 = vld [vmem:[#allocation2 + $0xb] ss:$0 sm:$0xff] }
 0x127   : >> { %v705_v44 = vadd.f32 %v698_v35, %v2649_v43  ;;  %v2088_v43 = vld [vmem:[%s2407_s10 + $0x6c] sm:$0xf] }
 0x128   : >> { %v2697_v55 = vadd.f32 %v759_v10, %v706_v17 }
 0x129   : >> { %1094 = vperm.xlu2 %2217, %v2085_v53   ;;  %1089 = vperm.xlu1 %2216, %v2084_v26  }
 0x12a   : >> { %1084 = vperm.xlu0 %2215, %v2457_v54  }
 0x12b   : >> { %v805_v59 = vpop.permute.xlu2 %804  ;;  %v730_v14 = vpop.permute.xlu1 %729 }
 0x12c   : >> { %v755_v63 = vmul.f32 %v2671_v20, %v730_v14  ;;  %v725_v27 = vpop.permute.xlu0 %724  ;;  %v818_v46 = vmul.f32 %v2699_v47, %v805_v59  ;;  %v2099_v59 = vld [vmem:[%s2407_s10 + $0x6d] sm:$0xff] }
 0x12d   : >> { %v754_v29 = vmul.f32 %v2671_v20, %v725_v27 }
 0x12e   : >> { %v762_v51 = vadd.f32 %v755_v63, %v702_v18  ;;  %v2096_v18 = vld [vmem:[%s2407_s10 + $0x55] sm:$0xff]  ;;  %v2098_v63 = vld [vmem:[%s2407_s10 + $0x65] sm:$0xff] }
 0x12f   : >> { %v761_v5 = vadd.f32 %v754_v29, %v2660_v60 }
 0x130   : >> { %v2709_v49 = vadd.f32 %v815_v50, %v762_v51 }
 0x131   : >> { %1109 = vperm.xlu2 %2217, %v2088_v43   ;;  %1104 = vperm.xlu1 %2216, %v2087_v57  }
 0x132   : >> { %1099 = vperm.xlu0 %2215, %v2086_v52  }
 0x133   : >> { %v845_v54 = vpop.permute.xlu2 %844  ;;  %v745_v40 = vpop.permute.xlu1 %744 }
 0x134   : >> { %v758_v6 = vmul.f32 %v2671_v20, %v745_v40  ;;  %v740_v28 = vpop.permute.xlu0 %739  ;;  %v874_v4 = vmul.f32 %v2717_v41, %v845_v54  ;;  %v2101_v40 = vld [vmem:[%s2407_s10 + $0x7d] sm:$0xff] }
 0x135   : >> { %v757_v42 = vmul.f32 %v2671_v20, %v740_v28 }
 0x136   : >> { %v765_v16 = vadd.f32 %v758_v6, %v705_v44 }
 0x137   : >> { %v764_v60 = vadd.f32 %v757_v42, %v2669_v39  ;;  %v2723_v39 = vld [vmem:[%s2407_s10 + $0x7c] sm:$0xff] }
 0x138   : >> { %v2715_v19 = vadd.f32 %v818_v46, %v765_v16 }
 0x139   : >> { %1149 = vperm.xlu2 %2217, %v2087_v57   ;;  %1144 = vperm.xlu1 %2216, %v2086_v52   ;;  %v2103_v52 = vld [vmem:[%s2407_s10 + $0x56] sm:$0xff] }
 0x13a   : >> { %1139 = vperm.xlu0 %2215, %v2085_v53  }
 0x13b   : >> { %v860_v58 = vpop.permute.xlu2 %859  ;;  %v785_v24 = vpop.permute.xlu1 %784 }
 0x13c   : >> { %v814_v21 = vmul.f32 %v2699_v47, %v785_v24  ;;  %v780_v20 = vpop.permute.xlu0 %779  ;;  %v877_v31 = vmul.f32 %v2717_v41, %v860_v58 }
 0x13d   : >> { %v813_v23 = vmul.f32 %v2699_v47, %v780_v20 }
 0x13e   : >> { %v821_v62 = vadd.f32 %v814_v21, %v761_v5  ;;  %v2106_v21 = vld [vmem:[%s2407_s10 + $0x6e] sm:$0xff] }
 0x13f   : >> { %v820_v15 = vadd.f32 %v813_v23, %v2680_v30  ;;  %v2097_v30 = vld [vmem:[%s2407_s10 + $0x5d] sm:$0xff] }
 0x140   : >> { %v2730_v61 = vadd.f32 %v874_v4, %v821_v62  ;;  %v2104_v23 = vld [vmem:[%s2407_s10 + $0x5e] sm:$0xff]  ;;  %v2772_v62 = vld [vmem:[#allocation2 + $0xc] ss:$0 sm:$0xff] }
 0x141   : >> { %1164 = vperm.xlu2 %2217, %v2723_v39   ;;  %1159 = vperm.xlu1 %2216, %v2726_v25  }
 0x142   : >> { %1154 = vperm.xlu0 %2215, %v2092_v2  }
 0x143   : >> { %v900_v34 = vpop.permute.xlu2 %899  ;;  %v800_v32 = vpop.permute.xlu1 %799 }
 0x144   : >> { %v817_v1 = vmul.f32 %v2699_v47, %v800_v32  ;;  %v795_v33 = vpop.permute.xlu0 %794  ;;  %v933_v26 = vmul.f32 %v2743_v45, %v900_v34 }
 0x145   : >> { %v816_v0 = vmul.f32 %v2699_v47, %v795_v33 }
 0x146   : >> { %v824_v36 = vadd.f32 %v817_v1, %v764_v60 }
 0x147   : >> { %v823_v37 = vadd.f32 %v816_v0, %v2688_v38  ;;  %v2100_v38 = vld [vmem:[%s2407_s10 + $0x75] sm:$0xff]  ;;  %v2108_v0 = vld [vmem:[%s2407_s10 + $0x7e] sm:$0xff] }
 0x148   : >> { %v2741_v3 = vadd.f32 %v877_v31, %v824_v36  ;;  %v2107_v36 = vld [vmem:[%s2407_s10 + $0x76] sm:$0xff] }
 0x149   : >> { %1204 = vperm.xlu2 %2217, %v2097_v30   ;;  %1199 = vperm.xlu1 %2216, %v2096_v18  }
 0x14a   : >> { %1169 = vperm.xlu0 %2215, %v2095_v56  }
 0x14b   : >> { %v915_v48 = vpop.permute.xlu2 %914  ;;  %v840_v35 = vpop.permute.xlu1 %839 }
 0x14c   : >> { %v873_v10 = vmul.f32 %v2717_v41, %v840_v35  ;;  %v810_v17 = vpop.permute.xlu0 %809  ;;  %v936_v57 = vmul.f32 %v2743_v45, %v915_v48 }
 0x14d   : >> { %v819_v53 = vmul.f32 %v2699_v47, %v810_v17 }
 0x14e   : >> { %v880_v44 = vadd.f32 %v873_v10, %v820_v15 }
 0x14f   : >> { %v826_v14 = vadd.f32 %v819_v53, %v2697_v55  ;;  %v2102_v55 = vld [vmem:[%s2407_s10 + $0x85] sm:$0xf] }
 0x150   : >> { %v2752_v27 = vadd.f32 %v933_v26, %v880_v44  ;;  %v2112_v53 = vld [vmem:[%s2407_s10 + $0x67] sm:$0xff]  ;;  %v2110_v44 = vld [vmem:[%s2407_s10 + $0x57] sm:$0xff] }
 0x151   : >> { %1219 = vperm.xlu2 %2217, %v2100_v38   ;;  %1214 = vperm.xlu1 %2216, %v2099_v59   ;;  %v2792_v59 = vld [vmem:[#allocation2 + $0xd] ss:$0 sm:$0xff] }
 0x152   : >> { %1209 = vperm.xlu0 %2215, %v2098_v63  }
 0x153   : >> { %v930_v29 = vpop.permute.xlu2 %929  ;;  %v855_v50 = vpop.permute.xlu1 %854 }
 0x154   : >> { %v876_v47 = vmul.f32 %v2717_v41, %v855_v50  ;;  %v850_v51 = vpop.permute.xlu0 %849  ;;  %v939_v58 = vmul.f32 %v2743_v45, %v930_v29 }
 0x155   : >> { %v875_v43 = vmul.f32 %v2717_v41, %v850_v51 }
 0x156   : >> { %v883_v5 = vadd.f32 %v876_v47, %v823_v37 }
 0x157   : >> { %v882_v54 = vadd.f32 %v875_v43, %v2709_v49  ;;  %v2105_v49 = vld [vmem:[%s2407_s10 + $0x66] sm:$0xff]  ;;  %v2114_v43 = vld [vmem:[%s2407_s10 + $0x77] sm:$0xff] }
 0x158   : >> { %v2761_v6 = vadd.f32 %v936_v57, %v883_v5  ;;  %v2113_v5 = vld [vmem:[%s2407_s10 + $0x6f] sm:$0xff] }
 0x159   : >> { %1259 = vperm.xlu2 %2217, %v2103_v52   ;;  %1229 = vperm.xlu1 %2216, %v2102_v55  }
 0x15a   : >> { %1224 = vperm.xlu0 %2215, %v2101_v40  }
 0x15b   : >> { %v970_v28 = vpop.permute.xlu2 %969  ;;  %v870_v42 = vpop.permute.xlu1 %869 }
 0x15c   : >> { %v879_v46 = vmul.f32 %v2717_v41, %v870_v42  ;;  %v865_v16 = vpop.permute.xlu0 %864  ;;  %v995_v1 = vmul.f32 %v2772_v62, %v970_v28 }
 0x15d   : >> { %v878_v60 = vmul.f32 %v2717_v41, %v865_v16 }
 0x15e   : >> { %v886_v24 = vadd.f32 %v879_v46, %v826_v14 }
 0x15f   : >> { %v885_v20 = vadd.f32 %v878_v60, %v2715_v19  ;;  %v2109_v19 = vld [vmem:[%s2407_s10 + $0x86] sm:$0xf] }
 0x160   : >> { %v2770_v4 = vadd.f32 %v939_v58, %v886_v24  ;;  %v2116_v60 = vld [vmem:[%s2407_s10 + $0x87] sm:$0xf]  ;;  %v2812_v24 = vld [vmem:[#allocation2 + $0xe] ss:$0 sm:$0xff] }
 0x161   : >> { %1274 = vperm.xlu2 %2217, %v2106_v21   ;;  %1269 = vperm.xlu1 %2216, %v2105_v49  }
 0x162   : >> { %1264 = vperm.xlu0 %2215, %v2104_v23  }
 0x163   : >> { %v985_v15 = vpop.permute.xlu2 %984  ;;  %v910_v41 = vpop.permute.xlu1 %909 }
 0x164   : >> { %v935_v2 = vmul.f32 %v2743_v45, %v910_v41  ;;  %v905_v34 = vpop.permute.xlu0 %904  ;;  %v998_v10 = vmul.f32 %v2772_v62, %v985_v15 }
 0x165   : >> { %v934_v32 = vmul.f32 %v2743_v45, %v905_v34  ;;  %v2120_v34 = vld [vmem:[%s2407_s10 + $0x70] sm:$0xff] }
 0x166   : >> { %v942_v33 = vadd.f32 %v935_v2, %v882_v54  ;;  %v2121_v2 = vld [vmem:[%s2407_s10 + $0x78] sm:$0xff] }
 0x167   : >> { %v941_v31 = vadd.f32 %v934_v32, %v2730_v61  ;;  %v2111_v61 = vld [vmem:[%s2407_s10 + $0x5f] sm:$0xff] }
 0x168   : >> { %v2781_v30 = vadd.f32 %v995_v1, %v942_v33 }
 0x169   : >> { %1289 = vperm.xlu2 %2217, %v2109_v19   ;;  %1284 = vperm.xlu1 %2216, %v2108_v0  }
 0x16a   : >> { %1279 = vperm.xlu0 %2215, %v2107_v36  }
 0x16b   : >> { %v1025_v18 = vpop.permute.xlu2 %1024  ;;  %v925_v37 = vpop.permute.xlu1 %924 }
 0x16c   : >> { %v938_v56 = vmul.f32 %v2743_v45, %v925_v37  ;;  %v920_v48 = vpop.permute.xlu0 %919  ;;  %v1054_v47 = vmul.f32 %v2792_v59, %v1025_v18  ;;  %v2123_v18 = vld [vmem:[%s2407_s10 + $0x88] sm:$0xf]  ;;  %v2122_v37 = vld [vmem:[%s2407_s10 + $0x80] sm:$0xff] }
 0x16d   : >> { %v937_v35 = vmul.f32 %v2743_v45, %v920_v48 }
 0x16e   : >> { %v945_v17 = vadd.f32 %v938_v56, %v885_v20 }
 0x16f   : >> { %v944_v26 = vadd.f32 %v937_v35, %v2741_v3  ;;  %v2115_v3 = vld [vmem:[%s2407_s10 + $0x7f] sm:$0xff] }
 0x170   : >> { %v2790_v38 = vadd.f32 %v998_v10, %v945_v17 }
 0x171   : >> { %1329 = vperm.xlu2 %2217, %v2112_v53   ;;  %1324 = vperm.xlu1 %2216, %v2111_v61  }
 0x172   : >> { %1319 = vperm.xlu0 %2215, %v2110_v44   ;;  %v2130_v44 = vld [vmem:[%s2407_s10 + $0xa0] sm:$0xf] }
 0x173   : >> { %v1040_v14 = vpop.permute.xlu2 %1039  ;;  %v965_v45 = vpop.permute.xlu1 %964 }
 0x174   : >> { %v994_v63 = vmul.f32 %v2772_v62, %v965_v45  ;;  %v960_v29 = vpop.permute.xlu0 %959  ;;  %v1057_v46 = vmul.f32 %v2792_v59, %v1040_v14 }
 0x175   : >> { %v993_v50 = vmul.f32 %v2772_v62, %v960_v29 }
 0x176   : >> { %v1001_v51 = vadd.f32 %v994_v63, %v941_v31  ;;  %v2839_v63 = vld [vmem:[#allocation2 + $0xf] ss:$0 sm:$0xff] }
 0x177   : >> { %v1000_v57 = vadd.f32 %v993_v50, %v2752_v27 }
 0x178   : >> { %v2801_v52 = vadd.f32 %v1054_v47, %v1001_v51 }
 0x179   : >> { %1344 = vperm.xlu2 %2217, %v2115_v3   ;;  %1339 = vperm.xlu1 %2216, %v2114_v43  }
 0x17a   : >> { %1334 = vperm.xlu0 %2215, %v2113_v5  }
 0x17b   : >> { %v1080_v55 = vpop.permute.xlu2 %1079  ;;  %v980_v54 = vpop.permute.xlu1 %979 }
 0x17c   : >> { %v997_v40 = vmul.f32 %v2772_v62, %v980_v54  ;;  %v975_v28 = vpop.permute.xlu0 %974 }
 0x17d   : >> { %v996_v42 = vmul.f32 %v2772_v62, %v975_v28 }
 0x17e   : >> { %v1004_v16 = vadd.f32 %v997_v40, %v944_v26 }
 0x17f   : >> { %v1003_v27 = vadd.f32 %v996_v42, %v2761_v6  ;;  %v1113_v6 = vmul.f32 %v2812_v24, %v1080_v55  ;;  %v2128_v55 = vld [vmem:[%s2407_s10 + $0x90] sm:$0xff] }
 0x180   : >> { %v2808_v58 = vadd.f32 %v1057_v46, %v1004_v16 }
 0x181   : >> { %1384 = vperm.xlu2 %2217, %v2580_v8   ;;  %1379 = vperm.xlu1 %2216, %v2562_v22   ;;  %v2119_v22 = vld [vmem:[%s2407_s10 + $0x68] sm:$0xff] }
 0x182   : >> { %1349 = vperm.xlu0 %2215, %v2116_v60  }
 0x183   : >> { %v1095_v21 = vpop.permute.xlu2 %1094  ;;  %v1020_v49 = vpop.permute.xlu1 %1019 }
 0x184   : >> { %v1053_v20 = vmul.f32 %v2792_v59, %v1020_v49  ;;  %v990_v23 = vpop.permute.xlu0 %989  ;;  %v1116_v31 = vmul.f32 %v2812_v24, %v1095_v21  ;;  %v2135_v21 = vld [vmem:[%s2407_s10 + $0x91] sm:$0xff] }
 0x185   : >> { %v999_v15 = vmul.f32 %v2772_v62, %v990_v23  ;;  %v2858_v23 = vld [vmem:[#allocation2 + $0x10] ss:$0 sm:$0xff] }
 0x186   : >> { %v1060_v41 = vadd.f32 %v1053_v20, %v1000_v57  ;;  %v2136_v57 = vld [vmem:[%s2407_s10 + $0x99] sm:$0xff] }
 0x187   : >> { %v1006_v8 = vadd.f32 %v999_v15, %v2770_v4 }
 0x188   : >> { %v2821_v32 = vadd.f32 %v1113_v6, %v1060_v41 }
 0x189   : >> { %1399 = vperm.xlu2 %2217, %v2121_v2   ;;  %1394 = vperm.xlu1 %2216, %v2120_v34  }
 0x18a   : >> { %1389 = vperm.xlu0 %2215, %v2119_v22   ;;  %v2144_v22 = vld [vmem:[%s2407_s10 + $0xa2] sm:$0xf] }
 0x18b   : >> { %v1110_v1 = vpop.permute.xlu2 %1109  ;;  %v1035_v33 = vpop.permute.xlu1 %1034 }
 0x18c   : >> { %v1056_v19 = vmul.f32 %v2792_v59, %v1035_v33  ;;  %v1030_v62 = vpop.permute.xlu0 %1029  ;;  %v1119_v61 = vmul.f32 %v2812_v24, %v1110_v1  ;;  %v2143_v33 = vld [vmem:[%s2407_s10 + $0x9a] sm:$0xff] }
 0x18d   : >> { %v1055_v0 = vmul.f32 %v2792_v59, %v1030_v62 }
 0x18e   : >> { %v1063_v36 = vadd.f32 %v1056_v19, %v1003_v27 }
 0x18f   : >> { %v1062_v4 = vadd.f32 %v1055_v0, %v2781_v30  ;;  %v2129_v30 = vld [vmem:[%s2407_s10 + $0x98] sm:$0xff] }
 0x190   : >> { %v2829_v56 = vadd.f32 %v1116_v31, %v1063_v36 }
 0x191   : >> { %1439 = vperm.xlu2 %2217, %v2120_v34   ;;  %1409 = vperm.xlu1 %2216, %v2123_v18  }
 0x192   : >> { %1404 = vperm.xlu0 %2215, %v2122_v37  }
 0x193   : >> { %v1150_v48 = vpop.permute.xlu2 %1149  ;;  %v1050_v35 = vpop.permute.xlu1 %1049 }
 0x194   : >> { %v1059_v10 = vmul.f32 %v2792_v59, %v1050_v35  ;;  %v1045_v17 = vpop.permute.xlu0 %1044  ;;  %v1175_v3 = vmul.f32 %v2839_v63, %v1150_v48  ;;  %v2150_v48 = vld [vmem:[%s2407_s10 + $0x9b] sm:$0xff] }
 0x195   : >> { %v1058_v53 = vmul.f32 %v2792_v59, %v1045_v17 }
 0x196   : >> { %v1066_v26 = vadd.f32 %v1059_v10, %v1006_v8  ;;  %v2134_v10 = vld [vmem:[%s2407_s10 + $0x89] sm:$0xff] }
 0x197   : >> { %v1065_v14 = vadd.f32 %v1058_v53, %v2790_v38  ;;  %v2137_v38 = vld [vmem:[%s2407_s10 + $0xa1] sm:$0xf]  ;;  %v2878_v53 = vld [vmem:[#allocation2 + $0x11] ss:$0 sm:$0xff] }
 0x198   : >> { %v2837_v45 = vadd.f32 %v1119_v61, %v1066_v26 }
 0x199   : >> { %1469 = vperm.xlu2 %2217, %v2130_v44   ;;  %1464 = vperm.xlu1 %2216, %v2129_v30  }
 0x19a   : >> { %1444 = vperm.xlu0 %2215, %v2121_v2  }
 0x19b   : >> { %v1165_v29 = vpop.permute.xlu2 %1164  ;;  %v1090_v50 = vpop.permute.xlu1 %1089 }
 0x19c   : >> { %v1115_v59 = vmul.f32 %v2812_v24, %v1090_v50  ;;  %v1085_v47 = vpop.permute.xlu0 %1084  ;;  %v1178_v27 = vmul.f32 %v2839_v63, %v1165_v29 }
 0x19d   : >> { %v1114_v51 = vmul.f32 %v2812_v24, %v1085_v47 }
 0x19e   : >> { %v1122_v43 = vadd.f32 %v1115_v59, %v1062_v4  ;;  %v2132_v59 = vld [vmem:[%s2407_s10 + $0x79] sm:$0xff] }
 0x19f   : >> { %v1121_v5 = vadd.f32 %v1114_v51, %v2801_v52  ;;  %v2127_v52 = vld [vmem:[%s2407_s10 + $0x88] sm:$0xff]  ;;  %v2151_v51 = vld [vmem:[%s2407_s10 + $0xa3] sm:$0xf] }
 0x1a0   : >> { %v2848_v54 = vadd.f32 %v1175_v3, %v1122_v43 }
 0x1a1   : >> { %1529 = vperm.xlu2 %2217, %v2137_v38   ;;  %1524 = vperm.xlu1 %2216, %v2136_v57  }
 0x1a2   : >> { %1459 = vperm.xlu0 %2215, %v2128_v55  }
 0x1a3   : >> { %v1205_v40 = vpop.permute.xlu2 %1204  ;;  %v1105_v28 = vpop.permute.xlu1 %1104 }
 0x1a4   : >> { %v1118_v42 = vmul.f32 %v2812_v24, %v1105_v28  ;;  %v1100_v46 = vpop.permute.xlu0 %1099  ;;  %v1234_v34 = vmul.f32 %v2858_v23, %v1205_v40  ;;  %v2157_v28 = vld [vmem:[%s2407_s10 + $0x9c] sm:$0xff] }
 0x1a5   : >> { %v1117_v16 = vmul.f32 %v2812_v24, %v1100_v46  ;;  %v2141_v46 = vld [vmem:[%s2407_s10 + $0x8a] sm:$0xff] }
 0x1a6   : >> { %v1125_v60 = vadd.f32 %v1118_v42, %v1065_v14 }
 0x1a7   : >> { %v1124_v49 = vadd.f32 %v1117_v16, %v2808_v58  ;;  %v2133_v58 = vld [vmem:[%s2407_s10 + $0x81] sm:$0xff] }
 0x1a8   : >> { %v2856_v20 = vadd.f32 %v1178_v27, %v1125_v60 }
 0x1a9   : >> { %1519 = vperm.xlu2 %2217, %v2135_v21   ;;  %1454 = vperm.xlu1 %2216, %v2127_v52  }
 0x1aa   : >> { %1449 = vperm.xlu0 %2215, %v2122_v37  }
 0x1ab   : >> { %v1220_v15 = vpop.permute.xlu2 %1219  ;;  %v1145_v6 = vpop.permute.xlu1 %1144 }
 0x1ac   : >> { %v1174_v24 = vmul.f32 %v2839_v63, %v1145_v6  ;;  %v1140_v41 = vpop.permute.xlu0 %1139  ;;  %v1237_v4 = vmul.f32 %v2858_v23, %v1220_v15 }
 0x1ad   : >> { %v1173_v2 = vmul.f32 %v2839_v63, %v1140_v41 }
 0x1ae   : >> { %v1181_v8 = vadd.f32 %v1174_v24, %v1121_v5  ;;  %v2139_v24 = vld [vmem:[%s2407_s10 + $0x7a] sm:$0xff] }
 0x1af   : >> { %v1180_v1 = vadd.f32 %v1173_v2, %v2821_v32  ;;  %v2142_v32 = vld [vmem:[%s2407_s10 + $0x92] sm:$0xff]  ;;  %v2158_v2 = vld [vmem:[%s2407_s10 + $0xa4] sm:$0xf] }
 0x1b0   : >> { %v2867_v19 = vadd.f32 %v1234_v34, %v1181_v8  ;;  %v2236_v8 = vld [vmem:[#allocation2 + $0x12] ss:$0 sm:$0xff] }
 0x1b1   : >> { %1509 = vperm.xlu2 %2217, %v2133_v58   ;;  %1589 = vperm.xlu1 %2216, %v2144_v22  }
 0x1b2   : >> { %1584 = vperm.xlu0 %2215, %v2143_v33  }
 0x1b3   : >> { %v1260_v62 = vpop.permute.xlu2 %1259  ;;  %v1160_v0 = vpop.permute.xlu1 %1159 }
 0x1b4   : >> { %v1177_v31 = vmul.f32 %v2839_v63, %v1160_v0  ;;  %v1155_v36 = vpop.permute.xlu0 %1154  ;;  %v1293_v29 = vmul.f32 %v2878_v53, %v1260_v62 }
 0x1b5   : >> { %v1176_v18 = vmul.f32 %v2839_v63, %v1155_v36 }
 0x1b6   : >> { %v1184_v37 = vadd.f32 %v1177_v31, %v1124_v49  ;;  %v2156_v31 = vld [vmem:[%s2407_s10 + $0x94] sm:$0xff] }
 0x1b7   : >> { %v1183_v35 = vadd.f32 %v1176_v18, %v2829_v56  ;;  %v2140_v56 = vld [vmem:[%s2407_s10 + $0x82] sm:$0xff] }
 0x1b8   : >> { %v2876_v17 = vadd.f32 %v1237_v4, %v1184_v37  ;;  %v2147_v18 = vld [vmem:[%s2407_s10 + $0x83] sm:$0xff] }
 0x1b9   : >> { %1644 = vperm.xlu2 %2217, %v2150_v48   ;;  %1579 = vperm.xlu1 %2216, %v2142_v32  }
 0x1ba   : >> { %1514 = vperm.xlu0 %2215, %v2134_v10  }
 0x1bb   : >> { %v1275_v61 = vpop.permute.xlu2 %1274  ;;  %v1200_v26 = vpop.permute.xlu1 %1199 }
 0x1bc   : >> { %v1233_v44 = vmul.f32 %v2858_v23, %v1200_v26  ;;  %v1170_v30 = vpop.permute.xlu0 %1169  ;;  %v1296_v55 = vmul.f32 %v2878_v53, %v1275_v61 }
 0x1bd   : >> { %v1179_v14 = vmul.f32 %v2839_v63, %v1170_v30  ;;  %v2146_v30 = vld [vmem:[%s2407_s10 + $0x7b] sm:$0xff] }
 0x1be   : >> { %v1240_v50 = vadd.f32 %v1233_v44, %v1180_v1  ;;  %v2154_v44 = vld [vmem:[%s2407_s10 + $0x84] sm:$0xff] }
 0x1bf   : >> { %v1186_v47 = vadd.f32 %v1179_v14, %v2837_v45  ;;  %v2149_v45 = vld [vmem:[%s2407_s10 + $0x93] sm:$0xff] }
 0x1c0   : >> { %v2887_v3 = vadd.f32 %v1293_v29, %v1240_v50  ;;  %v2138_v14 = vld [vmem:[%s2407_s10 + $0x72] sm:$0xff] }
 0x1c1   : >> { %1569 = vperm.xlu2 %2217, %v2140_v56   ;;  %1504 = vperm.xlu1 %2216, %v2132_v59   ;;  %v2921_v50 = vld [vmem:[#allocation2 + $0x13] ss:$0 sm:$0xff] }
 0x1c2   : >> { %1649 = vperm.xlu0 %2215, %v2151_v51  }
 0x1c3   : >> { %v1290_v43 = vpop.permute.xlu2 %1289  ;;  %v1215_v38 = vpop.permute.xlu1 %1214 }
 0x1c4   : >> { %v1236_v63 = vmul.f32 %v2858_v23, %v1215_v38  ;;  %v1210_v57 = vpop.permute.xlu0 %1209  ;;  %v1299_v15 = vmul.f32 %v2878_v53, %v1290_v43 }
 0x1c5   : >> { %v1235_v5 = vmul.f32 %v2858_v23, %v1210_v57  ;;  %v2155_v57 = vld [vmem:[%s2407_s10 + $0x8c] sm:$0xff] }
 0x1c6   : >> { %v1243_v40 = vadd.f32 %v1236_v63, %v1183_v35  ;;  %v2145_v63 = vld [vmem:[%s2407_s10 + $0x73] sm:$0xff] }
 0x1c7   : >> { %v1242_v42 = vadd.f32 %v1235_v5, %v2848_v54  ;;  %v2131_v54 = vld [vmem:[%s2407_s10 + $0x71] sm:$0xff] }
 0x1c8   : >> { %v2896_v16 = vadd.f32 %v1296_v55, %v1243_v40 }
 0x1c9   : >> { %1704 = vperm.xlu2 %2217, %v2157_v28   ;;  %1639 = vperm.xlu1 %2216, %v2149_v45  }
 0x1ca   : >> { %1574 = vperm.xlu0 %2215, %v2141_v46  }
 0x1cb   : >> { %v1330_v27 = vpop.permute.xlu2 %1329  ;;  %v1230_v60 = vpop.permute.xlu1 %1229 }
 0x1cc   : >> { %v1239_v21 = vmul.f32 %v2858_v23, %v1230_v60  ;;  %v1225_v52 = vpop.permute.xlu0 %1224  ;;  %v1355_v62 = vmul.f32 %v2236_v8, %v1330_v27 }
 0x1cd   : >> { %v1238_v49 = vmul.f32 %v2858_v23, %v1225_v52  ;;  %v2930_v52 = vld [vmem:[#allocation2 + $0x14] ss:$0 sm:$0xff] }
 0x1ce   : >> { %v1246_v6 = vadd.f32 %v1239_v21, %v1186_v47 }
 0x1cf   : >> { %v1245_v41 = vadd.f32 %v1238_v49, %v2856_v20  ;;  %v2148_v20 = vld [vmem:[%s2407_s10 + $0x8b] sm:$0xff] }
 0x1d0   : >> { %v2905_v34 = vadd.f32 %v1299_v15, %v1246_v6 }
 0x1d1   : >> { %1564 = vperm.xlu2 %2217, %v2139_v24   ;;  %1499 = vperm.xlu1 %2216, %v2131_v54  }
 0x1d2   : >> { %1709 = vperm.xlu0 %2215, %v2158_v2  }
 0x1d3   : >> { %v1345_v58 = vpop.permute.xlu2 %1344  ;;  %v1270_v22 = vpop.permute.xlu1 %1269 }
 0x1d4   : >> { %v1295_v23 = vmul.f32 %v2878_v53, %v1270_v22  ;;  %v1265_v1 = vpop.permute.xlu0 %1264  ;;  %v1358_v61 = vmul.f32 %v2236_v8, %v1345_v58 }
 0x1d5   : >> { %v1294_v33 = vmul.f32 %v2878_v53, %v1265_v1 }
 0x1d6   : >> { %v1302_v0 = vadd.f32 %v1295_v23, %v1242_v42 }
 0x1d7   : >> { %v1301_v36 = vadd.f32 %v1294_v33, %v2867_v19 }
 0x1d8   : >> { %v1362_v4 = vadd.f32 %v1355_v62, %v1302_v0 }
 0x1d9   : >> { %1699 = vperm.xlu2 %2217, %v2156_v31   ;;  %1634 = vperm.xlu1 %2216, %v2148_v20  }
 0x1da   : >> { %1629 = vperm.xlu0 %2215, %v2147_v18  }
 0x1db   : >> { %v1385_v37 = vpop.permute.xlu2 %1384  ;;  %v1285_v48 = vpop.permute.xlu1 %1284 }
 0x1dc   : >> { %v1298_v32 = vmul.f32 %v2878_v53, %v1285_v48  ;;  %v1280_v35 = vpop.permute.xlu0 %1279  ;;  %v1414_v43 = vmul.f32 %v2921_v50, %v1385_v37 }
 0x1dd   : >> { %v1297_v10 = vmul.f32 %v2878_v53, %v1280_v35 }
 0x1de   : >> { %v1305_v26 = vadd.f32 %v1298_v32, %v1245_v41 }
 0x1df   : >> { %v1304_v19 = vadd.f32 %v1297_v10, %v2876_v17 }
 0x1e0   : >> { %v2919_v29 = vadd.f32 %v1358_v61, %v1305_v26 }
 0x1e1   : >> { %1689 = vperm.xlu2 %2217, %v2154_v44   ;;  %1624 = vperm.xlu1 %2216, %v2146_v30  }
 0x1e2   : >> { %1559 = vperm.xlu0 %2215, %v2138_v14   ;;  %v2954_v14 = vld [vmem:[#allocation2 + $0x15] ss:$0 sm:$0xff] }
 0x1e3   : >> { %v1400_v56 = vpop.permute.xlu2 %1399  ;;  %v1325_v59 = vpop.permute.xlu1 %1324 }
 0x1e4   : >> { %v1354_v47 = vmul.f32 %v2236_v8, %v1325_v59  ;;  %v1320_v53 = vpop.permute.xlu0 %1319  ;;  %v1417_v46 = vmul.f32 %v2921_v50, %v1400_v56 }
 0x1e5   : >> { %v1353_v51 = vmul.f32 %v2236_v8, %v1320_v53 }
 0x1e6   : >> { %v1361_v38 = vadd.f32 %v1354_v47, %v1301_v36 }
 0x1e7   : >> { %v1360_v17 = vadd.f32 %v1353_v51, %v2887_v3  ;;  %v2961_v51 = vld [vmem:[#allocation2 + $0x16] ss:$0 sm:$0xff] }
 0x1e8   : >> { %v1421_v5 = vadd.f32 %v1414_v43, %v1361_v38 }
 0x1e9   : >> { %1684 = vperm.xlu2 %2217, %v2723_v39   ;;  %1619 = vperm.xlu1 %2216, %v2145_v63  }
 0x1ea   : >> { %1694 = vperm.xlu0 %2215, %v2155_v57  }
 0x1eb   : >> { %v1440_v55 = vpop.permute.xlu2 %1439  ;;  %v1340_v40 = vpop.permute.xlu1 %1339 }
 0x1ec   : >> { %v1357_v28 = vmul.f32 %v2236_v8, %v1340_v40  ;;  %v1335_v45 = vpop.permute.xlu0 %1334  ;;  %v1473_v24 = vmul.f32 %v2930_v52, %v1440_v55 }
 0x1ed   : >> { %v1356_v42 = vmul.f32 %v2236_v8, %v1335_v45 }
 0x1ee   : >> { %v1364_v27 = vadd.f32 %v1357_v28, %v1304_v19 }
 0x1ef   : >> { %v1363_v60 = vadd.f32 %v1356_v42, %v2896_v16 }
 0x1f0   : >> { %v1424_v21 = vadd.f32 %v1417_v46, %v1364_v27  ;;  %v2971_v46 = vld [vmem:[#allocation2 + $0x18] ss:$0 sm:$0xff] }
 0x1f2   : >> { %1679 = vperm.xlu0 %2215, %v2726_v25  }
 0x1f3   : >> { %v1470_v3 = vpop.permute.xlu2 %1469  ;;  %v1380_v49 = vpop.permute.xlu1 %1379 }
 0x1f4   : >> { %v1413_v39 = vmul.f32 %v2921_v50, %v1380_v49  ;;  %v1350_v15 = vpop.permute.xlu0 %1349 }
 0x1f5   : >> { %v1359_v6 = vmul.f32 %v2236_v8, %v1350_v15 }
 0x1f6   : >> { %v1420_v54 = vadd.f32 %v1413_v39, %v1360_v17  ;;  %v2966_v17 = vld [vmem:[#allocation2 + $0x17] ss:$0 sm:$0xff] }
 0x1f7   : >> { %v1366_v41 = vadd.f32 %v1359_v6, %v2905_v34 }
 0x1f8   : >> { %v2936_v2 = vadd.f32 %v1473_v24, %v1420_v54  ;;  %v1479_v24 = vmul.f32 %v2930_v52, %v1470_v3 }
 0x1fb   : >> { %v1530_v58 = vpop.permute.xlu2 %1529  ;;  %v1395_v16 = vpop.permute.xlu1 %1394 }
 0x1fc   : >> { %v1416_v22 = vmul.f32 %v2921_v50, %v1395_v16  ;;  %v1390_v23 = vpop.permute.xlu0 %1389 }
 0x1fd   : >> { %v1415_v25 = vmul.f32 %v2921_v50, %v1390_v23 }
 0x1fe   : >> { %v2940_v1 = vadd.f32 %v1416_v22, %v1363_v60 }
 0x1ff   : >> { %v2942_v33 = vadd.f32 %v1415_v25, %v1362_v4 }
 0x203   : >> { %v1520_v62 = vpop.permute.xlu2 %1519  ;;  %v1410_v8 = vpop.permute.xlu1 %1409 }
 0x204   : >> { %v1405_v0 = vpop.permute.xlu0 %1404  ;;  %v1419_v45 = vmul.f32 %v2921_v50, %v1410_v8  ;;  %v1537_v27 = vmul.f32 %v2954_v14, %v1520_v62 }
 0x205   : >> { %v1418_v30 = vmul.f32 %v2921_v50, %v1405_v0  ;;  %v2978_v50 = vperm.slane %v2385_v7, 0 }
 0x206   : >> { %v1426_v39 = vadd.f32 %v1419_v45, %v1366_v41  ;;  %v1539_v41 = vmul.f32 %v2954_v14, %v1530_v58 }
 0x207   : >> { %v1425_v47 = vadd.f32 %v1418_v30, %v2919_v29 }
 0x208   : >> { %v1486_v62 = vadd.f32 %v1479_v24, %v1426_v39 }
 0x20b   : >> { %v2944_v31 = vpop.permute.xlu2 %1509  ;;  %v1465_v20 = vpop.permute.xlu1 %1464 }
 0x20c   : >> { %v1445_v34 = vpop.permute.xlu0 %1444  ;;  %v1478_v56 = vmul.f32 %v2930_v52, %v1465_v20 }
 0x20d   : >> { %v1474_v36 = vmul.f32 %v2930_v52, %v1445_v34 }
 0x20e   : >> { %v1485_v43 = vadd.f32 %v1478_v56, %v1425_v47 }
 0x20f   : >> { %v2947_v18 = vadd.f32 %v1474_v36, %v1421_v5 }
 0x213   : >> { %v1645_v37 = vpop.permute.xlu2 %1644  ;;  %v1525_v48 = vpop.permute.xlu1 %1524 }
 0x214   : >> { %v1460_v32 = vpop.permute.xlu0 %1459  ;;  %v1538_v53 = vmul.f32 %v2954_v14, %v1525_v48  ;;  %v1658_v29 = vmul.f32 %v2966_v17, %v1645_v37  ;;  %v1546_v37 = vadd.f32 %v1539_v41, %v1486_v62 }
 0x215   : >> { %v1477_v5 = vmul.f32 %v2930_v52, %v1460_v32 }
 0x216   : >> { %v1545_v57 = vadd.f32 %v1538_v53, %v1485_v43  ;;  %v1535_v53 = vmul.f32 %v2954_v14, %v2944_v31 }
 0x217   : >> { %v1484_v42 = vadd.f32 %v1477_v5, %v1424_v21 }
 0x219   : >> { %v1544_v6 = vadd.f32 %v1537_v27, %v1484_v42 }
 0x21b   : >> { %v2949_v35 = vpop.permute.xlu1 %1454  ;;  %v2951_v61 = vpop.permute.xlu2 %1569 }
 0x21c   : >> { %v1450_v10 = vpop.permute.xlu0 %1449 }
 0x21d   : >> { %v1475_v36 = vmul.f32 %v2930_v52, %v1450_v10 }
 0x223   : >> { %v1590_v4 = vpop.permute.xlu1 %1589  ;;  %v1705_v44 = vpop.permute.xlu2 %1704 }
 0x224   : >> { %v1585_v26 = vpop.permute.xlu0 %1584  ;;  %v1718_v15 = vmul.f32 %v2971_v46, %v1705_v44  ;;  %v1599_v20 = vmul.f32 %v2961_v51, %v1590_v4  ;;  %v1482_v4 = vadd.f32 %v1475_v36, %v2942_v33 }
 0x225   : >> { %v1598_v38 = vmul.f32 %v2961_v51, %v1585_v26 }
 0x226   : >> { %v1606_v26 = vadd.f32 %v1599_v20, %v1546_v37 }
 0x227   : >> { %v1605_v40 = vadd.f32 %v1598_v38, %v1545_v57  ;;  %v1542_v38 = vadd.f32 %v1535_v53, %v1482_v4 }
 0x229   : >> { %v1665_v60 = vadd.f32 %v1658_v29, %v1605_v40  ;;  %v1595_v40 = vmul.f32 %v2961_v51, %v2951_v61  ;;  %v1476_v61 = vmul.f32 %v2930_v52, %v2949_v35 }
 0x22b   : >> { %v1580_v19 = vpop.permute.xlu1 %1579  ;;  %v2964_v63 = vpop.permute.xlu2 %1564  ;;  %v1725_v22 = vadd.f32 %v1718_v15, %v1665_v60  ;;  %v1602_v42 = vadd.f32 %v1595_v40, %v1542_v38 }
 0x22c   : >> { %v2957_v59 = vpop.permute.xlu0 %1514  ;;  %v1597_v49 = vmul.f32 %v2961_v51, %v1580_v19 }
 0x22d   : >> { %v1735_v3 = vadd.f32 %v2978_v50, %v1725_v22 }
 0x22e   : >> { %v1604_v21 = vadd.f32 %v1597_v49, %v1544_v6  ;;  %v1594_v6 = vmul.f32 %v2961_v51, %v2964_v63  ;;  %v1483_v63 = vadd.f32 %v1476_v61, %v2940_v1 }
 0x22f   : >> { %v1745_v30 = vrot.slane %v1735_v3, 4 }
 0x233   : >> { %v1505_v55 = vpop.permute.xlu1 %1504  ;;  %v1700_v54 = vpop.permute.xlu2 %1699 }
 0x234   : >> { %v1650_v28 = vpop.permute.xlu0 %1649  ;;  %v1717_v8 = vmul.f32 %v2971_v46, %v1700_v54  ;;  %v1534_v45 = vmul.f32 %v2954_v14, %v1505_v55 }
 0x235   : >> { %v1659_v48 = vmul.f32 %v2966_v17, %v1650_v28 }
 0x236   : >> { %v1541_v39 = vadd.f32 %v1534_v45, %v2947_v18 }
 0x237   : >> { %v1666_v56 = vadd.f32 %v1659_v48, %v1606_v26 }
 0x23b   : >> { %v1640_v16 = vpop.permute.xlu1 %1639  ;;  %v1690_v57 = vpop.permute.xlu2 %1689 }
 0x23c   : >> { %v1657_v23 = vmul.f32 %v2966_v17, %v1640_v16  ;;  %v1575_v25 = vpop.permute.xlu0 %1574  ;;  %v1715_v31 = vmul.f32 %v2971_v46, %v1690_v57  ;;  %v1601_v16 = vadd.f32 %v1594_v6, %v1541_v39 }
 0x23e   : >> { %v1664_v0 = vadd.f32 %v1657_v23, %v1604_v21  ;;  %v1536_v23 = vmul.f32 %v2954_v14, %v2957_v59 }
 0x240   : >> { %v1724_v34 = vadd.f32 %v1717_v8, %v1664_v0  ;;  %v1596_v0 = vmul.f32 %v2961_v51, %v1575_v25  ;;  %v1543_v35 = vadd.f32 %v1536_v23, %v1483_v63 }
 0x242   : >> { %v2988_v32 = vadd.f32 %v2978_v50, %v1724_v34  ;;  %v1603_v3 = vadd.f32 %v1596_v0, %v1543_v35 }
 0x243   : >> { %v1500_v44 = vpop.permute.xlu1 %1499  ;;  %v1685_v24 = vpop.permute.xlu2 %1684 }
 0x244   : >> { %v1743_v19 = vrot.slane %v2988_v32, 4  ;;  %v1710_v58 = vpop.permute.xlu0 %1709  ;;  %v1714_v18 = vmul.f32 %v2971_v46, %v1685_v24  ;;  %v1533_v36 = vmul.f32 %v2954_v14, %v1500_v44 }
 0x245   : >> { %v1719_v47 = vmul.f32 %v2971_v46, %v1710_v58 }
 0x246   : >> { %v1746_v10 = vsel %vm1741_vm4, %v1743_v19, %v1745_v30 }
 0x247   : >> { %v1726_v43 = vadd.f32 %v1719_v47, %v1666_v56 }
 0x249   : >> { %v1736_v5 = vadd.f32 %v2978_v50, %v1726_v43 }
 0x24b   : >> { %v1747_v28 = vrot.slane %v1736_v5, 4  ;;  %v1635_v33 = vpop.permute.xlu1 %1634 }
 0x24c   : >> { %v1630_v29 = vpop.permute.xlu0 %1629  ;;  %v1656_v41 = vmul.f32 %v2966_v17, %v1635_v33 }
 0x24d   : >> { %v1655_v27 = vmul.f32 %v2966_v17, %v1630_v29  ;;  %v1748_v60 = vsel %vm1741_vm4, %v1745_v30, %v1747_v28  ;;  %v1540_v30 = vadd.f32 %v1533_v36, %v2936_v2 }
 0x24e   : >> { %v1663_v37 = vadd.f32 %v1656_v41, %v1603_v3 }
 0x24f   : >> { %v1662_v49 = vadd.f32 %v1655_v27, %v1602_v42 }
 0x251   : >> { %v1722_v15 = vadd.f32 %v1715_v31, %v1662_v49 }
 0x253   : >> { %v1732_v55 = vadd.f32 %v2978_v50, %v1722_v15  ;;  %v1625_v54 = vpop.permute.xlu1 %1624 }
 0x254   : >> { %v1654_v22 = vmul.f32 %v2966_v17, %v1625_v54  ;;  %v1560_v21 = vpop.permute.xlu0 %1559 }
 0x255   : >> { %v1754_v62 = vmax.f32 %v1732_v55, %v1748_v60  ;;  %v1593_v25 = vmul.f32 %v2961_v51, %v1560_v21 }
 0x256   : >> { %v1661_v8 = vadd.f32 %v1654_v22, %v1601_v16 }
 0x257   : >> { %1775 = vmatpush.msra.mxu0 %v1754_v62  ;;  %2166 = vmatpush.msra.mxu2 %v1754_v62  ;;  %v1600_v56 = vadd.f32 %v1593_v25, %v1540_v30 }
 0x258   : >> { %v1721_v52 = vadd.f32 %v1714_v18, %v1661_v8  ;;  %1804 = vmatpush.msra.mxu1 %v1754_v62  ;;  %2169 = vmatpush.msra.mxu3 %v1754_v62 }
 0x25a   : >> { %v1731_v20 = vadd.f32 %v2978_v50, %v1721_v52 }
 0x25b   : >> { %v1620_v48 = vpop.permute.xlu1 %1619 }
 0x25c   : >> { %v1695_v59 = vpop.permute.xlu0 %1694  ;;  %v1753_v34 = vmax.f32 %v1731_v20, %v1746_v10  ;;  %v1653_v58 = vmul.f32 %v2966_v17, %v1620_v48 }
 0x25d   : >> { %v1716_v1 = vmul.f32 %v2971_v46, %v1695_v59 }
 0x25e   : >> { %1776 = vmatpush.msra.mxu0 %v1753_v34  ;;  %2167 = vmatpush.msra.mxu2 %v1753_v34  ;;  %v1660_v44 = vadd.f32 %v1653_v58, %v1600_v56 }
 0x25f   : >> { %v1723_v26 = vadd.f32 %v1716_v1, %v1663_v37  ;;  %1805 = vmatpush.msra.mxu1 %v1753_v34  ;;  %2170 = vmatpush.msra.mxu3 %v1753_v34 }
 0x261   : >> { %v1733_v4 = vadd.f32 %v2978_v50, %v1723_v26 }
 0x263   : >> { %v1742_v47 = vrot.slane %v1733_v4, 4 }
 0x264   : >> { %v1680_v14 = vpop.permute.xlu0 %1679 }
 0x265   : >> { %v1744_v10 = vsel %vm1741_vm4, %v1742_v47, %v1743_v19  ;;  %v1713_v51 = vmul.f32 %v2971_v46, %v1680_v14 }
 0x267   : >> { %v1720_v53 = vadd.f32 %v1713_v51, %v1660_v44 }
 0x269   : >> { %v1730_v43 = vadd.f32 %v2978_v50, %v1720_v53 }
 0x26b   : >> { %v1752_v2 = vmax.f32 %v1730_v43, %v1744_v10 }
 0x26d   : >> { %1777 = vmatpush.msra.mxu0 %v1752_v2  ;;  %2168 = vmatpush.msra.mxu2 %v1752_v2 }
 0x26e   : >> { %1806 = vmatpush.msra.mxu1 %v1752_v2  ;;  %2171 = vmatpush.msra.mxu3 %v1752_v2 }
 0x26f   : >> { %2160 = vmatmul.msk.f32.vlgmr.msra.gmra.mxu2 %vm1755_vm5, %v2394_v11  ;;  %2162 = vmatmul.msk.f32.vlgmr.msra.gmra.mxu3 %vm1755_vm5, %v2398_v13 }
 0x270   : >> { %2159 = vmatmul.msk.f32.vlgmr.msra.gmra.mxu0 %vm1755_vm5, %v2392_v9  ;;  %2161 = vmatmul.msk.f32.vlgmr.msra.gmra.mxu1 %vm1755_vm5, %v2396_v12 }
 0x2ed   : >> { %v1779_v17 = vpop.f32.mrf.mxu0  ;;  %v1808_v46 = vpop.f32.mrf.mxu1 }
 0x2ee   : >> { %v1814_v32 = vmax.f32 %v1779_v17, %v1808_v46 }
 0x2f0   : >> { %v1816_v50 = vmax.f32 %v1814_v32, 0.0 }
 0x2f2   : >> { %v1782_v19 = vpop.f32.mrf.mxu2  ;;  %1820 = vst [vmem:[%s1819_s13] sm:$0xff] %v1816_v50  ;;  %v1811_v38 = vpop.f32.mrf.mxu3 }
 0x2f3   : >> { %v1815_v57 = vmax.f32 %v1782_v19, %v1811_v38  ;;  %225 = sbr.rel (!%p223_p7) target bundleno = 29 (0x1d), region = 104 }
 0x2f5   : >> { %v1817_v5 = vmax.f32 %v1815_v57, 0.0 }
 0x2f7   : >> { %1821 = vst [vmem:[%s1819_s13 + $0x8] sm:$0xf] %v1817_v5 }
 0x2f8 PF: > { %s15_s12 = sadd.s32 1, %s2321_s12  }
 0x2f9   : > { %p12_p8 = scmp.ge.s32.totalorder %s15_s12, 4  }
 0x2fb   :  { %14 = sbr.rel (!%p12_p8) target bundleno = 2 (0x2), region = 115 }
 0x300   :  { %1843 = vsyncpa [#allocation3], 1 }
 0x301   :  { %1845 = vsyncpa [#allocation3 + $0x1], 1 }
 0x302   :  { %1846 = vsyncpa [#allocation5], 1 }

// kernel: net_forward.4
= control target key start
LH: loop header
LB: loop body
LE: loop exit
PB: predicated region body
PF: predicated region fallthrough
CT: control target
= control target key end

     0   :  { %8 = vsyncpa [#allocation3], 0  ;;  %s2100_s0 = inlined_call_operand.vmem [shape: f32[2,144,128], index: 0, kind: input, shape index: {}]   ;;  %s2101_s1 = inlined_call_operand.hbm [shape: f32[3200,128], index: 1, kind: input, shape index: {}]   ;;  %s2102_s2 = inlined_call_operand.hbm [shape: f32[1,128], index: 2, kind: input, shape index: {}]   ;;  %s2103_s3 = inlined_call_operand.vmem [shape: f32[2,4,4,128], index: 3, kind: output, shape index: {}]  }
   0x1   :  { %9 = vsyncpa [#allocation5], 0  ;;  %s1944_s12 = smov 0  }
   0x2 LB: > { %s125_s15 = sshll.u32 %s2101_s1, 4  ;;  %s1688_s16 = sadd.s32 4294967295, %s1913_s12   ;;  %s1913_s12 = sphi %s1944_s12, %s15_s12   ;;  %s126_s15 = int_to_ptr.hbm [resolvable:$true] %s125_s15 }
   0x3   : > { %p1690_p0 = scmp.ge.s32.totalorder %s1913_s12, 1  ;;  %p114_p1 = scmp.lt.s32.totalorder %s1913_s12, 3 }
   0x4   : > { %p1810_p2 = scmp.eq.s32.totalorder %s1688_s16, 0  ;;  %s1919_s18 = smov [#allocation2]  }
   0x5   : > { %p1955_p3 = pnand %p1690_p0, %p114_p1  ;;  %s127_s19 = sshll.u32 %s1919_s18, 4  ;;  %s128_s19 = int_to_ptr.vmem [resolvable:$true] %s127_s19 }
   0x6   : > { %s140_s22 = sshll.u32 %s2102_s2, 4  ;;  %s1920_s23 = smov [#allocation4]   ;;  %s141_s22 = int_to_ptr.hbm [resolvable:$true] %s140_s22 }
   0x7   : > { %p1803_p4 = pneg %p1955_p3  ;;  %s142_s24 = sshll.u32 %s1920_s23, 4  ;;  %s143_s24 = int_to_ptr.vmem [resolvable:$true] %s142_s24 }
   0x8   : > { %s1921_s25 = smov 128   ;;  %s1922_s26 = smov 8  }
   0x9   : > { %p1804_p5 = pnand %p1810_p2, %p1803_p4  ;;  %163 = sbr.rel (%p1955_p3) target bundleno = 570 (0x23a), region = 32 }
   0xb   : > { %1806 = dma.hbm_to_vmem [thread:$0]  (!%p1804_p5), %s126_s15, 51200, %s128_s19, [#allocation3], %s1921_s25, %s1921_s25, %s1922_s26  }
   0xc   : > { %1809 = dma.hbm_to_vmem [thread:$0]  (!%p1804_p5), %s141_s22, 16, %s143_s24, [#allocation5]  }
   0xe   : > { %1904 = dma.done.wait (%p1810_p2), [#allocation3], 51200  }
   0xf   : > { %1906 = vsyncadd (%p1810_p2), [#allocation3], 4294916096 }
  0x10   : > { %1908 = dma.done.wait (%p1810_p2), [#allocation5], 16  }
  0x11   : > { %1910 = vsyncadd (%p1810_p2), [#allocation5], 4294967280  ;;  %p193_p6 = scmp.lt.s32.totalorder %s1688_s16, 1  ;;  %v204_v0 = vlaneseq  ;;  %v1981_v5 = vld [vmem:[#allocation4] sm:$0x1]  ;;  %v1923_v6 = vmov 0.0  }
  0x12   : > { %s1987_s8 = smov 0  }
  0x13   : > { %s2106_s16 = smov (!%p193_p6, %s1688_s16), 1  ;;  %v205_v1 = vshrl.u32 %v204_v0, 7  ;;  %v207_v2 = vand.u32 127, %v204_v0 }
  0x14   : > { %s1794_s27 = smul.u32 144, %s2106_s16  ;;  %s1777_s28 = sshll.u32 %s2106_s16, 4 }
  0x15   : > { %v208_v3 = vmul.u32 2, %v205_v1  ;;  %s1974_s4 = scalar_lea.vmem %s2103_s3, %s1777_s28 }
  0x16   : > { %s1979_s7 = scalar_lea.vmem %s2100_s0, %s1794_s27 }
  0x17   : > { %vm209_vm0 = vcmp.eq.s32.totalorder %v207_v2, %v208_v3  ;;  %v211_v4 = vadd.s32 1, %v208_v3 }
  0x18   : > { %v1983_v7 = vsel %vm209_vm0, 1.0, %v1923_v6 }
  0x19   : > { %vm212_vm1 = vcmp.eq.s32.totalorder %v207_v2, %v211_v4 }
  0x1a   : > { %v1985_v8 = vsel %vm212_vm1, 1.0, %v1923_v6 }
  0x1b LB: >> { %v261_v9 = vld [vmem:[#allocation2 + $0xf8] sm:$0xff]  ;;  %v260_v12 = vld [vmem:[#allocation2 + $0xf0] sm:$0xff]  ;;  %v259_v16 = vld [vmem:[#allocation2 + $0xe8] sm:$0xff]  ;;  %s220_s9 = smul.u32 24, %s1917_s8  ;;  %vm1472_vm2 = vcmask 1043456   ;;  %vm1478_vm3 = vcmask 64512   ;;  %s1917_s8 = sphi %s1987_s8, %s219_s8  }
  0x1c   : >> { %v334_v10 = vld [vmem:[#allocation2 + $0x178] sm:$0xff]  ;;  %262 = vmatpush.msra.mxu0 %v261_v9  ;;  %v333_v14 = vld [vmem:[#allocation2 + $0x170] sm:$0xff]  ;;  %v332_v18 = vld [vmem:[#allocation2 + $0x168] sm:$0xff]  ;;  %s1774_s11 = sshll.u32 %s1917_s8, 2  ;;  %s219_s8 = sadd.s32 1, %s1917_s8  }
  0x1d   : >> { %v384_v11 = vld [vmem:[#allocation2 + $0x1f8] sm:$0xff]  ;;  %335 = vmatpush.msra.mxu2 %v334_v10  ;;  %v383_v15 = vld [vmem:[#allocation2 + $0x1f0] sm:$0xff]  ;;  %v382_v19 = vld [vmem:[#allocation2 + $0x1e8] sm:$0xff]  ;;  %s1994_s10 = scalar_lea.vmem %s1979_s7, %s220_s9  ;;  %s1528_s13 = scalar_lea.vmem %s1974_s4, %s1774_s11 }
  0x1e   : >> { %v240_v13 = vld [vmem:[#allocation2 + $0x78] sm:$0xff]  ;;  %385 = vmatpush.msra.mxu3 %v384_v11  ;;  %v239_v17 = vld [vmem:[#allocation2 + $0x70] sm:$0xff]  ;;  %263 = vmatpush.msra.mxu0 %v260_v12  ;;  %v258_v20 = vld [vmem:[#allocation2 + $0xe0] sm:$0xff]  ;;  %p216_p7 = scmp.ge.s32.totalorder %s219_s8, 4  }
  0x1f   : >> { %288 = vmatpush.msra.mxu1 %v240_v13  ;;  %336 = vmatpush.msra.mxu2 %v333_v14  ;;  %v238_v21 = vld [vmem:[#allocation2 + $0x68] sm:$0xff]  ;;  %v331_v22 = vld [vmem:[#allocation2 + $0x160] sm:$0xff]  ;;  %v257_v25 = vld [vmem:[#allocation2 + $0xd8] sm:$0xff] }
  0x20   : >> { %386 = vmatpush.msra.mxu3 %v383_v15  ;;  %264 = vmatpush.msra.mxu0 %v259_v16  ;;  %v381_v23 = vld [vmem:[#allocation2 + $0x1e0] sm:$0xff]  ;;  %v330_v26 = vld [vmem:[#allocation2 + $0x158] sm:$0xff]  ;;  %v256_v29 = vld [vmem:[#allocation2 + $0xd0] sm:$0xff] }
  0x21   : >> { %289 = vmatpush.msra.mxu1 %v239_v17  ;;  %337 = vmatpush.msra.mxu2 %v332_v18  ;;  %v237_v24 = vld [vmem:[#allocation2 + $0x60] sm:$0xff]  ;;  %v380_v27 = vld [vmem:[#allocation2 + $0x1d8] sm:$0xff]  ;;  %v329_v30 = vld [vmem:[#allocation2 + $0x150] sm:$0xff] }
  0x22   : >> { %387 = vmatpush.msra.mxu3 %v382_v19  ;;  %265 = vmatpush.msra.mxu0 %v258_v20  ;;  %v236_v28 = vld [vmem:[#allocation2 + $0x58] sm:$0xff]  ;;  %v379_v31 = vld [vmem:[#allocation2 + $0x1d0] sm:$0xff]  ;;  %v255_v33 = vld [vmem:[#allocation2 + $0xc8] sm:$0xff] }
  0x23   : >> { %290 = vmatpush.msra.mxu1 %v238_v21  ;;  %338 = vmatpush.msra.mxu2 %v331_v22  ;;  %v235_v32 = vld [vmem:[#allocation2 + $0x50] sm:$0xff]  ;;  %v328_v34 = vld [vmem:[#allocation2 + $0x148] sm:$0xff]  ;;  %v254_v37 = vld [vmem:[#allocation2 + $0xc0] sm:$0xff] }
  0x24   : >> { %388 = vmatpush.msra.mxu3 %v381_v23  ;;  %266 = vmatpush.msra.mxu0 %v257_v25  ;;  %v378_v35 = vld [vmem:[#allocation2 + $0x1c8] sm:$0xff]  ;;  %v327_v38 = vld [vmem:[#allocation2 + $0x140] sm:$0xff]  ;;  %v253_v41 = vld [vmem:[#allocation2 + $0xb8] sm:$0xff] }
  0x25   : >> { %291 = vmatpush.msra.mxu1 %v237_v24  ;;  %339 = vmatpush.msra.mxu2 %v330_v26  ;;  %v234_v36 = vld [vmem:[#allocation2 + $0x48] sm:$0xff]  ;;  %v377_v39 = vld [vmem:[#allocation2 + $0x1c0] sm:$0xff]  ;;  %v326_v42 = vld [vmem:[#allocation2 + $0x138] sm:$0xff] }
  0x26   : >> { %389 = vmatpush.msra.mxu3 %v380_v27  ;;  %267 = vmatpush.msra.mxu0 %v256_v29  ;;  %v233_v40 = vld [vmem:[#allocation2 + $0x40] sm:$0xff]  ;;  %v376_v43 = vld [vmem:[#allocation2 + $0x1b8] sm:$0xff]  ;;  %v252_v45 = vld [vmem:[#allocation2 + $0xb0] sm:$0xff] }
  0x27   : >> { %292 = vmatpush.msra.mxu1 %v236_v28  ;;  %340 = vmatpush.msra.mxu2 %v329_v30  ;;  %v232_v44 = vld [vmem:[#allocation2 + $0x38] sm:$0xff]  ;;  %v325_v46 = vld [vmem:[#allocation2 + $0x130] sm:$0xff]  ;;  %v251_v49 = vld [vmem:[#allocation2 + $0xa8] sm:$0xff] }
  0x28   : >> { %390 = vmatpush.msra.mxu3 %v379_v31  ;;  %268 = vmatpush.msra.mxu0 %v255_v33  ;;  %v375_v47 = vld [vmem:[#allocation2 + $0x1b0] sm:$0xff]  ;;  %v324_v50 = vld [vmem:[#allocation2 + $0x128] sm:$0xff]  ;;  %v250_v53 = vld [vmem:[#allocation2 + $0xa0] sm:$0xff] }
  0x29   : >> { %293 = vmatpush.msra.mxu1 %v235_v32  ;;  %341 = vmatpush.msra.mxu2 %v328_v34  ;;  %v231_v48 = vld [vmem:[#allocation2 + $0x30] sm:$0xff]  ;;  %v374_v51 = vld [vmem:[#allocation2 + $0x1a8] sm:$0xff]  ;;  %v323_v54 = vld [vmem:[#allocation2 + $0x120] sm:$0xff] }
  0x2a   : >> { %391 = vmatpush.msra.mxu3 %v378_v35  ;;  %269 = vmatpush.msra.mxu0 %v254_v37  ;;  %v230_v52 = vld [vmem:[#allocation2 + $0x28] sm:$0xff]  ;;  %v373_v55 = vld [vmem:[#allocation2 + $0x1a0] sm:$0xff]  ;;  %v249_v57 = vld [vmem:[#allocation2 + $0x98] sm:$0xff] }
  0x2b   : >> { %294 = vmatpush.msra.mxu1 %v234_v36  ;;  %342 = vmatpush.msra.mxu2 %v327_v38  ;;  %v229_v56 = vld [vmem:[#allocation2 + $0x20] sm:$0xff]  ;;  %v322_v58 = vld [vmem:[#allocation2 + $0x118] sm:$0xff]  ;;  %v248_v61 = vld [vmem:[#allocation2 + $0x90] sm:$0xff] }
  0x2c   : >> { %392 = vmatpush.msra.mxu3 %v377_v39  ;;  %270 = vmatpush.msra.mxu0 %v253_v41  ;;  %v372_v59 = vld [vmem:[#allocation2 + $0x198] sm:$0xff]  ;;  %v321_v62 = vld [vmem:[#allocation2 + $0x110] sm:$0xff]  ;;  %v247_v1 = vld [vmem:[#allocation2 + $0x88] sm:$0xff] }
  0x2d   : >> { %295 = vmatpush.msra.mxu1 %v233_v40  ;;  %343 = vmatpush.msra.mxu2 %v326_v42  ;;  %v228_v60 = vld [vmem:[#allocation2 + $0x18] sm:$0xff]  ;;  %v371_v63 = vld [vmem:[#allocation2 + $0x190] sm:$0xff]  ;;  %v320_v2 = vld [vmem:[#allocation2 + $0x108] sm:$0xff] }
  0x2e   : >> { %393 = vmatpush.msra.mxu3 %v376_v43  ;;  %271 = vmatpush.msra.mxu0 %v252_v45  ;;  %v227_v0 = vld [vmem:[#allocation2 + $0x10] sm:$0xff]  ;;  %v370_v3 = vld [vmem:[#allocation2 + $0x188] sm:$0xff]  ;;  %v246_v6 = vld [vmem:[#allocation2 + $0x80] sm:$0xff] }
  0x2f   : >> { %296 = vmatpush.msra.mxu1 %v232_v44  ;;  %344 = vmatpush.msra.mxu2 %v325_v46  ;;  %v226_v4 = vld [vmem:[#allocation2 + $0x8] sm:$0xff]  ;;  %v319_v9 = vld [vmem:[#allocation2 + $0x100] sm:$0xff]  ;;  %v434_v11 = vld [vmem:[#allocation2 + $0x278] sm:$0xff] }
  0x30   : >> { %394 = vmatpush.msra.mxu3 %v375_v47  ;;  %272 = vmatpush.msra.mxu0 %v251_v49  ;;  %v369_v10 = vld [vmem:[#allocation2 + $0x180] sm:$0xff]  ;;  %v534_v12 = vld [vmem:[#allocation2 + $0x378] sm:$0xff]  ;;  %v433_v15 = vld [vmem:[#allocation2 + $0x270] sm:$0xff] }
  0x31   : >> { %297 = vmatpush.msra.mxu1 %v231_v48  ;;  %345 = vmatpush.msra.mxu2 %v324_v50  ;;  %v584_v13 = vld [vmem:[#allocation2 + $0x3f8] sm:$0xff]  ;;  %v225_v14 = vld [vmem:[#allocation2] sm:$0xff]  ;;  %v533_v17 = vld [vmem:[#allocation2 + $0x370] sm:$0xff] }
  0x32   : >> { %395 = vmatpush.msra.mxu3 %v374_v51  ;;  %273 = vmatpush.msra.mxu0 %v250_v53  ;;  %v484_v16 = vld [vmem:[#allocation2 + $0x2f8] sm:$0xff]  ;;  %v583_v18 = vld [vmem:[#allocation2 + $0x3f0] sm:$0xff]  ;;  %v432_v19 = vld [vmem:[#allocation2 + $0x268] sm:$0xff] }
  0x33   : >> { %298 = vmatpush.msra.mxu1 %v230_v52  ;;  %346 = vmatpush.msra.mxu2 %v323_v54  ;;  %v483_v20 = vld [vmem:[#allocation2 + $0x2f0] sm:$0xff]  ;;  %v532_v21 = vld [vmem:[#allocation2 + $0x368] sm:$0xff]  ;;  %v431_v23 = vld [vmem:[#allocation2 + $0x260] sm:$0xff] }
  0x34   : >> { %396 = vmatpush.msra.mxu3 %v373_v55  ;;  %274 = vmatpush.msra.mxu0 %v249_v57  ;;  %v582_v22 = vld [vmem:[#allocation2 + $0x3e8] sm:$0xff]  ;;  %v531_v25 = vld [vmem:[#allocation2 + $0x360] sm:$0xff]  ;;  %v430_v27 = vld [vmem:[#allocation2 + $0x258] sm:$0xff] }
  0x35   : >> { %299 = vmatpush.msra.mxu1 %v229_v56  ;;  %347 = vmatpush.msra.mxu2 %v322_v58  ;;  %v482_v24 = vld [vmem:[#allocation2 + $0x2e8] sm:$0xff]  ;;  %v581_v26 = vld [vmem:[#allocation2 + $0x3e0] sm:$0xff]  ;;  %v530_v29 = vld [vmem:[#allocation2 + $0x358] sm:$0xff] }
  0x36   : >> { %397 = vmatpush.msra.mxu3 %v372_v59  ;;  %275 = vmatpush.msra.mxu0 %v248_v61  ;;  %v481_v28 = vld [vmem:[#allocation2 + $0x2e0] sm:$0xff]  ;;  %v580_v30 = vld [vmem:[#allocation2 + $0x3d8] sm:$0xff]  ;;  %v429_v31 = vld [vmem:[#allocation2 + $0x250] sm:$0xff] }
  0x37   : >> { %300 = vmatpush.msra.mxu1 %v228_v60  ;;  %348 = vmatpush.msra.mxu2 %v321_v62  ;;  %v480_v32 = vld [vmem:[#allocation2 + $0x2d8] sm:$0xff]  ;;  %v529_v33 = vld [vmem:[#allocation2 + $0x350] sm:$0xff]  ;;  %v428_v35 = vld [vmem:[#allocation2 + $0x248] sm:$0xff] }
  0x38   : >> { %398 = vmatpush.msra.mxu3 %v371_v63  ;;  %276 = vmatpush.msra.mxu0 %v247_v1  ;;  %v579_v34 = vld [vmem:[#allocation2 + $0x3d0] sm:$0xff]  ;;  %v528_v37 = vld [vmem:[#allocation2 + $0x348] sm:$0xff]  ;;  %v427_v42 = vld [vmem:[#allocation2 + $0x240] sm:$0xff] }
  0x39   : >> { %301 = vmatpush.msra.mxu1 %v227_v0  ;;  %349 = vmatpush.msra.mxu2 %v320_v2  ;;  %v479_v36 = vld [vmem:[#allocation2 + $0x2d0] sm:$0xff]  ;;  %v578_v38 = vld [vmem:[#allocation2 + $0x3c8] sm:$0xff]  ;;  %v527_v43 = vld [vmem:[#allocation2 + $0x340] sm:$0xff] }
  0x3a   : >> { %399 = vmatpush.msra.mxu3 %v370_v3  ;;  %277 = vmatpush.msra.mxu0 %v246_v6  ;;  %v1703_v39 = vld [vmem:[%s1994_s10 + $0x2] sm:$0xff]  ;;  %v426_v47 = vld [vmem:[#allocation2 + $0x238] sm:$0xff]  ;;  %v425_v51 = vld [vmem:[#allocation2 + $0x230] sm:$0xff] }
  0x3b   : >> { %302 = vmatpush.msra.mxu1 %v226_v4  ;;  %350 = vmatpush.msra.mxu2 %v319_v9  ;;  %v1700_v40 = vld [vmem:[%s1994_s10 + $0x1] sm:$0xff]  ;;  %v526_v49 = vld [vmem:[#allocation2 + $0x338] sm:$0xff]  ;;  %v525_v53 = vld [vmem:[#allocation2 + $0x330] sm:$0xff] }
  0x3c   : >> { %400 = vmatpush.msra.mxu3 %v369_v10  ;;  %435 = vmatpush.msrb.mxu0 %v434_v11  ;;  %v478_v41 = vld [vmem:[#allocation2 + $0x2c8] sm:$0xff]  ;;  %v577_v44 = vld [vmem:[#allocation2 + $0x3c0] sm:$0xff]  ;;  %v576_v50 = vld [vmem:[#allocation2 + $0x3b8] sm:$0xff] }
  0x3d   : >> { %535 = vmatpush.msrb.mxu2 %v534_v12  ;;  %303 = vmatpush.msra.mxu1 %v225_v14  ;;  %v222_v45 = vld [vmem:[%s1994_s10] sm:$0xff]  ;;  %v476_v52 = vld [vmem:[#allocation2 + $0x2b8] sm:$0xff]  ;;  %v575_v54 = vld [vmem:[#allocation2 + $0x3b0] sm:$0xff] }
  0x3e   : >> { %585 = vmatpush.msrb.mxu3 %v584_v13  ;;  %436 = vmatpush.msrb.mxu0 %v433_v15  ;;  %v1706_v46 = vld [vmem:[%s1994_s10 + $0x3] sm:$0xff]  ;;  %v475_v56 = vld [vmem:[#allocation2 + $0x2b0] sm:$0xff]  ;;  %v422_v3 = vld [vmem:[#allocation2 + $0x218] sm:$0xff] }
  0x3f   : >> { %485 = vmatpush.msrb.mxu1 %v484_v16  ;;  %536 = vmatpush.msrb.mxu2 %v533_v17  ;;  %v477_v48 = vld [vmem:[#allocation2 + $0x2c0] sm:$0xff]  ;;  %v424_v55 = vld [vmem:[#allocation2 + $0x228] sm:$0xff]  ;;  %v522_v6 = vld [vmem:[#allocation2 + $0x318] sm:$0xff] }
  0x40   : >> { %586 = vmatpush.msrb.mxu3 %v583_v18  ;;  %437 = vmatpush.msrb.mxu0 %v432_v19  ;;  %v524_v57 = vld [vmem:[#allocation2 + $0x328] sm:$0xff]  ;;  %v423_v62 = vld [vmem:[#allocation2 + $0x220] sm:$0xff]  ;;  %v572_v9 = vld [vmem:[#allocation2 + $0x398] sm:$0xff] }
  0x41   : >> { %486 = vmatpush.msrb.mxu1 %v483_v20  ;;  %537 = vmatpush.msrb.mxu2 %v532_v21  ;;  %v574_v58 = vld [vmem:[#allocation2 + $0x3a8] sm:$0xff]  ;;  %v523_v63 = vld [vmem:[#allocation2 + $0x320] sm:$0xff]  ;;  %v421_v10 = vld [vmem:[#allocation2 + $0x210] sm:$0xff] }
  0x42   : >> { %587 = vmatpush.msrb.mxu3 %v582_v22  ;;  %438 = vmatpush.msrb.mxu0 %v431_v23  ;;  %v1704_v59 = vld [vmem:[%s1994_s10 + $0xa] sm:$0xff]  ;;  %v573_v0 = vld [vmem:[#allocation2 + $0x3a0] sm:$0xff]  ;;  %v472_v11 = vld [vmem:[#allocation2 + $0x298] sm:$0xff] }
  0x43   : >> { %487 = vmatpush.msrb.mxu1 %v482_v24  ;;  %538 = vmatpush.msrb.mxu2 %v531_v25  ;;  %v1701_v60 = vld [vmem:[%s1994_s10 + $0x9] sm:$0xff]  ;;  %v473_v4 = vld [vmem:[#allocation2 + $0x2a0] sm:$0xff]  ;;  %v1705_v18 = vld [vmem:[%s1994_s10 + $0x12] sm:$0xf] }
  0x44   : >> { %588 = vmatpush.msrb.mxu3 %v581_v26  ;;  %439 = vmatpush.msrb.mxu0 %v430_v27  ;;  %v474_v61 = vld [vmem:[#allocation2 + $0x2a8] sm:$0xff]  ;;  %v521_v12 = vld [vmem:[#allocation2 + $0x310] sm:$0xff]  ;;  %v419_v21 = vld [vmem:[#allocation2 + $0x200] sm:$0xff] }
  0x45   : >> { %488 = vmatpush.msrb.mxu1 %v481_v28  ;;  %539 = vmatpush.msrb.mxu2 %v530_v29  ;;  %v223_v1 = vld [vmem:[%s1994_s10 + $0x8] sm:$0xff]  ;;  %v571_v13 = vld [vmem:[#allocation2 + $0x390] sm:$0xff]  ;;  %v519_v22 = vld [vmem:[#allocation2 + $0x300] sm:$0xff] }
  0x46   : >> { %589 = vmatpush.msrb.mxu3 %v580_v30  ;;  %440 = vmatpush.msrb.mxu0 %v429_v31  ;;  %v1707_v2 = vld [vmem:[%s1994_s10 + $0xb] sm:$0xff]  ;;  %v569_v23 = vld [vmem:[#allocation2 + $0x380] sm:$0xff]  ;;  %v634_v24 = vld [vmem:[#allocation2 + $0x478] sm:$0xff] }
  0x47   : >> { %489 = vmatpush.msrb.mxu1 %v480_v32  ;;  %540 = vmatpush.msrb.mxu2 %v529_v33  ;;  %v420_v14 = vld [vmem:[#allocation2 + $0x208] sm:$0xff]  ;;  %v471_v15 = vld [vmem:[#allocation2 + $0x290] sm:$0xff]  ;;  %v734_v26 = vld [vmem:[#allocation2 + $0x578] sm:$0xff] }
  0x48   : >> { %590 = vmatpush.msrb.mxu3 %v579_v34  ;;  %441 = vmatpush.msrb.mxu0 %v428_v35  ;;  %v520_v16 = vld [vmem:[#allocation2 + $0x308] sm:$0xff]  ;;  %v1702_v19 = vld [vmem:[%s1994_s10 + $0x11] sm:$0xf]  ;;  %v784_v27 = vld [vmem:[#allocation2 + $0x5f8] sm:$0xff] }
  0x49   : >> { %490 = vmatpush.msrb.mxu1 %v479_v36  ;;  %541 = vmatpush.msrb.mxu2 %v528_v37  ;;  %v570_v17 = vld [vmem:[#allocation2 + $0x388] sm:$0xff]  ;;  %v1708_v25 = vld [vmem:[%s1994_s10 + $0x13] sm:$0xf]  ;;  %v469_v29 = vld [vmem:[#allocation2 + $0x280] sm:$0xff] }
  0x4a   : >> { %591 = vmatpush.msrb.mxu3 %v578_v38  ;;  %351 = vmatmul.f32.vlgmr.msra.gmra.mxu2 %v1703_v39  ;;  %v470_v20 = vld [vmem:[#allocation2 + $0x288] sm:$0xff]  ;;  %v224_v28 = vld [vmem:[%s1994_s10 + $0x10] sm:$0xf]  ;;  %v684_v31 = vld [vmem:[#allocation2 + $0x4f8] sm:$0xff] }
  0x4b   : >> { %278 = vmatmul.f32.vlgmr.msra.gmra.mxu0 %v1700_v40  ;;  %491 = vmatpush.msrb.mxu1 %v478_v41  ;;  %v633_v30 = vld [vmem:[#allocation2 + $0x470] sm:$0xff]  ;;  %v632_v34 = vld [vmem:[#allocation2 + $0x468] sm:$0xff]  ;;  %v631_v39 = vld [vmem:[#allocation2 + $0x460] sm:$0xff] }
  0x4c   : >> { %442 = vmatpush.msrb.mxu0 %v427_v42  ;;  %542 = vmatpush.msrb.mxu2 %v527_v43  ;;  %v733_v32 = vld [vmem:[#allocation2 + $0x570] sm:$0xff]  ;;  %v732_v36 = vld [vmem:[#allocation2 + $0x568] sm:$0xff]  ;;  %v731_v41 = vld [vmem:[#allocation2 + $0x560] sm:$0xff] }
  0x4d   : >> { %592 = vmatpush.msrb.mxu3 %v577_v44  ;;  %304 = vmatmul.f32.vlgmr.msra.gmra.mxu1 %v222_v45  ;;  %v783_v33 = vld [vmem:[#allocation2 + $0x5f0] sm:$0xff]  ;;  %v782_v37 = vld [vmem:[#allocation2 + $0x5e8] sm:$0xff]  ;;  %v781_v42 = vld [vmem:[#allocation2 + $0x5e0] sm:$0xff] }
  0x4e   : >> { %401 = vmatmul.f32.vlgmr.msra.gmra.mxu3 %v1706_v46  ;;  %443 = vmatpush.msrb.mxu0 %v426_v47  ;;  %v683_v35 = vld [vmem:[#allocation2 + $0x4f0] sm:$0xff]  ;;  %v682_v40 = vld [vmem:[#allocation2 + $0x4e8] sm:$0xff]  ;;  %v630_v45 = vld [vmem:[#allocation2 + $0x458] sm:$0xff] }
  0x4f   : >> { %492 = vmatpush.msrb.mxu1 %v477_v48  ;;  %543 = vmatpush.msrb.mxu2 %v526_v49  ;;  %v1715_v38 = vld [vmem:[%s1994_s10 + $0xd] sm:$0xff]  ;;  %v1709_v43 = vld [vmem:[%s1994_s10 + $0x4] sm:$0xff]  ;;  %v730_v47 = vld [vmem:[#allocation2 + $0x558] sm:$0xff] }
  0x50   : >> { %593 = vmatpush.msrb.mxu3 %v576_v50  ;;  %444 = vmatpush.msrb.mxu0 %v425_v51  ;;  %v1718_v44 = vld [vmem:[%s1994_s10 + $0xe] sm:$0xff]  ;;  %v681_v46 = vld [vmem:[#allocation2 + $0x4e0] sm:$0xff]  ;;  %v780_v48 = vld [vmem:[#allocation2 + $0x5d8] sm:$0xff] }
  0x51   : >> { %493 = vmatpush.msrb.mxu1 %v476_v52  ;;  %544 = vmatpush.msrb.mxu2 %v525_v53  ;;  %v1712_v49 = vld [vmem:[%s1994_s10 + $0xc] sm:$0xff]  ;;  %v680_v51 = vld [vmem:[#allocation2 + $0x4d8] sm:$0xff] }
  0x52   : >> { %594 = vmatpush.msrb.mxu3 %v575_v54  ;;  %445 = vmatpush.msrb.mxu0 %v424_v55  ;;  %v629_v50 = vld [vmem:[#allocation2 + $0x450] sm:$0xff]  ;;  %v628_v54 = vld [vmem:[#allocation2 + $0x448] sm:$0xff] }
  0x53   : >> { %494 = vmatpush.msrb.mxu1 %v475_v56  ;;  %545 = vmatpush.msrb.mxu2 %v524_v57  ;;  %v729_v52 = vld [vmem:[#allocation2 + $0x550] sm:$0xff]  ;;  %v728_v56 = vld [vmem:[#allocation2 + $0x548] sm:$0xff] }
  0x54   : >> { %595 = vmatpush.msrb.mxu3 %v574_v58  ;;  %354 = vmatmul.f32.gmra.mxu2 %v1704_v59  ;;  %v779_v53 = vld [vmem:[#allocation2 + $0x5d0] sm:$0xff]  ;;  %v778_v57 = vld [vmem:[#allocation2 + $0x5c8] sm:$0xff]  ;;  %v627_v58 = vld [vmem:[#allocation2 + $0x440] sm:$0xff] }
  0x55   : >> { %281 = vmatmul.f32.gmra.mxu0 %v1701_v60  ;;  %495 = vmatpush.msrb.mxu1 %v474_v61  ;;  %v679_v55 = vld [vmem:[#allocation2 + $0x4d0] sm:$0xff]  ;;  %v678_v59 = vld [vmem:[#allocation2 + $0x4c8] sm:$0xff]  ;;  %v727_v60 = vld [vmem:[#allocation2 + $0x540] sm:$0xff] }
  0x56   : >> { %446 = vmatpush.msrb.mxu0 %v423_v62  ;;  %546 = vmatpush.msrb.mxu2 %v523_v63  ;;  %v777_v61 = vld [vmem:[#allocation2 + $0x5c0] sm:$0xff]  ;;  %v1716_v62 = vld [vmem:[%s1994_s10 + $0x15] sm:$0xff] }
  0x57   : >> { %596 = vmatpush.msrb.mxu3 %v573_v0  ;;  %307 = vmatmul.f32.gmra.mxu1 %v223_v1  ;;  %v626_v63 = vld [vmem:[#allocation2 + $0x438] sm:$0xff]  ;;  %v677_v0 = vld [vmem:[#allocation2 + $0x4c0] sm:$0xff] }
  0x58   : >> { %404 = vmatmul.f32.gmra.mxu3 %v1707_v2  ;;  %447 = vmatpush.msrb.mxu0 %v422_v3  ;;  %v726_v1 = vld [vmem:[#allocation2 + $0x538] sm:$0xff] }
  0x59   : >> { %496 = vmatpush.msrb.mxu1 %v473_v4  ;;  %547 = vmatpush.msrb.mxu2 %v522_v6  ;;  %v776_v2 = vld [vmem:[#allocation2 + $0x5b8] sm:$0xff]  ;;  %v625_v6 = vld [vmem:[#allocation2 + $0x430] sm:$0xff] }
  0x5a   : >> { %597 = vmatpush.msrb.mxu3 %v572_v9  ;;  %448 = vmatpush.msrb.mxu0 %v421_v10  ;;  %v1713_v3 = vld [vmem:[%s1994_s10 + $0x14] sm:$0xff] }
  0x5b   : >> { %497 = vmatpush.msrb.mxu1 %v472_v11  ;;  %548 = vmatpush.msrb.mxu2 %v521_v12  ;;  %v1719_v4 = vld [vmem:[%s1994_s10 + $0x16] sm:$0xff]  ;;  %v624_v12 = vld [vmem:[#allocation2 + $0x428] sm:$0xff] }
  0x5c   : >> { %598 = vmatpush.msrb.mxu3 %v571_v13  ;;  %449 = vmatpush.msrb.mxu0 %v420_v14  ;;  %v676_v9 = vld [vmem:[#allocation2 + $0x4b8] sm:$0xff]  ;;  %v725_v10 = vld [vmem:[#allocation2 + $0x530] sm:$0xff]  ;;  %v724_v14 = vld [vmem:[#allocation2 + $0x528] sm:$0xff] }
  0x5d   : >> { %498 = vmatpush.msrb.mxu1 %v471_v15  ;;  %549 = vmatpush.msrb.mxu2 %v520_v16  ;;  %v775_v11 = vld [vmem:[#allocation2 + $0x5b0] sm:$0xff]  ;;  %v774_v15 = vld [vmem:[#allocation2 + $0x5a8] sm:$0xff]  ;;  %v623_v16 = vld [vmem:[#allocation2 + $0x420] sm:$0xff] }
  0x5e   : >> { %599 = vmatpush.msrb.mxu3 %v570_v17  ;;  %357 = vmatmul.f32.gmra.mxu2 %v1705_v18  ;;  %v675_v13 = vld [vmem:[#allocation2 + $0x4b0] sm:$0xff]  ;;  %v674_v17 = vld [vmem:[#allocation2 + $0x4a8] sm:$0xff]  ;;  %v723_v18 = vld [vmem:[#allocation2 + $0x520] sm:$0xff] }
  0x5f   : >> { %284 = vmatmul.f32.gmra.mxu0 %v1702_v19  ;;  %499 = vmatpush.msrb.mxu1 %v470_v20  ;;  %v773_v19 = vld [vmem:[#allocation2 + $0x5a0] sm:$0xff]  ;;  %v1711_v20 = vld [vmem:[%s1994_s10 + $0x14] sm:$0xf] }
  0x60   : >> { %450 = vmatpush.msrb.mxu0 %v419_v21  ;;  %550 = vmatpush.msrb.mxu2 %v519_v22  ;;  %v1717_v21 = vld [vmem:[%s1994_s10 + $0x1d] sm:$0xf] }
  0x61   : >> { %600 = vmatpush.msrb.mxu3 %v569_v23  ;;  %310 = vmatmul.f32.gmra.mxu1 %v224_v28  ;;  %v622_v22 = vld [vmem:[#allocation2 + $0x418] sm:$0xff]  ;;  %v673_v23 = vld [vmem:[#allocation2 + $0x4a0] sm:$0xff]  ;;  %v621_v28 = vld [vmem:[#allocation2 + $0x410] sm:$0xff] }
  0x62   : >> { %635 = vmatpush.msra.mxu0 %v634_v24  ;;  %407 = vmatmul.f32.gmra.mxu3 %v1708_v25  ;;  %v722_v24 = vld [vmem:[#allocation2 + $0x518] sm:$0xff] }
  0x63   : >> { %735 = vmatpush.msra.mxu2 %v734_v26  ;;  %785 = vmatpush.msra.mxu3 %v784_v27  ;;  %v772_v25 = vld [vmem:[#allocation2 + $0x598] sm:$0xff] }
  0x64   : >> { %500 = vmatpush.msrb.mxu1 %v469_v29  ;;  %636 = vmatpush.msra.mxu0 %v633_v30  ;;  %v1714_v26 = vld [vmem:[%s1994_s10 + $0x1c] sm:$0xf]  ;;  %v721_v30 = vld [vmem:[#allocation2 + $0x510] sm:$0xff] }
  0x65   : >> { %736 = vmatpush.msra.mxu2 %v733_v32  ;;  %786 = vmatpush.msra.mxu3 %v783_v33  ;;  %v1720_v27 = vld [vmem:[%s1994_s10 + $0x1e] sm:$0xf]  ;;  %v620_v32 = vld [vmem:[#allocation2 + $0x408] sm:$0xff]  ;;  %v671_v33 = vld [vmem:[#allocation2 + $0x490] sm:$0xff] }
  0x66   : >> { %685 = vmatpush.msra.mxu1 %v684_v31  ;;  %637 = vmatpush.msra.mxu0 %v632_v34  ;;  %v672_v29 = vld [vmem:[#allocation2 + $0x498] sm:$0xff]  ;;  %v771_v31 = vld [vmem:[#allocation2 + $0x590] sm:$0xff]  ;;  %v720_v34 = vld [vmem:[#allocation2 + $0x508] sm:$0xff] }
  0x67   : >> { %737 = vmatpush.msra.mxu2 %v732_v36  ;;  %787 = vmatpush.msra.mxu3 %v782_v37  ;;  %v619_v36 = vld [vmem:[#allocation2 + $0x400] sm:$0xff]  ;;  %v670_v37 = vld [vmem:[#allocation2 + $0x488] sm:$0xff] }
  0x68   : >> { %686 = vmatpush.msra.mxu1 %v683_v35  ;;  %551 = vmatmul.f32.vlgmr.msrb.gmra.mxu2 %v1715_v38  ;;  %v770_v35 = vld [vmem:[#allocation2 + $0x588] sm:$0xff]  ;;  %v719_v38 = vld [vmem:[#allocation2 + $0x500] sm:$0xff] }
  0x69   : >> { %638 = vmatpush.msra.mxu0 %v631_v39  ;;  %738 = vmatpush.msra.mxu2 %v731_v41  ;;  %v769_v39 = vld [vmem:[#allocation2 + $0x580] sm:$0xff]  ;;  %v1727_v41 = vld [vmem:[%s1994_s10 + $0x18] sm:$0xff] }
  0x6a   : >> { %687 = vmatpush.msra.mxu1 %v682_v40  ;;  %788 = vmatpush.msra.mxu3 %v781_v42  ;;  %v1721_v40 = vld [vmem:[%s1994_s10 + $0xf] sm:$0xff]  ;;  %v834_v42 = vld [vmem:[#allocation2 + $0x678] sm:$0xff] }
  0x6b   : >> { %451 = vmatmul.f32.vlgmr.msrb.gmra.mxu0 %v1709_v43  ;;  %601 = vmatmul.f32.vlgmr.msrb.gmra.mxu3 %v1718_v44  ;;  %v934_v43 = vld [vmem:[#allocation2 + $0x778] sm:$0xff] }
  0x6c   : >> { %639 = vmatpush.msra.mxu0 %v630_v45  ;;  %688 = vmatpush.msra.mxu1 %v681_v46  ;;  %v984_v44 = vld [vmem:[#allocation2 + $0x7f8] sm:$0xff]  ;;  %v669_v45 = vld [vmem:[#allocation2 + $0x480] sm:$0xff] }
  0x6d   : >> { %739 = vmatpush.msra.mxu2 %v730_v47  ;;  %789 = vmatpush.msra.mxu3 %v780_v48  ;;  %v1730_v46 = vld [vmem:[%s1994_s10 + $0x19] sm:$0xff]  ;;  %v1724_v47 = vld [vmem:[%s1994_s10 + $0x10] sm:$0xff] }
  0x6e   : >> { %501 = vmatmul.f32.vlgmr.msrb.gmra.mxu1 %v1712_v49  ;;  %640 = vmatpush.msra.mxu0 %v629_v50  ;;  %v833_v48 = vld [vmem:[#allocation2 + $0x670] sm:$0xff] }
  0x6f   : >> { %689 = vmatpush.msra.mxu1 %v680_v51  ;;  %740 = vmatpush.msra.mxu2 %v729_v52  ;;  %v933_v50 = vld [vmem:[#allocation2 + $0x770] sm:$0xff]  ;;  %v832_v52 = vld [vmem:[#allocation2 + $0x668] sm:$0xff] }
  0x70   : >> { %790 = vmatpush.msra.mxu3 %v779_v53  ;;  %641 = vmatpush.msra.mxu0 %v628_v54  ;;  %v983_v51 = vld [vmem:[#allocation2 + $0x7f0] sm:$0xff]  ;;  %v932_v54 = vld [vmem:[#allocation2 + $0x768] sm:$0xff] }
  0x71   : >> { %690 = vmatpush.msra.mxu1 %v679_v55  ;;  %741 = vmatpush.msra.mxu2 %v728_v56  ;;  %v883_v53 = vld [vmem:[#allocation2 + $0x6f0] sm:$0xff]  ;;  %v982_v55 = vld [vmem:[#allocation2 + $0x7e8] sm:$0xff]  ;;  %v831_v56 = vld [vmem:[#allocation2 + $0x660] sm:$0xff] }
  0x72   : >> { %791 = vmatpush.msra.mxu3 %v778_v57  ;;  %642 = vmatpush.msra.mxu0 %v627_v58  ;;  %v882_v57 = vld [vmem:[#allocation2 + $0x6e8] sm:$0xff]  ;;  %v931_v58 = vld [vmem:[#allocation2 + $0x760] sm:$0xff] }
  0x73   : >> { %691 = vmatpush.msra.mxu1 %v678_v59  ;;  %742 = vmatpush.msra.mxu2 %v727_v60  ;;  %v981_v59 = vld [vmem:[#allocation2 + $0x7e0] sm:$0xff]  ;;  %v1722_v60 = vld [vmem:[%s1994_s10 + $0x17] sm:$0xff] }
  0x74   : >> { %792 = vmatpush.msra.mxu3 %v777_v61  ;;  %454 = vmatmul.f32.gmra.mxu0 %v1712_v49  ;;  %v884_v49 = vld [vmem:[#allocation2 + $0x6f8] sm:$0xff]  ;;  %v1728_v61 = vld [vmem:[%s1994_s10 + $0x20] sm:$0xff] }
  0x75   : >> { %554 = vmatmul.f32.gmra.mxu2 %v1716_v62  ;;  %643 = vmatpush.msra.mxu0 %v626_v63  ;;  %v830_v62 = vld [vmem:[#allocation2 + $0x658] sm:$0xff]  ;;  %v881_v63 = vld [vmem:[#allocation2 + $0x6e0] sm:$0xff] }
  0x76   : >> { %692 = vmatpush.msra.mxu1 %v677_v0  ;;  %743 = vmatpush.msra.mxu2 %v726_v1  ;;  %v930_v0 = vld [vmem:[#allocation2 + $0x758] sm:$0xff] }
  0x77   : >> { %793 = vmatpush.msra.mxu3 %v776_v2  ;;  %504 = vmatmul.f32.gmra.mxu1 %v1713_v3  ;;  %v980_v1 = vld [vmem:[#allocation2 + $0x7d8] sm:$0xff]  ;;  %v1731_v2 = vld [vmem:[%s1994_s10 + $0x21] sm:$0xff]  ;;  %v829_v3 = vld [vmem:[#allocation2 + $0x650] sm:$0xff] }
  0x78   : >> { %604 = vmatmul.f32.gmra.mxu3 %v1719_v4  ;;  %644 = vmatpush.msra.mxu0 %v625_v6  ;;  %v880_v4 = vld [vmem:[#allocation2 + $0x6d8] sm:$0xff]  ;;  %v929_v6 = vld [vmem:[#allocation2 + $0x750] sm:$0xff] }
  0x79   : >> { %693 = vmatpush.msra.mxu1 %v676_v9  ;;  %744 = vmatpush.msra.mxu2 %v725_v10  ;;  %v979_v9 = vld [vmem:[#allocation2 + $0x7d0] sm:$0xff]  ;;  %v828_v10 = vld [vmem:[#allocation2 + $0x648] sm:$0xff] }
  0x7a   : >> { %794 = vmatpush.msra.mxu3 %v775_v11  ;;  %645 = vmatpush.msra.mxu0 %v624_v12  ;;  %v879_v11 = vld [vmem:[#allocation2 + $0x6d0] sm:$0xff]  ;;  %v928_v12 = vld [vmem:[#allocation2 + $0x748] sm:$0xff] }
  0x7b   : >> { %694 = vmatpush.msra.mxu1 %v675_v13  ;;  %745 = vmatpush.msra.mxu2 %v724_v14  ;;  %v978_v13 = vld [vmem:[#allocation2 + $0x7c8] sm:$0xff]  ;;  %v827_v14 = vld [vmem:[#allocation2 + $0x640] sm:$0xff] }
  0x7c   : >> { %795 = vmatpush.msra.mxu3 %v774_v15  ;;  %646 = vmatpush.msra.mxu0 %v623_v16  ;;  %v878_v15 = vld [vmem:[#allocation2 + $0x6c8] sm:$0xff]  ;;  %v927_v16 = vld [vmem:[#allocation2 + $0x740] sm:$0xff] }
  0x7d   : >> { %695 = vmatpush.msra.mxu1 %v674_v17  ;;  %746 = vmatpush.msra.mxu2 %v723_v18  ;;  %v977_v17 = vld [vmem:[#allocation2 + $0x7c0] sm:$0xff] }
  0x7e   : >> { %796 = vmatpush.msra.mxu3 %v773_v19  ;;  %457 = vmatmul.f32.gmra.mxu0 %v1711_v20  ;;  %v1723_v18 = vld [vmem:[%s1994_s10 + $0x1f] sm:$0xf]  ;;  %v1729_v19 = vld [vmem:[%s1994_s10 + $0x28] sm:$0xf] }
  0x7f   : >> { %557 = vmatmul.f32.gmra.mxu2 %v1717_v21  ;;  %647 = vmatpush.msra.mxu0 %v622_v22  ;;  %v826_v20 = vld [vmem:[#allocation2 + $0x638] sm:$0xff]  ;;  %v877_v21 = vld [vmem:[#allocation2 + $0x6c0] sm:$0xff] }
  0x80   : >> { %696 = vmatpush.msra.mxu1 %v673_v23  ;;  %747 = vmatpush.msra.mxu2 %v722_v24  ;;  %v926_v22 = vld [vmem:[#allocation2 + $0x738] sm:$0xff]  ;;  %v1726_v24 = vld [vmem:[%s1994_s10 + $0x20] sm:$0xf] }
  0x81   : >> { %797 = vmatpush.msra.mxu3 %v772_v25  ;;  %507 = vmatmul.f32.gmra.mxu1 %v1714_v26  ;;  %v976_v23 = vld [vmem:[#allocation2 + $0x7b8] sm:$0xff]  ;;  %v1732_v25 = vld [vmem:[%s1994_s10 + $0x29] sm:$0xf]  ;;  %v825_v26 = vld [vmem:[#allocation2 + $0x630] sm:$0xff] }
  0x82   : >> { %607 = vmatmul.f32.gmra.mxu3 %v1720_v27  ;;  %648 = vmatpush.msra.mxu0 %v621_v28  ;;  %v876_v27 = vld [vmem:[#allocation2 + $0x6b8] sm:$0xff]  ;;  %v925_v28 = vld [vmem:[#allocation2 + $0x730] sm:$0xff] }
  0x83   : >> { %697 = vmatpush.msra.mxu1 %v672_v29  ;;  %748 = vmatpush.msra.mxu2 %v721_v30  ;;  %v975_v29 = vld [vmem:[#allocation2 + $0x7b0] sm:$0xff]  ;;  %v824_v30 = vld [vmem:[#allocation2 + $0x628] sm:$0xff] }
  0x84   : >> { %798 = vmatpush.msra.mxu3 %v771_v31  ;;  %649 = vmatpush.msra.mxu0 %v620_v32  ;;  %v875_v31 = vld [vmem:[#allocation2 + $0x6b0] sm:$0xff]  ;;  %v924_v32 = vld [vmem:[#allocation2 + $0x728] sm:$0xff] }
  0x85   : >> { %698 = vmatpush.msra.mxu1 %v671_v33  ;;  %749 = vmatpush.msra.mxu2 %v720_v34  ;;  %v974_v33 = vld [vmem:[#allocation2 + $0x7a8] sm:$0xff]  ;;  %v823_v34 = vld [vmem:[#allocation2 + $0x620] sm:$0xff] }
  0x86   : >> { %799 = vmatpush.msra.mxu3 %v770_v35  ;;  %650 = vmatpush.msra.mxu0 %v619_v36  ;;  %v874_v35 = vld [vmem:[#allocation2 + $0x6a8] sm:$0xff]  ;;  %v923_v36 = vld [vmem:[#allocation2 + $0x720] sm:$0xff] }
  0x87   : >> { %699 = vmatpush.msra.mxu1 %v670_v37  ;;  %750 = vmatpush.msra.mxu2 %v719_v38  ;;  %v973_v37 = vld [vmem:[#allocation2 + $0x7a0] sm:$0xff]  ;;  %v822_v38 = vld [vmem:[#allocation2 + $0x618] sm:$0xff] }
  0x88   : >> { %800 = vmatpush.msra.mxu3 %v769_v39  ;;  %651 = vmatmul.f32.vlgmr.msra.gmra.mxu0 %v1721_v40  ;;  %v873_v39 = vld [vmem:[#allocation2 + $0x6a0] sm:$0xff]  ;;  %v922_v40 = vld [vmem:[#allocation2 + $0x718] sm:$0xff] }
  0x89   : >> { %751 = vmatmul.f32.vlgmr.msra.gmra.mxu2 %v1727_v41  ;;  %835 = vmatpush.msrb.mxu0 %v834_v42  ;;  %v821_v42 = vld [vmem:[#allocation2 + $0x610] sm:$0xff] }
  0x8a   : >> { %935 = vmatpush.msrb.mxu2 %v934_v43  ;;  %985 = vmatpush.msrb.mxu3 %v984_v44  ;;  %v872_v43 = vld [vmem:[#allocation2 + $0x698] sm:$0xff]  ;;  %v921_v44 = vld [vmem:[#allocation2 + $0x710] sm:$0xff] }
  0x8b   : >> { %700 = vmatpush.msra.mxu1 %v669_v45  ;;  %801 = vmatmul.f32.vlgmr.msra.gmra.mxu3 %v1730_v46  ;;  %v971_v45 = vld [vmem:[#allocation2 + $0x790] sm:$0xff]  ;;  %v820_v46 = vld [vmem:[#allocation2 + $0x608] sm:$0xff] }
  0x8c   : >> { %701 = vmatmul.f32.vlgmr.msra.gmra.mxu1 %v1724_v47  ;;  %836 = vmatpush.msrb.mxu0 %v833_v48  ;;  %v871_v47 = vld [vmem:[#allocation2 + $0x690] sm:$0xff]  ;;  %v920_v48 = vld [vmem:[#allocation2 + $0x708] sm:$0xff] }
  0x8d   : >> { %885 = vmatpush.msrb.mxu1 %v884_v49  ;;  %936 = vmatpush.msrb.mxu2 %v933_v50  ;;  %v970_v49 = vld [vmem:[#allocation2 + $0x788] sm:$0xff]  ;;  %v819_v50 = vld [vmem:[#allocation2 + $0x600] sm:$0xff] }
  0x8e   : >> { %986 = vmatpush.msrb.mxu3 %v983_v51  ;;  %837 = vmatpush.msrb.mxu0 %v832_v52  ;;  %v870_v51 = vld [vmem:[#allocation2 + $0x688] sm:$0xff]  ;;  %v919_v52 = vld [vmem:[#allocation2 + $0x700] sm:$0xff] }
  0x8f   : >> { %886 = vmatpush.msrb.mxu1 %v883_v53  ;;  %937 = vmatpush.msrb.mxu2 %v932_v54  ;;  %v969_v53 = vld [vmem:[#allocation2 + $0x780] sm:$0xff] }
  0x90   : >> { %987 = vmatpush.msrb.mxu3 %v982_v55  ;;  %838 = vmatpush.msrb.mxu0 %v831_v56  ;;  %v1733_v54 = vld [vmem:[%s1994_s10 + $0x1a] sm:$0xff] }
  0x91   : >> { %887 = vmatpush.msrb.mxu1 %v882_v57  ;;  %938 = vmatpush.msrb.mxu2 %v931_v58  ;;  %v1739_v55 = vld [vmem:[%s1994_s10 + $0x1c] sm:$0xff] }
  0x92   : >> { %988 = vmatpush.msrb.mxu3 %v981_v59  ;;  %654 = vmatmul.f32.gmra.mxu0 %v1722_v60  ;;  %v1034_v56 = vld [vmem:[#allocation2 + $0x878] sm:$0xff]  ;;  %v869_v59 = vld [vmem:[#allocation2 + $0x680] sm:$0xff] }
  0x93   : >> { %754 = vmatmul.f32.gmra.mxu2 %v1728_v61  ;;  %839 = vmatpush.msrb.mxu0 %v830_v62  ;;  %v1134_v57 = vld [vmem:[#allocation2 + $0x978] sm:$0xff]  ;;  %v1742_v60 = vld [vmem:[%s1994_s10 + $0x24] sm:$0xff]  ;;  %v1033_v62 = vld [vmem:[#allocation2 + $0x870] sm:$0xff] }
  0x94   : >> { %888 = vmatpush.msrb.mxu1 %v881_v63  ;;  %939 = vmatpush.msrb.mxu2 %v930_v0  ;;  %v1184_v58 = vld [vmem:[#allocation2 + $0x9f8] sm:$0xff]  ;;  %v1133_v0 = vld [vmem:[#allocation2 + $0x970] sm:$0xff] }
  0x95   : >> { %989 = vmatpush.msrb.mxu3 %v980_v1  ;;  %704 = vmatmul.f32.gmra.mxu1 %v1727_v41  ;;  %v972_v41 = vld [vmem:[#allocation2 + $0x798] sm:$0xff]  ;;  %v1183_v1 = vld [vmem:[#allocation2 + $0x9f0] sm:$0xff] }
  0x96   : >> { %804 = vmatmul.f32.gmra.mxu3 %v1731_v2  ;;  %840 = vmatpush.msrb.mxu0 %v829_v3  ;;  %v1736_v61 = vld [vmem:[%s1994_s10 + $0x1b] sm:$0xff]  ;;  %v1032_v2 = vld [vmem:[#allocation2 + $0x868] sm:$0xff]  ;;  %v1083_v3 = vld [vmem:[#allocation2 + $0x8f0] sm:$0xff] }
  0x97   : >> { %889 = vmatpush.msrb.mxu1 %v880_v4  ;;  %940 = vmatpush.msrb.mxu2 %v929_v6  ;;  %v1084_v63 = vld [vmem:[#allocation2 + $0x8f8] sm:$0xff]  ;;  %v1132_v4 = vld [vmem:[#allocation2 + $0x968] sm:$0xff] }
  0x98   : >> { %990 = vmatpush.msrb.mxu3 %v979_v9  ;;  %841 = vmatpush.msrb.mxu0 %v828_v10  ;;  %v1182_v6 = vld [vmem:[#allocation2 + $0x9e8] sm:$0xff]  ;;  %v1031_v9 = vld [vmem:[#allocation2 + $0x860] sm:$0xff] }
  0x99   : >> { %890 = vmatpush.msrb.mxu1 %v879_v11  ;;  %941 = vmatpush.msrb.mxu2 %v928_v12  ;;  %v1082_v10 = vld [vmem:[#allocation2 + $0x8e8] sm:$0xff]  ;;  %v1131_v11 = vld [vmem:[#allocation2 + $0x960] sm:$0xff] }
  0x9a   : >> { %991 = vmatpush.msrb.mxu3 %v978_v13  ;;  %842 = vmatpush.msrb.mxu0 %v827_v14  ;;  %v1181_v12 = vld [vmem:[#allocation2 + $0x9e0] sm:$0xff]  ;;  %v1030_v14 = vld [vmem:[#allocation2 + $0x858] sm:$0xff] }
  0x9b   : >> { %891 = vmatpush.msrb.mxu1 %v878_v15  ;;  %942 = vmatpush.msrb.mxu2 %v927_v16  ;;  %v1734_v13 = vld [vmem:[%s1994_s10 + $0x22] sm:$0xff]  ;;  %v1130_v16 = vld [vmem:[#allocation2 + $0x958] sm:$0xff] }
  0x9c   : >> { %992 = vmatpush.msrb.mxu3 %v977_v17  ;;  %657 = vmatmul.f32.gmra.mxu0 %v1723_v18  ;;  %v1081_v15 = vld [vmem:[#allocation2 + $0x8e0] sm:$0xff]  ;;  %v1180_v17 = vld [vmem:[#allocation2 + $0x9d8] sm:$0xff] }
  0x9d   : >> { %757 = vmatmul.f32.gmra.mxu2 %v1729_v19  ;;  %843 = vmatpush.msrb.mxu0 %v826_v20  ;;  %v1737_v18 = vld [vmem:[%s1994_s10 + $0x23] sm:$0xff]  ;;  %v1743_v19 = vld [vmem:[%s1994_s10 + $0x2c] sm:$0xff] }
  0x9e   : >> { %892 = vmatpush.msrb.mxu1 %v877_v21  ;;  %943 = vmatpush.msrb.mxu2 %v926_v22  ;;  %v1029_v20 = vld [vmem:[#allocation2 + $0x850] sm:$0xff]  ;;  %v1080_v21 = vld [vmem:[#allocation2 + $0x8d8] sm:$0xff] }
  0x9f   : >> { %993 = vmatpush.msrb.mxu3 %v976_v23  ;;  %707 = vmatmul.f32.gmra.mxu1 %v1726_v24  ;;  %v1129_v22 = vld [vmem:[#allocation2 + $0x950] sm:$0xff]  ;;  %v1028_v24 = vld [vmem:[#allocation2 + $0x848] sm:$0xff] }
  0xa0   : >> { %807 = vmatmul.f32.gmra.mxu3 %v1732_v25  ;;  %844 = vmatpush.msrb.mxu0 %v825_v26  ;;  %v1179_v23 = vld [vmem:[#allocation2 + $0x9d0] sm:$0xff]  ;;  %v1128_v26 = vld [vmem:[#allocation2 + $0x948] sm:$0xff] }
  0xa1   : >> { %893 = vmatpush.msrb.mxu1 %v876_v27  ;;  %944 = vmatpush.msrb.mxu2 %v925_v28  ;;  %v1079_v25 = vld [vmem:[#allocation2 + $0x8d0] sm:$0xff]  ;;  %v1178_v27 = vld [vmem:[#allocation2 + $0x9c8] sm:$0xff]  ;;  %v1027_v28 = vld [vmem:[#allocation2 + $0x840] sm:$0xff] }
  0xa2   : >> { %994 = vmatpush.msrb.mxu3 %v975_v29  ;;  %845 = vmatpush.msrb.mxu0 %v824_v30  ;;  %v1078_v29 = vld [vmem:[#allocation2 + $0x8c8] sm:$0xff]  ;;  %v1127_v30 = vld [vmem:[#allocation2 + $0x940] sm:$0xff] }
  0xa3   : >> { %894 = vmatpush.msrb.mxu1 %v875_v31  ;;  %945 = vmatpush.msrb.mxu2 %v924_v32  ;;  %v1177_v31 = vld [vmem:[#allocation2 + $0x9c0] sm:$0xff]  ;;  %v1735_v32 = vld [vmem:[%s1994_s10 + $0x2a] sm:$0xf] }
  0xa4   : >> { %995 = vmatpush.msrb.mxu3 %v974_v33  ;;  %846 = vmatpush.msrb.mxu0 %v823_v34  ;;  %v1741_v33 = vld [vmem:[%s1994_s10 + $0x2c] sm:$0xf]  ;;  %v1026_v34 = vld [vmem:[#allocation2 + $0x838] sm:$0xff] }
  0xa5   : >> { %895 = vmatpush.msrb.mxu1 %v874_v35  ;;  %946 = vmatpush.msrb.mxu2 %v923_v36  ;;  %v1077_v35 = vld [vmem:[#allocation2 + $0x8c0] sm:$0xff]  ;;  %v1126_v36 = vld [vmem:[#allocation2 + $0x938] sm:$0xff] }
  0xa6   : >> { %996 = vmatpush.msrb.mxu3 %v973_v37  ;;  %847 = vmatpush.msrb.mxu0 %v822_v38  ;;  %v1176_v37 = vld [vmem:[#allocation2 + $0x9b8] sm:$0xff]  ;;  %v1738_v38 = vld [vmem:[%s1994_s10 + $0x2b] sm:$0xf] }
  0xa7   : >> { %896 = vmatpush.msrb.mxu1 %v873_v39  ;;  %947 = vmatpush.msrb.mxu2 %v922_v40  ;;  %v1744_v39 = vld [vmem:[%s1994_s10 + $0x34] sm:$0xf] }
  0xa8   : >> { %997 = vmatpush.msrb.mxu3 %v972_v41  ;;  %848 = vmatpush.msrb.mxu0 %v821_v42  ;;  %v1025_v40 = vld [vmem:[#allocation2 + $0x830] sm:$0xff]  ;;  %v1076_v41 = vld [vmem:[#allocation2 + $0x8b8] sm:$0xff] }
  0xa9   : >> { %897 = vmatpush.msrb.mxu1 %v872_v43  ;;  %948 = vmatpush.msrb.mxu2 %v921_v44  ;;  %v1125_v42 = vld [vmem:[#allocation2 + $0x930] sm:$0xff]  ;;  %v1024_v44 = vld [vmem:[#allocation2 + $0x828] sm:$0xff] }
  0xaa   : >> { %998 = vmatpush.msrb.mxu3 %v971_v45  ;;  %849 = vmatpush.msrb.mxu0 %v820_v46  ;;  %v1175_v43 = vld [vmem:[#allocation2 + $0x9b0] sm:$0xff]  ;;  %v1124_v46 = vld [vmem:[#allocation2 + $0x928] sm:$0xff] }
  0xab   : >> { %898 = vmatpush.msrb.mxu1 %v871_v47  ;;  %949 = vmatpush.msrb.mxu2 %v920_v48  ;;  %v1075_v45 = vld [vmem:[#allocation2 + $0x8b0] sm:$0xff]  ;;  %v1174_v47 = vld [vmem:[#allocation2 + $0x9a8] sm:$0xff]  ;;  %v1023_v48 = vld [vmem:[#allocation2 + $0x820] sm:$0xff] }
  0xac   : >> { %999 = vmatpush.msrb.mxu3 %v970_v49  ;;  %850 = vmatpush.msrb.mxu0 %v819_v50  ;;  %v1074_v49 = vld [vmem:[#allocation2 + $0x8a8] sm:$0xff]  ;;  %v1123_v50 = vld [vmem:[#allocation2 + $0x920] sm:$0xff] }
  0xad   : >> { %899 = vmatpush.msrb.mxu1 %v870_v51  ;;  %950 = vmatpush.msrb.mxu2 %v919_v52  ;;  %v1173_v51 = vld [vmem:[#allocation2 + $0x9a0] sm:$0xff]  ;;  %v1022_v52 = vld [vmem:[#allocation2 + $0x818] sm:$0xff] }
  0xae   : >> { %1000 = vmatpush.msrb.mxu3 %v969_v53  ;;  %851 = vmatmul.f32.vlgmr.msrb.gmra.mxu0 %v1733_v54  ;;  %v1073_v53 = vld [vmem:[#allocation2 + $0x8a0] sm:$0xff]  ;;  %v1122_v54 = vld [vmem:[#allocation2 + $0x918] sm:$0xff] }
  0xaf   : >> { %951 = vmatmul.f32.vlgmr.msrb.gmra.mxu2 %v1739_v55  ;;  %1035 = vmatpush.msra.mxu0 %v1034_v56  ;;  %v1172_v56 = vld [vmem:[#allocation2 + $0x998] sm:$0xff] }
  0xb0   : >> { %1135 = vmatpush.msra.mxu2 %v1134_v57  ;;  %1185 = vmatpush.msra.mxu3 %v1184_v58  ;;  %v1021_v57 = vld [vmem:[#allocation2 + $0x810] sm:$0xff] }
  0xb1   : >> { %900 = vmatpush.msrb.mxu1 %v869_v59  ;;  %1001 = vmatmul.f32.vlgmr.msrb.gmra.mxu3 %v1742_v60  ;;  %v1072_v59 = vld [vmem:[#allocation2 + $0x898] sm:$0xff] }
  0xb2   : >> { %901 = vmatmul.f32.vlgmr.msrb.gmra.mxu1 %v1736_v61  ;;  %1036 = vmatpush.msra.mxu0 %v1033_v62  ;;  %v1171_v62 = vld [vmem:[#allocation2 + $0x990] sm:$0xff] }
  0xb3   : >> { %1085 = vmatpush.msra.mxu1 %v1084_v63  ;;  %1136 = vmatpush.msra.mxu2 %v1133_v0  ;;  %v1020_v63 = vld [vmem:[#allocation2 + $0x808] sm:$0xff]  ;;  %v1071_v0 = vld [vmem:[#allocation2 + $0x890] sm:$0xff] }
  0xb4   : >> { %1186 = vmatpush.msra.mxu3 %v1183_v1  ;;  %1037 = vmatpush.msra.mxu0 %v1032_v2  ;;  %v1120_v1 = vld [vmem:[#allocation2 + $0x908] sm:$0xff] }
  0xb5   : >> { %1086 = vmatpush.msra.mxu1 %v1083_v3  ;;  %1137 = vmatpush.msra.mxu2 %v1132_v4  ;;  %v1170_v3 = vld [vmem:[#allocation2 + $0x988] sm:$0xff]  ;;  %v1019_v4 = vld [vmem:[#allocation2 + $0x800] sm:$0xff] }
  0xb6   : >> { %1187 = vmatpush.msra.mxu3 %v1182_v6  ;;  %1038 = vmatpush.msra.mxu0 %v1031_v9  ;;  %v1070_v9 = vld [vmem:[#allocation2 + $0x888] sm:$0xff] }
  0xb7   : >> { %1087 = vmatpush.msra.mxu1 %v1082_v10  ;;  %1138 = vmatpush.msra.mxu2 %v1131_v11  ;;  %v1119_v10 = vld [vmem:[#allocation2 + $0x900] sm:$0xff] }
  0xb8   : >> { %1188 = vmatpush.msra.mxu3 %v1181_v12  ;;  %854 = vmatmul.f32.gmra.mxu0 %v1734_v13  ;;  %v1169_v11 = vld [vmem:[#allocation2 + $0x980] sm:$0xff] }
  0xb9   : >> { %954 = vmatmul.f32.gmra.mxu2 %v1742_v60  ;;  %1039 = vmatpush.msra.mxu0 %v1030_v14  ;;  %v1121_v60 = vld [vmem:[#allocation2 + $0x910] sm:$0xff]  ;;  %v1745_v12 = vld [vmem:[%s1994_s10 + $0x25] sm:$0xff] }
  0xba   : >> { %1088 = vmatpush.msra.mxu1 %v1081_v15  ;;  %1139 = vmatpush.msra.mxu2 %v1130_v16  ;;  %v1751_v14 = vld [vmem:[%s1994_s10 + $0x27] sm:$0xff]  ;;  %v1234_v15 = vld [vmem:[#allocation2 + $0xa78] sm:$0xff] }
  0xbb   : >> { %1189 = vmatpush.msra.mxu3 %v1180_v17  ;;  %904 = vmatmul.f32.gmra.mxu1 %v1737_v18  ;;  %v1334_v17 = vld [vmem:[#allocation2 + $0xb78] sm:$0xff] }
  0xbc   : >> { %1004 = vmatmul.f32.gmra.mxu3 %v1743_v19  ;;  %1040 = vmatpush.msra.mxu0 %v1029_v20  ;;  %v1384_v18 = vld [vmem:[#allocation2 + $0xbf8] sm:$0xff]  ;;  %v1069_v19 = vld [vmem:[#allocation2 + $0x880] sm:$0xff]  ;;  %v1754_v20 = vld [vmem:[%s1994_s10 + $0x28] sm:$0xff] }
  0xbd   : >> { %1089 = vmatpush.msra.mxu1 %v1080_v21  ;;  %1140 = vmatpush.msra.mxu2 %v1129_v22 }
  0xbe   : >> { %1190 = vmatpush.msra.mxu3 %v1179_v23  ;;  %1041 = vmatpush.msra.mxu0 %v1028_v24  ;;  %v1748_v23 = vld [vmem:[%s1994_s10 + $0x26] sm:$0xff]  ;;  %v1233_v24 = vld [vmem:[#allocation2 + $0xa70] sm:$0xff] }
  0xbf   : >> { %1090 = vmatpush.msra.mxu1 %v1079_v25  ;;  %1141 = vmatpush.msra.mxu2 %v1128_v26  ;;  %v1284_v26 = vld [vmem:[#allocation2 + $0xaf8] sm:$0xff] }
  0xc0   : >> { %1191 = vmatpush.msra.mxu3 %v1178_v27  ;;  %1042 = vmatpush.msra.mxu0 %v1027_v28  ;;  %v1333_v27 = vld [vmem:[#allocation2 + $0xb70] sm:$0xff] }
  0xc1   : >> { %1091 = vmatpush.msra.mxu1 %v1078_v29  ;;  %1142 = vmatpush.msra.mxu2 %v1127_v30  ;;  %v1383_v28 = vld [vmem:[#allocation2 + $0xbf0] sm:$0xff]  ;;  %v1232_v29 = vld [vmem:[#allocation2 + $0xa68] sm:$0xff] }
  0xc2   : >> { %1192 = vmatpush.msra.mxu3 %v1177_v31  ;;  %857 = vmatmul.f32.gmra.mxu0 %v1735_v32  ;;  %v1283_v31 = vld [vmem:[#allocation2 + $0xaf0] sm:$0xff]  ;;  %v1332_v32 = vld [vmem:[#allocation2 + $0xb68] sm:$0xff] }
  0xc3   : >> { %957 = vmatmul.f32.gmra.mxu2 %v1741_v33  ;;  %1043 = vmatpush.msra.mxu0 %v1026_v34  ;;  %v1382_v34 = vld [vmem:[#allocation2 + $0xbe8] sm:$0xff] }
  0xc4   : >> { %1092 = vmatpush.msra.mxu1 %v1077_v35  ;;  %1143 = vmatpush.msra.mxu2 %v1126_v36  ;;  %v1231_v35 = vld [vmem:[#allocation2 + $0xa60] sm:$0xff]  ;;  %v1282_v36 = vld [vmem:[#allocation2 + $0xae8] sm:$0xff] }
  0xc5   : >> { %1193 = vmatpush.msra.mxu3 %v1176_v37  ;;  %907 = vmatmul.f32.gmra.mxu1 %v1738_v38  ;;  %v1331_v37 = vld [vmem:[#allocation2 + $0xb60] sm:$0xff] }
  0xc6   : >> { %1007 = vmatmul.f32.gmra.mxu3 %v1744_v39  ;;  %1044 = vmatpush.msra.mxu0 %v1025_v40  ;;  %v1381_v38 = vld [vmem:[#allocation2 + $0xbe0] sm:$0xff]  ;;  %v1746_v39 = vld [vmem:[%s1994_s10 + $0x2d] sm:$0xff] }
  0xc7   : >> { %1093 = vmatpush.msra.mxu1 %v1076_v41  ;;  %1144 = vmatpush.msra.mxu2 %v1125_v42  ;;  %v1752_v41 = vld [vmem:[%s1994_s10 + $0x2f] sm:$0xff]  ;;  %v1230_v42 = vld [vmem:[#allocation2 + $0xa58] sm:$0xff] }
  0xc8   : >> { %1194 = vmatpush.msra.mxu3 %v1175_v43  ;;  %1045 = vmatpush.msra.mxu0 %v1024_v44  ;;  %v279_v55 = vpop.f32.mrf.mxu0  ;;  %v1281_v44 = vld [vmem:[#allocation2 + $0xae0] sm:$0xff] }
  0xc9   : >> { %1094 = vmatpush.msra.mxu1 %v1075_v45  ;;  %1145 = vmatpush.msra.mxu2 %v1124_v46  ;;  %v1330_v45 = vld [vmem:[#allocation2 + $0xb58] sm:$0xff] }
  0xca   : >> { %1195 = vmatpush.msra.mxu3 %v1174_v47  ;;  %1046 = vmatpush.msra.mxu0 %v1023_v48  ;;  %v305_v58 = vpop.f32.mrf.mxu1  ;;  %v1380_v46 = vld [vmem:[#allocation2 + $0xbd8] sm:$0xff]  ;;  %v1749_v47 = vld [vmem:[%s1994_s10 + $0x2e] sm:$0xff] }
  0xcb   : >> { %1095 = vmatpush.msra.mxu1 %v1074_v49  ;;  %1146 = vmatpush.msra.mxu2 %v1123_v50  ;;  %v306_v61 = vadd.f32 %v305_v58, %v279_v55  ;;  %v2053_v49 = vld [vmem:[%s1994_s10 + $0x30] sm:$0xff]  ;;  %v1228_v55 = vld [vmem:[#allocation2 + $0xa48] sm:$0xff] }
  0xcc   : >> { %1196 = vmatpush.msra.mxu3 %v1173_v51  ;;  %1047 = vmatpush.msra.mxu0 %v1022_v52  ;;  %v1229_v50 = vld [vmem:[#allocation2 + $0xa50] sm:$0xff]  ;;  %v1280_v51 = vld [vmem:[#allocation2 + $0xad8] sm:$0xff] }
  0xcd   : >> { %1096 = vmatpush.msra.mxu1 %v1073_v53  ;;  %1147 = vmatpush.msra.mxu2 %v1122_v54  ;;  %v352_v2 = vpop.f32.mrf.mxu2  ;;  %v1329_v52 = vld [vmem:[#allocation2 + $0xb50] sm:$0xff] }
  0xce   : >> { %1197 = vmatpush.msra.mxu3 %v1172_v56  ;;  %1048 = vmatpush.msra.mxu0 %v1021_v57  ;;  %v361_v6 = vadd.f32 %v352_v2, %v306_v61  ;;  %v1379_v54 = vld [vmem:[#allocation2 + $0xbd0] sm:$0xff]  ;;  %v1227_v61 = vld [vmem:[#allocation2 + $0xa40] sm:$0xff] }
  0xcf   : >> { %1097 = vmatpush.msra.mxu1 %v1072_v59  ;;  %1148 = vmatpush.msra.mxu2 %v1121_v60  ;;  %v1279_v58 = vld [vmem:[#allocation2 + $0xad0] sm:$0xff]  ;;  %v1328_v59 = vld [vmem:[#allocation2 + $0xb48] sm:$0xff] }
  0xd0   : >> { %1198 = vmatpush.msra.mxu3 %v1171_v62  ;;  %1049 = vmatpush.msra.mxu0 %v1020_v63  ;;  %v1378_v60 = vld [vmem:[#allocation2 + $0xbc8] sm:$0xff]  ;;  %v1747_v2 = vld [vmem:[%s1994_s10 + $0x35] sm:$0xf] }
  0xd1   : >> { %1098 = vmatpush.msra.mxu1 %v1071_v0  ;;  %1149 = vmatpush.msra.mxu2 %v1120_v1  ;;  %v402_v13 = vpop.f32.mrf.mxu3  ;;  %v1278_v63 = vld [vmem:[#allocation2 + $0xac8] sm:$0xff]  ;;  %v1327_v0 = vld [vmem:[#allocation2 + $0xb40] sm:$0xff] }
  0xd2   : >> { %1199 = vmatpush.msra.mxu3 %v1170_v3  ;;  %1050 = vmatpush.msra.mxu0 %v1019_v4  ;;  %v2043_v16 = vadd.f32 %v402_v13, %v361_v6  ;;  %v282_v21 = vpop.f32.mrf.mxu0  ;;  %v1377_v1 = vld [vmem:[#allocation2 + $0xbc0] sm:$0xff]  ;;  %v1753_v4 = vld [vmem:[%s1994_s10 + $0x37] sm:$0xf] }
  0xd3   : >> { %1099 = vmatpush.msra.mxu1 %v1070_v9  ;;  %1150 = vmatpush.msra.mxu2 %v1119_v10  ;;  %v1226_v6 = vld [vmem:[#allocation2 + $0xa38] sm:$0xff]  ;;  %v1277_v10 = vld [vmem:[#allocation2 + $0xac0] sm:$0xff] }
  0xd4   : >> { %1200 = vmatpush.msra.mxu3 %v1169_v11  ;;  %1051 = vmatmul.f32.vlgmr.msra.gmra.mxu0 %v1745_v12  ;;  %v308_v22 = vpop.f32.mrf.mxu1  ;;  %v1326_v11 = vld [vmem:[#allocation2 + $0xb38] sm:$0xff] }
  0xd5   : >> { %1151 = vmatmul.f32.vlgmr.msra.gmra.mxu2 %v1751_v14  ;;  %1235 = vmatpush.msrb.mxu0 %v1234_v15  ;;  %v309_v25 = vadd.f32 %v308_v22, %v282_v21  ;;  %v1376_v12 = vld [vmem:[#allocation2 + $0xbb8] sm:$0xff]  ;;  %v1375_v21 = vld [vmem:[#allocation2 + $0xbb0] sm:$0xff]  ;;  %v1224_v22 = vld [vmem:[#allocation2 + $0xa28] sm:$0xff] }
  0xd6   : >> { %1335 = vmatpush.msrb.mxu2 %v1334_v17  ;;  %1385 = vmatpush.msrb.mxu3 %v1384_v18  ;;  %v1750_v13 = vld [vmem:[%s1994_s10 + $0x36] sm:$0xf] }
  0xd7   : >> { %1100 = vmatpush.msra.mxu1 %v1069_v19  ;;  %1201 = vmatmul.f32.vlgmr.msra.gmra.mxu3 %v1754_v20  ;;  %v355_v30 = vpop.f32.mrf.mxu2  ;;  %v1756_v15 = vld [vmem:[%s1994_s10 + $0x38] sm:$0xf]  ;;  %v1225_v17 = vld [vmem:[#allocation2 + $0xa30] sm:$0xff] }
  0xd8   : >> { %1101 = vmatmul.f32.vlgmr.msra.gmra.mxu1 %v1748_v23  ;;  %1236 = vmatpush.msrb.mxu0 %v1233_v24  ;;  %v362_v33 = vadd.f32 %v355_v30, %v309_v25  ;;  %v1276_v19 = vld [vmem:[#allocation2 + $0xab8] sm:$0xff]  ;;  %v1325_v20 = vld [vmem:[#allocation2 + $0xb30] sm:$0xff]  ;;  %v1323_v30 = vld [vmem:[#allocation2 + $0xb20] sm:$0xff] }
  0xd9   : >> { %1285 = vmatpush.msrb.mxu1 %v1284_v26  ;;  %1336 = vmatpush.msrb.mxu2 %v1333_v27  ;;  %v1275_v25 = vld [vmem:[#allocation2 + $0xab0] sm:$0xff]  ;;  %v1324_v26 = vld [vmem:[#allocation2 + $0xb28] sm:$0xff] }
  0xda   : >> { %1386 = vmatpush.msrb.mxu3 %v1383_v28  ;;  %1237 = vmatpush.msrb.mxu0 %v1232_v29  ;;  %v1374_v28 = vld [vmem:[#allocation2 + $0xba8] sm:$0xff]  ;;  %v1223_v29 = vld [vmem:[#allocation2 + $0xa20] sm:$0xff] }
  0xdb   : >> { %1286 = vmatpush.msrb.mxu1 %v1283_v31  ;;  %1337 = vmatpush.msrb.mxu2 %v1332_v32  ;;  %v405_v40 = vpop.f32.mrf.mxu3 }
  0xdc   : >> { %1387 = vmatpush.msrb.mxu3 %v1382_v34  ;;  %1238 = vmatpush.msrb.mxu0 %v1231_v35  ;;  %v2049_v43 = vadd.f32 %v405_v40, %v362_v33  ;;  %v285_v48 = vpop.f32.mrf.mxu0  ;;  %v1373_v33 = vld [vmem:[#allocation2 + $0xba0] sm:$0xff]  ;;  %v1222_v34 = vld [vmem:[#allocation2 + $0xa18] sm:$0xff] }
  0xdd   : >> { %1287 = vmatpush.msrb.mxu1 %v1282_v36  ;;  %1338 = vmatpush.msrb.mxu2 %v1331_v37  ;;  %v1273_v35 = vld [vmem:[#allocation2 + $0xaa0] sm:$0xff]  ;;  %v1322_v36 = vld [vmem:[#allocation2 + $0xb18] sm:$0xff] }
  0xde   : >> { %1388 = vmatpush.msrb.mxu3 %v1381_v38  ;;  %1054 = vmatmul.f32.gmra.mxu0 %v1746_v39  ;;  %v311_v53 = vpop.f32.mrf.mxu1  ;;  %v1372_v38 = vld [vmem:[#allocation2 + $0xb98] sm:$0xff]  ;;  %v1221_v39 = vld [vmem:[#allocation2 + $0xa10] sm:$0xff] }
  0xdf   : >> { %1154 = vmatmul.f32.gmra.mxu2 %v1752_v41  ;;  %1239 = vmatpush.msrb.mxu0 %v1230_v42  ;;  %v312_v56 = vadd.f32 %v311_v53, %v285_v48  ;;  %v1272_v41 = vld [vmem:[#allocation2 + $0xa98] sm:$0xff]  ;;  %v1321_v42 = vld [vmem:[#allocation2 + $0xb10] sm:$0xff]  ;;  %v1320_v48 = vld [vmem:[#allocation2 + $0xb08] sm:$0xff] }
  0xe0   : >> { %1288 = vmatpush.msrb.mxu1 %v1281_v44  ;;  %1339 = vmatpush.msrb.mxu2 %v1330_v45  ;;  %v1371_v45 = vld [vmem:[#allocation2 + $0xb90] sm:$0xff] }
  0xe1   : >> { %1389 = vmatpush.msrb.mxu3 %v1380_v46  ;;  %1104 = vmatmul.f32.gmra.mxu1 %v1749_v47  ;;  %v358_v57 = vpop.f32.mrf.mxu2  ;;  %v1220_v46 = vld [vmem:[#allocation2 + $0xa08] sm:$0xff]  ;;  %v1271_v47 = vld [vmem:[#allocation2 + $0xa90] sm:$0xff] }
  0xe2   : >> { %1204 = vmatmul.f32.gmra.mxu3 %v2053_v49  ;;  %1240 = vmatpush.msrb.mxu0 %v1229_v50  ;;  %v363_v62 = vadd.f32 %v358_v57, %v312_v56  ;;  %v1763_v56 = vld [vmem:[%s1994_s10 + $0x32] sm:$0xff] }
  0xe3   : >> { %1289 = vmatpush.msrb.mxu1 %v1280_v51  ;;  %1340 = vmatpush.msrb.mxu2 %v1329_v52  ;;  %v1370_v51 = vld [vmem:[#allocation2 + $0xb88] sm:$0xff]  ;;  %v1219_v52 = vld [vmem:[#allocation2 + $0xa00] sm:$0xff]  ;;  %v1434_v57 = vld [vmem:[#allocation2 + $0xc78] sm:$0xff] }
  0xe4   : >> { %1390 = vmatpush.msrb.mxu3 %v1379_v54  ;;  %1241 = vmatpush.msrb.mxu0 %v1228_v55  ;;  %v1270_v54 = vld [vmem:[#allocation2 + $0xa88] sm:$0xff]  ;;  %v1369_v55 = vld [vmem:[#allocation2 + $0xb80] sm:$0xff] }
  0xe5   : >> { %1290 = vmatpush.msrb.mxu1 %v1279_v58  ;;  %1341 = vmatpush.msrb.mxu2 %v1328_v59  ;;  %v408_v3 = vpop.f32.mrf.mxu3  ;;  %v1269_v59 = vld [vmem:[#allocation2 + $0xa80] sm:$0xff] }
  0xe6   : >> { %1391 = vmatpush.msrb.mxu3 %v1378_v60  ;;  %1242 = vmatpush.msrb.mxu0 %v1227_v61  ;;  %v2058_v9 = vadd.f32 %v408_v3, %v363_v62  ;;  %v1760_v61 = vld [vmem:[%s1994_s10 + $0x31] sm:$0xff] }
  0xe7   : >> { %1291 = vmatpush.msrb.mxu1 %v1278_v63  ;;  %1342 = vmatpush.msrb.mxu2 %v1327_v0  ;;  %v1766_v62 = vld [vmem:[%s1994_s10 + $0x33] sm:$0xff] }
  0xe8   : >> { %1392 = vmatpush.msrb.mxu3 %v1377_v1  ;;  %1057 = vmatmul.f32.gmra.mxu0 %v1747_v2  ;;  %v452_v14 = vpop.f32.mrf.mxu0  ;;  %v1433_v63 = vld [vmem:[#allocation2 + $0xc70] sm:$0xff] }
  0xe9   : >> { %1157 = vmatmul.f32.gmra.mxu2 %v1753_v4  ;;  %1243 = vmatpush.msrb.mxu0 %v1226_v6  ;;  %v461_v18 = vadd.f32 %v452_v14, %v2043_v16  ;;  %v1274_v16 = vld [vmem:[#allocation2 + $0xaa8] sm:$0xff]  ;;  %v1431_v6 = vld [vmem:[#allocation2 + $0xc60] sm:$0xff] }
  0xea   : >> { %1292 = vmatpush.msrb.mxu1 %v1277_v10  ;;  %1343 = vmatpush.msrb.mxu2 %v1326_v11  ;;  %v1758_v11 = vld [vmem:[%s1994_s10 + $0x38] sm:$0xff] }
  0xeb   : >> { %1393 = vmatpush.msrb.mxu3 %v1376_v12  ;;  %1107 = vmatmul.f32.gmra.mxu1 %v1750_v13  ;;  %v502_v23 = vpop.f32.mrf.mxu1  ;;  %v552_v24 = vpop.f32.mrf.mxu2  ;;  %v1764_v12 = vld [vmem:[%s1994_s10 + $0x3a] sm:$0xff] }
  0xec   : >> { %1207 = vmatmul.f32.gmra.mxu3 %v1756_v15  ;;  %1244 = vmatpush.msrb.mxu0 %v1225_v17  ;;  %v511_v27 = vadd.f32 %v502_v23, %v461_v18  ;;  %v1430_v13 = vld [vmem:[#allocation2 + $0xc58] sm:$0xff]  ;;  %v1429_v17 = vld [vmem:[#allocation2 + $0xc50] sm:$0xff] }
  0xed   : >> { %1293 = vmatpush.msrb.mxu1 %v1276_v19  ;;  %1344 = vmatpush.msrb.mxu2 %v1325_v20  ;;  %v1767_v14 = vld [vmem:[%s1994_s10 + $0x3b] sm:$0xff]  ;;  %v1428_v19 = vld [vmem:[#allocation2 + $0xc48] sm:$0xff] }
  0xee   : >> { %1394 = vmatpush.msrb.mxu3 %v1375_v21  ;;  %1245 = vmatpush.msrb.mxu0 %v1224_v22  ;;  %v561_v31 = vadd.f32 %v552_v24, %v511_v27  ;;  %v602_v32 = vpop.f32.mrf.mxu3  ;;  %v1427_v24 = vld [vmem:[#allocation2 + $0xc40] sm:$0xff]  ;;  %v1426_v27 = vld [vmem:[#allocation2 + $0xc38] sm:$0xff] }
  0xef   : >> { %1294 = vmatpush.msrb.mxu1 %v1275_v25  ;;  %1345 = vmatpush.msrb.mxu2 %v1324_v26  ;;  %v1759_v25 = vld [vmem:[%s1994_s10 + $0x40] sm:$0xf] }
  0xf0   : >> { %1395 = vmatpush.msrb.mxu3 %v1374_v28  ;;  %1246 = vmatpush.msrb.mxu0 %v1223_v29  ;;  %v2063_v37 = vadd.f32 %v602_v32, %v561_v31  ;;  %v1765_v26 = vld [vmem:[%s1994_s10 + $0x42] sm:$0xf]  ;;  %v1425_v31 = vld [vmem:[#allocation2 + $0xc30] sm:$0xff] }
  0xf1   : >> { %1295 = vmatpush.msrb.mxu1 %v1274_v16  ;;  %1346 = vmatpush.msrb.mxu2 %v1323_v30  ;;  %v455_v40 = vpop.f32.mrf.mxu0  ;;  %v1762_v29 = vld [vmem:[%s1994_s10 + $0x41] sm:$0xf] }
  0xf2   : >> { %1396 = vmatpush.msrb.mxu3 %v1373_v33  ;;  %1247 = vmatpush.msrb.mxu0 %v1222_v34  ;;  %v462_v44 = vadd.f32 %v455_v40, %v2049_v43  ;;  %v1319_v43 = vld [vmem:[#allocation2 + $0xb00] sm:$0xff]  ;;  %v1424_v33 = vld [vmem:[#allocation2 + $0xc28] sm:$0xff] }
  0xf3   : >> { %1296 = vmatpush.msrb.mxu1 %v1273_v35  ;;  %1347 = vmatpush.msrb.mxu2 %v1322_v36  ;;  %v1768_v16 = vld [vmem:[%s1994_s10 + $0x43] sm:$0xf] }
  0xf4   : >> { %1397 = vmatpush.msrb.mxu3 %v1372_v38  ;;  %1248 = vmatpush.msrb.mxu0 %v1221_v39  ;;  %v505_v50 = vpop.f32.mrf.mxu1  ;;  %v1423_v36 = vld [vmem:[#allocation2 + $0xc20] sm:$0xff]  ;;  %v1422_v39 = vld [vmem:[#allocation2 + $0xc18] sm:$0xff] }
  0xf5   : >> { %1297 = vmatpush.msrb.mxu1 %v1272_v41  ;;  %1348 = vmatpush.msrb.mxu2 %v1321_v42  ;;  %v512_v53 = vadd.f32 %v505_v50, %v462_v44  ;;  %v1421_v42 = vld [vmem:[#allocation2 + $0xc10] sm:$0xff]  ;;  %v1420_v44 = vld [vmem:[#allocation2 + $0xc08] sm:$0xff] }
  0xf6   : >> { %1398 = vmatpush.msrb.mxu3 %v1371_v45  ;;  %1249 = vmatpush.msrb.mxu0 %v1220_v46  ;;  %v1769_v50 = vld [vmem:[%s1994_s10 + $0x34] sm:$0xff] }
  0xf7   : >> { %1298 = vmatpush.msrb.mxu1 %v1271_v47  ;;  %1349 = vmatpush.msrb.mxu2 %v1320_v48  ;;  %v1419_v47 = vld [vmem:[#allocation2 + $0xc00] sm:$0xff] }
  0xf8   : >> { %1399 = vmatpush.msrb.mxu3 %v1370_v51  ;;  %1250 = vmatpush.msrb.mxu0 %v1219_v52  ;;  %v555_v58 = vpop.f32.mrf.mxu2  ;;  %v1770_v51 = vld [vmem:[%s1994_s10 + $0x3c] sm:$0xff] }
  0xf9   : >> { %1299 = vmatpush.msrb.mxu1 %v1270_v54  ;;  %1350 = vmatpush.msrb.mxu2 %v1319_v43  ;;  %v562_v60 = vadd.f32 %v555_v58, %v512_v53  ;;  %v1771_v54 = vld [vmem:[%s1994_s10 + $0x44] sm:$0xf] }
  0xfa   : >> { %1400 = vmatpush.msrb.mxu3 %v1369_v55  ;;  %1251 = vmatmul.f32.vlgmr.msrb.gmra.mxu0 %v2053_v49  ;;  %v1432_v49 = vld [vmem:[#allocation2 + $0xc68] sm:$0xff] }
  0xfb   : >> { %1351 = vmatmul.f32.vlgmr.msrb.gmra.mxu2 %v1763_v56  ;;  %1435 = vmatpush.msra.mxu0 %v1434_v57  ;;  %v458_v0 = vpop.f32.mrf.mxu0  ;;  %v605_v1 = vpop.f32.mrf.mxu3 }
  0xfc   : >> { %1778 = vmatpush.msra.mxu3 %v1434_v57  ;;  %1300 = vmatpush.msrb.mxu1 %v1269_v59  ;;  %v463_v2 = vadd.f32 %v458_v0, %v2058_v9  ;;  %v2071_v3 = vadd.f32 %v605_v1, %v562_v60  ;;  %v1761_v9 = vld [vmem:[%s1994_s10 + $0x39] sm:$0xff] }
  0xfd   : >> { %1301 = vmatmul.f32.vlgmr.msrb.gmra.mxu1 %v1760_v61  ;;  %1401 = vmatmul.f32.vlgmr.msrb.gmra.mxu3 %v1766_v62 }
  0xfe   : >> { %1436 = vmatpush.msra.mxu0 %v1433_v63  ;;  %1779 = vmatpush.msra.mxu3 %v1433_v63  ;;  %v508_v4 = vpop.f32.mrf.mxu1 }
  0xff   : >> { %v513_v10 = vadd.f32 %v508_v4, %v463_v2 }
 0x100   : >> { %1437 = vmatpush.msra.mxu0 %v1432_v49  ;;  %1780 = vmatpush.msra.mxu3 %v1432_v49 }
 0x102   : >> { %1438 = vmatpush.msra.mxu0 %v1431_v6  ;;  %1781 = vmatpush.msra.mxu3 %v1431_v6  ;;  %v558_v15 = vpop.f32.mrf.mxu2 }
 0x103   : >> { %1254 = vmatmul.f32.gmra.mxu0 %v1758_v11  ;;  %1354 = vmatmul.f32.gmra.mxu2 %v1764_v12  ;;  %v563_v18 = vadd.f32 %v558_v15, %v513_v10 }
 0x104   : >> { %1439 = vmatpush.msra.mxu0 %v1430_v13  ;;  %1782 = vmatpush.msra.mxu3 %v1430_v13 }
 0x105   : >> { %1304 = vmatmul.f32.gmra.mxu1 %v1761_v9  ;;  %1404 = vmatmul.f32.gmra.mxu3 %v1767_v14  ;;  %v608_v20 = vpop.f32.mrf.mxu3  ;;  %v652_v21 = vpop.f32.mrf.mxu0 }
 0x106   : >> { %1440 = vmatpush.msra.mxu0 %v1429_v17  ;;  %1783 = vmatpush.msra.mxu3 %v1429_v17  ;;  %v2077_v22 = vadd.f32 %v608_v20, %v563_v18  ;;  %v661_v23 = vadd.f32 %v652_v21, %v2063_v37 }
 0x108   : >> { %1441 = vmatpush.msra.mxu0 %v1428_v19  ;;  %1784 = vmatpush.msra.mxu3 %v1428_v19 }
 0x109   : >> { %v702_v28 = vpop.f32.mrf.mxu1 }
 0x10a   : >> { %1442 = vmatpush.msra.mxu0 %v1427_v24  ;;  %1785 = vmatpush.msra.mxu3 %v1427_v24  ;;  %v711_v30 = vadd.f32 %v702_v28, %v661_v23 }
 0x10b   : >> { %1257 = vmatmul.f32.gmra.mxu0 %v1759_v25  ;;  %1357 = vmatmul.f32.gmra.mxu2 %v1765_v26 }
 0x10c   : >> { %1443 = vmatpush.msra.mxu0 %v1426_v27  ;;  %1786 = vmatpush.msra.mxu3 %v1426_v27  ;;  %v752_v32 = vpop.f32.mrf.mxu2 }
 0x10d   : >> { %1307 = vmatmul.f32.gmra.mxu1 %v1762_v29  ;;  %1407 = vmatmul.f32.gmra.mxu3 %v1768_v16  ;;  %v761_v34 = vadd.f32 %v752_v32, %v711_v30 }
 0x10e   : >> { %1444 = vmatpush.msra.mxu0 %v1425_v31  ;;  %1787 = vmatpush.msra.mxu3 %v1425_v31  ;;  %v802_v35 = vpop.f32.mrf.mxu3 }
 0x10f   : >> { %v655_v37 = vpop.f32.mrf.mxu0  ;;  %v811_v38 = vadd.f32 %v802_v35, %v761_v34 }
 0x110   : >> { %1445 = vmatpush.msra.mxu0 %v1424_v33  ;;  %1788 = vmatpush.msra.mxu3 %v1424_v33  ;;  %v662_v40 = vadd.f32 %v655_v37, %v2071_v3 }
 0x112   : >> { %1446 = vmatpush.msra.mxu0 %v1423_v36  ;;  %1789 = vmatpush.msra.mxu3 %v1423_v36  ;;  %v705_v41 = vpop.f32.mrf.mxu1 }
 0x113   : >> { %v712_v45 = vadd.f32 %v705_v41, %v662_v40 }
 0x114   : >> { %1447 = vmatpush.msra.mxu0 %v1422_v39  ;;  %1790 = vmatpush.msra.mxu3 %v1422_v39 }
 0x116   : >> { %1448 = vmatpush.msra.mxu0 %v1421_v42  ;;  %1791 = vmatpush.msra.mxu3 %v1421_v42  ;;  %v755_v46 = vpop.f32.mrf.mxu2 }
 0x117   : >> { %v762_v48 = vadd.f32 %v755_v46, %v712_v45 }
 0x118   : >> { %1449 = vmatpush.msra.mxu0 %v1420_v44  ;;  %1792 = vmatpush.msra.mxu3 %v1420_v44 }
 0x119   : >> { %v805_v52 = vpop.f32.mrf.mxu3  ;;  %v658_v43 = vpop.f32.mrf.mxu0 }
 0x11a   : >> { %1450 = vmatpush.msra.mxu0 %v1419_v47  ;;  %1793 = vmatpush.msra.mxu3 %v1419_v47  ;;  %v812_v53 = vadd.f32 %v805_v52, %v762_v48  ;;  %v663_v20 = vadd.f32 %v658_v43, %v2077_v22 }
 0x11b   : >> { %1451 = vmatmul.f32.vlgmr.msra.gmra.mxu0 %v1769_v50  ;;  %1454 = vmatmul.f32.vlgmr.msra.gmra.mxu3 %v1770_v51 }
 0x11c   : >> { %v708_v55 = vpop.f32.mrf.mxu1 }
 0x11d   : >> { %v713_v24 = vadd.f32 %v708_v55, %v663_v20 }
 0x120   : >> { %v758_v56 = vpop.f32.mrf.mxu2 }
 0x121   : >> { %v763_v26 = vadd.f32 %v758_v56, %v713_v24 }
 0x123   : >> { %1457 = vmatmul.f32.gmra.mxu3 %v1771_v54  ;;  %v808_v58 = vpop.f32.mrf.mxu3 }
 0x124   : >> { %v813_v29 = vadd.f32 %v808_v58, %v763_v26 }
 0x12b   : >> { %v852_v57 = vpop.f32.mrf.mxu0 }
 0x12c   : >> { %v861_v59 = vadd.f32 %v852_v57, %v811_v38 }
 0x12f   : >> { %v902_v60 = vpop.f32.mrf.mxu1 }
 0x130   : >> { %v911_v61 = vadd.f32 %v902_v60, %v861_v59 }
 0x132   : >> { %v952_v62 = vpop.f32.mrf.mxu2 }
 0x133   : >> { %v961_v63 = vadd.f32 %v952_v62, %v911_v61 }
 0x134   : >> { %v1002_v0 = vpop.f32.mrf.mxu3 }
 0x135   : >> { %v1011_v1 = vadd.f32 %v1002_v0, %v961_v63  ;;  %v855_v3 = vpop.f32.mrf.mxu0 }
 0x136   : >> { %v862_v27 = vadd.f32 %v855_v3, %v812_v53 }
 0x138   : >> { %v905_v49 = vpop.f32.mrf.mxu1 }
 0x139   : >> { %v912_v31 = vadd.f32 %v905_v49, %v862_v27 }
 0x13c   : >> { %v955_v4 = vpop.f32.mrf.mxu2 }
 0x13d   : >> { %v962_v34 = vadd.f32 %v955_v4, %v912_v31 }
 0x13f   : >> { %v1005_v2 = vpop.f32.mrf.mxu3  ;;  %v858_v10 = vpop.f32.mrf.mxu0 }
 0x140   : >> { %v863_v32 = vadd.f32 %v858_v10, %v813_v29  ;;  %v1012_v37 = vadd.f32 %v1005_v2, %v962_v34 }
 0x142   : >> { %v908_v11 = vpop.f32.mrf.mxu1 }
 0x143   : >> { %v913_v35 = vadd.f32 %v908_v11, %v863_v32 }
 0x146   : >> { %v958_v12 = vpop.f32.mrf.mxu2 }
 0x147   : >> { %v963_v38 = vadd.f32 %v958_v12, %v913_v35 }
 0x149   : >> { %v1008_v6 = vpop.f32.mrf.mxu3 }
 0x14a   : >> { %v1013_v41 = vadd.f32 %v1008_v6, %v963_v38 }
 0x151   : >> { %v1052_v9 = vpop.f32.mrf.mxu0 }
 0x152   : >> { %v1061_v46 = vadd.f32 %v1052_v9, %v1011_v1 }
 0x155   : >> { %v1102_v14 = vpop.f32.mrf.mxu1 }
 0x156   : >> { %v1111_v51 = vadd.f32 %v1102_v14, %v1061_v46  ;;  %v1465_v14 = vperm.slane %v1981_v5, 0 }
 0x158   : >> { %v1152_v15 = vpop.f32.mrf.mxu2 }
 0x159   : >> { %v1161_v43 = vadd.f32 %v1152_v15, %v1111_v51 }
 0x15a   : >> { %v1202_v13 = vpop.f32.mrf.mxu3 }
 0x15b   : >> { %v1055_v18 = vpop.f32.mrf.mxu0  ;;  %v1211_v59 = vadd.f32 %v1202_v13, %v1161_v43 }
 0x15c   : >> { %v1062_v22 = vadd.f32 %v1055_v18, %v1012_v37 }
 0x15e   : >> { %v1105_v19 = vpop.f32.mrf.mxu1 }
 0x15f   : >> { %v1112_v44 = vadd.f32 %v1105_v19, %v1062_v22 }
 0x162   : >> { %v1155_v21 = vpop.f32.mrf.mxu2 }
 0x163   : >> { %v1162_v47 = vadd.f32 %v1155_v21, %v1112_v44 }
 0x165   : >> { %v1205_v17 = vpop.f32.mrf.mxu3  ;;  %v1058_v25 = vpop.f32.mrf.mxu0 }
 0x166   : >> { %v1063_v45 = vadd.f32 %v1058_v25, %v1013_v41  ;;  %v1212_v53 = vadd.f32 %v1205_v17, %v1162_v47 }
 0x168   : >> { %v1108_v28 = vpop.f32.mrf.mxu1 }
 0x169   : >> { %v1113_v50 = vadd.f32 %v1108_v28, %v1063_v45 }
 0x16c   : >> { %v1158_v16 = vpop.f32.mrf.mxu2 }
 0x16d   : >> { %v1163_v54 = vadd.f32 %v1158_v16, %v1113_v50 }
 0x16f   : >> { %v1208_v23 = vpop.f32.mrf.mxu3 }
 0x170   : >> { %v1213_v58 = vadd.f32 %v1208_v23, %v1163_v54 }
 0x177   : >> { %v1252_v33 = vpop.f32.mrf.mxu0 }
 0x178   : >> { %v1261_v62 = vadd.f32 %v1252_v33, %v1211_v59 }
 0x17a   : >> { %v1302_v36 = vpop.f32.mrf.mxu1 }
 0x17b   : >> { %v1311_v49 = vadd.f32 %v1302_v36, %v1261_v62 }
 0x17e   : >> { %v1352_v39 = vpop.f32.mrf.mxu2 }
 0x17f   : >> { %v1361_v10 = vadd.f32 %v1352_v39, %v1311_v49 }
 0x180   : >> { %v1402_v30 = vpop.f32.mrf.mxu3  ;;  %v1255_v42 = vpop.f32.mrf.mxu0 }
 0x181   : >> { %v1262_v56 = vadd.f32 %v1255_v42, %v1212_v53  ;;  %v1411_v15 = vadd.f32 %v1402_v30, %v1361_v10 }
 0x182   : >> { %v1305_v48 = vpop.f32.mrf.mxu1 }
 0x183   : >> { %v1312_v60 = vadd.f32 %v1305_v48, %v1262_v56 }
 0x186   : >> { %v1355_v52 = vpop.f32.mrf.mxu2 }
 0x187   : >> { %v1362_v0 = vadd.f32 %v1355_v52, %v1312_v60 }
 0x188   : >> { %v1405_v40 = vpop.f32.mrf.mxu3  ;;  %v1258_v57 = vpop.f32.mrf.mxu0 }
 0x189   : >> { %v1263_v61 = vadd.f32 %v1258_v57, %v1213_v58  ;;  %v1412_v4 = vadd.f32 %v1405_v40, %v1362_v0 }
 0x18a   : >> { %v1308_v63 = vpop.f32.mrf.mxu1 }
 0x18b   : >> { %v1313_v3 = vadd.f32 %v1308_v63, %v1263_v61 }
 0x18e   : >> { %v1358_v2 = vpop.f32.mrf.mxu2 }
 0x18f   : >> { %v1363_v6 = vadd.f32 %v1358_v2, %v1313_v3 }
 0x190   : >> { %v1408_v55 = vpop.f32.mrf.mxu3 }
 0x191   : >> { %v1413_v12 = vadd.f32 %v1408_v55, %v1363_v6 }
 0x198   : >> { %v1452_v9 = vpop.f32.mrf.mxu0 }
 0x199   : >> { %v1461_v19 = vadd.f32 %v1452_v9, %v1411_v15 }
 0x19b   : >> { %v1467_v24 = vadd.f32 %v1465_v14, %v1461_v19 }
 0x19e   : >> { %v1455_v1 = vpop.f32.mrf.mxu3 }
 0x19f   : >> { %v1462_v11 = vadd.f32 %v1455_v1, %v1412_v4 }
 0x1a1   : >> { %v1468_v13 = vadd.f32 %v1465_v14, %v1462_v11 }
 0x1a3   : >> { %v1473_v21 = vrot.slane %v1468_v13, 4 }
 0x1a6   : >> { %v1458_v17 = vpop.f32.mrf.mxu3 }
 0x1a7   : >> { %v1463_v18 = vadd.f32 %v1458_v17, %v1413_v12 }
 0x1a9   : >> { %v1469_v20 = vadd.f32 %v1465_v14, %v1463_v18 }
 0x1ab   : >> { %v1474_v23 = vrot.slane %v1469_v20, 4 }
 0x1ad   : >> { %v1475_v25 = vsel %vm1472_vm2, %v1473_v21, %v1474_v23 }
 0x1ae   : >> { %v1477_v26 = vmax.f32 %v1467_v24, %v1475_v25 }
 0x1b0   : >> { %1497 = vmatpush.msra.mxu1 %v1477_v26  ;;  %1520 = vmatpush.msra.mxu2 %v1477_v26 }
 0x1b1   : >> { %1773 = vmatmul.msk.f32.vlgmr.msra.gmra.mxu2 %vm1478_vm3, %v1985_v8  ;;  %1772 = vmatmul.msk.f32.vlgmr.msra.gmra.mxu1 %vm1478_vm3, %v1983_v7 }
 0x22e   : >> { %v1499_v27 = vpop.f32.mrf.mxu1 }
 0x234   : >> { %v1522_v28 = vpop.f32.mrf.mxu2 }
 0x235   : >> { %v1525_v29 = vmax.f32 %v1499_v27, %v1522_v28  ;;  %218 = sbr.rel (!%p216_p7) target bundleno = 27 (0x1b), region = 104 }
 0x237   : >> { %v1526_v16 = vmax.f32 %v1525_v29, 0.0 }
 0x239   : >> { %1529 = vst [vmem:[%s1528_s13] sm:$0xf] %v1526_v16 }
 0x23a PF: > { %s15_s12 = sadd.s32 1, %s1913_s12  }
 0x23b   : > { %p12_p8 = scmp.ge.s32.totalorder %s15_s12, 4  }
 0x23d   :  { %14 = sbr.rel (!%p12_p8) target bundleno = 2 (0x2), region = 115 }
 0x242   :  { %1551 = vsyncpa [#allocation3], 1 }
 0x243   :  { %1553 = vsyncpa [#allocation3 + $0x1], 1 }
 0x244   :  { %1554 = vsyncpa [#allocation5], 1 }

// kernel: net_forward.5
= control target key start
LH: loop header
LB: loop body
LE: loop exit
PB: predicated region body
PF: predicated region fallthrough
CT: control target
= control target key end

     0   :  { %10 = vsyncpa [#allocation4], 0  ;;  %s1666_s0 = inlined_call_operand.vmem [shape: f32[2,2048], index: 0, kind: input, shape index: {}]   ;;  %s1667_s1 = inlined_call_operand.hbm [shape: f32[2048,256], index: 1, kind: input, shape index: {}]   ;;  %s1668_s2 = inlined_call_operand.hbm [shape: f32[1,256], index: 2, kind: input, shape index: {}]   ;;  %s1669_s3 = inlined_call_operand.hbm [shape: f32[256,128], index: 3, kind: input, shape index: {}]   ;;  %s1670_s4 = inlined_call_operand.hbm [shape: f32[1,128], index: 4, kind: input, shape index: {}]   ;;  %s1671_s5 = inlined_call_operand.hbm [shape: f32[2,128], index: 5, kind: output, shape index: {}]  }
   0x1   :  { %11 = vsyncpa [#allocation7], 0 }
   0x2   :  { %12 = vsyncpa [#allocation10], 0  ;;  %s34_s20 = sshll.u32 %s1668_s2, 4  ;;  %s35_s20 = int_to_ptr.hbm [resolvable:$true] %s34_s20 }
   0x3   :  { %13 = vsyncpa [#allocation5], 0  ;;  %s1541_s21 = smov [#allocation6]   ;;  %s20_s25 = sshll.u32 %s1667_s1, 4  ;;  %s21_s25 = int_to_ptr.hbm [resolvable:$true] %s20_s25 }
   0x4   :  { %s36_s22 = sshll.u32 %s1541_s21, 4  ;;  %s1542_s26 = smov [#allocation3]   ;;  %s37_s22 = int_to_ptr.vmem [resolvable:$true] %s36_s22 }
   0x5   :  { %39 = dma.hbm_to_vmem [thread:$0]  %s35_s20, 32, %s37_s22, [#allocation7]  }
   0x6   :  { %s22_s27 = sshll.u32 %s1542_s26, 4  ;;  %s1543_s28 = smov 256   ;;  %s23_s27 = int_to_ptr.vmem [resolvable:$true] %s22_s27 }
   0x7   :  { %s1544_s29 = smov 16   ;;  %s44_s2 = sshll.u32 %s1669_s3, 4  ;;  %s45_s2 = int_to_ptr.hbm [resolvable:$true] %s44_s2 }
   0x8   :  { %28 = dma.hbm_to_vmem [thread:$0]  %s21_s25, 65536, %s23_s27, [#allocation4], %s1543_s28, %s1543_s28, %s1544_s29  }
   0x9   :  { %s1545_s7 = smov [#allocation8]   ;;  %s58_s1 = sshll.u32 %s1670_s4, 4  ;;  %s59_s1 = int_to_ptr.hbm [resolvable:$true] %s58_s1 }
   0xa   :  { %s46_s8 = sshll.u32 %s1545_s7, 4  ;;  %s1546_s11 = smov 128   ;;  %s47_s8 = int_to_ptr.vmem [resolvable:$true] %s46_s8 }
   0xb   :  { %s1547_s12 = smov 8   ;;  %s1548_s13 = smov [#allocation9]  }
   0xc   :  { %52 = dma.hbm_to_vmem [thread:$0]  %s45_s2, 4096, %s47_s8, [#allocation7], %s1546_s11, %s1546_s11, %s1547_s12  }
   0xd   :  { %s60_s14 = sshll.u32 %s1548_s13, 4  ;;  %s61_s14 = int_to_ptr.vmem [resolvable:$true] %s60_s14 }
   0xe   :  { %63 = dma.hbm_to_vmem [thread:$0]  %s59_s1, 16, %s61_s14, [#allocation10]  }
   0xf   :  { %1533 = dma.done.wait [#allocation4], 65536  }
  0x10   :  { %1534 = vsyncadd [#allocation4], 4294901760 }
  0x11   :  { %1535 = dma.done.wait [#allocation7], 4128  }
  0x12   :  { %1536 = vsyncadd [#allocation7], 4294963168 }
  0x13   :  { %1537 = dma.done.wait [#allocation10], 16  }
  0x14   :  { %1538 = vsyncadd [#allocation10], 4294967280  ;;  %v114_v0 = vld [vmem:[#allocation3 + $0xf0] sm:$0xff]  ;;  %v112_v2 = vld [vmem:[#allocation3 + $0xe0] sm:$0xff]  ;;  %vm1288_vm0 = vcmask 1041408   ;;  %s1383_s24 = sshll.u32 %s1671_s5, 4  ;;  %s1384_s24 = int_to_ptr.hbm [resolvable:$true] %s1383_s24 }
  0x15   :  { %v178_v1 = vld [vmem:[#allocation3 + $0x2f0] sm:$0xff]  ;;  %643 = vmatpush.msra.mxu0 %v114_v0  ;;  %v176_v4 = vld [vmem:[#allocation3 + $0x2e0] sm:$0xff] }
  0x16   :  { %683 = vmatpush.msra.mxu2 %v178_v1  ;;  %v146_v3 = vld [vmem:[#allocation3 + $0x1f0] sm:$0xff]  ;;  %v144_v7 = vld [vmem:[#allocation3 + $0x1e0] sm:$0xff] }
  0x17   :  { %v210_v5 = vld [vmem:[#allocation3 + $0x3f0] sm:$0xff]  ;;  %663 = vmatpush.msra.mxu1 %v146_v3  ;;  %644 = vmatpush.msra.mxu0 %v112_v2  ;;  %v208_v9 = vld [vmem:[#allocation3 + $0x3e0] sm:$0xff] }
  0x18   :  { %703 = vmatpush.msra.mxu3 %v210_v5  ;;  %v110_v6 = vld [vmem:[#allocation3 + $0xd0] sm:$0xff]  ;;  %684 = vmatpush.msra.mxu2 %v176_v4  ;;  %v108_v11 = vld [vmem:[#allocation3 + $0xc0] sm:$0xff] }
  0x19   :  { %v174_v8 = vld [vmem:[#allocation3 + $0x2d0] sm:$0xff]  ;;  %664 = vmatpush.msra.mxu1 %v144_v7  ;;  %v172_v12 = vld [vmem:[#allocation3 + $0x2c0] sm:$0xff]  ;;  %645 = vmatpush.msra.mxu0 %v110_v6 }
  0x1a   :  { %v142_v10 = vld [vmem:[#allocation3 + $0x1d0] sm:$0xff]  ;;  %704 = vmatpush.msra.mxu3 %v208_v9  ;;  %685 = vmatpush.msra.mxu2 %v174_v8  ;;  %v140_v14 = vld [vmem:[#allocation3 + $0x1c0] sm:$0xff] }
  0x1b   :  { %v206_v13 = vld [vmem:[#allocation3 + $0x3d0] sm:$0xff]  ;;  %v204_v15 = vld [vmem:[#allocation3 + $0x3c0] sm:$0xff]  ;;  %665 = vmatpush.msra.mxu1 %v142_v10  ;;  %646 = vmatpush.msra.mxu0 %v108_v11 }
  0x1c   :  { %705 = vmatpush.msra.mxu3 %v206_v13  ;;  %v106_v16 = vld [vmem:[#allocation3 + $0xb0] sm:$0xff]  ;;  %686 = vmatpush.msra.mxu2 %v172_v12  ;;  %v104_v20 = vld [vmem:[#allocation3 + $0xa0] sm:$0xff] }
  0x1d   :  { %v170_v17 = vld [vmem:[#allocation3 + $0x2b0] sm:$0xff]  ;;  %666 = vmatpush.msra.mxu1 %v140_v14  ;;  %v168_v21 = vld [vmem:[#allocation3 + $0x2a0] sm:$0xff]  ;;  %647 = vmatpush.msra.mxu0 %v106_v16 }
  0x1e   :  { %v138_v18 = vld [vmem:[#allocation3 + $0x1b0] sm:$0xff]  ;;  %706 = vmatpush.msra.mxu3 %v204_v15  ;;  %687 = vmatpush.msra.mxu2 %v170_v17  ;;  %v136_v22 = vld [vmem:[#allocation3 + $0x1a0] sm:$0xff] }
  0x1f   :  { %v202_v19 = vld [vmem:[#allocation3 + $0x3b0] sm:$0xff]  ;;  %v200_v23 = vld [vmem:[#allocation3 + $0x3a0] sm:$0xff]  ;;  %667 = vmatpush.msra.mxu1 %v138_v18  ;;  %648 = vmatpush.msra.mxu0 %v104_v20 }
  0x20   :  { %707 = vmatpush.msra.mxu3 %v202_v19  ;;  %v102_v24 = vld [vmem:[#allocation3 + $0x90] sm:$0xff]  ;;  %688 = vmatpush.msra.mxu2 %v168_v21  ;;  %v100_v28 = vld [vmem:[#allocation3 + $0x80] sm:$0xff] }
  0x21   :  { %v166_v25 = vld [vmem:[#allocation3 + $0x290] sm:$0xff]  ;;  %668 = vmatpush.msra.mxu1 %v136_v22  ;;  %v164_v29 = vld [vmem:[#allocation3 + $0x280] sm:$0xff]  ;;  %649 = vmatpush.msra.mxu0 %v102_v24 }
  0x22   :  { %v134_v26 = vld [vmem:[#allocation3 + $0x190] sm:$0xff]  ;;  %708 = vmatpush.msra.mxu3 %v200_v23  ;;  %689 = vmatpush.msra.mxu2 %v166_v25  ;;  %v132_v30 = vld [vmem:[#allocation3 + $0x180] sm:$0xff] }
  0x23   :  { %v198_v27 = vld [vmem:[#allocation3 + $0x390] sm:$0xff]  ;;  %v196_v31 = vld [vmem:[#allocation3 + $0x380] sm:$0xff]  ;;  %669 = vmatpush.msra.mxu1 %v134_v26  ;;  %650 = vmatpush.msra.mxu0 %v100_v28 }
  0x24   :  { %709 = vmatpush.msra.mxu3 %v198_v27  ;;  %v98_v32 = vld [vmem:[#allocation3 + $0x70] sm:$0xff]  ;;  %690 = vmatpush.msra.mxu2 %v164_v29  ;;  %v96_v36 = vld [vmem:[#allocation3 + $0x60] sm:$0xff] }
  0x25   :  { %v162_v33 = vld [vmem:[#allocation3 + $0x270] sm:$0xff]  ;;  %670 = vmatpush.msra.mxu1 %v132_v30  ;;  %v160_v37 = vld [vmem:[#allocation3 + $0x260] sm:$0xff]  ;;  %651 = vmatpush.msra.mxu0 %v98_v32 }
  0x26   :  { %v130_v34 = vld [vmem:[#allocation3 + $0x170] sm:$0xff]  ;;  %710 = vmatpush.msra.mxu3 %v196_v31  ;;  %691 = vmatpush.msra.mxu2 %v162_v33  ;;  %v128_v38 = vld [vmem:[#allocation3 + $0x160] sm:$0xff] }
  0x27   :  { %v194_v35 = vld [vmem:[#allocation3 + $0x370] sm:$0xff]  ;;  %v192_v39 = vld [vmem:[#allocation3 + $0x360] sm:$0xff]  ;;  %671 = vmatpush.msra.mxu1 %v130_v34  ;;  %652 = vmatpush.msra.mxu0 %v96_v36 }
  0x28   :  { %711 = vmatpush.msra.mxu3 %v194_v35  ;;  %v94_v40 = vld [vmem:[#allocation3 + $0x50] sm:$0xff]  ;;  %692 = vmatpush.msra.mxu2 %v160_v37  ;;  %v92_v44 = vld [vmem:[#allocation3 + $0x40] sm:$0xff] }
  0x29   :  { %v158_v41 = vld [vmem:[#allocation3 + $0x250] sm:$0xff]  ;;  %672 = vmatpush.msra.mxu1 %v128_v38  ;;  %v156_v45 = vld [vmem:[#allocation3 + $0x240] sm:$0xff]  ;;  %653 = vmatpush.msra.mxu0 %v94_v40 }
  0x2a   :  { %v126_v42 = vld [vmem:[#allocation3 + $0x150] sm:$0xff]  ;;  %712 = vmatpush.msra.mxu3 %v192_v39  ;;  %693 = vmatpush.msra.mxu2 %v158_v41  ;;  %v124_v46 = vld [vmem:[#allocation3 + $0x140] sm:$0xff] }
  0x2b   :  { %v190_v43 = vld [vmem:[#allocation3 + $0x350] sm:$0xff]  ;;  %v188_v47 = vld [vmem:[#allocation3 + $0x340] sm:$0xff]  ;;  %673 = vmatpush.msra.mxu1 %v126_v42  ;;  %654 = vmatpush.msra.mxu0 %v92_v44 }
  0x2c   :  { %713 = vmatpush.msra.mxu3 %v190_v43  ;;  %v90_v48 = vld [vmem:[#allocation3 + $0x30] sm:$0xff]  ;;  %694 = vmatpush.msra.mxu2 %v156_v45  ;;  %v88_v52 = vld [vmem:[#allocation3 + $0x20] sm:$0xff] }
  0x2d   :  { %v154_v49 = vld [vmem:[#allocation3 + $0x230] sm:$0xff]  ;;  %674 = vmatpush.msra.mxu1 %v124_v46  ;;  %v152_v53 = vld [vmem:[#allocation3 + $0x220] sm:$0xff]  ;;  %655 = vmatpush.msra.mxu0 %v90_v48 }
  0x2e   :  { %v122_v50 = vld [vmem:[#allocation3 + $0x130] sm:$0xff]  ;;  %714 = vmatpush.msra.mxu3 %v188_v47  ;;  %695 = vmatpush.msra.mxu2 %v154_v49  ;;  %v120_v54 = vld [vmem:[#allocation3 + $0x120] sm:$0xff] }
  0x2f   :  { %v186_v51 = vld [vmem:[#allocation3 + $0x330] sm:$0xff]  ;;  %v184_v55 = vld [vmem:[#allocation3 + $0x320] sm:$0xff]  ;;  %675 = vmatpush.msra.mxu1 %v122_v50  ;;  %656 = vmatpush.msra.mxu0 %v88_v52 }
  0x30   :  { %715 = vmatpush.msra.mxu3 %v186_v51  ;;  %v86_v56 = vld [vmem:[#allocation3 + $0x10] sm:$0xff]  ;;  %696 = vmatpush.msra.mxu2 %v152_v53  ;;  %v84_v60 = vld [vmem:[#allocation3] sm:$0xff] }
  0x31   :  { %v150_v57 = vld [vmem:[#allocation3 + $0x210] sm:$0xff]  ;;  %676 = vmatpush.msra.mxu1 %v120_v54  ;;  %v148_v61 = vld [vmem:[#allocation3 + $0x200] sm:$0xff]  ;;  %657 = vmatpush.msra.mxu0 %v86_v56 }
  0x32   :  { %v118_v58 = vld [vmem:[#allocation3 + $0x110] sm:$0xff]  ;;  %716 = vmatpush.msra.mxu3 %v184_v55  ;;  %697 = vmatpush.msra.mxu2 %v150_v57  ;;  %v116_v0 = vld [vmem:[#allocation3 + $0x100] sm:$0xff] }
  0x33   :  { %v182_v59 = vld [vmem:[#allocation3 + $0x310] sm:$0xff]  ;;  %677 = vmatpush.msra.mxu1 %v118_v58  ;;  %v180_v1 = vld [vmem:[#allocation3 + $0x300] sm:$0xff]  ;;  %658 = vmatpush.msra.mxu0 %v84_v60 }
  0x34   :  { %v242_v62 = vld [vmem:[#allocation3 + $0x4f0] sm:$0xff]  ;;  %717 = vmatpush.msra.mxu3 %v182_v59  ;;  %698 = vmatpush.msra.mxu2 %v148_v61  ;;  %v240_v2 = vld [vmem:[#allocation3 + $0x4e0] sm:$0xff] }
  0x35   :  { %v306_v63 = vld [vmem:[#allocation3 + $0x6f0] sm:$0xff]  ;;  %723 = vmatpush.msrb.mxu0 %v242_v62  ;;  %v304_v4 = vld [vmem:[#allocation3 + $0x6e0] sm:$0xff]  ;;  %678 = vmatpush.msra.mxu1 %v116_v0 }
  0x36   :  { %v274_v3 = vld [vmem:[#allocation3 + $0x5f0] sm:$0xff]  ;;  %763 = vmatpush.msrb.mxu2 %v306_v63  ;;  %718 = vmatpush.msra.mxu3 %v180_v1  ;;  %v272_v7 = vld [vmem:[#allocation3 + $0x5e0] sm:$0xff] }
  0x37   :  { %v338_v5 = vld [vmem:[#allocation3 + $0x7f0] sm:$0xff]  ;;  %724 = vmatpush.msrb.mxu0 %v240_v2  ;;  %743 = vmatpush.msrb.mxu1 %v274_v3  ;;  %v336_v9 = vld [vmem:[#allocation3 + $0x7e0] sm:$0xff] }
  0x38   :  { %v238_v6 = vld [vmem:[#allocation3 + $0x4d0] sm:$0xff]  ;;  %764 = vmatpush.msrb.mxu2 %v304_v4  ;;  %783 = vmatpush.msrb.mxu3 %v338_v5  ;;  %v236_v10 = vld [vmem:[#allocation3 + $0x4c0] sm:$0xff] }
  0x39   :  { %v302_v8 = vld [vmem:[#allocation3 + $0x6d0] sm:$0xff]  ;;  %725 = vmatpush.msrb.mxu0 %v238_v6  ;;  %744 = vmatpush.msrb.mxu1 %v272_v7  ;;  %v300_v12 = vld [vmem:[#allocation3 + $0x6c0] sm:$0xff] }
  0x3a   :  { %v270_v11 = vld [vmem:[#allocation3 + $0x5d0] sm:$0xff]  ;;  %765 = vmatpush.msrb.mxu2 %v302_v8  ;;  %784 = vmatpush.msrb.mxu3 %v336_v9  ;;  %v268_v15 = vld [vmem:[#allocation3 + $0x5c0] sm:$0xff] }
  0x3b   :  { %v334_v13 = vld [vmem:[#allocation3 + $0x7d0] sm:$0xff]  ;;  %726 = vmatpush.msrb.mxu0 %v236_v10  ;;  %745 = vmatpush.msrb.mxu1 %v270_v11  ;;  %v332_v17 = vld [vmem:[#allocation3 + $0x7c0] sm:$0xff] }
  0x3c   :  { %v234_v14 = vld [vmem:[#allocation3 + $0x4b0] sm:$0xff]  ;;  %766 = vmatpush.msrb.mxu2 %v300_v12  ;;  %785 = vmatpush.msrb.mxu3 %v334_v13  ;;  %v232_v18 = vld [vmem:[#allocation3 + $0x4a0] sm:$0xff] }
  0x3d   :  { %v298_v16 = vld [vmem:[#allocation3 + $0x6b0] sm:$0xff]  ;;  %727 = vmatpush.msrb.mxu0 %v234_v14  ;;  %746 = vmatpush.msrb.mxu1 %v268_v15  ;;  %v296_v20 = vld [vmem:[#allocation3 + $0x6a0] sm:$0xff] }
  0x3e   :  { %v266_v19 = vld [vmem:[#allocation3 + $0x5b0] sm:$0xff]  ;;  %767 = vmatpush.msrb.mxu2 %v298_v16  ;;  %786 = vmatpush.msrb.mxu3 %v332_v17  ;;  %v264_v23 = vld [vmem:[#allocation3 + $0x5a0] sm:$0xff] }
  0x3f   :  { %v330_v21 = vld [vmem:[#allocation3 + $0x7b0] sm:$0xff]  ;;  %728 = vmatpush.msrb.mxu0 %v232_v18  ;;  %747 = vmatpush.msrb.mxu1 %v266_v19  ;;  %v328_v25 = vld [vmem:[#allocation3 + $0x7a0] sm:$0xff] }
  0x40   :  { %v230_v22 = vld [vmem:[#allocation3 + $0x490] sm:$0xff]  ;;  %768 = vmatpush.msrb.mxu2 %v296_v20  ;;  %787 = vmatpush.msrb.mxu3 %v330_v21  ;;  %v228_v27 = vld [vmem:[#allocation3 + $0x480] sm:$0xff] }
  0x41   :  { %v294_v24 = vld [vmem:[#allocation3 + $0x690] sm:$0xff]  ;;  %729 = vmatpush.msrb.mxu0 %v230_v22  ;;  %748 = vmatpush.msrb.mxu1 %v264_v23  ;;  %v292_v29 = vld [vmem:[#allocation3 + $0x680] sm:$0xff] }
  0x42   :  { %v80_v26 = vld [vmem:[%s1666_s0] sm:$0xff]  ;;  %769 = vmatpush.msrb.mxu2 %v294_v24  ;;  %788 = vmatpush.msrb.mxu3 %v328_v25  ;;  %v260_v32 = vld [vmem:[#allocation3 + $0x580] sm:$0xff]  ;;  %v83_v63 = vld [vmem:[%s1666_s0 + $0x18] sm:$0xff] }
  0x43   :  { %v262_v28 = vld [vmem:[#allocation3 + $0x590] sm:$0xff]  ;;  %606 = vst [vmem:[#allocation1] ss:$4 sm:$0xff] %v80_v26  ;;  %v324_v34 = vld [vmem:[#allocation3 + $0x780] sm:$0xff]  ;;  %730 = vmatpush.msrb.mxu0 %v228_v27 }
  0x44   :  { %v326_v30 = vld [vmem:[#allocation3 + $0x790] sm:$0xff]  ;;  %749 = vmatpush.msrb.mxu1 %v262_v28  ;;  %v224_v35 = vld [vmem:[#allocation3 + $0x460] sm:$0xff]  ;;  %770 = vmatpush.msrb.mxu2 %v292_v29 }
  0x45   :  { %v226_v31 = vld [vmem:[#allocation3 + $0x470] sm:$0xff]  ;;  %v288_v37 = vld [vmem:[#allocation3 + $0x660] sm:$0xff]  ;;  %789 = vmatpush.msrb.mxu3 %v326_v30 }
  0x46   :  { %v290_v33 = vld [vmem:[#allocation3 + $0x670] sm:$0xff]  ;;  %v256_v40 = vld [vmem:[#allocation3 + $0x560] sm:$0xff]  ;;  %731 = vmatpush.msrb.mxu0 %v226_v31  ;;  %750 = vmatpush.msrb.mxu1 %v260_v32 }
  0x47   :  { %v258_v36 = vld [vmem:[#allocation3 + $0x570] sm:$0xff]  ;;  %v320_v42 = vld [vmem:[#allocation3 + $0x760] sm:$0xff]  ;;  %771 = vmatpush.msrb.mxu2 %v290_v33  ;;  %790 = vmatpush.msrb.mxu3 %v324_v34 }
  0x48   :  { %v322_v38 = vld [vmem:[#allocation3 + $0x770] sm:$0xff]  ;;  %v81_v43 = vld [vmem:[%s1666_s0 + $0x8] sm:$0xff]  ;;  %v82_v46 = vld [vmem:[%s1666_s0 + $0x10] sm:$0xff]  ;;  %732 = vmatpush.msrb.mxu0 %v224_v35  ;;  %751 = vmatpush.msrb.mxu1 %v258_v36  ;;  %s1549_s0 = smov [#allocation11]  }
  0x49   :  { %v222_v39 = vld [vmem:[#allocation3 + $0x450] sm:$0xff]  ;;  %v220_v44 = vld [vmem:[#allocation3 + $0x440] sm:$0xff]  ;;  %608 = vst [vmem:[#allocation1 + $0x20] ss:$4 sm:$0xff] %v81_v43  ;;  %772 = vmatpush.msrb.mxu2 %v288_v37  ;;  %791 = vmatpush.msrb.mxu3 %v322_v38  ;;  %s1381_s21 = sshll.u32 %s1549_s0, 4  ;;  %s1382_s21 = int_to_ptr.vmem [resolvable:$true] %s1381_s21 }
  0x4a   :  { %v286_v41 = vld [vmem:[#allocation3 + $0x650] sm:$0xff]  ;;  %v284_v47 = vld [vmem:[#allocation3 + $0x640] sm:$0xff]  ;;  %733 = vmatpush.msrb.mxu0 %v222_v39  ;;  %752 = vmatpush.msrb.mxu1 %v256_v40 }
  0x4b   :  { %v254_v45 = vld [vmem:[#allocation3 + $0x550] sm:$0xff]  ;;  %v1603_v49 = vld.sshfl [vmem:[#allocation1 + $0x10] sm:$0xff pattern:$0x73625140]  ;;  %773 = vmatpush.msrb.mxu2 %v286_v41  ;;  %792 = vmatpush.msrb.mxu3 %v320_v42 }
  0x4c   :  { %v1601_v48 = vld.sshfl [vmem:[#allocation1] sm:$0xff pattern:$0x73625140]  ;;  %v1605_v50 = vld.sshfl [vmem:[#allocation1 + $0x8] sm:$0xff pattern:$0x73625140]  ;;  %734 = vmatpush.msrb.mxu0 %v220_v44  ;;  %753 = vmatpush.msrb.mxu1 %v254_v45 }
  0x4d   :  { %v1607_v51 = vld.sshfl [vmem:[#allocation1 + $0x18] sm:$0xff pattern:$0x73625140]  ;;  %v252_v54 = vld [vmem:[#allocation3 + $0x540] sm:$0xff]  ;;  %774 = vmatpush.msrb.mxu2 %v284_v47  ;;  %659 = vmatmul.f32.vlgmr.msra.gmra.mxu0 %v1601_v48 }
  0x4e   :  { %v318_v52 = vld [vmem:[#allocation3 + $0x750] sm:$0xff]  ;;  %617 = vst [vmem:[#allocation1] ss:$4 sm:$0xff] %v82_v46  ;;  %v316_v56 = vld [vmem:[#allocation3 + $0x740] sm:$0xff]  ;;  %754 = vmatpush.msrb.mxu1 %v252_v54  ;;  %699 = vmatmul.f32.vlgmr.msra.gmra.mxu2 %v1603_v49 }
  0x4f   :  { %v218_v53 = vld [vmem:[#allocation3 + $0x430] sm:$0xff]  ;;  %v216_v57 = vld [vmem:[#allocation3 + $0x420] sm:$0xff]  ;;  %793 = vmatpush.msrb.mxu3 %v318_v52  ;;  %679 = vmatmul.f32.vlgmr.msra.gmra.mxu1 %v1605_v50 }
  0x50   :  { %v282_v55 = vld [vmem:[#allocation3 + $0x630] sm:$0xff]  ;;  %v280_v59 = vld [vmem:[#allocation3 + $0x620] sm:$0xff]  ;;  %735 = vmatpush.msrb.mxu0 %v218_v53  ;;  %719 = vmatmul.f32.vlgmr.msra.gmra.mxu3 %v1607_v51 }
  0x51   :  { %v250_v58 = vld [vmem:[#allocation3 + $0x530] sm:$0xff]  ;;  %v248_v62 = vld [vmem:[#allocation3 + $0x520] sm:$0xff]  ;;  %775 = vmatpush.msrb.mxu2 %v282_v55  ;;  %794 = vmatpush.msrb.mxu3 %v316_v56 }
  0x52   :  { %v314_v60 = vld [vmem:[#allocation3 + $0x730] sm:$0xff]  ;;  %v1612_v0 = vld.sshfl [vmem:[#allocation1 + $0x30] sm:$0xff pattern:$0x73625140]  ;;  %736 = vmatpush.msrb.mxu0 %v216_v57  ;;  %755 = vmatpush.msrb.mxu1 %v250_v58 }
  0x53   :  { %v214_v61 = vld [vmem:[#allocation3 + $0x410] sm:$0xff]  ;;  %v1618_v3 = vld.sshfl [vmem:[#allocation1 + $0x28] sm:$0xff pattern:$0x73625140]  ;;  %776 = vmatpush.msrb.mxu2 %v280_v59  ;;  %795 = vmatpush.msrb.mxu3 %v314_v60 }
  0x54   :  { %v1614_v1 = vld.sshfl [vmem:[#allocation1 + $0x20] sm:$0xff pattern:$0x73625140]  ;;  %v1616_v2 = vld.sshfl [vmem:[#allocation1 + $0x38] sm:$0xff pattern:$0x73625140]  ;;  %737 = vmatpush.msrb.mxu0 %v214_v61  ;;  %756 = vmatpush.msrb.mxu1 %v248_v62 }
  0x55   :  { %v278_v4 = vld [vmem:[#allocation3 + $0x610] sm:$0xff]  ;;  %v312_v5 = vld [vmem:[#allocation3 + $0x720] sm:$0xff]  ;;  %618 = vst [vmem:[#allocation1 + $0x20] ss:$4 sm:$0xff] %v83_v63 }
  0x56   :  { %v212_v6 = vld [vmem:[#allocation3 + $0x400] sm:$0xff]  ;;  %v246_v7 = vld [vmem:[#allocation3 + $0x510] sm:$0xff]  ;;  %777 = vmatpush.msrb.mxu2 %v278_v4  ;;  %796 = vmatpush.msrb.mxu3 %v312_v5 }
  0x57   :  { %v276_v8 = vld [vmem:[#allocation3 + $0x600] sm:$0xff]  ;;  %v310_v9 = vld [vmem:[#allocation3 + $0x710] sm:$0xff]  ;;  %738 = vmatpush.msrb.mxu0 %v212_v6  ;;  %757 = vmatpush.msrb.mxu1 %v246_v7 }
  0x58   :  { %v370_v10 = vld [vmem:[#allocation3 + $0x8f0] sm:$0xff]  ;;  %778 = vmatpush.msrb.mxu2 %v276_v8  ;;  %797 = vmatpush.msrb.mxu3 %v310_v9  ;;  %v244_v12 = vld [vmem:[#allocation3 + $0x500] sm:$0xff] }
  0x59   :  { %v434_v11 = vld [vmem:[#allocation3 + $0xaf0] sm:$0xff]  ;;  %v308_v13 = vld [vmem:[#allocation3 + $0x700] sm:$0xff]  ;;  %803 = vmatpush.msra.mxu0 %v370_v10  ;;  %758 = vmatpush.msrb.mxu1 %v244_v12 }
  0x5a   :  { %843 = vmatpush.msra.mxu2 %v434_v11  ;;  %v368_v14 = vld [vmem:[#allocation3 + $0x8e0] sm:$0xff]  ;;  %v402_v15 = vld [vmem:[#allocation3 + $0x9f0] sm:$0xff]  ;;  %798 = vmatpush.msrb.mxu3 %v308_v13 }
  0x5b   :  { %v432_v16 = vld [vmem:[#allocation3 + $0xae0] sm:$0xff]  ;;  %v466_v17 = vld [vmem:[#allocation3 + $0xbf0] sm:$0xff]  ;;  %804 = vmatpush.msra.mxu0 %v368_v14  ;;  %823 = vmatpush.msra.mxu1 %v402_v15 }
  0x5c   :  { %v366_v18 = vld [vmem:[#allocation3 + $0x8d0] sm:$0xff]  ;;  %v400_v19 = vld [vmem:[#allocation3 + $0x9e0] sm:$0xff]  ;;  %844 = vmatpush.msra.mxu2 %v432_v16  ;;  %863 = vmatpush.msra.mxu3 %v466_v17 }
  0x5d   :  { %v430_v20 = vld [vmem:[#allocation3 + $0xad0] sm:$0xff]  ;;  %v464_v21 = vld [vmem:[#allocation3 + $0xbe0] sm:$0xff]  ;;  %805 = vmatpush.msra.mxu0 %v366_v18  ;;  %824 = vmatpush.msra.mxu1 %v400_v19 }
  0x5e   :  { %v364_v22 = vld [vmem:[#allocation3 + $0x8c0] sm:$0xff]  ;;  %v398_v23 = vld [vmem:[#allocation3 + $0x9d0] sm:$0xff]  ;;  %845 = vmatpush.msra.mxu2 %v430_v20  ;;  %864 = vmatpush.msra.mxu3 %v464_v21 }
  0x5f   :  { %v428_v24 = vld [vmem:[#allocation3 + $0xac0] sm:$0xff]  ;;  %v462_v25 = vld [vmem:[#allocation3 + $0xbd0] sm:$0xff]  ;;  %806 = vmatpush.msra.mxu0 %v364_v22  ;;  %825 = vmatpush.msra.mxu1 %v398_v23 }
  0x60   :  { %v362_v26 = vld [vmem:[#allocation3 + $0x8b0] sm:$0xff]  ;;  %v396_v27 = vld [vmem:[#allocation3 + $0x9c0] sm:$0xff]  ;;  %846 = vmatpush.msra.mxu2 %v428_v24  ;;  %865 = vmatpush.msra.mxu3 %v462_v25 }
  0x61   :  { %v426_v28 = vld [vmem:[#allocation3 + $0xab0] sm:$0xff]  ;;  %v460_v29 = vld [vmem:[#allocation3 + $0xbc0] sm:$0xff]  ;;  %779 = vmatmul.f32.vlgmr.msrb.gmra.mxu2 %v1612_v0  ;;  %807 = vmatpush.msra.mxu0 %v362_v26 }
  0x62   :  { %v360_v30 = vld [vmem:[#allocation3 + $0x8a0] sm:$0xff]  ;;  %826 = vmatpush.msra.mxu1 %v396_v27  ;;  %847 = vmatpush.msra.mxu2 %v426_v28  ;;  %v394_v31 = vld [vmem:[#allocation3 + $0x9b0] sm:$0xff] }
  0x63   :  { %v424_v32 = vld [vmem:[#allocation3 + $0xaa0] sm:$0xff]  ;;  %866 = vmatpush.msra.mxu3 %v460_v29  ;;  %739 = vmatmul.f32.vlgmr.msrb.gmra.mxu0 %v1614_v1  ;;  %v458_v33 = vld [vmem:[#allocation3 + $0xbb0] sm:$0xff] }
  0x64   :  { %799 = vmatmul.f32.vlgmr.msrb.gmra.mxu3 %v1616_v2  ;;  %808 = vmatpush.msra.mxu0 %v360_v30  ;;  %v358_v34 = vld [vmem:[#allocation3 + $0x890] sm:$0xff]  ;;  %v392_v35 = vld [vmem:[#allocation3 + $0x9a0] sm:$0xff] }
  0x65   :  { %827 = vmatpush.msra.mxu1 %v394_v31  ;;  %848 = vmatpush.msra.mxu2 %v424_v32  ;;  %v422_v36 = vld [vmem:[#allocation3 + $0xa90] sm:$0xff]  ;;  %v456_v37 = vld [vmem:[#allocation3 + $0xba0] sm:$0xff] }
  0x66   :  { %867 = vmatpush.msra.mxu3 %v458_v33  ;;  %759 = vmatmul.f32.vlgmr.msrb.gmra.mxu1 %v1618_v3  ;;  %v356_v38 = vld [vmem:[#allocation3 + $0x880] sm:$0xff]  ;;  %v390_v39 = vld [vmem:[#allocation3 + $0x990] sm:$0xff] }
  0x67   :  { %809 = vmatpush.msra.mxu0 %v358_v34  ;;  %828 = vmatpush.msra.mxu1 %v392_v35  ;;  %v420_v40 = vld [vmem:[#allocation3 + $0xa80] sm:$0xff]  ;;  %v454_v41 = vld [vmem:[#allocation3 + $0xb90] sm:$0xff] }
  0x68   :  { %849 = vmatpush.msra.mxu2 %v422_v36  ;;  %868 = vmatpush.msra.mxu3 %v456_v37  ;;  %v354_v42 = vld [vmem:[#allocation3 + $0x870] sm:$0xff]  ;;  %v388_v43 = vld [vmem:[#allocation3 + $0x980] sm:$0xff] }
  0x69   :  { %810 = vmatpush.msra.mxu0 %v356_v38  ;;  %829 = vmatpush.msra.mxu1 %v390_v39  ;;  %v418_v44 = vld [vmem:[#allocation3 + $0xa70] sm:$0xff]  ;;  %v452_v45 = vld [vmem:[#allocation3 + $0xb80] sm:$0xff] }
  0x6a   :  { %850 = vmatpush.msra.mxu2 %v420_v40  ;;  %869 = vmatpush.msra.mxu3 %v454_v41  ;;  %v352_v46 = vld [vmem:[#allocation3 + $0x860] sm:$0xff]  ;;  %v386_v47 = vld [vmem:[#allocation3 + $0x970] sm:$0xff] }
  0x6b   :  { %811 = vmatpush.msra.mxu0 %v354_v42  ;;  %830 = vmatpush.msra.mxu1 %v388_v43  ;;  %v416_v52 = vld [vmem:[#allocation3 + $0xa60] sm:$0xff]  ;;  %v450_v53 = vld [vmem:[#allocation3 + $0xb70] sm:$0xff] }
  0x6c   :  { %851 = vmatpush.msra.mxu2 %v418_v44  ;;  %870 = vmatpush.msra.mxu3 %v452_v45  ;;  %v350_v54 = vld [vmem:[#allocation3 + $0x850] sm:$0xff]  ;;  %v384_v55 = vld [vmem:[#allocation3 + $0x960] sm:$0xff] }
  0x6d   :  { %812 = vmatpush.msra.mxu0 %v352_v46  ;;  %831 = vmatpush.msra.mxu1 %v386_v47  ;;  %v414_v56 = vld [vmem:[#allocation3 + $0xa50] sm:$0xff]  ;;  %v448_v57 = vld [vmem:[#allocation3 + $0xb60] sm:$0xff] }
  0x6e   :  { %852 = vmatpush.msra.mxu2 %v416_v52  ;;  %871 = vmatpush.msra.mxu3 %v450_v53  ;;  %v348_v58 = vld [vmem:[#allocation3 + $0x840] sm:$0xff]  ;;  %v382_v59 = vld [vmem:[#allocation3 + $0x950] sm:$0xff] }
  0x6f   :  { %813 = vmatpush.msra.mxu0 %v350_v54  ;;  %832 = vmatpush.msra.mxu1 %v384_v55  ;;  %v412_v60 = vld [vmem:[#allocation3 + $0xa40] sm:$0xff]  ;;  %v446_v61 = vld [vmem:[#allocation3 + $0xb50] sm:$0xff] }
  0x70   :  { %853 = vmatpush.msra.mxu2 %v414_v56  ;;  %872 = vmatpush.msra.mxu3 %v448_v57  ;;  %v346_v62 = vld [vmem:[#allocation3 + $0x830] sm:$0xff]  ;;  %v380_v63 = vld [vmem:[#allocation3 + $0x940] sm:$0xff] }
  0x71   :  { %814 = vmatpush.msra.mxu0 %v348_v58  ;;  %833 = vmatpush.msra.mxu1 %v382_v59  ;;  %v410_v4 = vld [vmem:[#allocation3 + $0xa30] sm:$0xff]  ;;  %v444_v5 = vld [vmem:[#allocation3 + $0xb40] sm:$0xff] }
  0x72   :  { %854 = vmatpush.msra.mxu2 %v412_v60  ;;  %873 = vmatpush.msra.mxu3 %v446_v61  ;;  %v344_v6 = vld [vmem:[#allocation3 + $0x820] sm:$0xff]  ;;  %v378_v7 = vld [vmem:[#allocation3 + $0x930] sm:$0xff] }
  0x73   :  { %815 = vmatpush.msra.mxu0 %v346_v62  ;;  %834 = vmatpush.msra.mxu1 %v380_v63  ;;  %v408_v8 = vld [vmem:[#allocation3 + $0xa20] sm:$0xff]  ;;  %v442_v9 = vld [vmem:[#allocation3 + $0xb30] sm:$0xff] }
  0x74   :  { %855 = vmatpush.msra.mxu2 %v410_v4  ;;  %874 = vmatpush.msra.mxu3 %v444_v5  ;;  %v342_v10 = vld [vmem:[#allocation3 + $0x810] sm:$0xff]  ;;  %v376_v11 = vld [vmem:[#allocation3 + $0x920] sm:$0xff] }
  0x75   :  { %816 = vmatpush.msra.mxu0 %v344_v6  ;;  %835 = vmatpush.msra.mxu1 %v378_v7  ;;  %v406_v12 = vld [vmem:[#allocation3 + $0xa10] sm:$0xff]  ;;  %v440_v13 = vld [vmem:[#allocation3 + $0xb20] sm:$0xff] }
  0x76   :  { %856 = vmatpush.msra.mxu2 %v408_v8  ;;  %875 = vmatpush.msra.mxu3 %v442_v9  ;;  %v340_v14 = vld [vmem:[#allocation3 + $0x800] sm:$0xff]  ;;  %v374_v15 = vld [vmem:[#allocation3 + $0x910] sm:$0xff] }
  0x77   :  { %817 = vmatpush.msra.mxu0 %v342_v10  ;;  %836 = vmatpush.msra.mxu1 %v376_v11  ;;  %v404_v16 = vld [vmem:[#allocation3 + $0xa00] sm:$0xff]  ;;  %v438_v17 = vld [vmem:[#allocation3 + $0xb10] sm:$0xff] }
  0x78   :  { %857 = vmatpush.msra.mxu2 %v406_v12  ;;  %876 = vmatpush.msra.mxu3 %v440_v13  ;;  %v619_v18 = vld.sshfl [vmem:[#allocation1] sm:$0xff pattern:$0x73625140]  ;;  %v621_v19 = vld.sshfl [vmem:[#allocation1 + $0x10] sm:$0xff pattern:$0x73625140] }
  0x79   :  { %818 = vmatpush.msra.mxu0 %v340_v14  ;;  %837 = vmatpush.msra.mxu1 %v374_v15  ;;  %v498_v20 = vld [vmem:[#allocation3 + $0xcf0] sm:$0xff]  ;;  %v372_v22 = vld [vmem:[#allocation3 + $0x900] sm:$0xff] }
  0x7a   :  { %v562_v21 = vld [vmem:[#allocation3 + $0xef0] sm:$0xff]  ;;  %858 = vmatpush.msra.mxu2 %v404_v16  ;;  %877 = vmatpush.msra.mxu3 %v438_v17  ;;  %v436_v23 = vld [vmem:[#allocation3 + $0xb00] sm:$0xff] }
  0x7b   :  { %819 = vmatmul.f32.vlgmr.msra.gmra.mxu0 %v619_v18  ;;  %859 = vmatmul.f32.vlgmr.msra.gmra.mxu2 %v621_v19  ;;  %v620_v24 = vld.sshfl [vmem:[#allocation1 + $0x8] sm:$0xff pattern:$0x73625140]  ;;  %v622_v25 = vld.sshfl [vmem:[#allocation1 + $0x18] sm:$0xff pattern:$0x73625140] }
  0x7c   :  { %883 = vmatpush.msrb.mxu0 %v498_v20  ;;  %923 = vmatpush.msrb.mxu2 %v562_v21  ;;  %v496_v26 = vld [vmem:[#allocation3 + $0xce0] sm:$0xff]  ;;  %v530_v27 = vld [vmem:[#allocation3 + $0xdf0] sm:$0xff] }
  0x7d   :  { %838 = vmatpush.msra.mxu1 %v372_v22  ;;  %878 = vmatpush.msra.mxu3 %v436_v23  ;;  %v560_v28 = vld [vmem:[#allocation3 + $0xee0] sm:$0xff]  ;;  %v594_v29 = vld [vmem:[#allocation3 + $0xff0] sm:$0xff] }
  0x7e   :  { %839 = vmatmul.f32.vlgmr.msra.gmra.mxu1 %v620_v24  ;;  %879 = vmatmul.f32.vlgmr.msra.gmra.mxu3 %v622_v25  ;;  %v494_v30 = vld [vmem:[#allocation3 + $0xcd0] sm:$0xff]  ;;  %v528_v31 = vld [vmem:[#allocation3 + $0xde0] sm:$0xff] }
  0x7f   :  { %884 = vmatpush.msrb.mxu0 %v496_v26  ;;  %903 = vmatpush.msrb.mxu1 %v530_v27  ;;  %v558_v32 = vld [vmem:[#allocation3 + $0xed0] sm:$0xff]  ;;  %v592_v33 = vld [vmem:[#allocation3 + $0xfe0] sm:$0xff] }
  0x80   :  { %924 = vmatpush.msrb.mxu2 %v560_v28  ;;  %943 = vmatpush.msrb.mxu3 %v594_v29  ;;  %v492_v34 = vld [vmem:[#allocation3 + $0xcc0] sm:$0xff]  ;;  %v526_v35 = vld [vmem:[#allocation3 + $0xdd0] sm:$0xff] }
  0x81   :  { %885 = vmatpush.msrb.mxu0 %v494_v30  ;;  %904 = vmatpush.msrb.mxu1 %v528_v31  ;;  %v556_v36 = vld [vmem:[#allocation3 + $0xec0] sm:$0xff]  ;;  %v590_v37 = vld [vmem:[#allocation3 + $0xfd0] sm:$0xff] }
  0x82   :  { %925 = vmatpush.msrb.mxu2 %v558_v32  ;;  %944 = vmatpush.msrb.mxu3 %v592_v33  ;;  %v490_v38 = vld [vmem:[#allocation3 + $0xcb0] sm:$0xff]  ;;  %v524_v39 = vld [vmem:[#allocation3 + $0xdc0] sm:$0xff]  ;;  %v115_v32 = vld [vmem:[#allocation3 + $0xf8] sm:$0xff] }
  0x83   :  { %886 = vmatpush.msrb.mxu0 %v492_v34  ;;  %905 = vmatpush.msrb.mxu1 %v526_v35  ;;  %v554_v40 = vld [vmem:[#allocation3 + $0xeb0] sm:$0xff]  ;;  %v588_v41 = vld [vmem:[#allocation3 + $0xfc0] sm:$0xff]  ;;  %v179_v33 = vld [vmem:[#allocation3 + $0x2f8] sm:$0xff] }
  0x84   :  { %926 = vmatpush.msrb.mxu2 %v556_v36  ;;  %945 = vmatpush.msrb.mxu3 %v590_v37  ;;  %v488_v42 = vld [vmem:[#allocation3 + $0xca0] sm:$0xff]  ;;  %v522_v43 = vld [vmem:[#allocation3 + $0xdb0] sm:$0xff] }
  0x85   :  { %887 = vmatpush.msrb.mxu0 %v490_v38  ;;  %906 = vmatpush.msrb.mxu1 %v524_v39  ;;  %v552_v44 = vld [vmem:[#allocation3 + $0xea0] sm:$0xff]  ;;  %v586_v45 = vld [vmem:[#allocation3 + $0xfb0] sm:$0xff]  ;;  %v113_v38 = vld [vmem:[#allocation3 + $0xe8] sm:$0xff] }
  0x86   :  { %927 = vmatpush.msrb.mxu2 %v554_v40  ;;  %946 = vmatpush.msrb.mxu3 %v588_v41  ;;  %v486_v46 = vld [vmem:[#allocation3 + $0xc90] sm:$0xff]  ;;  %v520_v47 = vld [vmem:[#allocation3 + $0xda0] sm:$0xff]  ;;  %v147_v39 = vld [vmem:[#allocation3 + $0x1f8] sm:$0xff] }
  0x87   :  { %888 = vmatpush.msrb.mxu0 %v488_v42  ;;  %907 = vmatpush.msrb.mxu1 %v522_v43  ;;  %v550_v52 = vld [vmem:[#allocation3 + $0xe90] sm:$0xff]  ;;  %v584_v53 = vld [vmem:[#allocation3 + $0xfa0] sm:$0xff]  ;;  %v177_v40 = vld [vmem:[#allocation3 + $0x2e8] sm:$0xff] }
  0x88   :  { %928 = vmatpush.msrb.mxu2 %v552_v44  ;;  %947 = vmatpush.msrb.mxu3 %v586_v45  ;;  %v484_v54 = vld [vmem:[#allocation3 + $0xc80] sm:$0xff]  ;;  %v518_v55 = vld [vmem:[#allocation3 + $0xd90] sm:$0xff]  ;;  %v211_v41 = vld [vmem:[#allocation3 + $0x3f8] sm:$0xff] }
  0x89   :  { %889 = vmatpush.msrb.mxu0 %v486_v46  ;;  %908 = vmatpush.msrb.mxu1 %v520_v47  ;;  %v548_v56 = vld [vmem:[#allocation3 + $0xe80] sm:$0xff]  ;;  %v582_v57 = vld [vmem:[#allocation3 + $0xf90] sm:$0xff]  ;;  %v111_v42 = vld [vmem:[#allocation3 + $0xd8] sm:$0xff] }
  0x8a   :  { %929 = vmatpush.msrb.mxu2 %v550_v52  ;;  %948 = vmatpush.msrb.mxu3 %v584_v53  ;;  %v482_v58 = vld [vmem:[#allocation3 + $0xc70] sm:$0xff]  ;;  %v516_v59 = vld [vmem:[#allocation3 + $0xd80] sm:$0xff]  ;;  %v145_v43 = vld [vmem:[#allocation3 + $0x1e8] sm:$0xff] }
  0x8b   :  { %890 = vmatpush.msrb.mxu0 %v484_v54  ;;  %909 = vmatpush.msrb.mxu1 %v518_v55  ;;  %v546_v60 = vld [vmem:[#allocation3 + $0xe70] sm:$0xff]  ;;  %v580_v61 = vld [vmem:[#allocation3 + $0xf80] sm:$0xff]  ;;  %v175_v44 = vld [vmem:[#allocation3 + $0x2d8] sm:$0xff] }
  0x8c   :  { %930 = vmatpush.msrb.mxu2 %v548_v56  ;;  %949 = vmatpush.msrb.mxu3 %v582_v57  ;;  %v480_v62 = vld [vmem:[#allocation3 + $0xc60] sm:$0xff]  ;;  %v514_v63 = vld [vmem:[#allocation3 + $0xd70] sm:$0xff]  ;;  %v209_v45 = vld [vmem:[#allocation3 + $0x3e8] sm:$0xff] }
  0x8d   :  { %891 = vmatpush.msrb.mxu0 %v482_v58  ;;  %910 = vmatpush.msrb.mxu1 %v516_v59  ;;  %v544_v4 = vld [vmem:[#allocation3 + $0xe60] sm:$0xff]  ;;  %v578_v5 = vld [vmem:[#allocation3 + $0xf70] sm:$0xff]  ;;  %v109_v46 = vld [vmem:[#allocation3 + $0xc8] sm:$0xff] }
  0x8e   :  { %931 = vmatpush.msrb.mxu2 %v546_v60  ;;  %950 = vmatpush.msrb.mxu3 %v580_v61  ;;  %v478_v6 = vld [vmem:[#allocation3 + $0xc50] sm:$0xff]  ;;  %v512_v7 = vld [vmem:[#allocation3 + $0xd60] sm:$0xff]  ;;  %v143_v47 = vld [vmem:[#allocation3 + $0x1d8] sm:$0xff] }
  0x8f   :  { %892 = vmatpush.msrb.mxu0 %v480_v62  ;;  %911 = vmatpush.msrb.mxu1 %v514_v63  ;;  %v542_v8 = vld [vmem:[#allocation3 + $0xe50] sm:$0xff]  ;;  %v576_v9 = vld [vmem:[#allocation3 + $0xf60] sm:$0xff]  ;;  %v173_v52 = vld [vmem:[#allocation3 + $0x2c8] sm:$0xff] }
  0x90   :  { %932 = vmatpush.msrb.mxu2 %v544_v4  ;;  %951 = vmatpush.msrb.mxu3 %v578_v5  ;;  %v476_v10 = vld [vmem:[#allocation3 + $0xc40] sm:$0xff]  ;;  %v510_v11 = vld [vmem:[#allocation3 + $0xd50] sm:$0xff]  ;;  %v207_v53 = vld [vmem:[#allocation3 + $0x3d8] sm:$0xff] }
  0x91   :  { %893 = vmatpush.msrb.mxu0 %v478_v6  ;;  %912 = vmatpush.msrb.mxu1 %v512_v7  ;;  %v540_v12 = vld [vmem:[#allocation3 + $0xe40] sm:$0xff]  ;;  %v574_v13 = vld [vmem:[#allocation3 + $0xf50] sm:$0xff]  ;;  %v107_v54 = vld [vmem:[#allocation3 + $0xb8] sm:$0xff] }
  0x92   :  { %933 = vmatpush.msrb.mxu2 %v542_v8  ;;  %952 = vmatpush.msrb.mxu3 %v576_v9  ;;  %v474_v14 = vld [vmem:[#allocation3 + $0xc30] sm:$0xff]  ;;  %v508_v15 = vld [vmem:[#allocation3 + $0xd40] sm:$0xff]  ;;  %v141_v55 = vld [vmem:[#allocation3 + $0x1c8] sm:$0xff] }
  0x93   :  { %894 = vmatpush.msrb.mxu0 %v476_v10  ;;  %913 = vmatpush.msrb.mxu1 %v510_v11  ;;  %v538_v16 = vld [vmem:[#allocation3 + $0xe30] sm:$0xff]  ;;  %v572_v17 = vld [vmem:[#allocation3 + $0xf40] sm:$0xff]  ;;  %v171_v56 = vld [vmem:[#allocation3 + $0x2b8] sm:$0xff] }
  0x94   :  { %934 = vmatpush.msrb.mxu2 %v540_v12  ;;  %953 = vmatpush.msrb.mxu3 %v574_v13  ;;  %v472_v18 = vld [vmem:[#allocation3 + $0xc20] sm:$0xff]  ;;  %v506_v19 = vld [vmem:[#allocation3 + $0xd30] sm:$0xff]  ;;  %v205_v57 = vld [vmem:[#allocation3 + $0x3c8] sm:$0xff] }
  0x95   :  { %895 = vmatpush.msrb.mxu0 %v474_v14  ;;  %914 = vmatpush.msrb.mxu1 %v508_v15  ;;  %v536_v20 = vld [vmem:[#allocation3 + $0xe20] sm:$0xff]  ;;  %v570_v21 = vld [vmem:[#allocation3 + $0xf30] sm:$0xff]  ;;  %v105_v58 = vld [vmem:[#allocation3 + $0xa8] sm:$0xff] }
  0x96   :  { %935 = vmatpush.msrb.mxu2 %v538_v16  ;;  %954 = vmatpush.msrb.mxu3 %v572_v17  ;;  %v470_v22 = vld [vmem:[#allocation3 + $0xc10] sm:$0xff]  ;;  %v504_v23 = vld [vmem:[#allocation3 + $0xd20] sm:$0xff]  ;;  %v139_v59 = vld [vmem:[#allocation3 + $0x1b8] sm:$0xff] }
  0x97   :  { %896 = vmatpush.msrb.mxu0 %v472_v18  ;;  %915 = vmatpush.msrb.mxu1 %v506_v19  ;;  %v534_v24 = vld [vmem:[#allocation3 + $0xe10] sm:$0xff]  ;;  %v568_v25 = vld [vmem:[#allocation3 + $0xf20] sm:$0xff]  ;;  %v169_v60 = vld [vmem:[#allocation3 + $0x2a8] sm:$0xff] }
  0x98   :  { %936 = vmatpush.msrb.mxu2 %v536_v20  ;;  %955 = vmatpush.msrb.mxu3 %v570_v21  ;;  %v468_v26 = vld [vmem:[#allocation3 + $0xc00] sm:$0xff]  ;;  %v502_v27 = vld [vmem:[#allocation3 + $0xd10] sm:$0xff]  ;;  %v203_v61 = vld [vmem:[#allocation3 + $0x3b8] sm:$0xff] }
  0x99   :  { %897 = vmatpush.msrb.mxu0 %v470_v22  ;;  %916 = vmatpush.msrb.mxu1 %v504_v23  ;;  %v532_v28 = vld [vmem:[#allocation3 + $0xe00] sm:$0xff]  ;;  %v566_v29 = vld [vmem:[#allocation3 + $0xf10] sm:$0xff]  ;;  %v103_v62 = vld [vmem:[#allocation3 + $0x98] sm:$0xff] }
  0x9a   :  { %937 = vmatpush.msrb.mxu2 %v534_v24  ;;  %956 = vmatpush.msrb.mxu3 %v568_v25  ;;  %v623_v30 = vld.sshfl [vmem:[#allocation1 + $0x20] sm:$0xff pattern:$0x73625140]  ;;  %v625_v31 = vld.sshfl [vmem:[#allocation1 + $0x30] sm:$0xff pattern:$0x73625140] }
  0x9b   :  { %898 = vmatpush.msrb.mxu0 %v468_v26  ;;  %917 = vmatpush.msrb.mxu1 %v502_v27  ;;  %v500_v34 = vld [vmem:[#allocation3 + $0xd00] sm:$0xff]  ;;  %v626_v37 = vld.sshfl [vmem:[#allocation1 + $0x38] sm:$0xff pattern:$0x73625140]  ;;  %v167_v4 = vld [vmem:[#allocation3 + $0x298] sm:$0xff] }
  0x9c   :  { %938 = vmatpush.msrb.mxu2 %v532_v28  ;;  %957 = vmatpush.msrb.mxu3 %v566_v29  ;;  %v564_v35 = vld [vmem:[#allocation3 + $0xf00] sm:$0xff]  ;;  %v137_v63 = vld [vmem:[#allocation3 + $0x1a8] sm:$0xff]  ;;  %v135_v7 = vld [vmem:[#allocation3 + $0x198] sm:$0xff] }
  0x9d   :  { %899 = vmatmul.f32.vlgmr.msrb.gmra.mxu0 %v623_v30  ;;  %939 = vmatmul.f32.vlgmr.msrb.gmra.mxu2 %v625_v31  ;;  %v624_v36 = vld.sshfl [vmem:[#allocation1 + $0x28] sm:$0xff pattern:$0x73625140]  ;;  %v201_v5 = vld [vmem:[#allocation3 + $0x3a8] sm:$0xff] }
  0x9e   :  { %963 = vmatpush.msra.mxu0 %v115_v32  ;;  %1003 = vmatpush.msra.mxu2 %v179_v33  ;;  %v101_v6 = vld [vmem:[#allocation3 + $0x88] sm:$0xff]  ;;  %v199_v9 = vld [vmem:[#allocation3 + $0x398] sm:$0xff] }
  0x9f   :  { %918 = vmatpush.msrb.mxu1 %v500_v34  ;;  %958 = vmatpush.msrb.mxu3 %v564_v35  ;;  %v165_v8 = vld [vmem:[#allocation3 + $0x288] sm:$0xff]  ;;  %v99_v10 = vld [vmem:[#allocation3 + $0x78] sm:$0xff] }
  0xa0   :  { %919 = vmatmul.f32.vlgmr.msrb.gmra.mxu1 %v624_v36  ;;  %959 = vmatmul.f32.vlgmr.msrb.gmra.mxu3 %v626_v37  ;;  %v133_v11 = vld [vmem:[#allocation3 + $0x188] sm:$0xff]  ;;  %v163_v12 = vld [vmem:[#allocation3 + $0x278] sm:$0xff] }
  0xa1   :  { %964 = vmatpush.msra.mxu0 %v113_v38  ;;  %983 = vmatpush.msra.mxu1 %v147_v39  ;;  %v197_v13 = vld [vmem:[#allocation3 + $0x388] sm:$0xff]  ;;  %v131_v15 = vld [vmem:[#allocation3 + $0x178] sm:$0xff] }
  0xa2   :  { %1004 = vmatpush.msra.mxu2 %v177_v40  ;;  %1023 = vmatpush.msra.mxu3 %v211_v41  ;;  %v97_v14 = vld [vmem:[#allocation3 + $0x68] sm:$0xff]  ;;  %v195_v17 = vld [vmem:[#allocation3 + $0x378] sm:$0xff] }
  0xa3   :  { %965 = vmatpush.msra.mxu0 %v111_v42  ;;  %984 = vmatpush.msra.mxu1 %v145_v43  ;;  %v161_v16 = vld [vmem:[#allocation3 + $0x268] sm:$0xff]  ;;  %v95_v18 = vld [vmem:[#allocation3 + $0x58] sm:$0xff] }
  0xa4   :  { %1005 = vmatpush.msra.mxu2 %v175_v44  ;;  %1024 = vmatpush.msra.mxu3 %v209_v45  ;;  %v129_v19 = vld [vmem:[#allocation3 + $0x168] sm:$0xff]  ;;  %v159_v20 = vld [vmem:[#allocation3 + $0x258] sm:$0xff] }
  0xa5   :  { %966 = vmatpush.msra.mxu0 %v109_v46  ;;  %985 = vmatpush.msra.mxu1 %v143_v47  ;;  %v193_v21 = vld [vmem:[#allocation3 + $0x368] sm:$0xff]  ;;  %v127_v23 = vld [vmem:[#allocation3 + $0x158] sm:$0xff] }
  0xa6   :  { %1006 = vmatpush.msra.mxu2 %v173_v52  ;;  %1025 = vmatpush.msra.mxu3 %v207_v53  ;;  %v93_v22 = vld [vmem:[#allocation3 + $0x48] sm:$0xff]  ;;  %v191_v25 = vld [vmem:[#allocation3 + $0x358] sm:$0xff] }
  0xa7   :  { %967 = vmatpush.msra.mxu0 %v107_v54  ;;  %986 = vmatpush.msra.mxu1 %v141_v55  ;;  %v157_v24 = vld [vmem:[#allocation3 + $0x248] sm:$0xff]  ;;  %v91_v26 = vld [vmem:[#allocation3 + $0x38] sm:$0xff] }
  0xa8   :  { %1007 = vmatpush.msra.mxu2 %v171_v56  ;;  %1026 = vmatpush.msra.mxu3 %v205_v57  ;;  %v125_v27 = vld [vmem:[#allocation3 + $0x148] sm:$0xff]  ;;  %v155_v28 = vld [vmem:[#allocation3 + $0x238] sm:$0xff] }
  0xa9   :  { %968 = vmatpush.msra.mxu0 %v105_v58  ;;  %987 = vmatpush.msra.mxu1 %v139_v59  ;;  %v189_v29 = vld [vmem:[#allocation3 + $0x348] sm:$0xff]  ;;  %v123_v31 = vld [vmem:[#allocation3 + $0x138] sm:$0xff] }
  0xaa   :  { %1008 = vmatpush.msra.mxu2 %v169_v60  ;;  %1027 = vmatpush.msra.mxu3 %v203_v61  ;;  %v89_v30 = vld [vmem:[#allocation3 + $0x28] sm:$0xff]  ;;  %v187_v33 = vld [vmem:[#allocation3 + $0x338] sm:$0xff] }
  0xab   :  { %969 = vmatpush.msra.mxu0 %v103_v62  ;;  %988 = vmatpush.msra.mxu1 %v137_v63  ;;  %v153_v32 = vld [vmem:[#allocation3 + $0x228] sm:$0xff]  ;;  %v87_v34 = vld [vmem:[#allocation3 + $0x18] sm:$0xff] }
  0xac   :  { %1009 = vmatpush.msra.mxu2 %v167_v4  ;;  %1028 = vmatpush.msra.mxu3 %v201_v5  ;;  %v121_v35 = vld [vmem:[#allocation3 + $0x128] sm:$0xff]  ;;  %v151_v36 = vld [vmem:[#allocation3 + $0x218] sm:$0xff] }
  0xad   :  { %970 = vmatpush.msra.mxu0 %v101_v6  ;;  %989 = vmatpush.msra.mxu1 %v135_v7  ;;  %v185_v37 = vld [vmem:[#allocation3 + $0x328] sm:$0xff]  ;;  %v119_v39 = vld [vmem:[#allocation3 + $0x118] sm:$0xff] }
  0xae   :  { %1010 = vmatpush.msra.mxu2 %v165_v8  ;;  %1029 = vmatpush.msra.mxu3 %v199_v9  ;;  %v85_v38 = vld [vmem:[#allocation3 + $0x8] sm:$0xff]  ;;  %v183_v41 = vld [vmem:[#allocation3 + $0x318] sm:$0xff] }
  0xaf   :  { %971 = vmatpush.msra.mxu0 %v99_v10  ;;  %990 = vmatpush.msra.mxu1 %v133_v11  ;;  %v149_v40 = vld [vmem:[#allocation3 + $0x208] sm:$0xff]  ;;  %v243_v42 = vld [vmem:[#allocation3 + $0x4f8] sm:$0xff] }
  0xb0   :  { %1011 = vmatpush.msra.mxu2 %v163_v12  ;;  %1030 = vmatpush.msra.mxu3 %v197_v13  ;;  %v307_v43 = vld [vmem:[#allocation3 + $0x6f8] sm:$0xff]  ;;  %v117_v44 = vld [vmem:[#allocation3 + $0x108] sm:$0xff] }
  0xb1   :  { %972 = vmatpush.msra.mxu0 %v97_v14  ;;  %991 = vmatpush.msra.mxu1 %v131_v15  ;;  %v181_v45 = vld [vmem:[#allocation3 + $0x308] sm:$0xff]  ;;  %v275_v47 = vld [vmem:[#allocation3 + $0x5f8] sm:$0xff] }
  0xb2   :  { %1012 = vmatpush.msra.mxu2 %v161_v16  ;;  %1031 = vmatpush.msra.mxu3 %v195_v17  ;;  %v241_v46 = vld [vmem:[#allocation3 + $0x4e8] sm:$0xff]  ;;  %v339_v53 = vld [vmem:[#allocation3 + $0x7f8] sm:$0xff] }
  0xb3   :  { %973 = vmatpush.msra.mxu0 %v95_v18  ;;  %992 = vmatpush.msra.mxu1 %v129_v19  ;;  %v305_v52 = vld [vmem:[#allocation3 + $0x6e8] sm:$0xff]  ;;  %v239_v54 = vld [vmem:[#allocation3 + $0x4d8] sm:$0xff] }
  0xb4   :  { %1013 = vmatpush.msra.mxu2 %v159_v20  ;;  %1032 = vmatpush.msra.mxu3 %v193_v21  ;;  %v273_v55 = vld [vmem:[#allocation3 + $0x5e8] sm:$0xff]  ;;  %v303_v56 = vld [vmem:[#allocation3 + $0x6d8] sm:$0xff] }
  0xb5   :  { %974 = vmatpush.msra.mxu0 %v93_v22  ;;  %993 = vmatpush.msra.mxu1 %v127_v23  ;;  %v337_v57 = vld [vmem:[#allocation3 + $0x7e8] sm:$0xff]  ;;  %v271_v59 = vld [vmem:[#allocation3 + $0x5d8] sm:$0xff] }
  0xb6   :  { %1014 = vmatpush.msra.mxu2 %v157_v24  ;;  %1033 = vmatpush.msra.mxu3 %v191_v25  ;;  %v237_v58 = vld [vmem:[#allocation3 + $0x4c8] sm:$0xff]  ;;  %v335_v61 = vld [vmem:[#allocation3 + $0x7d8] sm:$0xff] }
  0xb7   :  { %975 = vmatpush.msra.mxu0 %v91_v26  ;;  %994 = vmatpush.msra.mxu1 %v125_v27  ;;  %v301_v60 = vld [vmem:[#allocation3 + $0x6c8] sm:$0xff]  ;;  %v235_v62 = vld [vmem:[#allocation3 + $0x4b8] sm:$0xff] }
  0xb8   :  { %1015 = vmatpush.msra.mxu2 %v155_v28  ;;  %1034 = vmatpush.msra.mxu3 %v189_v29  ;;  %v269_v63 = vld [vmem:[#allocation3 + $0x5c8] sm:$0xff]  ;;  %v299_v4 = vld [vmem:[#allocation3 + $0x6b8] sm:$0xff] }
  0xb9   :  { %976 = vmatpush.msra.mxu0 %v89_v30  ;;  %995 = vmatpush.msra.mxu1 %v123_v31  ;;  %v333_v5 = vld [vmem:[#allocation3 + $0x7c8] sm:$0xff]  ;;  %v267_v7 = vld [vmem:[#allocation3 + $0x5b8] sm:$0xff] }
  0xba   :  { %1016 = vmatpush.msra.mxu2 %v153_v32  ;;  %1035 = vmatpush.msra.mxu3 %v187_v33  ;;  %v233_v6 = vld [vmem:[#allocation3 + $0x4a8] sm:$0xff]  ;;  %v331_v9 = vld [vmem:[#allocation3 + $0x7b8] sm:$0xff] }
  0xbb   :  { %977 = vmatpush.msra.mxu0 %v87_v34  ;;  %996 = vmatpush.msra.mxu1 %v121_v35  ;;  %v297_v8 = vld [vmem:[#allocation3 + $0x6a8] sm:$0xff]  ;;  %v231_v10 = vld [vmem:[#allocation3 + $0x498] sm:$0xff] }
  0xbc   :  { %1017 = vmatpush.msra.mxu2 %v151_v36  ;;  %1036 = vmatpush.msra.mxu3 %v185_v37  ;;  %v265_v11 = vld [vmem:[#allocation3 + $0x5a8] sm:$0xff]  ;;  %v295_v12 = vld [vmem:[#allocation3 + $0x698] sm:$0xff] }
  0xbd   :  { %978 = vmatpush.msra.mxu0 %v85_v38  ;;  %997 = vmatpush.msra.mxu1 %v119_v39  ;;  %v329_v13 = vld [vmem:[#allocation3 + $0x7a8] sm:$0xff]  ;;  %v263_v15 = vld [vmem:[#allocation3 + $0x598] sm:$0xff] }
  0xbe   :  { %1018 = vmatpush.msra.mxu2 %v149_v40  ;;  %1037 = vmatpush.msra.mxu3 %v183_v41  ;;  %v229_v14 = vld [vmem:[#allocation3 + $0x488] sm:$0xff]  ;;  %v327_v17 = vld [vmem:[#allocation3 + $0x798] sm:$0xff] }
  0xbf   :  { %1043 = vmatpush.msrb.mxu0 %v243_v42  ;;  %998 = vmatpush.msra.mxu1 %v117_v44  ;;  %v293_v16 = vld [vmem:[#allocation3 + $0x688] sm:$0xff]  ;;  %v227_v18 = vld [vmem:[#allocation3 + $0x478] sm:$0xff] }
  0xc0   :  { %1083 = vmatpush.msrb.mxu2 %v307_v43  ;;  %1038 = vmatpush.msra.mxu3 %v181_v45  ;;  %v261_v19 = vld [vmem:[#allocation3 + $0x588] sm:$0xff]  ;;  %v291_v20 = vld [vmem:[#allocation3 + $0x678] sm:$0xff] }
  0xc1   :  { %1044 = vmatpush.msrb.mxu0 %v241_v46  ;;  %1063 = vmatpush.msrb.mxu1 %v275_v47  ;;  %v325_v21 = vld [vmem:[#allocation3 + $0x788] sm:$0xff]  ;;  %v259_v23 = vld [vmem:[#allocation3 + $0x578] sm:$0xff] }
  0xc2   :  { %1084 = vmatpush.msrb.mxu2 %v305_v52  ;;  %1103 = vmatpush.msrb.mxu3 %v339_v53  ;;  %v225_v22 = vld [vmem:[#allocation3 + $0x468] sm:$0xff]  ;;  %v323_v25 = vld [vmem:[#allocation3 + $0x778] sm:$0xff] }
  0xc3   :  { %1045 = vmatpush.msrb.mxu0 %v239_v54  ;;  %1064 = vmatpush.msrb.mxu1 %v273_v55  ;;  %v289_v24 = vld [vmem:[#allocation3 + $0x668] sm:$0xff]  ;;  %v223_v26 = vld [vmem:[#allocation3 + $0x458] sm:$0xff] }
  0xc4   :  { %1085 = vmatpush.msrb.mxu2 %v303_v56  ;;  %1104 = vmatpush.msrb.mxu3 %v337_v57  ;;  %v257_v27 = vld [vmem:[#allocation3 + $0x568] sm:$0xff]  ;;  %v287_v28 = vld [vmem:[#allocation3 + $0x658] sm:$0xff] }
  0xc5   :  { %1046 = vmatpush.msrb.mxu0 %v237_v58  ;;  %1065 = vmatpush.msrb.mxu1 %v271_v59  ;;  %v321_v29 = vld [vmem:[#allocation3 + $0x768] sm:$0xff]  ;;  %v255_v31 = vld [vmem:[#allocation3 + $0x558] sm:$0xff] }
  0xc6   :  { %1086 = vmatpush.msrb.mxu2 %v301_v60  ;;  %1105 = vmatpush.msrb.mxu3 %v335_v61  ;;  %v221_v30 = vld [vmem:[#allocation3 + $0x448] sm:$0xff]  ;;  %v319_v33 = vld [vmem:[#allocation3 + $0x758] sm:$0xff] }
  0xc7   :  { %1047 = vmatpush.msrb.mxu0 %v235_v62  ;;  %1066 = vmatpush.msrb.mxu1 %v269_v63  ;;  %v285_v32 = vld [vmem:[#allocation3 + $0x648] sm:$0xff]  ;;  %v219_v34 = vld [vmem:[#allocation3 + $0x438] sm:$0xff] }
  0xc8   :  { %1087 = vmatpush.msrb.mxu2 %v299_v4  ;;  %1106 = vmatpush.msrb.mxu3 %v333_v5  ;;  %v253_v35 = vld [vmem:[#allocation3 + $0x548] sm:$0xff]  ;;  %v283_v36 = vld [vmem:[#allocation3 + $0x638] sm:$0xff] }
  0xc9   :  { %1048 = vmatpush.msrb.mxu0 %v233_v6  ;;  %1067 = vmatpush.msrb.mxu1 %v267_v7  ;;  %v317_v37 = vld [vmem:[#allocation3 + $0x748] sm:$0xff]  ;;  %v251_v39 = vld [vmem:[#allocation3 + $0x538] sm:$0xff] }
  0xca   :  { %1088 = vmatpush.msrb.mxu2 %v297_v8  ;;  %1107 = vmatpush.msrb.mxu3 %v331_v9  ;;  %v217_v38 = vld [vmem:[#allocation3 + $0x428] sm:$0xff]  ;;  %v315_v41 = vld [vmem:[#allocation3 + $0x738] sm:$0xff] }
  0xcb   :  { %1049 = vmatpush.msrb.mxu0 %v231_v10  ;;  %1068 = vmatpush.msrb.mxu1 %v265_v11  ;;  %v281_v40 = vld [vmem:[#allocation3 + $0x628] sm:$0xff]  ;;  %v215_v42 = vld [vmem:[#allocation3 + $0x418] sm:$0xff] }
  0xcc   :  { %1089 = vmatpush.msrb.mxu2 %v295_v12  ;;  %1108 = vmatpush.msrb.mxu3 %v329_v13  ;;  %v249_v43 = vld [vmem:[#allocation3 + $0x528] sm:$0xff]  ;;  %v279_v44 = vld [vmem:[#allocation3 + $0x618] sm:$0xff] }
  0xcd   :  { %1050 = vmatpush.msrb.mxu0 %v229_v14  ;;  %1069 = vmatpush.msrb.mxu1 %v263_v15  ;;  %v313_v45 = vld [vmem:[#allocation3 + $0x728] sm:$0xff]  ;;  %v247_v47 = vld [vmem:[#allocation3 + $0x518] sm:$0xff] }
  0xce   :  { %1090 = vmatpush.msrb.mxu2 %v293_v16  ;;  %1109 = vmatpush.msrb.mxu3 %v327_v17  ;;  %v213_v46 = vld [vmem:[#allocation3 + $0x408] sm:$0xff]  ;;  %v311_v53 = vld [vmem:[#allocation3 + $0x718] sm:$0xff] }
  0xcf   :  { %1051 = vmatpush.msrb.mxu0 %v227_v18  ;;  %1070 = vmatpush.msrb.mxu1 %v261_v19  ;;  %v277_v52 = vld [vmem:[#allocation3 + $0x608] sm:$0xff]  ;;  %v371_v54 = vld [vmem:[#allocation3 + $0x8f8] sm:$0xff] }
  0xd0   :  { %1091 = vmatpush.msrb.mxu2 %v291_v20  ;;  %1110 = vmatpush.msrb.mxu3 %v325_v21  ;;  %v435_v55 = vld [vmem:[#allocation3 + $0xaf8] sm:$0xff]  ;;  %v245_v56 = vld [vmem:[#allocation3 + $0x508] sm:$0xff] }
  0xd1   :  { %1052 = vmatpush.msrb.mxu0 %v225_v22  ;;  %1071 = vmatpush.msrb.mxu1 %v259_v23  ;;  %v309_v57 = vld [vmem:[#allocation3 + $0x708] sm:$0xff]  ;;  %v403_v59 = vld [vmem:[#allocation3 + $0x9f8] sm:$0xff] }
  0xd2   :  { %1092 = vmatpush.msrb.mxu2 %v289_v24  ;;  %1111 = vmatpush.msrb.mxu3 %v323_v25  ;;  %v369_v58 = vld [vmem:[#allocation3 + $0x8e8] sm:$0xff]  ;;  %v467_v61 = vld [vmem:[#allocation3 + $0xbf8] sm:$0xff] }
  0xd3   :  { %1053 = vmatpush.msrb.mxu0 %v223_v26  ;;  %1072 = vmatpush.msrb.mxu1 %v257_v27  ;;  %v433_v60 = vld [vmem:[#allocation3 + $0xae8] sm:$0xff]  ;;  %v367_v62 = vld [vmem:[#allocation3 + $0x8d8] sm:$0xff] }
  0xd4   :  { %1093 = vmatpush.msrb.mxu2 %v287_v28  ;;  %1112 = vmatpush.msrb.mxu3 %v321_v29  ;;  %v401_v63 = vld [vmem:[#allocation3 + $0x9e8] sm:$0xff]  ;;  %v431_v4 = vld [vmem:[#allocation3 + $0xad8] sm:$0xff] }
  0xd5   :  { %1054 = vmatpush.msrb.mxu0 %v221_v30  ;;  %1073 = vmatpush.msrb.mxu1 %v255_v31  ;;  %v399_v5 = vld [vmem:[#allocation3 + $0x9d8] sm:$0xff]  ;;  %v429_v6 = vld [vmem:[#allocation3 + $0xac8] sm:$0xff] }
  0xd6   :  { %1094 = vmatpush.msrb.mxu2 %v285_v32  ;;  %1113 = vmatpush.msrb.mxu3 %v319_v33  ;;  %v463_v7 = vld [vmem:[#allocation3 + $0xbd8] sm:$0xff]  ;;  %v461_v9 = vld [vmem:[#allocation3 + $0xbc8] sm:$0xff] }
  0xd7   :  { %1055 = vmatpush.msrb.mxu0 %v219_v34  ;;  %1074 = vmatpush.msrb.mxu1 %v253_v35  ;;  %v363_v8 = vld [vmem:[#allocation3 + $0x8b8] sm:$0xff]  ;;  %v361_v10 = vld [vmem:[#allocation3 + $0x8a8] sm:$0xff] }
  0xd8   :  { %1095 = vmatpush.msrb.mxu2 %v283_v36  ;;  %1114 = vmatpush.msrb.mxu3 %v317_v37  ;;  %v395_v11 = vld [vmem:[#allocation3 + $0x9b8] sm:$0xff]  ;;  %v425_v12 = vld [vmem:[#allocation3 + $0xaa8] sm:$0xff] }
  0xd9   :  { %1056 = vmatpush.msrb.mxu0 %v217_v38  ;;  %1075 = vmatpush.msrb.mxu1 %v251_v39  ;;  %v459_v13 = vld [vmem:[#allocation3 + $0xbb8] sm:$0xff]  ;;  %v393_v15 = vld [vmem:[#allocation3 + $0x9a8] sm:$0xff] }
  0xda   :  { %1096 = vmatpush.msrb.mxu2 %v281_v40  ;;  %1115 = vmatpush.msrb.mxu3 %v315_v41  ;;  %v359_v14 = vld [vmem:[#allocation3 + $0x898] sm:$0xff]  ;;  %v457_v17 = vld [vmem:[#allocation3 + $0xba8] sm:$0xff] }
  0xdb   :  { %1057 = vmatpush.msrb.mxu0 %v215_v42  ;;  %1076 = vmatpush.msrb.mxu1 %v249_v43  ;;  %v423_v16 = vld [vmem:[#allocation3 + $0xa98] sm:$0xff]  ;;  %v421_v19 = vld [vmem:[#allocation3 + $0xa88] sm:$0xff] }
  0xdc   :  { %1097 = vmatpush.msrb.mxu2 %v279_v44  ;;  %1116 = vmatpush.msrb.mxu3 %v313_v45  ;;  %v391_v18 = vld [vmem:[#allocation3 + $0x998] sm:$0xff]  ;;  %v453_v22 = vld [vmem:[#allocation3 + $0xb88] sm:$0xff] }
  0xdd   :  { %1058 = vmatpush.msrb.mxu0 %v213_v46  ;;  %1077 = vmatpush.msrb.mxu1 %v247_v47  ;;  %v455_v20 = vld [vmem:[#allocation3 + $0xb98] sm:$0xff]  ;;  %v353_v23 = vld [vmem:[#allocation3 + $0x868] sm:$0xff] }
  0xde   :  { %1098 = vmatpush.msrb.mxu2 %v277_v52  ;;  %1117 = vmatpush.msrb.mxu3 %v311_v53  ;;  %v419_v21 = vld [vmem:[#allocation3 + $0xa78] sm:$0xff]  ;;  %v385_v27 = vld [vmem:[#allocation3 + $0x968] sm:$0xff] }
  0xdf   :  { %979 = vmatmul.f32.vlgmr.msra.gmra.mxu0 %v1601_v48  ;;  %1019 = vmatmul.f32.vlgmr.msra.gmra.mxu2 %v1603_v49  ;;  %v465_v48 = vld [vmem:[#allocation3 + $0xbe8] sm:$0xff]  ;;  %v387_v24 = vld [vmem:[#allocation3 + $0x978] sm:$0xff] }
  0xe0   :  { %1123 = vmatpush.msra.mxu0 %v371_v54  ;;  %1163 = vmatpush.msra.mxu2 %v435_v55  ;;  %v365_v49 = vld [vmem:[#allocation3 + $0x8c8] sm:$0xff]  ;;  %v451_v25 = vld [vmem:[#allocation3 + $0xb78] sm:$0xff] }
  0xe1   :  { %1078 = vmatpush.msrb.mxu1 %v245_v56  ;;  %1118 = vmatpush.msrb.mxu3 %v309_v57  ;;  %v351_v26 = vld [vmem:[#allocation3 + $0x858] sm:$0xff]  ;;  %v449_v29 = vld [vmem:[#allocation3 + $0xb68] sm:$0xff] }
  0xe2   :  { %999 = vmatmul.f32.vlgmr.msra.gmra.mxu1 %v1605_v50  ;;  %1039 = vmatmul.f32.vlgmr.msra.gmra.mxu3 %v1607_v51  ;;  %v397_v50 = vld [vmem:[#allocation3 + $0x9c8] sm:$0xff]  ;;  %v427_v51 = vld [vmem:[#allocation3 + $0xab8] sm:$0xff] }
  0xe3   :  { %1124 = vmatpush.msra.mxu0 %v369_v58  ;;  %1143 = vmatpush.msra.mxu1 %v403_v59  ;;  %v415_v28 = vld [vmem:[#allocation3 + $0xa58] sm:$0xff]  ;;  %v349_v30 = vld [vmem:[#allocation3 + $0x848] sm:$0xff] }
  0xe4   :  { %1164 = vmatpush.msra.mxu2 %v433_v60  ;;  %1183 = vmatpush.msra.mxu3 %v467_v61  ;;  %v383_v31 = vld [vmem:[#allocation3 + $0x958] sm:$0xff]  ;;  %v413_v32 = vld [vmem:[#allocation3 + $0xa48] sm:$0xff] }
  0xe5   :  { %1125 = vmatpush.msra.mxu0 %v367_v62  ;;  %1144 = vmatpush.msra.mxu1 %v401_v63  ;;  %v447_v33 = vld [vmem:[#allocation3 + $0xb58] sm:$0xff]  ;;  %v381_v35 = vld [vmem:[#allocation3 + $0x948] sm:$0xff] }
  0xe6   :  { %1165 = vmatpush.msra.mxu2 %v431_v4  ;;  %1184 = vmatpush.msra.mxu3 %v465_v48  ;;  %v347_v34 = vld [vmem:[#allocation3 + $0x838] sm:$0xff]  ;;  %v445_v37 = vld [vmem:[#allocation3 + $0xb48] sm:$0xff] }
  0xe7   :  { %1126 = vmatpush.msra.mxu0 %v365_v49  ;;  %1145 = vmatpush.msra.mxu1 %v399_v5  ;;  %v411_v36 = vld [vmem:[#allocation3 + $0xa38] sm:$0xff]  ;;  %v345_v38 = vld [vmem:[#allocation3 + $0x828] sm:$0xff] }
  0xe8   :  { %1166 = vmatpush.msra.mxu2 %v429_v6  ;;  %1185 = vmatpush.msra.mxu3 %v463_v7  ;;  %v379_v39 = vld [vmem:[#allocation3 + $0x938] sm:$0xff]  ;;  %v409_v40 = vld [vmem:[#allocation3 + $0xa28] sm:$0xff] }
  0xe9   :  { %1099 = vmatmul.f32.vlgmr.msrb.gmra.mxu2 %v1612_v0  ;;  %1127 = vmatpush.msra.mxu0 %v363_v8  ;;  %v357_v0 = vld [vmem:[#allocation3 + $0x888] sm:$0xff]  ;;  %v443_v41 = vld [vmem:[#allocation3 + $0xb38] sm:$0xff] }
  0xea   :  { %1146 = vmatpush.msra.mxu1 %v397_v50  ;;  %1167 = vmatpush.msra.mxu2 %v427_v51  ;;  %v343_v42 = vld [vmem:[#allocation3 + $0x818] sm:$0xff]  ;;  %v377_v43 = vld [vmem:[#allocation3 + $0x928] sm:$0xff] }
  0xeb   :  { %1186 = vmatpush.msra.mxu3 %v461_v9  ;;  %1059 = vmatmul.f32.vlgmr.msrb.gmra.mxu0 %v1614_v1  ;;  %v355_v1 = vld [vmem:[#allocation3 + $0x878] sm:$0xff]  ;;  %v441_v45 = vld [vmem:[#allocation3 + $0xb28] sm:$0xff] }
  0xec   :  { %1119 = vmatmul.f32.vlgmr.msrb.gmra.mxu3 %v1616_v2  ;;  %1128 = vmatpush.msra.mxu0 %v361_v10  ;;  %v389_v2 = vld [vmem:[#allocation3 + $0x988] sm:$0xff]  ;;  %v407_v44 = vld [vmem:[#allocation3 + $0xa18] sm:$0xff] }
  0xed   :  { %1147 = vmatpush.msra.mxu1 %v395_v11  ;;  %1168 = vmatpush.msra.mxu2 %v425_v12  ;;  %v341_v46 = vld [vmem:[#allocation3 + $0x808] sm:$0xff]  ;;  %v375_v47 = vld [vmem:[#allocation3 + $0x918] sm:$0xff] }
  0xee   :  { %1187 = vmatpush.msra.mxu3 %v459_v13  ;;  %1079 = vmatmul.f32.vlgmr.msrb.gmra.mxu1 %v1618_v3  ;;  %v417_v3 = vld [vmem:[#allocation3 + $0xa68] sm:$0xff]  ;;  %v439_v53 = vld [vmem:[#allocation3 + $0xb18] sm:$0xff] }
  0xef   :  { %1129 = vmatpush.msra.mxu0 %v359_v14  ;;  %1148 = vmatpush.msra.mxu1 %v393_v15  ;;  %v405_v52 = vld [vmem:[#allocation3 + $0xa08] sm:$0xff]  ;;  %v499_v54 = vld [vmem:[#allocation3 + $0xcf8] sm:$0xff] }
  0xf0   :  { %1169 = vmatpush.msra.mxu2 %v423_v16  ;;  %1188 = vmatpush.msra.mxu3 %v457_v17  ;;  %v563_v55 = vld [vmem:[#allocation3 + $0xef8] sm:$0xff]  ;;  %v373_v56 = vld [vmem:[#allocation3 + $0x908] sm:$0xff] }
  0xf1   :  { %1130 = vmatpush.msra.mxu0 %v357_v0  ;;  %1149 = vmatpush.msra.mxu1 %v391_v18  ;;  %v437_v57 = vld [vmem:[#allocation3 + $0xb08] sm:$0xff]  ;;  %v1405_v58 = vld.sshfl [vmem:[#allocation1] sm:$0xff pattern:$0x73625140] }
  0xf2   :  { %1170 = vmatpush.msra.mxu2 %v421_v19  ;;  %1189 = vmatpush.msra.mxu3 %v455_v20  ;;  %v1406_v59 = vld.sshfl [vmem:[#allocation1 + $0x10] sm:$0xff pattern:$0x73625140]  ;;  %v531_v61 = vld [vmem:[#allocation3 + $0xdf8] sm:$0xff] }
  0xf3   :  { %1131 = vmatpush.msra.mxu0 %v355_v1  ;;  %1150 = vmatpush.msra.mxu1 %v389_v2  ;;  %v497_v60 = vld [vmem:[#allocation3 + $0xce8] sm:$0xff]  ;;  %v595_v63 = vld [vmem:[#allocation3 + $0xff8] sm:$0xff] }
  0xf4   :  { %1171 = vmatpush.msra.mxu2 %v419_v21  ;;  %1190 = vmatpush.msra.mxu3 %v453_v22  ;;  %v561_v62 = vld [vmem:[#allocation3 + $0xee8] sm:$0xff]  ;;  %v1407_v4 = vld.sshfl [vmem:[#allocation1 + $0x8] sm:$0xff pattern:$0x73625140] }
  0xf5   :  { %1132 = vmatpush.msra.mxu0 %v353_v23  ;;  %1151 = vmatpush.msra.mxu1 %v387_v24  ;;  %v1408_v48 = vld.sshfl [vmem:[#allocation1 + $0x18] sm:$0xff pattern:$0x73625140]  ;;  %v495_v49 = vld [vmem:[#allocation3 + $0xcd8] sm:$0xff] }
  0xf6   :  { %1172 = vmatpush.msra.mxu2 %v417_v3  ;;  %1191 = vmatpush.msra.mxu3 %v451_v25  ;;  %v529_v5 = vld [vmem:[#allocation3 + $0xde8] sm:$0xff]  ;;  %v559_v6 = vld [vmem:[#allocation3 + $0xed8] sm:$0xff] }
  0xf7   :  { %1133 = vmatpush.msra.mxu0 %v351_v26  ;;  %1152 = vmatpush.msra.mxu1 %v385_v27  ;;  %v593_v7 = vld [vmem:[#allocation3 + $0xfe8] sm:$0xff]  ;;  %v527_v50 = vld [vmem:[#allocation3 + $0xdd8] sm:$0xff] }
  0xf8   :  { %1173 = vmatpush.msra.mxu2 %v415_v28  ;;  %1192 = vmatpush.msra.mxu3 %v449_v29  ;;  %v493_v8 = vld [vmem:[#allocation3 + $0xcc8] sm:$0xff]  ;;  %v591_v9 = vld [vmem:[#allocation3 + $0xfd8] sm:$0xff] }
  0xf9   :  { %1134 = vmatpush.msra.mxu0 %v349_v30  ;;  %1153 = vmatpush.msra.mxu1 %v383_v31  ;;  %v557_v51 = vld [vmem:[#allocation3 + $0xec8] sm:$0xff]  ;;  %v491_v10 = vld [vmem:[#allocation3 + $0xcb8] sm:$0xff] }
  0xfa   :  { %1174 = vmatpush.msra.mxu2 %v413_v32  ;;  %1193 = vmatpush.msra.mxu3 %v447_v33  ;;  %v525_v11 = vld [vmem:[#allocation3 + $0xdc8] sm:$0xff]  ;;  %v555_v12 = vld [vmem:[#allocation3 + $0xeb8] sm:$0xff] }
  0xfb   :  { %1135 = vmatpush.msra.mxu0 %v347_v34  ;;  %1154 = vmatpush.msra.mxu1 %v381_v35  ;;  %v589_v13 = vld [vmem:[#allocation3 + $0xfc8] sm:$0xff]  ;;  %v523_v15 = vld [vmem:[#allocation3 + $0xdb8] sm:$0xff] }
  0xfc   :  { %1175 = vmatpush.msra.mxu2 %v411_v36  ;;  %1194 = vmatpush.msra.mxu3 %v445_v37  ;;  %v489_v14 = vld [vmem:[#allocation3 + $0xca8] sm:$0xff]  ;;  %v587_v17 = vld [vmem:[#allocation3 + $0xfb8] sm:$0xff] }
  0xfd   :  { %1136 = vmatpush.msra.mxu0 %v345_v38  ;;  %1155 = vmatpush.msra.mxu1 %v379_v39  ;;  %v553_v16 = vld [vmem:[#allocation3 + $0xea8] sm:$0xff]  ;;  %v487_v0 = vld [vmem:[#allocation3 + $0xc98] sm:$0xff] }
  0xfe   :  { %1176 = vmatpush.msra.mxu2 %v409_v40  ;;  %1195 = vmatpush.msra.mxu3 %v443_v41  ;;  %v521_v18 = vld [vmem:[#allocation3 + $0xda8] sm:$0xff]  ;;  %v551_v19 = vld [vmem:[#allocation3 + $0xe98] sm:$0xff] }
  0xff   :  { %1137 = vmatpush.msra.mxu0 %v343_v42  ;;  %1156 = vmatpush.msra.mxu1 %v377_v43  ;;  %v585_v20 = vld [vmem:[#allocation3 + $0xfa8] sm:$0xff]  ;;  %v519_v2 = vld [vmem:[#allocation3 + $0xd98] sm:$0xff] }
 0x100   :  { %1177 = vmatpush.msra.mxu2 %v407_v44  ;;  %1196 = vmatpush.msra.mxu3 %v441_v45  ;;  %v485_v1 = vld [vmem:[#allocation3 + $0xc88] sm:$0xff]  ;;  %v583_v22 = vld [vmem:[#allocation3 + $0xf98] sm:$0xff] }
 0x101   :  { %1138 = vmatpush.msra.mxu0 %v341_v46  ;;  %1157 = vmatpush.msra.mxu1 %v375_v47  ;;  %v549_v21 = vld [vmem:[#allocation3 + $0xe88] sm:$0xff]  ;;  %v483_v23 = vld [vmem:[#allocation3 + $0xc78] sm:$0xff] }
 0x102   :  { %1178 = vmatpush.msra.mxu2 %v405_v52  ;;  %1197 = vmatpush.msra.mxu3 %v439_v53  ;;  %v517_v24 = vld [vmem:[#allocation3 + $0xd88] sm:$0xff]  ;;  %v547_v3 = vld [vmem:[#allocation3 + $0xe78] sm:$0xff] }
 0x103   :  { %1139 = vmatmul.f32.vlgmr.msra.gmra.mxu0 %v1405_v58  ;;  %1179 = vmatmul.f32.vlgmr.msra.gmra.mxu2 %v1406_v59  ;;  %v581_v25 = vld [vmem:[#allocation3 + $0xf88] sm:$0xff]  ;;  %v515_v27 = vld [vmem:[#allocation3 + $0xd78] sm:$0xff] }
 0x104   :  { %1203 = vmatpush.msrb.mxu0 %v499_v54  ;;  %1243 = vmatpush.msrb.mxu2 %v563_v55  ;;  %v481_v26 = vld [vmem:[#allocation3 + $0xc68] sm:$0xff]  ;;  %v579_v29 = vld [vmem:[#allocation3 + $0xf78] sm:$0xff] }
 0x105   :  { %1158 = vmatpush.msra.mxu1 %v373_v56  ;;  %1198 = vmatpush.msra.mxu3 %v437_v57  ;;  %v545_v28 = vld [vmem:[#allocation3 + $0xe68] sm:$0xff]  ;;  %v479_v30 = vld [vmem:[#allocation3 + $0xc58] sm:$0xff] }
 0x106   :  { %1159 = vmatmul.f32.vlgmr.msra.gmra.mxu1 %v1407_v4  ;;  %1199 = vmatmul.f32.vlgmr.msra.gmra.mxu3 %v1408_v48  ;;  %v513_v31 = vld [vmem:[#allocation3 + $0xd68] sm:$0xff]  ;;  %v543_v32 = vld [vmem:[#allocation3 + $0xe58] sm:$0xff]  ;;  %v660_v4 = vpop.f32.mrf.mxu0  ;;  %v680_v48 = vpop.f32.mrf.mxu1 }
 0x107   :  { %1204 = vmatpush.msrb.mxu0 %v497_v60  ;;  %1223 = vmatpush.msrb.mxu1 %v531_v61  ;;  %v577_v33 = vld [vmem:[#allocation3 + $0xf68] sm:$0xff]  ;;  %v511_v35 = vld [vmem:[#allocation3 + $0xd58] sm:$0xff] }
 0x108   :  { %1244 = vmatpush.msrb.mxu2 %v561_v62  ;;  %1263 = vmatpush.msrb.mxu3 %v595_v63  ;;  %v477_v34 = vld [vmem:[#allocation3 + $0xc48] sm:$0xff]  ;;  %v575_v37 = vld [vmem:[#allocation3 + $0xf58] sm:$0xff] }
 0x109   :  { %1205 = vmatpush.msrb.mxu0 %v495_v49  ;;  %1224 = vmatpush.msrb.mxu1 %v529_v5  ;;  %v541_v36 = vld [vmem:[#allocation3 + $0xe48] sm:$0xff]  ;;  %v475_v38 = vld [vmem:[#allocation3 + $0xc38] sm:$0xff]  ;;  %v700_v49 = vpop.f32.mrf.mxu2 }
 0x10a   :  { %1245 = vmatpush.msrb.mxu2 %v559_v6  ;;  %1264 = vmatpush.msrb.mxu3 %v593_v7  ;;  %v509_v39 = vld [vmem:[#allocation3 + $0xd48] sm:$0xff]  ;;  %v539_v40 = vld [vmem:[#allocation3 + $0xe38] sm:$0xff]  ;;  %v720_v6 = vpop.f32.mrf.mxu3 }
 0x10b   :  { %1206 = vmatpush.msrb.mxu0 %v493_v8  ;;  %1225 = vmatpush.msrb.mxu1 %v527_v50  ;;  %v573_v41 = vld [vmem:[#allocation3 + $0xf48] sm:$0xff]  ;;  %v507_v43 = vld [vmem:[#allocation3 + $0xd38] sm:$0xff] }
 0x10c   :  { %1246 = vmatpush.msrb.mxu2 %v557_v51  ;;  %1265 = vmatpush.msrb.mxu3 %v591_v9  ;;  %v473_v42 = vld [vmem:[#allocation3 + $0xc28] sm:$0xff]  ;;  %v571_v45 = vld [vmem:[#allocation3 + $0xf38] sm:$0xff] }
 0x10d   :  { %1207 = vmatpush.msrb.mxu0 %v491_v10  ;;  %1226 = vmatpush.msrb.mxu1 %v525_v11  ;;  %v537_v44 = vld [vmem:[#allocation3 + $0xe28] sm:$0xff]  ;;  %v471_v46 = vld [vmem:[#allocation3 + $0xc18] sm:$0xff] }
 0x10e   :  { %1247 = vmatpush.msrb.mxu2 %v555_v12  ;;  %1266 = vmatpush.msrb.mxu3 %v589_v13  ;;  %v505_v47 = vld [vmem:[#allocation3 + $0xd28] sm:$0xff]  ;;  %v535_v52 = vld [vmem:[#allocation3 + $0xe18] sm:$0xff]  ;;  %v740_v5 = vpop.f32.mrf.mxu0  ;;  %v760_v7 = vpop.f32.mrf.mxu1  ;;  %v596_v12 = vld [vmem:[#allocation6] sm:$0x3] }
 0x10f   :  { %1208 = vmatpush.msrb.mxu0 %v489_v14  ;;  %1227 = vmatpush.msrb.mxu1 %v523_v15  ;;  %v569_v53 = vld [vmem:[#allocation3 + $0xf28] sm:$0xff]  ;;  %v503_v55 = vld [vmem:[#allocation3 + $0xd18] sm:$0xff]  ;;  %v598_v15 = vperm.slane %v596_v12, 0 }
 0x110   :  { %1248 = vmatpush.msrb.mxu2 %v553_v16  ;;  %1267 = vmatpush.msrb.mxu3 %v587_v17  ;;  %v469_v54 = vld [vmem:[#allocation3 + $0xc08] sm:$0xff]  ;;  %v567_v57 = vld [vmem:[#allocation3 + $0xf18] sm:$0xff]  ;;  %v599_v16 = vperm.slane %v596_v12, 1 }
 0x111   :  { %1209 = vmatpush.msrb.mxu0 %v487_v0  ;;  %1228 = vmatpush.msrb.mxu1 %v521_v18  ;;  %v533_v56 = vld [vmem:[#allocation3 + $0xe08] sm:$0xff]  ;;  %v1409_v60 = vld.sshfl [vmem:[#allocation1 + $0x20] sm:$0xff pattern:$0x73625140]  ;;  %v780_v8 = vpop.f32.mrf.mxu2  ;;  %v661_v18 = vadd.f32 %v660_v4, %v598_v15 }
 0x112   :  { %1249 = vmatpush.msrb.mxu2 %v551_v19  ;;  %1268 = vmatpush.msrb.mxu3 %v585_v20  ;;  %v501_v58 = vld [vmem:[#allocation3 + $0xd08] sm:$0xff]  ;;  %v1411_v62 = vld.sshfl [vmem:[#allocation1 + $0x28] sm:$0xff pattern:$0x73625140]  ;;  %v1638_v51 = vpop.f32.mrf.mxu3 }
 0x113   :  { %1210 = vmatpush.msrb.mxu0 %v485_v1  ;;  %1229 = vmatpush.msrb.mxu1 %v519_v2  ;;  %v565_v59 = vld [vmem:[#allocation3 + $0xf08] sm:$0xff]  ;;  %v681_v2 = vadd.f32 %v680_v48, %v661_v18  ;;  %v1296_v15 = vld [vmem:[#allocation8 + $0x18] sm:$0xff] }
 0x114   :  { %1250 = vmatpush.msrb.mxu2 %v549_v21  ;;  %1269 = vmatpush.msrb.mxu3 %v583_v22  ;;  %v1410_v61 = vld.sshfl [vmem:[#allocation1 + $0x30] sm:$0xff pattern:$0x73625140]  ;;  %v1412_v63 = vld.sshfl [vmem:[#allocation1 + $0x38] sm:$0xff pattern:$0x73625140] }
 0x115   :  { %1211 = vmatpush.msrb.mxu0 %v483_v23  ;;  %1230 = vmatpush.msrb.mxu1 %v517_v24  ;;  %v701_v23 = vadd.f32 %v700_v49, %v681_v2  ;;  %v1298_v48 = vld [vmem:[#allocation8 + $0x28] sm:$0xff] }
 0x116   :  { %1251 = vmatpush.msrb.mxu2 %v547_v3  ;;  %1270 = vmatpush.msrb.mxu3 %v581_v25  ;;  %v1636_v50 = vpop.f32.mrf.mxu0  ;;  %v1640_v9 = vpop.f32.mrf.mxu1  ;;  %v1308_v25 = vld [vmem:[#allocation8 + $0x78] sm:$0xff]  ;;  %v1314_v49 = vld [vmem:[#allocation8 + $0xa8] sm:$0xff] }
 0x117   :  { %1212 = vmatpush.msrb.mxu0 %v481_v26  ;;  %1231 = vmatpush.msrb.mxu1 %v515_v27  ;;  %v1324_v26 = vld [vmem:[#allocation8 + $0xf8] sm:$0xff]  ;;  %v721_v27 = vadd.f32 %v720_v6, %v701_v23  ;;  %v1310_v2 = vld [vmem:[#allocation8 + $0x88] sm:$0xff]  ;;  %v1293_v23 = vld [vmem:[#allocation8] sm:$0xff] }
 0x118   :  { %1252 = vmatpush.msrb.mxu2 %v545_v28  ;;  %1271 = vmatpush.msrb.mxu3 %v579_v29  ;;  %v1307_v28 = vld [vmem:[#allocation8 + $0x70] sm:$0xff] }
 0x119   :  { %1213 = vmatpush.msrb.mxu0 %v479_v30  ;;  %1232 = vmatpush.msrb.mxu1 %v513_v31  ;;  %v1642_v10 = vpop.f32.mrf.mxu2  ;;  %v1323_v29 = vld [vmem:[#allocation8 + $0xf0] sm:$0xff]  ;;  %v1306_v31 = vld [vmem:[#allocation8 + $0x68] sm:$0xff] }
 0x11a   :  { %1253 = vmatpush.msrb.mxu2 %v543_v32  ;;  %1272 = vmatpush.msrb.mxu3 %v577_v33  ;;  %v1646_v13 = vpop.f32.mrf.mxu3  ;;  %v1322_v32 = vld [vmem:[#allocation8 + $0xe8] sm:$0xff] }
 0x11b   :  { %1214 = vmatpush.msrb.mxu0 %v477_v34  ;;  %1233 = vmatpush.msrb.mxu1 %v511_v35  ;;  %v741_v34 = vadd.f32 %v740_v5, %v721_v27  ;;  %v1305_v35 = vld [vmem:[#allocation8 + $0x60] sm:$0xff] }
 0x11c   :  { %1254 = vmatpush.msrb.mxu2 %v541_v36  ;;  %1273 = vmatpush.msrb.mxu3 %v575_v37  ;;  %v1321_v36 = vld [vmem:[#allocation8 + $0xe0] sm:$0xff] }
 0x11d   :  { %1215 = vmatpush.msrb.mxu0 %v475_v38  ;;  %1234 = vmatpush.msrb.mxu1 %v509_v39  ;;  %v1304_v39 = vld [vmem:[#allocation8 + $0x58] sm:$0xff] }
 0x11e   :  { %1255 = vmatpush.msrb.mxu2 %v539_v40  ;;  %1274 = vmatpush.msrb.mxu3 %v573_v41  ;;  %v1644_v11 = vpop.f32.mrf.mxu0  ;;  %v1648_v14 = vpop.f32.mrf.mxu1  ;;  %v1320_v40 = vld [vmem:[#allocation8 + $0xd8] sm:$0xff]  ;;  %v761_v41 = vadd.f32 %v760_v7, %v741_v34  ;;  %v1297_v7 = vld [vmem:[#allocation8 + $0x20] sm:$0xff] }
 0x11f   :  { %1216 = vmatpush.msrb.mxu0 %v473_v42  ;;  %1235 = vmatpush.msrb.mxu1 %v507_v43  ;;  %v1303_v42 = vld [vmem:[#allocation8 + $0x50] sm:$0xff] }
 0x120   :  { %1256 = vmatpush.msrb.mxu2 %v537_v44  ;;  %1275 = vmatpush.msrb.mxu3 %v571_v45  ;;  %v1319_v43 = vld [vmem:[#allocation8 + $0xd0] sm:$0xff] }
 0x121   :  { %1217 = vmatpush.msrb.mxu0 %v471_v46  ;;  %1236 = vmatpush.msrb.mxu1 %v505_v47  ;;  %v1650_v17 = vpop.f32.mrf.mxu2  ;;  %v1302_v46 = vld [vmem:[#allocation8 + $0x48] sm:$0xff] }
 0x122   :  { %1257 = vmatpush.msrb.mxu2 %v535_v52  ;;  %1276 = vmatpush.msrb.mxu3 %v569_v53  ;;  %v1318_v47 = vld [vmem:[#allocation8 + $0xc8] sm:$0xff]  ;;  %v781_v52 = vadd.f32 %v780_v8, %v761_v41  ;;  %v1301_v53 = vld [vmem:[#allocation8 + $0x40] sm:$0xff] }
 0x123   :  { %1218 = vmatpush.msrb.mxu0 %v469_v54  ;;  %1237 = vmatpush.msrb.mxu1 %v503_v55  ;;  %v1652_v20 = vpop.f32.mrf.mxu3  ;;  %v1317_v54 = vld [vmem:[#allocation8 + $0xc0] sm:$0xff] }
 0x124   :  { %1258 = vmatpush.msrb.mxu2 %v533_v56  ;;  %1277 = vmatpush.msrb.mxu3 %v567_v57  ;;  %v1300_v57 = vld [vmem:[#allocation8 + $0x38] sm:$0xff]  ;;  %v1313_v8 = vld [vmem:[#allocation8 + $0xa0] sm:$0xff] }
 0x125   :  { %1219 = vmatmul.f32.vlgmr.msrb.gmra.mxu0 %v1409_v60  ;;  %1259 = vmatmul.f32.vlgmr.msrb.gmra.mxu2 %v1410_v61  ;;  %v1299_v61 = vld [vmem:[#allocation8 + $0x30] sm:$0xff] }
 0x126   :  { %1238 = vmatpush.msrb.mxu1 %v501_v58  ;;  %1278 = vmatpush.msrb.mxu3 %v565_v59  ;;  %v1316_v58 = vld [vmem:[#allocation8 + $0xb8] sm:$0xff]  ;;  %v801_v59 = vadd.f32 %v1638_v51, %v781_v52 }
 0x127   :  { %1239 = vmatmul.f32.vlgmr.msrb.gmra.mxu1 %v1411_v62  ;;  %1279 = vmatmul.f32.vlgmr.msrb.gmra.mxu3 %v1412_v63  ;;  %v1315_v62 = vld [vmem:[#allocation8 + $0xb0] sm:$0xff] }
 0x128   :  { %1335 = vmatpush.msra.mxu0 %v1308_v25  ;;  %1355 = vmatpush.msra.mxu1 %v1324_v26  ;;  %v821_v63 = vadd.f32 %v1636_v50, %v801_v59 }
 0x12a   :  { %1336 = vmatpush.msra.mxu0 %v1307_v28  ;;  %1356 = vmatpush.msra.mxu1 %v1323_v29  ;;  %v841_v51 = vadd.f32 %v1640_v9, %v821_v63  ;;  %v1309_v9 = vld [vmem:[#allocation8 + $0x80] sm:$0xff] }
 0x12c   :  { %1337 = vmatpush.msra.mxu0 %v1306_v31  ;;  %1357 = vmatpush.msra.mxu1 %v1322_v32  ;;  %v861_v50 = vadd.f32 %v1642_v10, %v841_v51 }
 0x12e   :  { %1338 = vmatpush.msra.mxu0 %v1305_v35  ;;  %1358 = vmatpush.msra.mxu1 %v1321_v36 }
 0x130   :  { %1339 = vmatpush.msra.mxu0 %v1304_v39  ;;  %1359 = vmatpush.msra.mxu1 %v1320_v40 }
 0x132   :  { %1340 = vmatpush.msra.mxu0 %v1303_v42  ;;  %1360 = vmatpush.msra.mxu1 %v1319_v43 }
 0x134   :  { %1341 = vmatpush.msra.mxu0 %v1302_v46  ;;  %1361 = vmatpush.msra.mxu1 %v1318_v47 }
 0x136   :  { %1342 = vmatpush.msra.mxu0 %v1301_v53  ;;  %1362 = vmatpush.msra.mxu1 %v1317_v54 }
 0x138   :  { %1343 = vmatpush.msra.mxu0 %v1300_v57  ;;  %1363 = vmatpush.msra.mxu1 %v1316_v58 }
 0x13a   :  { %1344 = vmatpush.msra.mxu0 %v1299_v61  ;;  %1364 = vmatpush.msra.mxu1 %v1315_v62 }
 0x13c   :  { %1345 = vmatpush.msra.mxu0 %v1298_v48  ;;  %1365 = vmatpush.msra.mxu1 %v1314_v49 }
 0x13e   :  { %1346 = vmatpush.msra.mxu0 %v1297_v7  ;;  %1366 = vmatpush.msra.mxu1 %v1313_v8 }
 0x140   :  { %1347 = vmatpush.msra.mxu0 %v1296_v15 }
 0x15c   :  { %v980_v0 = vpop.f32.mrf.mxu0 }
 0x15d   :  { %v981_v19 = vadd.f32 %v980_v0, %v599_v16  ;;  %v1312_v16 = vld [vmem:[#allocation8 + $0x98] sm:$0xff]  ;;  %v1295_v0 = vld [vmem:[#allocation8 + $0x10] sm:$0xff] }
 0x15e   :  { %1367 = vmatpush.msra.mxu1 %v1312_v16  ;;  %1348 = vmatpush.msra.mxu0 %v1295_v0 }
 0x15f   :  { %v1000_v1 = vpop.f32.mrf.mxu1 }
 0x160   :  { %v1001_v21 = vadd.f32 %v1000_v1, %v981_v19  ;;  %v1311_v19 = vld [vmem:[#allocation8 + $0x90] sm:$0xff]  ;;  %v1294_v1 = vld [vmem:[#allocation8 + $0x8] sm:$0xff] }
 0x161   :  { %1368 = vmatpush.msra.mxu1 %v1311_v19  ;;  %1349 = vmatpush.msra.mxu0 %v1294_v1 }
 0x162   :  { %v1020_v22 = vpop.f32.mrf.mxu2 }
 0x163   :  { %v1021_v24 = vadd.f32 %v1020_v22, %v1001_v21  ;;  %1369 = vmatpush.msra.mxu1 %v1310_v2  ;;  %1350 = vmatpush.msra.mxu0 %v1293_v23 }
 0x165   :  { %v1040_v3 = vpop.f32.mrf.mxu3  ;;  %1370 = vmatpush.msra.mxu1 %v1309_v9 }
 0x166   :  { %v1041_v30 = vadd.f32 %v1040_v3, %v1021_v24  ;;  %v881_v24 = vadd.f32 %v1646_v13, %v861_v50 }
 0x168   :  { %v1060_v33 = vpop.f32.mrf.mxu0  ;;  %v901_v3 = vadd.f32 %v1644_v11, %v881_v24 }
 0x169   :  { %v1061_v37 = vadd.f32 %v1060_v33, %v1041_v30 }
 0x16a   :  { %v921_v28 = vadd.f32 %v1648_v14, %v901_v3  ;;  %v1404_v14 = vld [vmem:[#allocation9] ss:$0 sm:$0xff] }
 0x16b   :  { %v1080_v38 = vpop.f32.mrf.mxu1 }
 0x16c   :  { %v1081_v44 = vadd.f32 %v1080_v38, %v1061_v37  ;;  %v1100_v45 = vpop.f32.mrf.mxu2  ;;  %v941_v29 = vadd.f32 %v1650_v17, %v921_v28 }
 0x16e   :  { %v1101_v55 = vadd.f32 %v1100_v45, %v1081_v44  ;;  %v961_v13 = vadd.f32 %v1652_v20, %v941_v29 }
 0x16f   :  { %v1120_v56 = vpop.f32.mrf.mxu3 }
 0x170   :  { %v1121_v4 = vadd.f32 %v1120_v56, %v1101_v55  ;;  %v1283_v11 = vmax.f32 %v961_v13, 0.0 }
 0x180   :  { %v1140_v60 = vpop.f32.mrf.mxu0 }
 0x181   :  { %v1141_v5 = vadd.f32 %v1140_v60, %v1121_v4 }
 0x183   :  { %v1160_v6 = vpop.f32.mrf.mxu1 }
 0x184   :  { %v1161_v18 = vadd.f32 %v1160_v6, %v1141_v5 }
 0x186   :  { %v1180_v12 = vpop.f32.mrf.mxu2 }
 0x187   :  { %v1181_v21 = vadd.f32 %v1180_v12, %v1161_v18 }
 0x189   :  { %v1200_v22 = vpop.f32.mrf.mxu3 }
 0x18a   :  { %v1201_v25 = vadd.f32 %v1200_v22, %v1181_v21 }
 0x1a2   :  { %v1220_v10 = vpop.f32.mrf.mxu0 }
 0x1a3   :  { %v1221_v26 = vadd.f32 %v1220_v10, %v1201_v25 }
 0x1a4   :  { %v1240_v27 = vpop.f32.mrf.mxu1 }
 0x1a5   :  { %v1241_v30 = vadd.f32 %v1240_v27, %v1221_v26 }
 0x1a8   :  { %v1260_v31 = vpop.f32.mrf.mxu2 }
 0x1a9   :  { %v1261_v32 = vadd.f32 %v1260_v31, %v1241_v30 }
 0x1aa   :  { %v1280_v33 = vpop.f32.mrf.mxu3 }
 0x1ab   :  { %v1281_v34 = vadd.f32 %v1280_v33, %v1261_v32 }
 0x1ad   :  { %v1284_v35 = vmax.f32 %v1281_v34, 0.0 }
 0x1af   :  { %v1287_v36 = vrot.slane %v1284_v35, 6 }
 0x1b1   :  { %v1289_v37 = vsel %vm1288_vm0, %v1283_v11, %v1287_v36 }
 0x1b2   :  { %1291 = vst [vmem:[#allocation2] sm:$0xf] %v1289_v37 }
 0x1b9   :  { %v1292_v38 = vld [vmem:[#allocation2] sm:$0xf] }
 0x1ba   :  { %1330 = vst [vmem:[#allocation1] ss:$4 sm:$0xff] %v1292_v38 }
 0x1c1   :  { %v1331_v39 = vld.sshfl [vmem:[#allocation1] sm:$0xff pattern:$0x73625140]  ;;  %v1332_v40 = vld.sshfl [vmem:[#allocation1 + $0x8] sm:$0xff pattern:$0x73625140] }
 0x1c2   :  { %1351 = vmatmul.f32.vlgmr.msra.gmra.mxu0 %v1331_v39  ;;  %1371 = vmatmul.f32.vlgmr.msra.gmra.mxu1 %v1332_v40 }
 0x23f   :  { %v1352_v17 = vpop.f32.mrf.mxu0  ;;  %v1372_v41 = vpop.f32.mrf.mxu1 }
 0x240   :  { %v1353_v20 = vadd.f32 %v1404_v14, %v1352_v17 }
 0x242   :  { %v1373_v42 = vadd.f32 %v1372_v41, %v1353_v20 }
 0x244   :  { %1375 = vst [vmem:[#allocation11] sm:$0x3] %v1373_v42 }
 0x245   :  { %1386 = dma.vmem_to_hbm [thread:$0]  %s1382_s21, 32, %s1384_s24, [#allocation5]  }
 0x246   :  { %1539 = dma.done.wait [#allocation5], 32  }
 0x247   :  { %1540 = vsyncadd [#allocation5], 4294967264 }
 0x248   :  { %1391 = vsyncpa [#allocation4], 1 }
 0x249   :  { %1392 = vsyncpa [#allocation7], 1 }
 0x24a   :  { %1393 = vsyncpa [#allocation10], 1 }
 0x24b   :  { %1394 = vsyncpa [#allocation5], 1 }

</bundles_post_ra>
